<compile_context>
chip_gen: v7x
topology: tpu7x:2x2x1
jax: 0.10.0
libtpu: 0.0.40
codegen_flags: <defaults>
</compile_context>

<pallas_src>
import functools

import jax
import jax.numpy as jnp
from jax import lax
from jax.experimental import pallas as pl
from jax.experimental.pallas import tpu as pltpu

HIGHEST = lax.Precision.HIGHEST


def _round_up(x, m):
    return (x + m - 1) // m * m


# ---------------- fused Pallas kernel ----------------

def _bottleneckx_kernel(H, W, OFF,
                        x_ref, w1_ref, s1_ref, b1_ref,
                        w2_ref, s2_ref, b2_ref,
                        w3_ref, s3_ref, b3_ref,
                        hidx_ref, widx_ref,
                        o_ref, h1p_ref):
    """B_blk images per grid step; all intermediates live in VMEM.

    x_ref  : (B, HW, Cin)  bf16   Cin == planes*4 == C4 (also the residual source)
    w1_ref : (Cin, 2P)     bf16   conv1 | conv1_d concatenated along Cout
    w2_ref : (9, 2P, 2P)   bf16   block-diagonal grouped 3x3 taps (tap = ky*3+kx, HWIO)
    w3_ref : (2P, C4)      bf16   conv3 ; conv3_d stacked along K
    s*/b*  : (1, C)        f32    folded BatchNorm scale / bias
    hidx/widx : (M, 1)     i32    per-flattened-row h / w coordinates (for conv2 masks)
    o_ref  : (B, HW, C4)   bf16
    h1p_ref: (ROWS, 2P)    bf16   row-padded staging buffer for the 9 shifted taps
    """
    B, HW, Cin = x_ref.shape
    M = B * HW
    P2 = w1_ref.shape[1]
    C4 = w3_ref.shape[1]

    x2d = x_ref[...].reshape(M, Cin)                     # (M, Cin) bf16

    # ---- conv1 (+ conv1_d) + bn1 + relu : one bf16 matmul, f32 accumulate ----
    h1 = jnp.dot(x2d, w1_ref[...], preferred_element_type=jnp.float32)
    h1 = jnp.maximum(h1 * s1_ref[...] + b1_ref[...], 0.0).astype(jnp.bfloat16)

    # Stage h1 into the row-padded scratch: ONE aligned contiguous store (OFF % 8 == 0).
    # The halo rows are never zeroed: any tap row that could read them is masked below,
    # so their (stale) contents are irrelevant — also safe under megacore sharding.
    h1p_ref[pl.ds(OFF, M), :] = h1

    # ---- grouped 3x3 conv (+ _d): 9 accumulating dots over row-shifted taps ----
    # Output row o = b*HW + h*W + w ; tap (dy,dx) reads scratch row OFF + o + dy*W + dx,
    # a contiguous sublane slice.  Zero-padding and per-image isolation inside the
    # flattened batch are enforced with per-row where-masks (select, NaN-safe).
    h_idx = hidx_ref[...]                                # (M, 1) int32
    w_idx = widx_ref[...]
    acc = jnp.zeros((M, P2), jnp.float32)
    for ky in range(3):
        for kx in range(3):
            dy, dx = ky - 1, kx - 1
            valid = ((h_idx + dy >= 0) & (h_idx + dy < H) &
                     (w_idx + dx >= 0) & (w_idx + dx < W))
            tap = h1p_ref[pl.ds(OFF + dy * W + dx, M), :]
            tap = jnp.where(valid, tap, jnp.zeros((), jnp.bfloat16))
            acc = acc + jnp.dot(tap, w2_ref[ky * 3 + kx],
                                preferred_element_type=jnp.float32)
    h2 = jnp.maximum(acc * s2_ref[...] + b2_ref[...], 0.0).astype(jnp.bfloat16)

    # ---- conv3 + conv3_d (stacked along K) + bn3 + residual + relu, bf16 store ----
    out = jnp.dot(h2, w3_ref[...], preferred_element_type=jnp.float32)
    y = out * s3_ref[...] + b3_ref[...] + x2d.astype(jnp.float32)
    o_ref[...] = jnp.maximum(y, 0.0).reshape(B, HW, C4).astype(o_ref.dtype)


# ---------------- wrapper (glue) ----------------

def fuse_block_params(params):
    """Concatenate main/_d branch weights and cast matmul operands to bf16."""
    pm, pd = params['main'], params['down']
    P = pm['w1'].shape[1]
    w1 = jnp.concatenate([pm['w1'], pd['w1']], axis=1).astype(jnp.bfloat16)
    s1 = jnp.concatenate([pm['s1'], pd['s1']], axis=1)
    b1 = jnp.concatenate([pm['b1'], pd['b1']], axis=1)
    # block-diagonal (3,3,2P,2P): main on [:P,:P], down on [P:,P:]; taps -> (9, 2P, 2P)
    w2d = jnp.zeros((3, 3, 2 * P, 2 * P), jnp.float32)
    w2d = w2d.at[:, :, :P, :P].set(pm['w2'])
    w2d = w2d.at[:, :, P:, P:].set(pd['w2'])
    w2 = w2d.reshape(9, 2 * P, 2 * P).astype(jnp.bfloat16)
    s2 = jnp.concatenate([pm['s2'], pd['s2']], axis=1)
    b2 = jnp.concatenate([pm['b2'], pd['b2']], axis=1)
    w3 = jnp.concatenate([pm['w3'], pd['w3']], axis=0).astype(jnp.bfloat16)
    return dict(w1=w1, s1=s1, b1=b1, w2=w2, s2=s2, b2=b2, w3=w3,
                s3=params['s3'], b3=params['b3'])


def _pick_batch_block(N, HW, target_m=256):
    """Images per grid step so M = B_blk*HW ~ target_m (use target_m=128 on v5e)."""
    want = max(1, -(-target_m // HW))              # ceil(target_m / HW)
    divs = [d for d in range(1, N + 1) if N % d == 0]
    ge = [d for d in divs if d >= want]
    return min(ge) if ge else max(divs)


def bottleneckx_forward(params, x_nchw):
    """BottleneckX forward. x_nchw: (N, inplanes, H, W) like PyTorch. Returns bf16 NCHW."""
    x = jnp.transpose(x_nchw, (0, 2, 3, 1))        # -> NHWC
    N, H, W, Cin = x.shape
    HW = H * W
    fp = fuse_block_params(params)
    P2 = fp['w1'].shape[1]
    C4 = fp['w3'].shape[1]

    b_blk = _pick_batch_block(N, HW)               # fill the MXU M dimension
    M = b_blk * HW
    OFF = _round_up(W + 1, 8)                      # sublane-aligned interior start
    ROWS = _round_up(OFF + M + W + 1, 8)           # all 9 tap slices stay in-bounds

    x3d = x.reshape(N, HW, Cin).astype(jnp.bfloat16)
    oo = jnp.arange(M, dtype=jnp.int32)
    w_idx = (oo % W).reshape(M, 1)
    h_idx = ((oo // W) % H).reshape(M, 1)

    kernel = functools.partial(_bottleneckx_kernel, H, W, OFF)
    out3d = pl.pallas_call(
        kernel,
        out_shape=jax.ShapeDtypeStruct((N, HW, C4), jnp.bfloat16),
        grid=(N // b_blk,),
        in_specs=[pl.BlockSpec((b_blk, HW, Cin), lambda n: (n, 0, 0)),
                  pl.BlockSpec((Cin, P2), lambda n: (0, 0)),
                  pl.BlockSpec((1, P2), lambda n: (0, 0)),
                  pl.BlockSpec((1, P2), lambda n: (0, 0)),
                  pl.BlockSpec((9, P2, P2), lambda n: (0, 0, 0)),
                  pl.BlockSpec((1, P2), lambda n: (0, 0)),
                  pl.BlockSpec((1, P2), lambda n: (0, 0)),
                  pl.BlockSpec((P2, C4), lambda n: (0, 0)),
                  pl.BlockSpec((1, C4), lambda n: (0, 0)),
                  pl.BlockSpec((1, C4), lambda n: (0, 0)),
                  pl.BlockSpec((M, 1), lambda n: (0, 0)),
                  pl.BlockSpec((M, 1), lambda n: (0, 0))],
        out_specs=pl.BlockSpec((b_blk, HW, C4), lambda n: (n, 0, 0)),
        scratch_shapes=[pltpu.VMEM((ROWS, P2), jnp.bfloat16)],
        compiler_params=pltpu.CompilerParams(
            dimension_semantics=("parallel",)),
    )(x3d, fp['w1'], fp['s1'], fp['b1'],
      fp['w2'], fp['s2'], fp['b2'],
      fp['w3'], fp['s3'], fp['b3'],
      h_idx, w_idx)

    out = out3d.reshape(N, H, W, C4)
    return jnp.transpose(out, (0, 3, 1, 2))        # -> NCHW (bf16)


# ---------------- parameters ----------------

def fold_bn(gamma, beta, mean, var, eps=1e-5):
    scale = gamma / jnp.sqrt(var + eps)
    bias = beta - mean * scale
    return scale.reshape(1, -1), bias.reshape(1, -1)


def make_params(key, inplanes, planes, cardinality):
    expansion = 4
    groups = cardinality // 2
    cpg = planes // groups
    ks = list(jax.random.split(key, 16))
    ki = iter(ks)

    def conv_w(k, cin, cout):
        return jax.random.normal(k, (cin, cout), jnp.float32) * 0.05

    def grouped_w(k):
        return jax.random.normal(k, (3, 3, cpg, planes), jnp.float32) * 0.05

    def bn_params(k, c):
        k1, k2, k3, k4 = jax.random.split(k, 4)
        gamma = 1.0 + 0.1 * jax.random.normal(k1, (c,), jnp.float32)
        beta = 0.1 * jax.random.normal(k2, (c,), jnp.float32)
        mean = 0.1 * jax.random.normal(k3, (c,), jnp.float32)
        var = 0.5 + 0.5 * jax.random.uniform(k4, (c,), jnp.float32)
        return fold_bn(gamma, beta, mean, var)

    def expand_grouped(wg):
        dense = jnp.zeros((3, 3, planes, planes), jnp.float32)
        for g in range(groups):
            dense = dense.at[:, :, g * cpg:(g + 1) * cpg,
                             g * cpg:(g + 1) * cpg].set(
                wg[:, :, :, g * cpg:(g + 1) * cpg])
        return dense

    def branch_params():
        w1 = conv_w(next(ki), inplanes, planes)
        s1, b1 = bn_params(next(ki), planes)
        w2g = grouped_w(next(ki))
        s2, b2 = bn_params(next(ki), planes)
        w3 = conv_w(next(ki), planes, planes * expansion)
        return dict(w1=w1, s1=s1, b1=b1, w2g=w2g, w2=expand_grouped(w2g),
                    s2=s2, b2=b2, w3=w3)

    params = dict(main=branch_params(), down=branch_params())
    s3, b3 = bn_params(next(ki), planes * expansion)
    params['s3'] = s3
    params['b3'] = b3
    return params, groups


# ---------------- pure-JAX reference (f32, HIGHEST) ----------------

def ref_forward(params, x_nchw, groups):
    x = jnp.transpose(x_nchw, (0, 2, 3, 1))

    def bn(h, s, b):
        return h * s.reshape(1, 1, 1, -1) + b.reshape(1, 1, 1, -1)

    def conv1x1(h, w):
        return jnp.einsum('nhwc,cd->nhwd', h, w, precision=HIGHEST)

    def branch(p):
        h = jnp.maximum(bn(conv1x1(x, p['w1']), p['s1'], p['b1']), 0.)
        h = lax.conv_general_dilated(h, p['w2g'], (1, 1), ((1, 1), (1, 1)),
                                     dimension_numbers=('NHWC', 'HWIO', 'NHWC'),
                                     feature_group_count=groups,
                                     precision=HIGHEST)
        h = jnp.maximum(bn(h, p['s2'], p['b2']), 0.)
        return conv1x1(h, p['w3'])

    out = branch(params['main'])
    out_d = branch(params['down'])
    y = bn(out + out_d, params['s3'], params['b3']) + x
    y = jnp.maximum(y, 0.)
    return jnp.transpose(y, (0, 3, 1, 2))


if __name__ == "__main__":
    def run_case(seed, N, H, W, planes, cardinality):
        inplanes = planes * 4      # residual add requires inplanes == planes*expansion
        key = jax.random.PRNGKey(seed)
        key_x, key_p = jax.random.split(key)
        x = jax.random.normal(key_x, (N, inplanes, H, W), jnp.float32)  # NCHW like PyTorch
        params, groups = make_params(key_p, inplanes, planes, cardinality)

        out = jax.block_until_ready(bottleneckx_forward(params, x))
        ref = jax.block_until_ready(ref_forward(params, x, groups))
        assert out.shape == (N, inplanes, H, W), out.shape
        out = out.astype(jnp.float32)
        err = float(jnp.max(jnp.abs(out - ref)))
        # Kernel uses the native bf16 MXU path (f32 accumulation) with a bf16 output and a
        # bf16 skip connection; the reference is f32/HIGHEST, hence the loose tolerance.
        assert jnp.allclose(out, ref, rtol=5e-2, atol=5e-2), f"max abs err = {err}"
        return err

    # Small spatial size: M filled by batching 4 images per grid step (grid length 2).
    run_case(0, N=8, H=8, W=8, planes=32, cardinality=8)
    # Larger spatial / channels / group count: exercises masking + layout at other shapes.
    run_case(1, N=4, H=16, W=16, planes=64, cardinality=32)
    print("KERNEL_OK")
</pallas_src>

<mosaic_0001>
module attributes {stable_mosaic.version = 11 : i64} {
  func.func @_bottleneckx_kernel(%arg0: i32, %arg1: memref<4x64x128xbf16, #tpu.memory_space<vmem>>, %arg2: memref<128x64xbf16, #tpu.memory_space<vmem>>, %arg3: memref<1x64xf32, #tpu.memory_space<vmem>>, %arg4: memref<1x64xf32, #tpu.memory_space<vmem>>, %arg5: memref<9x64x64xbf16, #tpu.memory_space<vmem>>, %arg6: memref<1x64xf32, #tpu.memory_space<vmem>>, %arg7: memref<1x64xf32, #tpu.memory_space<vmem>>, %arg8: memref<64x128xbf16, #tpu.memory_space<vmem>>, %arg9: memref<1x128xf32, #tpu.memory_space<vmem>>, %arg10: memref<1x128xf32, #tpu.memory_space<vmem>>, %arg11: memref<256x1xi32, #tpu.memory_space<vmem>>, %arg12: memref<256x1xi32, #tpu.memory_space<vmem>>, %arg13: memref<4x64x128xbf16, #tpu.memory_space<vmem>>, %arg14: memref<288x64xbf16, #tpu.memory_space<vmem>>) attributes {dimension_semantics = [#tpu.dimension_semantics<parallel>], iteration_bounds = array<i64: 2>, scalar_prefetch = 0 : i64, scratch_operands = 1 : i64, tpu.core_type = #tpu.core_type<tc>, window_params = [{transform_indices = @transform_0, window_bounds = array<i64: 4, 64, 128>}, {pipeline_mode = #tpu.pipeline_mode<synchronous>, transform_indices = @transform_1, window_bounds = array<i64: 128, 64>}, {pipeline_mode = #tpu.pipeline_mode<synchronous>, transform_indices = @transform_2, window_bounds = array<i64: 1, 64>}, {pipeline_mode = #tpu.pipeline_mode<synchronous>, transform_indices = @transform_3, window_bounds = array<i64: 1, 64>}, {pipeline_mode = #tpu.pipeline_mode<synchronous>, transform_indices = @transform_4, window_bounds = array<i64: 9, 64, 64>}, {pipeline_mode = #tpu.pipeline_mode<synchronous>, transform_indices = @transform_5, window_bounds = array<i64: 1, 64>}, {pipeline_mode = #tpu.pipeline_mode<synchronous>, transform_indices = @transform_6, window_bounds = array<i64: 1, 64>}, {pipeline_mode = #tpu.pipeline_mode<synchronous>, transform_indices = @transform_7, window_bounds = array<i64: 64, 128>}, {pipeline_mode = #tpu.pipeline_mode<synchronous>, transform_indices = @transform_8, window_bounds = array<i64: 1, 128>}, {pipeline_mode = #tpu.pipeline_mode<synchronous>, transform_indices = @transform_9, window_bounds = array<i64: 1, 128>}, {pipeline_mode = #tpu.pipeline_mode<synchronous>, transform_indices = @transform_10, window_bounds = array<i64: 256, 1>}, {pipeline_mode = #tpu.pipeline_mode<synchronous>, transform_indices = @transform_11, window_bounds = array<i64: 256, 1>}, {transform_indices = @transform_12, window_bounds = array<i64: 4, 64, 128>}]} {
    %c0 = arith.constant 0 : index
    %c0_0 = arith.constant 0 : index
    %c0_1 = arith.constant 0 : index
    %0 = vector.load %arg1[%c0, %c0_0, %c0_1] : memref<4x64x128xbf16, #tpu.memory_space<vmem>>, vector<4x64x128xbf16>
    %1 = vector.shape_cast %0 : vector<4x64x128xbf16> to vector<256x128xbf16>
    %c0_2 = arith.constant 0 : index
    %c0_3 = arith.constant 0 : index
    %2 = vector.load %arg2[%c0_2, %c0_3] : memref<128x64xbf16, #tpu.memory_space<vmem>>, vector<128x64xbf16>
    %cst = arith.constant dense<0.000000e+00> : vector<256x64xf32>
    %3 = tpu.matmul %1, %2, %cst {dimension_numbers = #tpu.dot_dimension_numbers<[1], [0], [0], [1], [0, 0, 1, 1], [], []>} : vector<256x128xbf16>, vector<128x64xbf16>, vector<256x64xf32> -> vector<256x64xf32>
    %c0_4 = arith.constant 0 : index
    %c0_5 = arith.constant 0 : index
    %4 = vector.load %arg3[%c0_4, %c0_5] : memref<1x64xf32, #tpu.memory_space<vmem>>, vector<1x64xf32>
    %5 = vector.broadcast %4 : vector<1x64xf32> to vector<256x64xf32>
    %6 = arith.mulf %3, %5 : vector<256x64xf32>
    %c0_6 = arith.constant 0 : index
    %c0_7 = arith.constant 0 : index
    %7 = vector.load %arg4[%c0_6, %c0_7] : memref<1x64xf32, #tpu.memory_space<vmem>>, vector<1x64xf32>
    %8 = vector.broadcast %7 : vector<1x64xf32> to vector<256x64xf32>
    %9 = arith.addf %6, %8 : vector<256x64xf32>
    %cst_8 = arith.constant 0.000000e+00 : f32
    %10 = vector.broadcast %cst_8 : f32 to vector<256x64xf32>
    %11 = arith.maximumf %9, %10 : vector<256x64xf32>
    %12 = arith.truncf %11 : vector<256x64xf32> to vector<256x64xbf16>
    %c16 = arith.constant 16 : index
    %c0_9 = arith.constant 0 : index
    %13 = vector.load %arg14[%c16, %c0_9] : memref<288x64xbf16, #tpu.memory_space<vmem>>, vector<256x64xbf16>
    tpu.vector_store %arg14[%c16, %c0_9], %12 {strides = array<i32>} : memref<288x64xbf16, #tpu.memory_space<vmem>>, vector<256x64xbf16>,
    %c0_10 = arith.constant 0 : index
    %c0_11 = arith.constant 0 : index
    %14 = vector.load %arg11[%c0_10, %c0_11] : memref<256x1xi32, #tpu.memory_space<vmem>>, vector<256x1xi32>
    %c0_12 = arith.constant 0 : index
    %c0_13 = arith.constant 0 : index
    %15 = vector.load %arg12[%c0_12, %c0_13] : memref<256x1xi32, #tpu.memory_space<vmem>>, vector<256x1xi32>
    %cst_14 = arith.constant 0.000000e+00 : f32
    %16 = vector.broadcast %cst_14 : f32 to vector<256x64xf32>
    %c-1_i32 = arith.constant -1 : i32
    %17 = vector.broadcast %c-1_i32 : i32 to vector<256x1xi32>
    %18 = arith.addi %14, %17 : vector<256x1xi32>
    %c0_i32 = arith.constant 0 : i32
    %19 = vector.broadcast %c0_i32 : i32 to vector<256x1xi32>
    %20 = arith.cmpi sge, %18, %19 : vector<256x1xi32>
    %c-1_i32_15 = arith.constant -1 : i32
    %21 = vector.broadcast %c-1_i32_15 : i32 to vector<256x1xi32>
    %22 = arith.addi %14, %21 : vector<256x1xi32>
    %c8_i32 = arith.constant 8 : i32
    %23 = vector.broadcast %c8_i32 : i32 to vector<256x1xi32>
    %24 = arith.cmpi slt, %22, %23 : vector<256x1xi32>
    %25 = arith.andi %20, %24 : vector<256x1xi1>
    %c-1_i32_16 = arith.constant -1 : i32
    %26 = vector.broadcast %c-1_i32_16 : i32 to vector<256x1xi32>
    %27 = arith.addi %15, %26 : vector<256x1xi32>
    %c0_i32_17 = arith.constant 0 : i32
    %28 = vector.broadcast %c0_i32_17 : i32 to vector<256x1xi32>
    %29 = arith.cmpi sge, %27, %28 : vector<256x1xi32>
    %30 = arith.andi %25, %29 : vector<256x1xi1>
    %c-1_i32_18 = arith.constant -1 : i32
    %31 = vector.broadcast %c-1_i32_18 : i32 to vector<256x1xi32>
    %32 = arith.addi %15, %31 : vector<256x1xi32>
    %c8_i32_19 = arith.constant 8 : i32
    %33 = vector.broadcast %c8_i32_19 : i32 to vector<256x1xi32>
    %34 = arith.cmpi slt, %32, %33 : vector<256x1xi32>
    %35 = arith.andi %30, %34 : vector<256x1xi1>
    %c7 = arith.constant 7 : index
    %c0_20 = arith.constant 0 : index
    %36 = vector.load %arg14[%c7, %c0_20] : memref<288x64xbf16, #tpu.memory_space<vmem>>, vector<256x64xbf16>
    %cst_21 = arith.constant 0.000000e+00 : bf16
    %37 = vector.shape_cast %35 : vector<256x1xi1> to vector<256x1xi1>
    %38 = vector.broadcast %37 : vector<256x1xi1> to vector<256x64xi1>
    %39 = vector.broadcast %cst_21 : bf16 to vector<256x64xbf16>
    %40 = arith.select %38, %36, %39 : vector<256x64xi1>, vector<256x64xbf16>
    %c0_22 = arith.constant 0 : index
    %c0_23 = arith.constant 0 : index
    %c0_24 = arith.constant 0 : index
    %41 = vector.load %arg5[%c0_22, %c0_23, %c0_24] : memref<9x64x64xbf16, #tpu.memory_space<vmem>>, vector<1x64x64xbf16>
    %42 = vector.shape_cast %41 : vector<1x64x64xbf16> to vector<64x64xbf16>
    %cst_25 = arith.constant dense<0.000000e+00> : vector<256x64xf32>
    %43 = tpu.matmul %40, %42, %cst_25 {dimension_numbers = #tpu.dot_dimension_numbers<[1], [0], [0], [1], [0, 0, 1, 1], [], []>} : vector<256x64xbf16>, vector<64x64xbf16>, vector<256x64xf32> -> vector<256x64xf32>
    %44 = arith.addf %16, %43 : vector<256x64xf32>
    %c-1_i32_26 = arith.constant -1 : i32
    %45 = vector.broadcast %c-1_i32_26 : i32 to vector<256x1xi32>
    %46 = arith.addi %14, %45 : vector<256x1xi32>
    %c0_i32_27 = arith.constant 0 : i32
    %47 = vector.broadcast %c0_i32_27 : i32 to vector<256x1xi32>
    %48 = arith.cmpi sge, %46, %47 : vector<256x1xi32>
    %c-1_i32_28 = arith.constant -1 : i32
    %49 = vector.broadcast %c-1_i32_28 : i32 to vector<256x1xi32>
    %50 = arith.addi %14, %49 : vector<256x1xi32>
    %c8_i32_29 = arith.constant 8 : i32
    %51 = vector.broadcast %c8_i32_29 : i32 to vector<256x1xi32>
    %52 = arith.cmpi slt, %50, %51 : vector<256x1xi32>
    %53 = arith.andi %48, %52 : vector<256x1xi1>
    %c0_i32_30 = arith.constant 0 : i32
    %54 = vector.broadcast %c0_i32_30 : i32 to vector<256x1xi32>
    %55 = arith.addi %15, %54 : vector<256x1xi32>
    %c0_i32_31 = arith.constant 0 : i32
    %56 = vector.broadcast %c0_i32_31 : i32 to vector<256x1xi32>
    %57 = arith.cmpi sge, %55, %56 : vector<256x1xi32>
    %58 = arith.andi %53, %57 : vector<256x1xi1>
    %c0_i32_32 = arith.constant 0 : i32
    %59 = vector.broadcast %c0_i32_32 : i32 to vector<256x1xi32>
    %60 = arith.addi %15, %59 : vector<256x1xi32>
    %c8_i32_33 = arith.constant 8 : i32
    %61 = vector.broadcast %c8_i32_33 : i32 to vector<256x1xi32>
    %62 = arith.cmpi slt, %60, %61 : vector<256x1xi32>
    %63 = arith.andi %58, %62 : vector<256x1xi1>
    %c8 = arith.constant 8 : index
    %c0_34 = arith.constant 0 : index
    %64 = vector.load %arg14[%c8, %c0_34] : memref<288x64xbf16, #tpu.memory_space<vmem>>, vector<256x64xbf16>
    %cst_35 = arith.constant 0.000000e+00 : bf16
    %65 = vector.shape_cast %63 : vector<256x1xi1> to vector<256x1xi1>
    %66 = vector.broadcast %65 : vector<256x1xi1> to vector<256x64xi1>
    %67 = vector.broadcast %cst_35 : bf16 to vector<256x64xbf16>
    %68 = arith.select %66, %64, %67 : vector<256x64xi1>, vector<256x64xbf16>
    %c1 = arith.constant 1 : index
    %c0_36 = arith.constant 0 : index
    %c0_37 = arith.constant 0 : index
    %69 = vector.load %arg5[%c1, %c0_36, %c0_37] : memref<9x64x64xbf16, #tpu.memory_space<vmem>>, vector<1x64x64xbf16>
    %70 = vector.shape_cast %69 : vector<1x64x64xbf16> to vector<64x64xbf16>
    %cst_38 = arith.constant dense<0.000000e+00> : vector<256x64xf32>
    %71 = tpu.matmul %68, %70, %cst_38 {dimension_numbers = #tpu.dot_dimension_numbers<[1], [0], [0], [1], [0, 0, 1, 1], [], []>} : vector<256x64xbf16>, vector<64x64xbf16>, vector<256x64xf32> -> vector<256x64xf32>
    %72 = arith.addf %44, %71 : vector<256x64xf32>
    %c-1_i32_39 = arith.constant -1 : i32
    %73 = vector.broadcast %c-1_i32_39 : i32 to vector<256x1xi32>
    %74 = arith.addi %14, %73 : vector<256x1xi32>
    %c0_i32_40 = arith.constant 0 : i32
    %75 = vector.broadcast %c0_i32_40 : i32 to vector<256x1xi32>
    %76 = arith.cmpi sge, %74, %75 : vector<256x1xi32>
    %c-1_i32_41 = arith.constant -1 : i32
    %77 = vector.broadcast %c-1_i32_41 : i32 to vector<256x1xi32>
    %78 = arith.addi %14, %77 : vector<256x1xi32>
    %c8_i32_42 = arith.constant 8 : i32
    %79 = vector.broadcast %c8_i32_42 : i32 to vector<256x1xi32>
    %80 = arith.cmpi slt, %78, %79 : vector<256x1xi32>
    %81 = arith.andi %76, %80 : vector<256x1xi1>
    %c1_i32 = arith.constant 1 : i32
    %82 = vector.broadcast %c1_i32 : i32 to vector<256x1xi32>
    %83 = arith.addi %15, %82 : vector<256x1xi32>
    %c0_i32_43 = arith.constant 0 : i32
    %84 = vector.broadcast %c0_i32_43 : i32 to vector<256x1xi32>
    %85 = arith.cmpi sge, %83, %84 : vector<256x1xi32>
    %86 = arith.andi %81, %85 : vector<256x1xi1>
    %c1_i32_44 = arith.constant 1 : i32
    %87 = vector.broadcast %c1_i32_44 : i32 to vector<256x1xi32>
    %88 = arith.addi %15, %87 : vector<256x1xi32>
    %c8_i32_45 = arith.constant 8 : i32
    %89 = vector.broadcast %c8_i32_45 : i32 to vector<256x1xi32>
    %90 = arith.cmpi slt, %88, %89 : vector<256x1xi32>
    %91 = arith.andi %86, %90 : vector<256x1xi1>
    %c9 = arith.constant 9 : index
    %c0_46 = arith.constant 0 : index
    %92 = vector.load %arg14[%c9, %c0_46] : memref<288x64xbf16, #tpu.memory_space<vmem>>, vector<256x64xbf16>
    %cst_47 = arith.constant 0.000000e+00 : bf16
    %93 = vector.shape_cast %91 : vector<256x1xi1> to vector<256x1xi1>
    %94 = vector.broadcast %93 : vector<256x1xi1> to vector<256x64xi1>
    %95 = vector.broadcast %cst_47 : bf16 to vector<256x64xbf16>
    %96 = arith.select %94, %92, %95 : vector<256x64xi1>, vector<256x64xbf16>
    %c2 = arith.constant 2 : index
    %c0_48 = arith.constant 0 : index
    %c0_49 = arith.constant 0 : index
    %97 = vector.load %arg5[%c2, %c0_48, %c0_49] : memref<9x64x64xbf16, #tpu.memory_space<vmem>>, vector<1x64x64xbf16>
    %98 = vector.shape_cast %97 : vector<1x64x64xbf16> to vector<64x64xbf16>
    %cst_50 = arith.constant dense<0.000000e+00> : vector<256x64xf32>
    %99 = tpu.matmul %96, %98, %cst_50 {dimension_numbers = #tpu.dot_dimension_numbers<[1], [0], [0], [1], [0, 0, 1, 1], [], []>} : vector<256x64xbf16>, vector<64x64xbf16>, vector<256x64xf32> -> vector<256x64xf32>
    %100 = arith.addf %72, %99 : vector<256x64xf32>
    %c0_i32_51 = arith.constant 0 : i32
    %101 = vector.broadcast %c0_i32_51 : i32 to vector<256x1xi32>
    %102 = arith.addi %14, %101 : vector<256x1xi32>
    %c0_i32_52 = arith.constant 0 : i32
    %103 = vector.broadcast %c0_i32_52 : i32 to vector<256x1xi32>
    %104 = arith.cmpi sge, %102, %103 : vector<256x1xi32>
    %c0_i32_53 = arith.constant 0 : i32
    %105 = vector.broadcast %c0_i32_53 : i32 to vector<256x1xi32>
    %106 = arith.addi %14, %105 : vector<256x1xi32>
    %c8_i32_54 = arith.constant 8 : i32
    %107 = vector.broadcast %c8_i32_54 : i32 to vector<256x1xi32>
    %108 = arith.cmpi slt, %106, %107 : vector<256x1xi32>
    %109 = arith.andi %104, %108 : vector<256x1xi1>
    %c-1_i32_55 = arith.constant -1 : i32
    %110 = vector.broadcast %c-1_i32_55 : i32 to vector<256x1xi32>
    %111 = arith.addi %15, %110 : vector<256x1xi32>
    %c0_i32_56 = arith.constant 0 : i32
    %112 = vector.broadcast %c0_i32_56 : i32 to vector<256x1xi32>
    %113 = arith.cmpi sge, %111, %112 : vector<256x1xi32>
    %114 = arith.andi %109, %113 : vector<256x1xi1>
    %c-1_i32_57 = arith.constant -1 : i32
    %115 = vector.broadcast %c-1_i32_57 : i32 to vector<256x1xi32>
    %116 = arith.addi %15, %115 : vector<256x1xi32>
    %c8_i32_58 = arith.constant 8 : i32
    %117 = vector.broadcast %c8_i32_58 : i32 to vector<256x1xi32>
    %118 = arith.cmpi slt, %116, %117 : vector<256x1xi32>
    %119 = arith.andi %114, %118 : vector<256x1xi1>
    %c15 = arith.constant 15 : index
    %c0_59 = arith.constant 0 : index
    %120 = vector.load %arg14[%c15, %c0_59] : memref<288x64xbf16, #tpu.memory_space<vmem>>, vector<256x64xbf16>
    %cst_60 = arith.constant 0.000000e+00 : bf16
    %121 = vector.shape_cast %119 : vector<256x1xi1> to vector<256x1xi1>
    %122 = vector.broadcast %121 : vector<256x1xi1> to vector<256x64xi1>
    %123 = vector.broadcast %cst_60 : bf16 to vector<256x64xbf16>
    %124 = arith.select %122, %120, %123 : vector<256x64xi1>, vector<256x64xbf16>
    %c3 = arith.constant 3 : index
    %c0_61 = arith.constant 0 : index
    %c0_62 = arith.constant 0 : index
    %125 = vector.load %arg5[%c3, %c0_61, %c0_62] : memref<9x64x64xbf16, #tpu.memory_space<vmem>>, vector<1x64x64xbf16>
    %126 = vector.shape_cast %125 : vector<1x64x64xbf16> to vector<64x64xbf16>
    %cst_63 = arith.constant dense<0.000000e+00> : vector<256x64xf32>
    %127 = tpu.matmul %124, %126, %cst_63 {dimension_numbers = #tpu.dot_dimension_numbers<[1], [0], [0], [1], [0, 0, 1, 1], [], []>} : vector<256x64xbf16>, vector<64x64xbf16>, vector<256x64xf32> -> vector<256x64xf32>
    %128 = arith.addf %100, %127 : vector<256x64xf32>
    %c0_i32_64 = arith.constant 0 : i32
    %129 = vector.broadcast %c0_i32_64 : i32 to vector<256x1xi32>
    %130 = arith.addi %14, %129 : vector<256x1xi32>
    %c0_i32_65 = arith.constant 0 : i32
    %131 = vector.broadcast %c0_i32_65 : i32 to vector<256x1xi32>
    %132 = arith.cmpi sge, %130, %131 : vector<256x1xi32>
    %c0_i32_66 = arith.constant 0 : i32
    %133 = vector.broadcast %c0_i32_66 : i32 to vector<256x1xi32>
    %134 = arith.addi %14, %133 : vector<256x1xi32>
    %c8_i32_67 = arith.constant 8 : i32
    %135 = vector.broadcast %c8_i32_67 : i32 to vector<256x1xi32>
    %136 = arith.cmpi slt, %134, %135 : vector<256x1xi32>
    %137 = arith.andi %132, %136 : vector<256x1xi1>
    %c0_i32_68 = arith.constant 0 : i32
    %138 = vector.broadcast %c0_i32_68 : i32 to vector<256x1xi32>
    %139 = arith.addi %15, %138 : vector<256x1xi32>
    %c0_i32_69 = arith.constant 0 : i32
    %140 = vector.broadcast %c0_i32_69 : i32 to vector<256x1xi32>
    %141 = arith.cmpi sge, %139, %140 : vector<256x1xi32>
    %142 = arith.andi %137, %141 : vector<256x1xi1>
    %c0_i32_70 = arith.constant 0 : i32
    %143 = vector.broadcast %c0_i32_70 : i32 to vector<256x1xi32>
    %144 = arith.addi %15, %143 : vector<256x1xi32>
    %c8_i32_71 = arith.constant 8 : i32
    %145 = vector.broadcast %c8_i32_71 : i32 to vector<256x1xi32>
    %146 = arith.cmpi slt, %144, %145 : vector<256x1xi32>
    %147 = arith.andi %142, %146 : vector<256x1xi1>
    %c16_72 = arith.constant 16 : index
    %c0_73 = arith.constant 0 : index
    %148 = vector.load %arg14[%c16_72, %c0_73] : memref<288x64xbf16, #tpu.memory_space<vmem>>, vector<256x64xbf16>
    %cst_74 = arith.constant 0.000000e+00 : bf16
    %149 = vector.shape_cast %147 : vector<256x1xi1> to vector<256x1xi1>
    %150 = vector.broadcast %149 : vector<256x1xi1> to vector<256x64xi1>
    %151 = vector.broadcast %cst_74 : bf16 to vector<256x64xbf16>
    %152 = arith.select %150, %148, %151 : vector<256x64xi1>, vector<256x64xbf16>
    %c4 = arith.constant 4 : index
    %c0_75 = arith.constant 0 : index
    %c0_76 = arith.constant 0 : index
    %153 = vector.load %arg5[%c4, %c0_75, %c0_76] : memref<9x64x64xbf16, #tpu.memory_space<vmem>>, vector<1x64x64xbf16>
    %154 = vector.shape_cast %153 : vector<1x64x64xbf16> to vector<64x64xbf16>
    %cst_77 = arith.constant dense<0.000000e+00> : vector<256x64xf32>
    %155 = tpu.matmul %152, %154, %cst_77 {dimension_numbers = #tpu.dot_dimension_numbers<[1], [0], [0], [1], [0, 0, 1, 1], [], []>} : vector<256x64xbf16>, vector<64x64xbf16>, vector<256x64xf32> -> vector<256x64xf32>
    %156 = arith.addf %128, %155 : vector<256x64xf32>
    %c0_i32_78 = arith.constant 0 : i32
    %157 = vector.broadcast %c0_i32_78 : i32 to vector<256x1xi32>
    %158 = arith.addi %14, %157 : vector<256x1xi32>
    %c0_i32_79 = arith.constant 0 : i32
    %159 = vector.broadcast %c0_i32_79 : i32 to vector<256x1xi32>
    %160 = arith.cmpi sge, %158, %159 : vector<256x1xi32>
    %c0_i32_80 = arith.constant 0 : i32
    %161 = vector.broadcast %c0_i32_80 : i32 to vector<256x1xi32>
    %162 = arith.addi %14, %161 : vector<256x1xi32>
    %c8_i32_81 = arith.constant 8 : i32
    %163 = vector.broadcast %c8_i32_81 : i32 to vector<256x1xi32>
    %164 = arith.cmpi slt, %162, %163 : vector<256x1xi32>
    %165 = arith.andi %160, %164 : vector<256x1xi1>
    %c1_i32_82 = arith.constant 1 : i32
    %166 = vector.broadcast %c1_i32_82 : i32 to vector<256x1xi32>
    %167 = arith.addi %15, %166 : vector<256x1xi32>
    %c0_i32_83 = arith.constant 0 : i32
    %168 = vector.broadcast %c0_i32_83 : i32 to vector<256x1xi32>
    %169 = arith.cmpi sge, %167, %168 : vector<256x1xi32>
    %170 = arith.andi %165, %169 : vector<256x1xi1>
    %c1_i32_84 = arith.constant 1 : i32
    %171 = vector.broadcast %c1_i32_84 : i32 to vector<256x1xi32>
    %172 = arith.addi %15, %171 : vector<256x1xi32>
    %c8_i32_85 = arith.constant 8 : i32
    %173 = vector.broadcast %c8_i32_85 : i32 to vector<256x1xi32>
    %174 = arith.cmpi slt, %172, %173 : vector<256x1xi32>
    %175 = arith.andi %170, %174 : vector<256x1xi1>
    %c17 = arith.constant 17 : index
    %c0_86 = arith.constant 0 : index
    %176 = vector.load %arg14[%c17, %c0_86] : memref<288x64xbf16, #tpu.memory_space<vmem>>, vector<256x64xbf16>
    %cst_87 = arith.constant 0.000000e+00 : bf16
    %177 = vector.shape_cast %175 : vector<256x1xi1> to vector<256x1xi1>
    %178 = vector.broadcast %177 : vector<256x1xi1> to vector<256x64xi1>
    %179 = vector.broadcast %cst_87 : bf16 to vector<256x64xbf16>
    %180 = arith.select %178, %176, %179 : vector<256x64xi1>, vector<256x64xbf16>
    %c5 = arith.constant 5 : index
    %c0_88 = arith.constant 0 : index
    %c0_89 = arith.constant 0 : index
    %181 = vector.load %arg5[%c5, %c0_88, %c0_89] : memref<9x64x64xbf16, #tpu.memory_space<vmem>>, vector<1x64x64xbf16>
    %182 = vector.shape_cast %181 : vector<1x64x64xbf16> to vector<64x64xbf16>
    %cst_90 = arith.constant dense<0.000000e+00> : vector<256x64xf32>
    %183 = tpu.matmul %180, %182, %cst_90 {dimension_numbers = #tpu.dot_dimension_numbers<[1], [0], [0], [1], [0, 0, 1, 1], [], []>} : vector<256x64xbf16>, vector<64x64xbf16>, vector<256x64xf32> -> vector<256x64xf32>
    %184 = arith.addf %156, %183 : vector<256x64xf32>
    %c1_i32_91 = arith.constant 1 : i32
    %185 = vector.broadcast %c1_i32_91 : i32 to vector<256x1xi32>
    %186 = arith.addi %14, %185 : vector<256x1xi32>
    %c0_i32_92 = arith.constant 0 : i32
    %187 = vector.broadcast %c0_i32_92 : i32 to vector<256x1xi32>
    %188 = arith.cmpi sge, %186, %187 : vector<256x1xi32>
    %c1_i32_93 = arith.constant 1 : i32
    %189 = vector.broadcast %c1_i32_93 : i32 to vector<256x1xi32>
    %190 = arith.addi %14, %189 : vector<256x1xi32>
    %c8_i32_94 = arith.constant 8 : i32
    %191 = vector.broadcast %c8_i32_94 : i32 to vector<256x1xi32>
    %192 = arith.cmpi slt, %190, %191 : vector<256x1xi32>
    %193 = arith.andi %188, %192 : vector<256x1xi1>
    %c-1_i32_95 = arith.constant -1 : i32
    %194 = vector.broadcast %c-1_i32_95 : i32 to vector<256x1xi32>
    %195 = arith.addi %15, %194 : vector<256x1xi32>
    %c0_i32_96 = arith.constant 0 : i32
    %196 = vector.broadcast %c0_i32_96 : i32 to vector<256x1xi32>
    %197 = arith.cmpi sge, %195, %196 : vector<256x1xi32>
    %198 = arith.andi %193, %197 : vector<256x1xi1>
    %c-1_i32_97 = arith.constant -1 : i32
    %199 = vector.broadcast %c-1_i32_97 : i32 to vector<256x1xi32>
    %200 = arith.addi %15, %199 : vector<256x1xi32>
    %c8_i32_98 = arith.constant 8 : i32
    %201 = vector.broadcast %c8_i32_98 : i32 to vector<256x1xi32>
    %202 = arith.cmpi slt, %200, %201 : vector<256x1xi32>
    %203 = arith.andi %198, %202 : vector<256x1xi1>
    %c23 = arith.constant 23 : index
    %c0_99 = arith.constant 0 : index
    %204 = vector.load %arg14[%c23, %c0_99] : memref<288x64xbf16, #tpu.memory_space<vmem>>, vector<256x64xbf16>
    %cst_100 = arith.constant 0.000000e+00 : bf16
    %205 = vector.shape_cast %203 : vector<256x1xi1> to vector<256x1xi1>
    %206 = vector.broadcast %205 : vector<256x1xi1> to vector<256x64xi1>
    %207 = vector.broadcast %cst_100 : bf16 to vector<256x64xbf16>
    %208 = arith.select %206, %204, %207 : vector<256x64xi1>, vector<256x64xbf16>
    %c6 = arith.constant 6 : index
    %c0_101 = arith.constant 0 : index
    %c0_102 = arith.constant 0 : index
    %209 = vector.load %arg5[%c6, %c0_101, %c0_102] : memref<9x64x64xbf16, #tpu.memory_space<vmem>>, vector<1x64x64xbf16>
    %210 = vector.shape_cast %209 : vector<1x64x64xbf16> to vector<64x64xbf16>
    %cst_103 = arith.constant dense<0.000000e+00> : vector<256x64xf32>
    %211 = tpu.matmul %208, %210, %cst_103 {dimension_numbers = #tpu.dot_dimension_numbers<[1], [0], [0], [1], [0, 0, 1, 1], [], []>} : vector<256x64xbf16>, vector<64x64xbf16>, vector<256x64xf32> -> vector<256x64xf32>
    %212 = arith.addf %184, %211 : vector<256x64xf32>
    %c1_i32_104 = arith.constant 1 : i32
    %213 = vector.broadcast %c1_i32_104 : i32 to vector<256x1xi32>
    %214 = arith.addi %14, %213 : vector<256x1xi32>
    %c0_i32_105 = arith.constant 0 : i32
    %215 = vector.broadcast %c0_i32_105 : i32 to vector<256x1xi32>
    %216 = arith.cmpi sge, %214, %215 : vector<256x1xi32>
    %c1_i32_106 = arith.constant 1 : i32
    %217 = vector.broadcast %c1_i32_106 : i32 to vector<256x1xi32>
    %218 = arith.addi %14, %217 : vector<256x1xi32>
    %c8_i32_107 = arith.constant 8 : i32
    %219 = vector.broadcast %c8_i32_107 : i32 to vector<256x1xi32>
    %220 = arith.cmpi slt, %218, %219 : vector<256x1xi32>
    %221 = arith.andi %216, %220 : vector<256x1xi1>
    %c0_i32_108 = arith.constant 0 : i32
    %222 = vector.broadcast %c0_i32_108 : i32 to vector<256x1xi32>
    %223 = arith.addi %15, %222 : vector<256x1xi32>
    %c0_i32_109 = arith.constant 0 : i32
    %224 = vector.broadcast %c0_i32_109 : i32 to vector<256x1xi32>
    %225 = arith.cmpi sge, %223, %224 : vector<256x1xi32>
    %226 = arith.andi %221, %225 : vector<256x1xi1>
    %c0_i32_110 = arith.constant 0 : i32
    %227 = vector.broadcast %c0_i32_110 : i32 to vector<256x1xi32>
    %228 = arith.addi %15, %227 : vector<256x1xi32>
    %c8_i32_111 = arith.constant 8 : i32
    %229 = vector.broadcast %c8_i32_111 : i32 to vector<256x1xi32>
    %230 = arith.cmpi slt, %228, %229 : vector<256x1xi32>
    %231 = arith.andi %226, %230 : vector<256x1xi1>
    %c24 = arith.constant 24 : index
    %c0_112 = arith.constant 0 : index
    %232 = vector.load %arg14[%c24, %c0_112] : memref<288x64xbf16, #tpu.memory_space<vmem>>, vector<256x64xbf16>
    %cst_113 = arith.constant 0.000000e+00 : bf16
    %233 = vector.shape_cast %231 : vector<256x1xi1> to vector<256x1xi1>
    %234 = vector.broadcast %233 : vector<256x1xi1> to vector<256x64xi1>
    %235 = vector.broadcast %cst_113 : bf16 to vector<256x64xbf16>
    %236 = arith.select %234, %232, %235 : vector<256x64xi1>, vector<256x64xbf16>
    %c7_114 = arith.constant 7 : index
    %c0_115 = arith.constant 0 : index
    %c0_116 = arith.constant 0 : index
    %237 = vector.load %arg5[%c7_114, %c0_115, %c0_116] : memref<9x64x64xbf16, #tpu.memory_space<vmem>>, vector<1x64x64xbf16>
    %238 = vector.shape_cast %237 : vector<1x64x64xbf16> to vector<64x64xbf16>
    %cst_117 = arith.constant dense<0.000000e+00> : vector<256x64xf32>
    %239 = tpu.matmul %236, %238, %cst_117 {dimension_numbers = #tpu.dot_dimension_numbers<[1], [0], [0], [1], [0, 0, 1, 1], [], []>} : vector<256x64xbf16>, vector<64x64xbf16>, vector<256x64xf32> -> vector<256x64xf32>
    %240 = arith.addf %212, %239 : vector<256x64xf32>
    %c1_i32_118 = arith.constant 1 : i32
    %241 = vector.broadcast %c1_i32_118 : i32 to vector<256x1xi32>
    %242 = arith.addi %14, %241 : vector<256x1xi32>
    %c0_i32_119 = arith.constant 0 : i32
    %243 = vector.broadcast %c0_i32_119 : i32 to vector<256x1xi32>
    %244 = arith.cmpi sge, %242, %243 : vector<256x1xi32>
    %c1_i32_120 = arith.constant 1 : i32
    %245 = vector.broadcast %c1_i32_120 : i32 to vector<256x1xi32>
    %246 = arith.addi %14, %245 : vector<256x1xi32>
    %c8_i32_121 = arith.constant 8 : i32
    %247 = vector.broadcast %c8_i32_121 : i32 to vector<256x1xi32>
    %248 = arith.cmpi slt, %246, %247 : vector<256x1xi32>
    %249 = arith.andi %244, %248 : vector<256x1xi1>
    %c1_i32_122 = arith.constant 1 : i32
    %250 = vector.broadcast %c1_i32_122 : i32 to vector<256x1xi32>
    %251 = arith.addi %15, %250 : vector<256x1xi32>
    %c0_i32_123 = arith.constant 0 : i32
    %252 = vector.broadcast %c0_i32_123 : i32 to vector<256x1xi32>
    %253 = arith.cmpi sge, %251, %252 : vector<256x1xi32>
    %254 = arith.andi %249, %253 : vector<256x1xi1>
    %c1_i32_124 = arith.constant 1 : i32
    %255 = vector.broadcast %c1_i32_124 : i32 to vector<256x1xi32>
    %256 = arith.addi %15, %255 : vector<256x1xi32>
    %c8_i32_125 = arith.constant 8 : i32
    %257 = vector.broadcast %c8_i32_125 : i32 to vector<256x1xi32>
    %258 = arith.cmpi slt, %256, %257 : vector<256x1xi32>
    %259 = arith.andi %254, %258 : vector<256x1xi1>
    %c25 = arith.constant 25 : index
    %c0_126 = arith.constant 0 : index
    %260 = vector.load %arg14[%c25, %c0_126] : memref<288x64xbf16, #tpu.memory_space<vmem>>, vector<256x64xbf16>
    %cst_127 = arith.constant 0.000000e+00 : bf16
    %261 = vector.shape_cast %259 : vector<256x1xi1> to vector<256x1xi1>
    %262 = vector.broadcast %261 : vector<256x1xi1> to vector<256x64xi1>
    %263 = vector.broadcast %cst_127 : bf16 to vector<256x64xbf16>
    %264 = arith.select %262, %260, %263 : vector<256x64xi1>, vector<256x64xbf16>
    %c8_128 = arith.constant 8 : index
    %c0_129 = arith.constant 0 : index
    %c0_130 = arith.constant 0 : index
    %265 = vector.load %arg5[%c8_128, %c0_129, %c0_130] : memref<9x64x64xbf16, #tpu.memory_space<vmem>>, vector<1x64x64xbf16>
    %266 = vector.shape_cast %265 : vector<1x64x64xbf16> to vector<64x64xbf16>
    %cst_131 = arith.constant dense<0.000000e+00> : vector<256x64xf32>
    %267 = tpu.matmul %264, %266, %cst_131 {dimension_numbers = #tpu.dot_dimension_numbers<[1], [0], [0], [1], [0, 0, 1, 1], [], []>} : vector<256x64xbf16>, vector<64x64xbf16>, vector<256x64xf32> -> vector<256x64xf32>
    %268 = arith.addf %240, %267 : vector<256x64xf32>
    %c0_132 = arith.constant 0 : index
    %c0_133 = arith.constant 0 : index
    %269 = vector.load %arg6[%c0_132, %c0_133] : memref<1x64xf32, #tpu.memory_space<vmem>>, vector<1x64xf32>
    %270 = vector.broadcast %269 : vector<1x64xf32> to vector<256x64xf32>
    %271 = arith.mulf %268, %270 : vector<256x64xf32>
    %c0_134 = arith.constant 0 : index
    %c0_135 = arith.constant 0 : index
    %272 = vector.load %arg7[%c0_134, %c0_135] : memref<1x64xf32, #tpu.memory_space<vmem>>, vector<1x64xf32>
    %273 = vector.broadcast %272 : vector<1x64xf32> to vector<256x64xf32>
    %274 = arith.addf %271, %273 : vector<256x64xf32>
    %cst_136 = arith.constant 0.000000e+00 : f32
    %275 = vector.broadcast %cst_136 : f32 to vector<256x64xf32>
    %276 = arith.maximumf %274, %275 : vector<256x64xf32>
    %277 = arith.truncf %276 : vector<256x64xf32> to vector<256x64xbf16>
    %c0_137 = arith.constant 0 : index
    %c0_138 = arith.constant 0 : index
    %278 = vector.load %arg8[%c0_137, %c0_138] : memref<64x128xbf16, #tpu.memory_space<vmem>>, vector<64x128xbf16>
    %cst_139 = arith.constant dense<0.000000e+00> : vector<256x128xf32>
    %279 = tpu.matmul %277, %278, %cst_139 {dimension_numbers = #tpu.dot_dimension_numbers<[1], [0], [0], [1], [0, 0, 1, 1], [], []>} : vector<256x64xbf16>, vector<64x128xbf16>, vector<256x128xf32> -> vector<256x128xf32>
    %c0_140 = arith.constant 0 : index
    %c0_141 = arith.constant 0 : index
    %280 = vector.load %arg9[%c0_140, %c0_141] : memref<1x128xf32, #tpu.memory_space<vmem>>, vector<1x128xf32>
    %281 = vector.broadcast %280 : vector<1x128xf32> to vector<256x128xf32>
    %282 = arith.mulf %279, %281 : vector<256x128xf32>
    %c0_142 = arith.constant 0 : index
    %c0_143 = arith.constant 0 : index
    %283 = vector.load %arg10[%c0_142, %c0_143] : memref<1x128xf32, #tpu.memory_space<vmem>>, vector<1x128xf32>
    %284 = vector.broadcast %283 : vector<1x128xf32> to vector<256x128xf32>
    %285 = arith.addf %282, %284 : vector<256x128xf32>
    %286 = arith.extf %1 : vector<256x128xbf16> to vector<256x128xf32>
    %287 = arith.addf %285, %286 : vector<256x128xf32>
    %cst_144 = arith.constant 0.000000e+00 : f32
    %288 = vector.broadcast %cst_144 : f32 to vector<256x128xf32>
    %289 = arith.maximumf %287, %288 : vector<256x128xf32>
    %290 = vector.shape_cast %289 : vector<256x128xf32> to vector<4x64x128xf32>
    %291 = arith.truncf %290 : vector<4x64x128xf32> to vector<4x64x128xbf16>
    %c0_145 = arith.constant 0 : index
    %c0_146 = arith.constant 0 : index
    %c0_147 = arith.constant 0 : index
    %292 = vector.load %arg13[%c0_145, %c0_146, %c0_147] : memref<4x64x128xbf16, #tpu.memory_space<vmem>>, vector<4x64x128xbf16>
    tpu.vector_store %arg13[%c0_145, %c0_146, %c0_147], %291 {strides = array<i32>} : memref<4x64x128xbf16, #tpu.memory_space<vmem>>, vector<4x64x128xbf16>,
    return
  }
  func.func @transform_0(%arg0: i32) -> (i32, i32, i32) {
    %c0_i32 = arith.constant 0 : i32
    %c0_i32_0 = arith.constant 0 : i32
    %c0_i32_1 = arith.constant 0 : i32
    return %arg0, %c0_i32, %c0_i32_0 : i32, i32, i32
  }
  func.func @transform_1(%arg0: i32) -> (i32, i32) {
    %c0_i32 = arith.constant 0 : i32
    %c0_i32_0 = arith.constant 0 : i32
    %c0_i32_1 = arith.constant 0 : i32
    return %c0_i32, %c0_i32_0 : i32, i32
  }
  func.func @transform_2(%arg0: i32) -> (i32, i32) {
    %c0_i32 = arith.constant 0 : i32
    %c0_i32_0 = arith.constant 0 : i32
    %c0_i32_1 = arith.constant 0 : i32
    return %c0_i32, %c0_i32_0 : i32, i32
  }
  func.func @transform_3(%arg0: i32) -> (i32, i32) {
    %c0_i32 = arith.constant 0 : i32
    %c0_i32_0 = arith.constant 0 : i32
    %c0_i32_1 = arith.constant 0 : i32
    return %c0_i32, %c0_i32_0 : i32, i32
  }
  func.func @transform_4(%arg0: i32) -> (i32, i32, i32) {
    %c0_i32 = arith.constant 0 : i32
    %c0_i32_0 = arith.constant 0 : i32
    %c0_i32_1 = arith.constant 0 : i32
    %c0_i32_2 = arith.constant 0 : i32
    return %c0_i32, %c0_i32_0, %c0_i32_1 : i32, i32, i32
  }
  func.func @transform_5(%arg0: i32) -> (i32, i32) {
    %c0_i32 = arith.constant 0 : i32
    %c0_i32_0 = arith.constant 0 : i32
    %c0_i32_1 = arith.constant 0 : i32
    return %c0_i32, %c0_i32_0 : i32, i32
  }
  func.func @transform_6(%arg0: i32) -> (i32, i32) {
    %c0_i32 = arith.constant 0 : i32
    %c0_i32_0 = arith.constant 0 : i32
    %c0_i32_1 = arith.constant 0 : i32
    return %c0_i32, %c0_i32_0 : i32, i32
  }
  func.func @transform_7(%arg0: i32) -> (i32, i32) {
    %c0_i32 = arith.constant 0 : i32
    %c0_i32_0 = arith.constant 0 : i32
    %c0_i32_1 = arith.constant 0 : i32
    return %c0_i32, %c0_i32_0 : i32, i32
  }
  func.func @transform_8(%arg0: i32) -> (i32, i32) {
    %c0_i32 = arith.constant 0 : i32
    %c0_i32_0 = arith.constant 0 : i32
    %c0_i32_1 = arith.constant 0 : i32
    return %c0_i32, %c0_i32_0 : i32, i32
  }
  func.func @transform_9(%arg0: i32) -> (i32, i32) {
    %c0_i32 = arith.constant 0 : i32
    %c0_i32_0 = arith.constant 0 : i32
    %c0_i32_1 = arith.constant 0 : i32
    return %c0_i32, %c0_i32_0 : i32, i32
  }
  func.func @transform_10(%arg0: i32) -> (i32, i32) {
    %c0_i32 = arith.constant 0 : i32
    %c0_i32_0 = arith.constant 0 : i32
    %c0_i32_1 = arith.constant 0 : i32
    return %c0_i32, %c0_i32_0 : i32, i32
  }
  func.func @transform_11(%arg0: i32) -> (i32, i32) {
    %c0_i32 = arith.constant 0 : i32
    %c0_i32_0 = arith.constant 0 : i32
    %c0_i32_1 = arith.constant 0 : i32
    return %c0_i32, %c0_i32_0 : i32, i32
  }
  func.func @transform_12(%arg0: i32) -> (i32, i32, i32) {
    %c0_i32 = arith.constant 0 : i32
    %c0_i32_0 = arith.constant 0 : i32
    %c0_i32_1 = arith.constant 0 : i32
    return %arg0, %c0_i32, %c0_i32_0 : i32, i32, i32
  }
}

</mosaic_0001>

<bundles_post_ra>
// kernel: tpu_custom_call.1
= control target key start
LH: loop header
LB: loop body
LE: loop exit
PB: predicated region body
PF: predicated region fallthrough
CT: control target
= control target key end

     0   :  { %s19143_s0 = inlined_call_operand.vmem [shape: bf16[8,64,128], index: 0, kind: input, shape index: {}]   ;;  %s19144_s1 = inlined_call_operand.vmem [shape: bf16[128,64], index: 1, kind: input, shape index: {}]   ;;  %s19145_s2 = inlined_call_operand.vmem [shape: f32[1,64], index: 2, kind: input, shape index: {}]   ;;  %s19146_s3 = inlined_call_operand.vmem [shape: f32[1,64], index: 3, kind: input, shape index: {}]   ;;  %s19147_s4 = inlined_call_operand.vmem [shape: bf16[9,64,64], index: 4, kind: input, shape index: {}]   ;;  %s19148_s5 = inlined_call_operand.vmem [shape: f32[1,64], index: 5, kind: input, shape index: {}]   ;;  %s19149_s6 = inlined_call_operand.vmem [shape: f32[1,64], index: 6, kind: input, shape index: {}]   ;;  %s19150_s7 = inlined_call_operand.vmem [shape: bf16[64,128], index: 7, kind: input, shape index: {}]   ;;  %s19151_s8 = inlined_call_operand.vmem [shape: f32[1,128], index: 8, kind: input, shape index: {}]   ;;  %s19152_s9 = inlined_call_operand.vmem [shape: f32[1,128], index: 9, kind: input, shape index: {}]   ;;  %s19153_s10 = inlined_call_operand.vmem [shape: s32[256,1], index: 10, kind: input, shape index: {}]   ;;  %s19154_s11 = inlined_call_operand.vmem [shape: s32[256,1], index: 11, kind: input, shape index: {}]   ;;  %s19155_s12 = inlined_call_operand.hbm [shape: bf16[8,64,128], index: 12, kind: output, shape index: {}]  }
   0x1   :  { %19846 = sst [smem:[#allocation163_spill]] %s19143_s0 }
   0x2   :  { %17 = vsyncpa [#allocation4], 0 }
   0x3   :  { %19 = vsyncpa [#allocation4 + $0x1], 0  ;;  %s11961_s21 = smov 0   ;;  %s11963_s22 = smov 0  }
   0x4   :  { %s11965_s23 = smov 0   ;;  %s11967_s24 = smov 0  }
   0x5 LB: > { %s11982_s25 = sadd.s32 4294967295, %s11890_s24   ;;  %s9943_s26 = sadd.s32 4294967294, %s11890_s24   ;;  %s11890_s24 = sphi %s11967_s24, %s21864_s24   ;;  %s11886_s23 = sphi %s11965_s23, %s21863_s23   ;;  %s11882_s22 = sphi %s11963_s22, %s21862_s22   ;;  %s11878_s21 = sphi %s11961_s21, %s21861_s21  }
   0x6   : > { %s11986_s27 = sadd.s32 1, %s11890_s24   ;;  %s289_s28 = sadd.s32 1, %s11886_s23 }
   0x7   : > { %s286_s29 = ssub.s32 %s11890_s24, %s11986_s27  ;;  %p299_p0 = scmp.ne.s32.totalorder %s11886_s23, %s11882_s22 }
   0x8   : > { %p287_p1 = scmp.eq.s32.totalorder %s286_s29, 0  ;;  %p300_p2 = scmp.eq.s32.totalorder %s11982_s25, 1 }
   0x9   : > { %p305_p3 = scmp.ne.s32.totalorder %s11882_s22, %s11878_s21  ;;  %p306_p4 = scmp.eq.s32.totalorder %s9943_s26, 1 }
   0xa   : > { %s11997_s30 = scalar_select %p287_p1, %s11886_s23, %s289_s28  }
   0xb   : > { %p11999_p5 = por %p300_p2, %p299_p0  ;;  %p12003_p6 = por %p306_p4, %p305_p3 }
   0xc   : > { %p9946_p7 = scmp.ge.s32.totalorder %s11890_s24, 1  ;;  %p367_p8 = scmp.lt.s32.totalorder %s11890_s24, 3 }
   0xe   : > { %p368_p9 = pnand %p9946_p7, %p367_p8 }
  0x10   : > { %371 = sbr.rel (%p368_p9) target bundleno = 1686 (0x696), region = 68 }
  0x17   : > { %v11539_v0 = vld [vmem:[%s19144_s1] sm:$0xff]   ;;  %v19214_v1 = vmov 0   ;;  %v11540_v2 = vld [vmem:[%s19144_s1 + $0x8] sm:$0xff]   ;;  %v919_v3 = vld [vmem:[%s19153_s10 + $0x10] sm:$0xff]  ;;  %v19851_v15 = vmov 0  ;;  %s9948_s19 = sshll.u32 %s11982_s25, 2 }
  0x18   : > { %11538 = vset.pattern.permute.xlu1 %v19214_v1  ;;  %11537 = vset.pattern.permute.xlu0 %v19214_v1  ;;  %v951_v4 = vld [vmem:[%s19154_s11 + $0x10] sm:$0xff]  ;;  %v917_v5 = vld [vmem:[%s19153_s10] sm:$0xff]  ;;  %v983_v6 = vadd.s32 4294967295, %v919_v3  ;;  %v920_v12 = vld [vmem:[%s19153_s10 + $0x18] sm:$0xff]  ;;  %p12093_p10 = scmp.lt.s32.totalorder %s9948_s19, 7  ;;  %v19859_v30 = vmov 0 }
  0x19   : > { %10783 = vmatprep.subr.bf16.mxu0 %v11539_v0  ;;  %v12026_v7 = vadd.s32 4294967295, %v951_v4  ;;  %v949_v8 = vld [vmem:[%s19154_s11] sm:$0xff]  ;;  %v981_v9 = vadd.s32 4294967295, %v917_v5  ;;  %v11541_v11 = vld [vmem:[%s19144_s1 + $0x10] sm:$0xff]   ;;  %v952_v13 = vld [vmem:[%s19154_s11 + $0x18] sm:$0xff]  ;;  %v984_v17 = vadd.s32 4294967295, %v920_v12 }
  0x1a   : > { %10784 = vmatpush3.bf16.msra.mxu0 %v11539_v0  ;;  %v12031_v10 = vadd.s32 4294967295, %v949_v8  ;;  %vm1015_vm0 = vcmp.ge.s32.totalorder %v983_v6, 0  ;;  %vm1047_vm1 = vcmp.lt.s32.totalorder %v983_v6, 8  ;;  %v918_v14 = vld [vmem:[%s19153_s10 + $0x8] sm:$0xff]  ;;  %v12060_v18 = vadd.s32 4294967295, %v952_v13  ;;  %v11542_v20 = vld [vmem:[%s19144_s1 + $0x18] sm:$0xff]  }
  0x1b   : > { %19849 = vst [vmem:[#allocation6_spill] sm:$0xff] %v12026_v7  ;;  %10785 = vmatprep.subr.bf16.mxu0 %v11540_v2  ;;  %vm19157_vm2 = vcmp.ge.s32.totalorder %v12026_v7, 0  ;;  %vm19156_vm3 = vcmp.lt.s32.totalorder %v12026_v7, 8  ;;  %vm12047_vm4 = vmand %vm1015_vm0, %vm1047_vm1  ;;  %vm1013_vm5 = vcmp.ge.s32.totalorder %v981_v9, 0  ;;  %vm1045_vm6 = vcmp.lt.s32.totalorder %v981_v9, 8  ;;  %v950_v16 = vld [vmem:[%s19154_s11 + $0x8] sm:$0xff] }
  0x1c   : > { %19850 = vst [vmem:[#allocation7_spill] sm:$0xff] %v12031_v10  ;;  %v19852_v15 = vsel %vm12047_vm4, 4294967295, %v19851_v15  ;;  %vm19162_vm7 = vcmp.ge.s32.totalorder %v12031_v10, 0  ;;  %vm1175_vm8 = vmand %vm12047_vm4, %vm19157_vm2  ;;  %v982_v19 = vadd.s32 4294967295, %v918_v14  ;;  %vm19160_vm10 = vcmp.lt.s32.totalorder %v12031_v10, 8  ;;  %v922_v21 = vld [vmem:[%s19153_s10 + $0x28] sm:$0xff] }
  0x1d   : > { %19853 = vst [vmem:[#allocation8_spill] sm:$0xff] %v19852_v15  ;;  %19854 = vst [vmem:[#allocation9_spill] sm:$0xff] %v12060_v18  ;;  %vm1016_vm12 = vcmp.ge.s32.totalorder %v984_v17, 0  ;;  %vm1048_vm13 = vcmp.lt.s32.totalorder %v984_v17, 8  ;;  %v12078_v24 = vadd.s32 4294967295, %v950_v16  ;;  %v954_v25 = vld [vmem:[%s19154_s11 + $0x28] sm:$0xff] }
  0x1e   : > { %10786 = vmatpush3.bf16.msra.mxu0 %v11540_v2  ;;  %vm1239_vm9 = vmand %vm1175_vm8, %vm19156_vm3  ;;  %vm19159_vm15 = vcmp.ge.s32.totalorder %v12060_v18, 0  ;;  %v921_v26 = vld [vmem:[%s19153_s10 + $0x20] sm:$0xff]  ;;  %vm19158_vm1 = vcmp.lt.s32.totalorder %v12060_v18, 8  ;;  %v986_v27 = vadd.s32 4294967295, %v922_v21  ;;  %vm1046_vm8 = vcmp.lt.s32.totalorder %v982_v19, 8  ;;  %v924_v35 = vld [vmem:[%s19153_s10 + $0x38] sm:$0xff] }
  0x1f   : > { %10787 = vmatprep.subr.bf16.mxu0 %v11541_v11  ;;  %v1288_v22 = vsel %vm1239_vm9, 1, %v19214_v1  ;;  %vm12074_vm11 = vmand %vm1013_vm5, %vm1045_vm6  ;;  %19857 = vst [vmem:[#allocation10_spill] sm:$0xff] %v12078_v24  ;;  %vm1014_vm5 = vcmp.ge.s32.totalorder %v982_v19, 0  ;;  %v953_v28 = vld [vmem:[%s19154_s11 + $0x20] sm:$0xff]  ;;  %v12110_v31 = vadd.s32 4294967295, %v954_v25  ;;  %v985_v33 = vadd.s32 4294967295, %v921_v26 }
  0x20   : > { %1325 = vperm.xlu1 %11538, %v1288_v22   ;;  %vm1173_vm14 = vmand %vm12074_vm11, %vm19162_vm7  ;;  %v11543_v32 = vld [vmem:[%s19144_s1 + $0x20] sm:$0xff]   ;;  %v12123_v34 = vadd.s32 4294967295, %v953_v28  ;;  %v956_v36 = vld [vmem:[%s19154_s11 + $0x38] sm:$0xff]  ;;  %vm1050_vm3 = vcmp.lt.s32.totalorder %v986_v27, 8  ;;  %s21866_s19 = smov (!%p12093_p10, %s9948_s19), 7  ;;  %v988_v41 = vadd.s32 4294967295, %v924_v35 }
  0x21   : > { %vm1237_vm0 = vmand %vm1173_vm14, %vm19160_vm10  ;;  %19862 = vst [vmem:[#allocation12_spill] sm:$0xff] %v12110_v31  ;;  %vm19167_vm14 = vcmp.ge.s32.totalorder %v12078_v24, 0  ;;  %v923_v39 = vld [vmem:[%s19153_s10 + $0x30] sm:$0xff]  ;;  %v11544_v40 = vld [vmem:[%s19144_s1 + $0x28] sm:$0xff]   ;;  %v19866_v43 = vmov 0  ;;  %vm1049_vm10 = vcmp.lt.s32.totalorder %v985_v33, 8 }
  0x22   : > { %10788 = vmatpush3.bf16.msra.mxu0 %v11541_v11  ;;  %v1286_v29 = vsel %vm1237_vm0, 1, %v19214_v1  ;;  %vm12106_vm6 = vmand %vm1016_vm12, %vm1048_vm13  ;;  %vm19163_vm13 = vcmp.lt.s32.totalorder %v12078_v24, 8  ;;  %19863 = vst [vmem:[#allocation13_spill] sm:$0xff] %v12123_v34  ;;  %v12162_v44 = vadd.s32 4294967295, %v956_v36  ;;  %v955_v45 = vld [vmem:[%s19154_s11 + $0x30] sm:$0xff]  ;;  %v987_v46 = vadd.s32 4294967295, %v923_v39 }
  0x23   : > { %v19860_v30 = vsel %vm12106_vm6, 4294967295, %v19859_v30  ;;  %10789 = vmatprep.subr.bf16.mxu0 %v11542_v20  ;;  %1319 = vperm.xlu0 %11537, %v1286_v29   ;;  %vm1176_vm9 = vmand %vm12106_vm6, %vm19159_vm15  ;;  %vm1017_vm15 = vcmp.ge.s32.totalorder %v985_v33, 0  ;;  %v926_v47 = vld [vmem:[%s19153_s10 + $0x48] sm:$0xff]  ;;  %v11545_v48 = vld [vmem:[%s19144_s1 + $0x30] sm:$0xff]   ;;  %s10429_s15 = sshll.u32 %s21866_s19, 5  ;;  %v19870_v50 = vmov 0 }
  0x24   : > { %19861 = vst [vmem:[#allocation11_spill] sm:$0xff] %v19860_v30  ;;  %vm1240_vm12 = vmand %vm1176_vm9, %vm19158_vm1  ;;  %vm1018_vm9 = vcmp.ge.s32.totalorder %v986_v27, 0  ;;  %vm1020_vm7 = vcmp.ge.s32.totalorder %v988_v41, 0  ;;  %v12189_v51 = vadd.s32 4294967295, %v955_v45  ;;  %v12194_v52 = vld [vmem:[%s19154_s11 + $0x48] sm:$0xff]  ;;  %v925_v53 = vld [vmem:[%s19153_s10 + $0x40] sm:$0xff] }
  0x25   : > { %v1289_v37 = vsel %vm1240_vm12, 1, %v19214_v1  ;;  %vm12133_vm0 = vmand %vm1014_vm5, %vm1046_vm8  ;;  %vm19161_vm12 = vcmp.ge.s32.totalorder %v12110_v31, 0  ;;  %vm19164_vm8 = vcmp.lt.s32.totalorder %v12110_v31, 8  ;;  %19869 = vst [vmem:[#allocation15_spill] sm:$0xff] %v12162_v44  ;;  %v990_v54 = vadd.s32 4294967295, %v926_v47  ;;  %v12210_v55 = vld [vmem:[%s19154_s11 + $0x40] sm:$0xff] }
  0x26   : > { %10790 = vmatpush3.bf16.msra.mxu0 %v11542_v20  ;;  %1328 = vperm.xlu1 %11538, %v1289_v37   ;;  %vm1174_vm2 = vmand %vm12133_vm0, %vm19167_vm14  ;;  %19873 = vst [vmem:[#allocation17_spill] sm:$0xff] %v12189_v51  ;;  %s19876_s0 = sld [smem:[#allocation163_spill]]  ;;  %v19877_v57 = vmov 0  ;;  %v12225_v58 = vadd.s32 4294967295, %v12194_v52  ;;  %v11546_v59 = vld [vmem:[%s19144_s1 + $0x38] sm:$0xff]   ;;  %v989_v60 = vadd.s32 4294967295, %v925_v53 }
  0x27   : > { %10791 = vmatprep.subr.bf16.mxu0 %v11543_v32  ;;  %vm1238_vm5 = vmand %vm1174_vm2, %vm19163_vm13  ;;  %vm1052_vm13 = vcmp.lt.s32.totalorder %v988_v41, 8  ;;  %19874 = vst [vmem:[#allocation18_spill] sm:$0xff] %v12194_v52  ;;  %v928_v61 = vld [vmem:[%s19153_s10 + $0x58] sm:$0xff]  ;;  %v19881_v0 = vmov 0  ;;  %v12249_v2 = vadd.s32 4294967295, %v12210_v55  ;;  %v927_v6 = vld [vmem:[%s19153_s10 + $0x50] sm:$0xff] }
  0x28   : > { %v1287_v42 = vsel %vm1238_vm5, 1, %v19214_v1  ;;  %vm12158_vm1 = vmand %vm1018_vm9, %vm1050_vm3  ;;  %vm19166_vm5 = vcmp.ge.s32.totalorder %v12123_v34, 0  ;;  %vm19165_vm9 = vcmp.lt.s32.totalorder %v12123_v34, 8  ;;  %19875 = vst [vmem:[#allocation19_spill] sm:$0xff] %v12210_v55  ;;  %v12254_v3 = vld [vmem:[%s19154_s11 + $0x58] sm:$0xff]  ;;  %v992_v5 = vadd.s32 4294967295, %v928_v61 }
  0x29   : > { %v19867_v43 = vsel %vm12158_vm1, 4294967295, %v19866_v43  ;;  %1322 = vperm.xlu0 %11537, %v1287_v42   ;;  %vm1178_vm2 = vmand %vm12158_vm1, %vm19161_vm12  ;;  %19880 = vst [vmem:[#allocation21_spill] sm:$0xff] %v12225_v58  ;;  %v19887_v9 = vmov 0  ;;  %v12275_v11 = vadd.s32 4294967295, %v12254_v3  ;;  %v12280_v12 = vld [vmem:[%s19154_s11 + $0x50] sm:$0xff]  ;;  %v991_v13 = vadd.s32 4294967295, %v927_v6 }
  0x2a   : > { %19868 = vst [vmem:[#allocation14_spill] sm:$0xff] %v19867_v43  ;;  %10792 = vmatpush3.bf16.msra.mxu0 %v11543_v32  ;;  %vm1242_vm3 = vmand %vm1178_vm2, %vm19164_vm8  ;;  %vm1019_vm8 = vcmp.ge.s32.totalorder %v987_v46, 0  ;;  %v930_v14 = vld [vmem:[%s19153_s10 + $0x68] sm:$0xff]  ;;  %v19893_v17 = vmov 0  ;;  %v12299_v19 = vadd.s32 4294967295, %v12280_v12  ;;  %v929_v21 = vld [vmem:[%s19153_s10 + $0x60] sm:$0xff] }
  0x2b   : > { %10793 = vmatprep.subr.bf16.mxu0 %v11544_v40  ;;  %v1291_v49 = vsel %vm1242_vm3, 1, %v19214_v1  ;;  %vm12185_vm12 = vmand %vm1017_vm15, %vm1049_vm10  ;;  %vm19168_vm10 = vcmp.ge.s32.totalorder %v12162_v44, 0  ;;  %vm19169_vm3 = vcmp.lt.s32.totalorder %v12162_v44, 8  ;;  %19884 = vst [vmem:[#allocation23_spill] sm:$0xff] %v12249_v2  ;;  %v12304_v20 = vld [vmem:[%s19154_s11 + $0x68] sm:$0xff]  ;;  %v994_v22 = vadd.s32 4294967295, %v930_v14 }
  0x2c   : > { %v19871_v50 = vsel %vm12185_vm12, 4294967295, %v19870_v50  ;;  %1334 = vperm.xlu1 %11538, %v1291_v49   ;;  %vm1177_vm2 = vmand %vm12185_vm12, %vm19166_vm5  ;;  %s12215_s16 = scalar_lea.vmem %s19876_s0, %s10429_s15  ;;  %vm19172_vm5 = vcmp.lt.s32.totalorder %v12189_v51, 8  ;;  %19885 = vst [vmem:[#allocation24_spill] sm:$0xff] %v12254_v3  ;;  %v19899_v28 = vmov 0  ;;  %v12326_v29 = vadd.s32 4294967295, %v12304_v20  ;;  %v12331_v32 = vld [vmem:[%s19154_s11 + $0x60] sm:$0xff] }
  0x2d   : > { %19872 = vst [vmem:[#allocation16_spill] sm:$0xff] %v19871_v50  ;;  %vm1241_vm15 = vmand %vm1177_vm2, %vm19165_vm9  ;;  %vm1051_vm9 = vcmp.lt.s32.totalorder %v987_v46, 8  ;;  %v421_v62 = vld [vmem:[%s12215_s16] sm:$0xff]   ;;  %v423_v4 = vld [vmem:[%s12215_s16 + $0x8] sm:$0xff]   ;;  %v993_v33 = vadd.s32 4294967295, %v929_v21  ;;  %v19905_v37 = vmov 0 }
  0x2e   : > { %10794 = vmatpush3.bf16.msra.mxu0 %v11544_v40  ;;  %v1290_v56 = vsel %vm1241_vm15, 1, %v19214_v1  ;;  %vm12220_vm2 = vmand %vm1020_vm7, %vm1052_vm13  ;;  %vm1054_vm7 = vcmp.lt.s32.totalorder %v990_v54, 8  ;;  %19890 = vst [vmem:[#allocation26_spill] sm:$0xff] %v12275_v11  ;;  %10799 = vmatprep.mubr.bf16.mxu0 %v421_v62  ;;  %v425_v25 = vld [vmem:[%s12215_s16 + $0x10] sm:$0xff]   ;;  %v427_v26 = vld [vmem:[%s12215_s16 + $0x18] sm:$0xff]   ;;  %vm1026_vm12 = vcmp.ge.s32.totalorder %v994_v22, 0 }
  0x2f   : > { %v19878_v57 = vsel %vm12220_vm2, 4294967295, %v19877_v57  ;;  %10795 = vmatprep.subr.bf16.mxu0 %v11545_v48  ;;  %1331 = vperm.xlu0 %11537, %v1290_v56   ;;  %vm1180_vm15 = vmand %vm12220_vm2, %vm19168_vm10  ;;  %vm1022_vm10 = vcmp.ge.s32.totalorder %v990_v54, 0  ;;  %19891 = vst [vmem:[#allocation27_spill] sm:$0xff] %v12280_v12  ;;  %v932_v35 = vld [vmem:[%s19153_s10 + $0x78] sm:$0xff]  ;;  %v12350_v39 = vadd.s32 4294967295, %v12331_v32  ;;  %v931_v42 = vld [vmem:[%s19153_s10 + $0x70] sm:$0xff] }
  0x30   : > { %19879 = vst [vmem:[#allocation20_spill] sm:$0xff] %v19878_v57  ;;  %vm1244_vm13 = vmand %vm1180_vm15, %vm19169_vm3  ;;  %vm19886_vm15 = vcmp.ge.s32.totalorder %v12189_v51, 0  ;;  %vm19175_vm3 = vcmp.lt.s32.totalorder %v12225_v58, 8  ;;  %v12355_v40 = vld [vmem:[%s19154_s11 + $0x78] sm:$0xff]  ;;  %v996_v41 = vadd.s32 4294967295, %v932_v35  ;;  %v19910_v46 = vmov 0 }
  0x31   : > { %v1293_v63 = vsel %vm1244_vm13, 1, %v19214_v1  ;;  %vm12244_vm14 = vmand %vm1019_vm8, %vm1051_vm9  ;;  %vm1053_vm9 = vcmp.lt.s32.totalorder %v989_v60, 8  ;;  %19896 = vst [vmem:[#allocation29_spill] sm:$0xff] %v12299_v19  ;;  %v12374_v47 = vadd.s32 4294967295, %v12355_v40  ;;  %v429_v49 = vld [vmem:[%s12215_s16 + $0x20] sm:$0xff]   ;;  %v995_v53 = vadd.s32 4294967295, %v931_v42 }
  0x32   : > { %v19882_v0 = vsel %vm12244_vm14, 4294967295, %v19881_v0  ;;  %10796 = vmatpush3.bf16.msra.mxu0 %v11545_v48  ;;  %1340 = vperm.xlu1 %11538, %v1293_v63   ;;  %vm1179_vm8 = vmand %vm12244_vm14, %vm19886_vm15  ;;  %vm1021_vm15 = vcmp.ge.s32.totalorder %v989_v60, 0  ;;  %19897 = vst [vmem:[#allocation30_spill] sm:$0xff] %v12304_v20  ;;  %v12379_v48 = vld [vmem:[%s19154_s11 + $0x70] sm:$0xff]  ;;  %v934_v54 = vld [vmem:[%s19153_s10 + $0x88] sm:$0xff]  ;;  %v19916_v60 = vmov 0 }
  0x33   : > { %19883 = vst [vmem:[#allocation22_spill] sm:$0xff] %v19882_v0  ;;  %10797 = vmatprep.subr.bf16.mxu0 %v11546_v59  ;;  %vm1243_vm13 = vmand %vm1179_vm8, %vm19172_vm5  ;;  %vm19892_vm8 = vcmp.ge.s32.totalorder %v12225_v58, 0  ;;  %vm19178_vm5 = vcmp.lt.s32.totalorder %v12249_v2, 8  ;;  %v431_v56 = vld [vmem:[%s12215_s16 + $0x28] sm:$0xff]   ;;  %v12401_v61 = vadd.s32 4294967295, %v12379_v48  ;;  %v933_v63 = vld [vmem:[%s19153_s10 + $0x80] sm:$0xff] }
  0x34   : > { %v1292_v8 = vsel %vm1243_vm13, 1, %v19214_v1  ;;  %vm12270_vm2 = vmand %vm1022_vm10, %vm1054_vm7  ;;  %vm1056_vm7 = vcmp.lt.s32.totalorder %v992_v5, 8  ;;  %19902 = vst [vmem:[#allocation32_spill] sm:$0xff] %v12326_v29  ;;  %v12406_v62 = vld [vmem:[%s19154_s11 + $0x88] sm:$0xff]  ;;  %v19922_v6 = vmov 0  ;;  %v997_v14 = vadd.s32 4294967295, %v933_v63 }
  0x35   : > { %v19888_v9 = vsel %vm12270_vm2, 4294967295, %v19887_v9  ;;  %1337 = vperm.xlu0 %11537, %v1292_v8   ;;  %vm1182_vm10 = vmand %vm12270_vm2, %vm19892_vm8  ;;  %vm1024_vm8 = vcmp.ge.s32.totalorder %v992_v5, 0  ;;  %19903 = vst [vmem:[#allocation33_spill] sm:$0xff] %v12331_v32  ;;  %v12425_v8 = vadd.s32 4294967295, %v12406_v62  ;;  %v433_v21 = vld [vmem:[%s12215_s16 + $0x30] sm:$0xff]   ;;  %v938_v42 = vld [vmem:[%s19153_s10 + $0xa8] sm:$0xff] }
  0x36   : > { %19889 = vst [vmem:[#allocation25_spill] sm:$0xff] %v19888_v9  ;;  %10798 = vmatpush3.bf16.msra.mxu0 %v11546_v59  ;;  %vm1246_vm13 = vmand %vm1182_vm10, %vm19175_vm3  ;;  %vm19898_vm10 = vcmp.ge.s32.totalorder %v12249_v2, 0  ;;  %vm19183_vm3 = vcmp.lt.s32.totalorder %v12275_v11, 8  ;;  %v935_v35 = vld [vmem:[%s19153_s10 + $0x90] sm:$0xff]  ;;  %v19963_v44 = vmov 0  ;;  %v443_v31 = vld [vmem:[%s12215_s16 + $0x58] sm:$0xff]  }
  0x37   : > { %v1295_v16 = vsel %vm1246_vm13, 1, %v19214_v1  ;;  %vm12294_vm14 = vmand %vm1021_vm15, %vm1053_vm9  ;;  %vm1055_vm9 = vcmp.lt.s32.totalorder %v991_v13, 8  ;;  %19908 = vst [vmem:[#allocation35_spill] sm:$0xff] %v12350_v39  ;;  %v939_v51 = vld [vmem:[%s19153_s10 + $0xb0] sm:$0xff]  ;;  %v445_v7 = vld [vmem:[%s12215_s16 + $0x60] sm:$0xff]   ;;  %v19971_v10 = vmov 0 }
  0x38   : > { %v19894_v17 = vsel %vm12294_vm14, 4294967295, %v19893_v17  ;;  %1346 = vperm.xlu1 %11538, %v1295_v16   ;;  %vm1181_vm13 = vmand %vm12294_vm14, %vm19898_vm10  ;;  %vm1023_vm10 = vcmp.ge.s32.totalorder %v991_v13, 0  ;;  %19909 = vst [vmem:[#allocation36_spill] sm:$0xff] %v12355_v40  ;;  %v12430_v13 = vld [vmem:[%s19154_s11 + $0x80] sm:$0xff]  ;;  %v936_v16 = vld [vmem:[%s19153_s10 + $0x98] sm:$0xff]  ;;  %v19978_v24 = vmov 0 }
  0x39   : > { %19895 = vst [vmem:[#allocation28_spill] sm:$0xff] %v19894_v17  ;;  %10800 = vmatmul.mubr.bf16.vlgmr.msra.gmra.mrb[0].mxu0 %v423_v4  ;;  %vm1245_vm15 = vmand %vm1181_vm13, %vm19178_vm5  ;;  %vm19904_vm13 = vcmp.ge.s32.totalorder %v12275_v11, 0  ;;  %vm19185_vm5 = vcmp.lt.s32.totalorder %v12299_v19, 8  ;;  %v998_v4 = vadd.s32 4294967295, %v934_v54  ;;  %v12496_v54 = vld [vmem:[%s19154_s11 + $0xa8] sm:$0xff]  ;;  %v451_v11 = vld [vmem:[%s12215_s16 + $0x78] sm:$0xff]  }
  0x3a   : > { %v1294_v27 = vsel %vm1245_vm15, 1, %v19214_v1  ;;  %vm12321_vm2 = vmand %vm1024_vm8, %vm1056_vm7  ;;  %vm19184_vm7 = vcmp.ge.s32.totalorder %v12299_v19, 0  ;;  %10803 = vmatprep.mubr.bf16.mxu0 %v425_v25  ;;  %19913 = vst [vmem:[#allocation38_spill] sm:$0xff] %v12374_v47  ;;  %v19927_v25 = vmov 0  ;;  %v20002_v19 = vmov 0  ;;  %v11628_v38 = vld [vmem:[%s19153_s10 + $0x68] sm:$0xff] }
  0x3b   : > { %v19900_v28 = vsel %vm12321_vm2, 4294967295, %v19899_v28  ;;  %1343 = vperm.xlu0 %11537, %v1294_v27   ;;  %vm1184_vm15 = vmand %vm12321_vm2, %vm19904_vm13  ;;  %vm1058_vm13 = vcmp.lt.s32.totalorder %v994_v22, 8  ;;  %19914 = vst [vmem:[#allocation39_spill] sm:$0xff] %v12379_v48  ;;  %v12456_v27 = vld [vmem:[%s19154_s11 + $0x98] sm:$0xff]  ;;  %v11629_v23 = vld [vmem:[%s19153_s10 + $0x60] sm:$0xff]  ;;  %s407_s15 = sand.u32 1, %s11882_s22  }
  0x3c   : > { %19901 = vst [vmem:[#allocation31_spill] sm:$0xff] %v19900_v28  ;;  %vm1248_vm8 = vmand %vm1184_vm15, %vm19183_vm3  ;;  %s9947_s17 = sshll.u32 %s407_s15, 7 }
  0x3d   : > { %v1297_v36 = vsel %vm1248_vm8, 1, %v19214_v1  ;;  %vm12345_vm14 = vmand %vm1023_vm10, %vm1055_vm9  ;;  %vm19188_vm8 = vcmp.lt.s32.totalorder %v12326_v29, 8  ;;  %vm1057_vm9 = vcmp.lt.s32.totalorder %v993_v33, 8  ;;  %19919 = vst [vmem:[#allocation41_spill] sm:$0xff] %v12401_v61  ;;  %s19003_s18 = scalar_lea.vmem [#allocation3], %s9947_s17  ;;  %s11893_s17 = smov [#allocation3]  }
  0x3e   : > { %v19906_v37 = vsel %vm12345_vm14, 4294967295, %v19905_v37  ;;  %1352 = vperm.xlu1 %11538, %v1297_v36   ;;  %vm1183_vm15 = vmand %vm12345_vm14, %vm19184_vm7  ;;  %vm1025_vm7 = vcmp.ge.s32.totalorder %v993_v33, 0  ;;  %19920 = vst [vmem:[#allocation42_spill] sm:$0xff] %v12406_v62  ;;  %v435_v33 = vld [vmem:[%s12215_s16 + $0x38] sm:$0xff]   ;;  %v12471_v36 = vld [vmem:[%s19154_s11 + $0x90] sm:$0xff]  ;;  %s9881_s26 = sshll.u32 %s19003_s18, 4  ;;  %s19096_s26 = int_to_ptr.vmem [resolvable:$true] %s9881_s26 }
  0x3f   : > { %19907 = vst [vmem:[#allocation34_spill] sm:$0xff] %v19906_v37  ;;  %vm1247_vm10 = vmand %vm1183_vm15, %vm19185_vm5  ;;  %vm19915_vm15 = vcmp.ge.s32.totalorder %v12326_v29, 0  ;;  %vm19193_vm5 = vcmp.lt.s32.totalorder %v12350_v39, 8  ;;  %v20030_v29 = vmov 0  ;;  %s11828_s19 = scalar_lea.vmem %s19096_s26, 2048  ;;  %s11832_s28 = sshll.u32 %s11893_s17, 4  ;;  %s11833_s28 = int_to_ptr.vmem [resolvable:$false] %s11832_s28 }
  0x40   : > { %v1296_v45 = vsel %vm1247_vm10, 1, %v19214_v1  ;;  %vm12369_vm3 = vmand %vm1026_vm12, %vm1058_vm13  ;;  %vm1060_vm13 = vcmp.lt.s32.totalorder %v996_v41, 8  ;;  %19925 = vst [vmem:[#allocation44_spill] sm:$0xff] %v12425_v8  ;;  %p11829_p11 = scmp.ne.s32.totalorder %s19096_s26, %s11828_s19  ;;  %p11835_p0 = scmp.lt.s32.totalorder %s19096_s26, %s11833_s28 }
  0x41   : > { %v19911_v46 = vsel %vm12369_vm3, 4294967295, %v19910_v46  ;;  %10804 = vmatmul.mubr.bf16.gmra.mrb[4].mxu0 %v427_v26  ;;  %1349 = vperm.xlu0 %11537, %v1296_v45   ;;  %vm1186_vm12 = vmand %vm12369_vm3, %vm19915_vm15  ;;  %vm1028_vm15 = vcmp.ge.s32.totalorder %v996_v41, 0  ;;  %19926 = vst [vmem:[#allocation45_spill] sm:$0xff] %v12430_v13  ;;  %v12451_v26 = vadd.s32 4294967295, %v12430_v13  ;;  %v1000_v41 = vadd.s32 4294967295, %v936_v16  ;;  %v12522_v16 = vld [vmem:[%s19154_s11 + $0xa0] sm:$0xff] }
  0x42   : > { %19912 = vst [vmem:[#allocation37_spill] sm:$0xff] %v19911_v46  ;;  %vm1250_vm10 = vmand %vm1186_vm12, %vm19188_vm8  ;;  %vm19921_vm12 = vcmp.ge.s32.totalorder %v12350_v39, 0  ;;  %vm19195_vm8 = vcmp.lt.s32.totalorder %v12374_v47, 8  ;;  %10807 = vmatprep.mubr.bf16.mxu0 %v429_v49  ;;  %v19936_v49 = vmov 0  ;;  %v20025_v39 = vmov 0  ;;  %p11830_p12 = pnand %p11829_p11, %p11999_p5 }
  0x43   : > { %v1299_v59 = vsel %vm1250_vm10, 1, %v19214_v1  ;;  %vm12396_vm14 = vmand %vm1025_vm7, %vm1057_vm9  ;;  %vm19194_vm7 = vcmp.ge.s32.totalorder %v12374_v47, 0  ;;  %19930 = vst [vmem:[#allocation47_spill] sm:$0xff] %v12451_v26  ;;  %v20009_v47 = vmov 0 }
  0x44   : > { %v19917_v60 = vsel %vm12396_vm14, 4294967295, %v19916_v60  ;;  %1358 = vperm.xlu1 %11538, %v1299_v59   ;;  %vm1185_vm10 = vmand %vm12396_vm14, %vm19921_vm12  ;;  %vm1027_vm12 = vcmp.ge.s32.totalorder %v995_v53, 0  ;;  %vm1059_vm14 = vcmp.lt.s32.totalorder %v995_v53, 8  ;;  %19931 = vst [vmem:[#allocation48_spill] sm:$0xff] %v12456_v27  ;;  %v12486_v53 = vadd.s32 4294967295, %v12456_v27  ;;  %v937_v59 = vld [vmem:[%s19153_s10 + $0xa0] sm:$0xff]  ;;  %p11831_p13 = pneg %p11830_p12 }
  0x45   : > { %19918 = vst [vmem:[#allocation40_spill] sm:$0xff] %v19917_v60  ;;  %vm1249_vm9 = vmand %vm1185_vm10, %vm19193_vm5  ;;  %v1001_v2 = vadd.s32 4294967295, %v937_v59  ;;  %v12562_v59 = vadd.s32 4294967295, %v12522_v16 }
  0x46   : > { %v1298_v5 = vsel %vm1249_vm9, 1, %v19214_v1  ;;  %vm12420_vm3 = vmand %vm1028_vm15, %vm1060_vm13  ;;  %vm19196_vm9 = vcmp.lt.s32.totalorder %v12401_v61, 8  ;;  %19933 = vst [vmem:[#allocation49_spill] sm:$0xff] %v12471_v36  ;;  %vm1061_vm15 = vcmp.lt.s32.totalorder %v997_v14, 8 }
  0x47   : > { %v19923_v6 = vsel %vm12420_vm3, 4294967295, %v19922_v6  ;;  %1355 = vperm.xlu0 %11537, %v1298_v5   ;;  %vm1188_vm13 = vmand %vm12420_vm3, %vm19194_vm7  ;;  %19939 = vst [vmem:[#allocation51_spill] sm:$0xff] %v12486_v53  ;;  %v12512_v5 = vadd.s32 4294967295, %v12471_v36 }
  0x48   : > { %19924 = vst [vmem:[#allocation43_spill] sm:$0xff] %v19923_v6  ;;  %vm1252_vm10 = vmand %vm1188_vm13, %vm19195_vm8  ;;  %vm19932_vm13 = vcmp.ge.s32.totalorder %v12401_v61, 0 }
  0x49   : > { %10808 = vmatmul.mubr.bf16.gmra.mrb[8].mxu0 %v431_v56  ;;  %v1301_v22 = vsel %vm1252_vm10, 1, %v19214_v1  ;;  %vm12446_vm5 = vmand %vm1027_vm12, %vm1059_vm14  ;;  %vm19935_vm10 = vcmp.ge.s32.totalorder %v998_v4, 0  ;;  %19941 = vst [vmem:[#allocation52_spill] sm:$0xff] %v12496_v54  ;;  %v999_v56 = vadd.s32 4294967295, %v935_v35  ;;  %v12532_v35 = vadd.s32 4294967295, %v12496_v54 }
  0x4a   : > { %v19928_v25 = vsel %vm12446_vm5, 4294967295, %v19927_v25  ;;  %1364 = vperm.xlu1 %11538, %v1301_v22   ;;  %vm1187_vm14 = vmand %vm12446_vm5, %vm19932_vm13  ;;  %vm19934_vm13 = vcmp.lt.s32.totalorder %v998_v4, 8  ;;  %10811 = vmatprep.mubr.bf16.mxu0 %v433_v21  ;;  %v19944_v4 = vmov 0  ;;  %vm1064_vm5 = vcmp.lt.s32.totalorder %v1000_v41, 8  ;;  %19947 = vst [vmem:[#allocation54_spill] sm:$0xff] %v12512_v5  ;;  %v940_v21 = vld [vmem:[%s19153_s10 + $0xb8] sm:$0xff] }
  0x4b   : > { %19929 = vst [vmem:[#allocation46_spill] sm:$0xff] %v19928_v25  ;;  %vm1251_vm8 = vmand %vm1187_vm14, %vm19196_vm9  ;;  %vm19940_vm14 = vcmp.ge.s32.totalorder %v12425_v8, 0  ;;  %v437_v22 = vld [vmem:[%s12215_s16 + $0x40] sm:$0xff]   ;;  %v1004_v58 = vadd.s32 4294967295, %v940_v21  ;;  %v942_v21 = vld [vmem:[%s19153_s10 + $0xc8] sm:$0xff] }
  0x4c   : > { %v1300_v45 = vsel %vm1251_vm8, 1, %v19214_v1  ;;  %vm12481_vm12 = vmand %vm19935_vm10, %vm19934_vm13  ;;  %vm19942_vm8 = vcmp.lt.s32.totalorder %v12425_v8, 8  ;;  %vm19203_vm13 = vcmp.lt.s32.totalorder %v12451_v26, 8  ;;  %19949 = vst [vmem:[#allocation55_spill] sm:$0xff] %v12522_v16 }
  0x4d   : > { %v19937_v49 = vsel %vm12481_vm12, 4294967295, %v19936_v49  ;;  %1361 = vperm.xlu0 %11537, %v1300_v45   ;;  %vm1190_vm9 = vmand %vm12481_vm12, %vm19940_vm14  ;;  %vm19943_vm14 = vcmp.ge.s32.totalorder %v997_v14, 0  ;;  %vm1032_vm12 = vcmp.ge.s32.totalorder %v1000_v41, 0  ;;  %v1002_v14 = vadd.s32 4294967295, %v938_v42  ;;  %19950 = vst [vmem:[#allocation56_spill] sm:$0xff] %v12532_v35  ;;  %v439_v42 = vld [vmem:[%s12215_s16 + $0x48] sm:$0xff]  }
  0x4e   : > { %19938 = vst [vmem:[#allocation50_spill] sm:$0xff] %v19937_v49  ;;  %vm1254_vm10 = vmand %vm1190_vm9, %vm19942_vm8  ;;  %vm19948_vm9 = vcmp.ge.s32.totalorder %v12451_v26, 0  ;;  %v12551_v41 = vld [vmem:[%s19154_s11 + $0xb8] sm:$0xff] }
  0x4f   : > { %v1303_v63 = vsel %vm1254_vm10, 1, %v19214_v1  ;;  %vm12507_vm7 = vmand %vm19943_vm14, %vm1061_vm15  ;;  %vm1031_vm10 = vcmp.ge.s32.totalorder %v999_v56, 0  ;;  %vm19216_vm14 = vcmp.ge.s32.totalorder %v12512_v5, 0  ;;  %19955 = vst [vmem:[#allocation58_spill] sm:$0xff] %v12551_v41  ;;  %vm1034_vm3 = vcmp.ge.s32.totalorder %v1002_v14, 0 }
  0x50   : > { %v19945_v4 = vsel %vm12507_vm7, 4294967295, %v19944_v4  ;;  %1370 = vperm.xlu1 %11538, %v1303_v63   ;;  %vm1189_vm8 = vmand %vm12507_vm7, %vm19948_vm9  ;;  %v19951_v63 = vmov 0  ;;  %vm1063_vm7 = vcmp.lt.s32.totalorder %v999_v56, 8  ;;  %19960 = vst [vmem:[#allocation60_spill] sm:$0xff] %v12562_v59  ;;  %v12590_v34 = vadd.s32 4294967295, %v12551_v41 }
  0x51   : > { %19946 = vst [vmem:[#allocation53_spill] sm:$0xff] %v19945_v4  ;;  %10812 = vmatmul.mubr.bf16.gmra.mrb[12].mxu0 %v435_v33  ;;  %vm1253_vm15 = vmand %vm1189_vm8, %vm19203_vm13  ;;  %v441_v33 = vld [vmem:[%s12215_s16 + $0x50] sm:$0xff]   ;;  %vm19954_vm8 = vcmp.ge.s32.totalorder %v12486_v53, 0 }
  0x52   : > { %v1302_v45 = vsel %vm1253_vm15, 1, %v19214_v1  ;;  %vm12538_vm9 = vmand %vm1032_vm12, %vm1064_vm5  ;;  %vm19956_vm5 = vcmp.lt.s32.totalorder %v12486_v53, 8  ;;  %vm19223_vm15 = vcmp.lt.s32.totalorder %v12512_v5, 8  ;;  %10815 = vmatprep.mubr.bf16.mxu0 %v437_v22  ;;  %v19962_v22 = vmov 0   ;;  %19966 = vst [vmem:[#allocation63_spill] sm:$0xff] %v12590_v34  ;;  %v447_v5 = vld [vmem:[%s12215_s16 + $0x68] sm:$0xff]  }
  0x53   : > { %v19952_v63 = vsel %vm12538_vm9, 4294967295, %v19951_v63  ;;  %1367 = vperm.xlu0 %11537, %v1302_v45   ;;  %vm1192_vm13 = vmand %vm12538_vm9, %vm19954_vm8  ;;  %v19957_v45 = vmov 0  ;;  %vm1066_vm8 = vcmp.lt.s32.totalorder %v1002_v14, 8  ;;  %v12602_v14 = vld [vmem:[%s19154_s11 + $0xc8] sm:$0xff]  ;;  %v19986_v53 = vmov 0 }
  0x54   : > { %19953 = vst [vmem:[#allocation57_spill] sm:$0xff] %v19952_v63  ;;  %vm1256_vm12 = vmand %vm1192_vm13, %vm19956_vm5  ;;  %vm19230_vm5 = vcmp.lt.s32.totalorder %v12532_v35, 8  ;;  %vm1068_vm13 = vcmp.lt.s32.totalorder %v1004_v58, 8 }
  0x55   : > { %v1305_v56 = vsel %vm1256_vm12, 1, %v19214_v1  ;;  %vm12557_vm2 = vmand %vm1031_vm10, %vm1063_vm7  ;;  %v12575_v1 = vld [vmem:[%s19154_s11 + $0xb0] sm:$0xff]  ;;  %vm19237_vm12 = vcmp.ge.s32.totalorder %v12562_v59, 0  ;;  %19968 = vst [vmem:[#allocation64_spill] sm:$0xff] %v12602_v14 }
  0x56   : > { %v19958_v45 = vsel %vm12557_vm2, 4294967295, %v19957_v45  ;;  %1376 = vperm.xlu1 %11538, %v1305_v56   ;;  %vm1191_vm7 = vmand %vm12557_vm2, %vm19216_vm14  ;;  %19961 = vst [vmem:[#allocation61_spill] sm:$0xff] %v12575_v1 }
  0x57   : > { %19959 = vst [vmem:[#allocation59_spill] sm:$0xff] %v19958_v45  ;;  %vm1255_vm10 = vmand %vm1191_vm7, %vm19223_vm15  ;;  %vm19967_vm7 = vcmp.ge.s32.totalorder %v12532_v35, 0  ;;  %v944_v35 = vld [vmem:[%s19153_s10 + $0xd8] sm:$0xff] }
  0x58   : > { %v1304_v56 = vsel %vm1255_vm10, 1, %v19962_v22  ;;  %vm12585_vm14 = vmand %vm1034_vm3, %vm1066_vm8  ;;  %vm19970_vm3 = vcmp.ge.s32.totalorder %v1001_v2, 0 }
  0x59   : > { %v19964_v44 = vsel %vm12585_vm14, 4294967295, %v19963_v44  ;;  %10816 = vmatmul.mubr.bf16.gmra.mrb[16].mxu0 %v439_v42  ;;  %1373 = vperm.xlu0 %11537, %v1304_v56   ;;  %vm1194_vm15 = vmand %vm12585_vm14, %vm19967_vm7  ;;  %v1003_v42 = vadd.s32 4294967295, %v939_v51  ;;  %v941_v56 = vld [vmem:[%s19153_s10 + $0xc0] sm:$0xff]  ;;  %vm19969_vm7 = vcmp.lt.s32.totalorder %v1001_v2, 8  ;;  %v1006_v51 = vadd.s32 4294967295, %v942_v21 }
  0x5a   : > { %19965 = vst [vmem:[#allocation62_spill] sm:$0xff] %v19964_v44  ;;  %10819 = vmatprep.mubr.bf16.mxu0 %v441_v33  ;;  %vm1258_vm8 = vmand %vm1194_vm15, %vm19230_vm5  ;;  %v12618_v33 = vadd.s32 4294967295, %v12575_v1  ;;  %v12628_v2 = vld [vmem:[%s19154_s11 + $0xc0] sm:$0xff]  ;;  %vm19977_vm14 = vcmp.ge.s32.totalorder %v1004_v58, 0  ;;  %v12640_v21 = vadd.s32 4294967295, %v12602_v14  ;;  %v1005_v58 = vadd.s32 4294967295, %v941_v56 }
  0x5b   : > { %v1307_v18 = vsel %vm1258_vm8, 1, %v19962_v22  ;;  %vm12613_vm10 = vmand %vm19970_vm3, %vm19969_vm7  ;;  %19975 = vst [vmem:[#allocation67_spill] sm:$0xff] %v12628_v2  ;;  %vm19976_vm3 = vcmp.lt.s32.totalorder %v12562_v59, 8  ;;  %vm19248_vm7 = vcmp.lt.s32.totalorder %v12590_v34, 8  ;;  %v12654_v59 = vld [vmem:[%s19154_s11 + $0xd8] sm:$0xff]  ;;  %vm1070_vm5 = vcmp.lt.s32.totalorder %v1006_v51, 8 }
  0x5c   : > { %v19972_v10 = vsel %vm12613_vm10, 4294967295, %v19971_v10  ;;  %19974 = vst [vmem:[#allocation66_spill] sm:$0xff] %v12618_v33  ;;  %1382 = vperm.xlu1 %11538, %v1307_v18   ;;  %vm1193_vm15 = vmand %vm12613_vm10, %vm19237_vm12  ;;  %v12667_v56 = vadd.s32 4294967295, %v12628_v2  ;;  %vm19993_vm10 = vcmp.ge.s32.totalorder %v1006_v51, 0  ;;  %v12706_v51 = vld [vmem:[%s19153_s10 + $0xe8] sm:$0xff] }
  0x5d   : > { %19973 = vst [vmem:[#allocation65_spill] sm:$0xff] %v19972_v10  ;;  %vm1257_vm8 = vmand %vm1193_vm15, %vm19976_vm3  ;;  %vm19982_vm15 = vcmp.ge.s32.totalorder %v12590_v34, 0  ;;  %v19994_v34 = vmov 0 }
  0x5e   : > { %v1306_v18 = vsel %vm1257_vm8, 1, %v19962_v22  ;;  %vm12635_vm2 = vmand %vm19977_vm14, %vm1068_vm13  ;;  %19981 = vst [vmem:[#allocation69_spill] sm:$0xff] %v12640_v21  ;;  %vm19985_vm14 = vcmp.ge.s32.totalorder %v1003_v42, 0  ;;  %vm19990_vm13 = vcmp.ge.s32.totalorder %v12618_v33, 0 }
  0x5f   : > { %v19979_v24 = vsel %vm12635_vm2, 4294967295, %v19978_v24  ;;  %1379 = vperm.xlu0 %11537, %v1306_v18   ;;  %vm1196_vm3 = vmand %vm12635_vm2, %vm19982_vm15  ;;  %19983 = vst [vmem:[#allocation70_spill] sm:$0xff] %v12654_v59  ;;  %vm19984_vm15 = vcmp.lt.s32.totalorder %v1003_v42, 8  ;;  %v1008_v42 = vadd.s32 4294967295, %v944_v35  ;;  %v12696_v35 = vld [vmem:[%s19154_s11 + $0xd0] sm:$0xff] }
  0x60   : > { %19980 = vst [vmem:[#allocation68_spill] sm:$0xff] %v19979_v24  ;;  %vm1260_vm8 = vmand %vm1196_vm3, %vm19248_vm7  ;;  %vm1069_vm7 = vcmp.lt.s32.totalorder %v1005_v58, 8 }
  0x61   : > { %10820 = vmatmul.mubr.bf16.gmra.mrb[20].mxu0 %v443_v31  ;;  %v1309_v18 = vsel %vm1260_vm8, 1, %v19962_v22  ;;  %vm12662_vm2 = vmand %vm19985_vm14, %vm19984_vm15  ;;  %19989 = vst [vmem:[#allocation72_spill] sm:$0xff] %v12667_v56  ;;  %v449_v31 = vld [vmem:[%s12215_s16 + $0x70] sm:$0xff]   ;;  %vm19991_vm8 = vcmp.lt.s32.totalorder %v12618_v33, 8  ;;  %vm19267_vm14 = vcmp.lt.s32.totalorder %v12640_v21, 8  ;;  %vm1037_vm15 = vcmp.ge.s32.totalorder %v1005_v58, 0 }
  0x62   : > { %v19987_v53 = vsel %vm12662_vm2, 4294967295, %v19986_v53  ;;  %10823 = vmatprep.mubr.bf16.mxu0 %v445_v7  ;;  %1388 = vperm.xlu1 %11538, %v1309_v18   ;;  %vm1195_vm3 = vmand %vm12662_vm2, %vm19990_vm13  ;;  %v12681_v7 = vld [vmem:[%s19153_s10 + $0xd0] sm:$0xff]  ;;  %v12691_v33 = vadd.s32 4294967295, %v12654_v59  ;;  %19998 = vst [vmem:[#allocation76_spill] sm:$0xff] %v12696_v35  ;;  %v12739_v58 = vld [vmem:[%s19154_s11 + $0xe0] sm:$0xff] }
  0x63   : > { %19988 = vst [vmem:[#allocation71_spill] sm:$0xff] %v19987_v53  ;;  %vm1259_vm12 = vmand %vm1195_vm3, %vm19991_vm8  ;;  %vm19999_vm3 = vcmp.ge.s32.totalorder %v12640_v21, 0  ;;  %vm19276_vm8 = vcmp.lt.s32.totalorder %v12667_v56, 8  ;;  %v1007_v26 = vadd.s32 4294967295, %v12681_v7  ;;  %v12724_v21 = vadd.s32 4294967295, %v12696_v35 }
  0x64   : > { %19992 = vst [vmem:[#allocation73_spill] sm:$0xff] %v12681_v7  ;;  %v1308_v18 = vsel %vm1259_vm12, 1, %v19962_v22  ;;  %vm12686_vm13 = vmand %vm19993_vm10, %vm1070_vm5  ;;  %vm1040_vm5 = vcmp.ge.s32.totalorder %v1008_v42, 0  ;;  %v12729_v7 = vld [vmem:[%s19153_s10 + $0xe0] sm:$0xff] }
  0x65   : > { %v19995_v34 = vsel %vm12686_vm13, 4294967295, %v19994_v34  ;;  %19997 = vst [vmem:[#allocation75_spill] sm:$0xff] %v12691_v33  ;;  %1385 = vperm.xlu0 %11537, %v1308_v18   ;;  %vm1198_vm12 = vmand %vm12686_vm13, %vm19999_vm3  ;;  %v12715_v18 = vld [vmem:[%s19154_s11 + $0xe8] sm:$0xff]  ;;  %vm1072_vm13 = vcmp.lt.s32.totalorder %v1008_v42, 8  ;;  %vm20022_vm2 = vcmp.lt.s32.totalorder %v12724_v21, 8 }
  0x66   : > { %19996 = vst [vmem:[#allocation74_spill] sm:$0xff] %v19995_v34  ;;  %20000 = vst [vmem:[#allocation77_spill] sm:$0xff] %v12706_v51 }
  0x67   : > { %vm1262_vm10 = vmand %vm1198_vm12, %vm19267_vm14  ;;  %20001 = vst [vmem:[#allocation78_spill] sm:$0xff] %v12715_v18  ;;  %vm20007_vm12 = vcmp.ge.s32.totalorder %v12667_v56, 0 }
  0x68   : > { %v1311_v8 = vsel %vm1262_vm10, 1, %v19962_v22  ;;  %vm12719_vm3 = vmand %vm1037_vm15, %vm1069_vm7  ;;  %20005 = vst [vmem:[#allocation80_spill] sm:$0xff] %v12724_v21  ;;  %vm1039_vm7 = vcmp.ge.s32.totalorder %v1007_v26, 0 }
  0x69   : > { %v20003_v19 = vsel %vm12719_vm3, 4294967295, %v20002_v19  ;;  %20006 = vst [vmem:[#allocation81_spill] sm:$0xff] %v12729_v7  ;;  %1394 = vperm.xlu1 %11538, %v1311_v8   ;;  %vm1197_vm10 = vmand %vm12719_vm3, %vm20007_vm12  ;;  %10824 = vmatmul.mubr.bf16.gmra.mrb[24].mxu0 %v447_v5  ;;  %v1010_v8 = vadd.s32 4294967295, %v12706_v51  ;;  %vm1071_vm3 = vcmp.lt.s32.totalorder %v1007_v26, 8  ;;  %v12753_v5 = vadd.s32 4294967295, %v12715_v18 }
  0x6a   : > { %20004 = vst [vmem:[#allocation79_spill] sm:$0xff] %v20003_v19  ;;  %20008 = vst [vmem:[#allocation82_spill] sm:$0xff] %v12739_v58  ;;  %10827 = vmatprep.mubr.bf16.mxu0 %v449_v31  ;;  %v12763_v31 = vld [vmem:[%s19153_s10 + $0xf8] sm:$0xff]  ;;  %v1009_v26 = vadd.s32 4294967295, %v12729_v7  ;;  %v20017_v51 = vmov 0 }
  0x6b   : > { %vm1261_vm15 = vmand %vm1197_vm10, %vm19276_vm8  ;;  %20012 = vst [vmem:[#allocation84_spill] sm:$0xff] %v12753_v5  ;;  %vm20013_vm10 = vcmp.ge.s32.totalorder %v12691_v33, 0  ;;  %vm1042_vm14 = vcmp.ge.s32.totalorder %v1010_v8, 0  ;;  %v1012_v7 = vadd.s32 4294967295, %v12763_v31 }
  0x6c   : > { %v1310_v61 = vsel %vm1261_vm15, 1, %v19962_v22  ;;  %vm12748_vm12 = vmand %vm1040_vm5, %vm1072_vm13  ;;  %20014 = vst [vmem:[#allocation85_spill] sm:$0xff] %v12763_v31  ;;  %vm20015_vm13 = vcmp.lt.s32.totalorder %v12691_v33, 8  ;;  %v12780_v33 = vadd.s32 4294967295, %v12739_v58  ;;  %vm19303_vm15 = vcmp.ge.s32.totalorder %v12753_v5, 0 }
  0x6d   : > { %v20010_v47 = vsel %vm12748_vm12, 4294967295, %v20009_v47  ;;  %1391 = vperm.xlu0 %11537, %v1310_v61   ;;  %vm1200_vm8 = vmand %vm12748_vm12, %vm20013_vm10  ;;  %v12772_v61 = vld [vmem:[%s19154_s11 + $0xf8] sm:$0xff]  ;;  %vm1074_vm12 = vcmp.lt.s32.totalorder %v1010_v8, 8  ;;  %v12794_v8 = vld [vmem:[%s19153_s10 + $0xf0] sm:$0xff]  ;;  %vm1044_vm9 = vcmp.ge.s32.totalorder %v1012_v7, 0  ;;  %vm1076_vm1 = vcmp.lt.s32.totalorder %v1012_v7, 8 }
  0x6e   : > { %20011 = vst [vmem:[#allocation83_spill] sm:$0xff] %v20010_v47  ;;  %vm1264_vm5 = vmand %vm1200_vm8, %vm20015_vm13  ;;  %vm20021_vm8 = vcmp.ge.s32.totalorder %v12724_v21, 0  ;;  %v12807_v31 = vadd.s32 4294967295, %v12772_v61  ;;  %v1011_v21 = vadd.s32 4294967295, %v12794_v8  ;;  %v20034_v7 = vmov 0 }
  0x6f   : > { %20016 = vst [vmem:[#allocation86_spill] sm:$0xff] %v12772_v61  ;;  %v1313_v42 = vsel %vm1264_vm5, 1, %v19962_v22  ;;  %vm12775_vm10 = vmand %vm1039_vm7, %vm1071_vm3  ;;  %vm19306_vm3 = vcmp.ge.s32.totalorder %v12780_v33, 0 }
  0x70   : > { %v20018_v51 = vsel %vm12775_vm10, 4294967295, %v20017_v51  ;;  %20020 = vst [vmem:[#allocation88_spill] sm:$0xff] %v12780_v33  ;;  %1400 = vperm.xlu1 %11538, %v1313_v42   ;;  %vm1199_vm13 = vmand %vm12775_vm10, %vm20021_vm8  ;;  %v12799_v42 = vld [vmem:[%s19154_s11 + $0xf0] sm:$0xff]  ;;  %vm1073_vm8 = vcmp.lt.s32.totalorder %v1009_v26, 8 }
  0x71   : > { %20019 = vst [vmem:[#allocation87_spill] sm:$0xff] %v20018_v51  ;;  %vm1263_vm5 = vmand %vm1199_vm13, %vm20022_vm2  ;;  %vm1041_vm2 = vcmp.ge.s32.totalorder %v1009_v26, 0  ;;  %10828 = vmatmul.mubr.bf16.gmra.mrb[28].mxu0 %v451_v11  ;;  %v12824_v11 = vadd.s32 4294967295, %v12799_v42 }
  0x72   : > { %20023 = vst [vmem:[#allocation89_spill] sm:$0xff] %v12794_v8  ;;  %20024 = vst [vmem:[#allocation90_spill] sm:$0xff] %v12799_v42  ;;  %v1312_v56 = vsel %vm1263_vm5, 1, %v19962_v22  ;;  %vm20029_vm5 = vcmp.lt.s32.totalorder %v12753_v5, 8  ;;  %v20037_v8 = vmov 0 }
  0x73   : > { %vm12802_vm7 = vmand %vm1042_vm14, %vm1074_vm12  ;;  %20028 = vst [vmem:[#allocation92_spill] sm:$0xff] %v12807_v31  ;;  %1397 = vperm.xlu0 %11537, %v1312_v56   ;;  %vm19309_vm12 = vcmp.lt.s32.totalorder %v12780_v33, 8 }
  0x74   : > { %v20026_v39 = vsel %vm12802_vm7, 4294967295, %v20025_v39  ;;  %vm1202_vm13 = vmand %vm12802_vm7, %vm19303_vm15  ;;  %20033 = vst [vmem:[#allocation94_spill] sm:$0xff] %v12824_v11  ;;  %vm1043_vm15 = vcmp.ge.s32.totalorder %v1011_v21, 0  ;;  %vm1075_vm7 = vcmp.lt.s32.totalorder %v1011_v21, 8  ;;  %v12855_v21 = vld [vmem:[%s19154_s11 + $0x8] sm:$0xff] }
  0x75   : > { %20027 = vst [vmem:[#allocation91_spill] sm:$0xff] %v20026_v39  ;;  %vm1266_vm14 = vmand %vm1202_vm13, %vm20029_vm5  ;;  %vm19334_vm5 = vcmp.ge.s32.totalorder %v12807_v31, 0 }
  0x76   : > { %v1315_v26 = vsel %vm1266_vm14, 1, %v19962_v22  ;;  %vm12819_vm10 = vmand %vm1041_vm2, %vm1073_vm8  ;;  %vm19330_vm2 = vcmp.lt.s32.totalorder %v12807_v31, 8  ;;  %20040 = vst [vmem:[#allocation97_spill] sm:$0xff] %v12855_v21 }
  0x77   : > { %v20031_v29 = vsel %vm12819_vm10, 4294967295, %v20030_v29  ;;  %1406 = vperm.xlu1 %11538, %v1315_v26   ;;  %vm1201_vm13 = vmand %vm12819_vm10, %vm19306_vm3  ;;  %vm19314_vm10 = vcmp.ge.s32.totalorder %v12824_v11, 0 }
  0x78   : > { %20032 = vst [vmem:[#allocation93_spill] sm:$0xff] %v20031_v29  ;;  %vm1265_vm14 = vmand %vm1201_vm13, %vm19309_vm12  ;;  %vm19315_vm12 = vcmp.lt.s32.totalorder %v12824_v11, 8 }
  0x79   : > { %v1314_v56 = vsel %vm1265_vm14, 1, %v19962_v22  ;;  %vm12835_vm8 = vmand %vm1044_vm9, %vm1076_vm1  ;;  %vm19318_vm9 = vcmp.ge.s32.totalorder %v12855_v21, 0  ;;  %vm19319_vm14 = vcmp.lt.s32.totalorder %v12855_v21, 8 }
  0x7a   : > { %v20035_v7 = vsel %vm12835_vm8, 4294967295, %v20034_v7  ;;  %1403 = vperm.xlu0 %11537, %v1314_v56   ;;  %vm1204_vm3 = vmand %vm12835_vm8, %vm19334_vm5  ;;  %v12868_v56 = vld [vmem:[%s19154_s11] sm:$0xff] }
  0x7b   : > { %20036 = vst [vmem:[#allocation95_spill] sm:$0xff] %v20035_v7  ;;  %vm1268_vm13 = vmand %vm1204_vm3, %vm19330_vm2 }
  0x7c   : > { %v1317_v26 = vsel %vm1268_vm13, 1, %v19962_v22  ;;  %vm12848_vm1 = vmand %vm1043_vm15, %vm1075_vm7  ;;  %20041 = vst [vmem:[#allocation98_spill] sm:$0xff] %v12868_v56  ;;  %vm19322_vm7 = vcmp.ge.s32.totalorder %v12868_v56, 0 }
  0x7d   : > { %v20038_v8 = vsel %vm12848_vm1, 4294967295, %v20037_v8  ;;  %1412 = vperm.xlu1 %11538, %v1317_v26   ;;  %vm1203_vm3 = vmand %vm12848_vm1, %vm19314_vm10  ;;  %vm19323_vm10 = vcmp.lt.s32.totalorder %v12868_v56, 8  ;;  %v12882_v26 = vld [vmem:[%s19154_s11 + $0x18] sm:$0xff] }
  0x7e   : > { %20039 = vst [vmem:[#allocation96_spill] sm:$0xff] %v20038_v8  ;;  %vm1267_vm15 = vmand %vm1203_vm3, %vm19315_vm12  ;;  %vm19326_vm12 = vcmp.ge.s32.totalorder %v12882_v26, 0 }
  0x7f   : > { %v1316_v31 = vsel %vm1267_vm15, 1, %v19962_v22  ;;  %vm1777_vm13 = vmand %vm12133_vm0, %vm19318_vm9  ;;  %20042 = vst [vmem:[#allocation99_spill] sm:$0xff] %v12882_v26  ;;  %vm19327_vm9 = vcmp.lt.s32.totalorder %v12882_v26, 8 }
  0x80   : > { %1409 = vperm.xlu0 %11537, %v1316_v31   ;;  %vm1841_vm3 = vmand %vm1777_vm13, %vm19319_vm14  ;;  %v12896_v31 = vld [vmem:[%s19154_s11 + $0x10] sm:$0xff] }
  0x81   : > { %v1874_v11 = vsel %vm1841_vm3, 1, %v19962_v22  ;;  %vm1776_vm15 = vmand %vm12074_vm11, %vm19322_vm7  ;;  %20043 = vst [vmem:[#allocation100_spill] sm:$0xff] %v12896_v31  ;;  %vm19329_vm14 = vcmp.ge.s32.totalorder %v12896_v31, 0  ;;  %vm19331_vm7 = vcmp.lt.s32.totalorder %v12896_v31, 8 }
  0x82   : > { %1909 = vperm.xlu1 %11538, %v1874_v11   ;;  %vm1840_vm13 = vmand %vm1776_vm15, %vm19323_vm10  ;;  %v12910_v11 = vld [vmem:[%s19154_s11 + $0x28] sm:$0xff] }
  0x83   : > { %v1873_v33 = vsel %vm1840_vm13, 1, %v19962_v22  ;;  %vm1779_vm3 = vmand %vm12106_vm6, %vm19326_vm12  ;;  %20044 = vst [vmem:[#allocation101_spill] sm:$0xff] %v12910_v11  ;;  %vm19333_vm10 = vcmp.ge.s32.totalorder %v12910_v11, 0  ;;  %vm19335_vm12 = vcmp.lt.s32.totalorder %v12910_v11, 8 }
  0x84   : > { %1906 = vperm.xlu0 %11537, %v1873_v33   ;;  %vm1843_vm15 = vmand %vm1779_vm3, %vm19327_vm9  ;;  %v12924_v33 = vld [vmem:[%s19154_s11 + $0x20] sm:$0xff] }
  0x85   : > { %v1876_v5 = vsel %vm1843_vm15, 1, %v19962_v22  ;;  %vm1778_vm13 = vmand %vm12047_vm4, %vm19329_vm14  ;;  %20045 = vst [vmem:[#allocation102_spill] sm:$0xff] %v12924_v33  ;;  %vm19337_vm9 = vcmp.ge.s32.totalorder %v12924_v33, 0  ;;  %vm20046_vm15 = vnez %v19867_v43  ;;  %vm19338_vm2 = vcmp.lt.s32.totalorder %v12924_v33, 8 }
  0x86   : > { %1915 = vperm.xlu1 %11538, %v1876_v5   ;;  %vm1842_vm3 = vmand %vm1778_vm13, %vm19331_vm7  ;;  %v12938_v5 = vld [vmem:[%s19154_s11 + $0x38] sm:$0xff]  ;;  %vm19348_vm4 = vcmp.ge.s32.totalorder %v12254_v3, 0 }
  0x87   : > { %v1875_v30 = vsel %vm1842_vm3, 1, %v19962_v22  ;;  %vm1781_vm14 = vmand %vm20046_vm15, %vm19333_vm10  ;;  %20047 = vst [vmem:[#allocation103_spill] sm:$0xff] %v12938_v5  ;;  %vm19340_vm7 = vcmp.ge.s32.totalorder %v12938_v5, 0  ;;  %vm20048_vm3 = vnez %v19871_v50  ;;  %vm20052_vm15 = vnez %v19882_v0  ;;  %v20115_v0 = vld [vmem:[#allocation44_spill] sm:$0xff] }
  0x88   : > { %1912 = vperm.xlu0 %11537, %v1875_v30   ;;  %vm1845_vm13 = vmand %vm1781_vm14, %vm19335_vm12  ;;  %v12952_v30 = vld [vmem:[%s19154_s11 + $0x30] sm:$0xff]  ;;  %v20118_v50 = vmov 0 }
  0x89   : > { %v1878_v15 = vsel %vm1845_vm13, 1, %v19962_v22  ;;  %vm1780_vm10 = vmand %vm20048_vm3, %vm19337_vm9  ;;  %20049 = vst [vmem:[#allocation104_spill] sm:$0xff] %v12952_v30  ;;  %vm19341_vm12 = vcmp.ge.s32.totalorder %v12952_v30, 0  ;;  %vm20050_vm13 = vnez %v19878_v57  ;;  %vm19343_vm5 = vcmp.lt.s32.totalorder %v12952_v30, 8  ;;  %v12972_v57 = vld [vmem:[%s19154_s11 + $0x48] sm:$0xff] }
  0x8a   : > { %1921 = vperm.xlu1 %11538, %v1878_v15   ;;  %vm1844_vm14 = vmand %vm1780_vm10, %vm19338_vm2  ;;  %vm20051_vm3 = vcmp.lt.s32.totalorder %v12938_v5, 8  ;;  %vm19344_vm2 = vcmp.ge.s32.totalorder %v12194_v52, 0  ;;  %20053 = vst [vmem:[#allocation105_spill] sm:$0xff] %v12972_v57 }
  0x8b   : > { %v1877_v43 = vsel %vm1844_vm14, 1, %v19962_v22  ;;  %vm1783_vm9 = vmand %vm20050_vm13, %vm19340_vm7  ;;  %vm19345_vm7 = vcmp.lt.s32.totalorder %v12972_v57, 8 }
  0x8c   : > { %1918 = vperm.xlu0 %11537, %v1877_v43   ;;  %vm1847_vm10 = vmand %vm1783_vm9, %vm20051_vm3  ;;  %vm19346_vm3 = vcmp.ge.s32.totalorder %v12210_v55, 0 }
  0x8d   : > { %v1880_v15 = vsel %vm1847_vm10, 1, %v19962_v22  ;;  %vm1782_vm14 = vmand %vm20052_vm15, %vm19341_vm12  ;;  %vm20054_vm10 = vnez %v19888_v9  ;;  %vm19347_vm15 = vcmp.lt.s32.totalorder %v12210_v55, 8  ;;  %v11635_v9 = vld [vmem:[%s19153_s10 + $0x80] sm:$0xff] }
  0x8e   : > { %1927 = vperm.xlu1 %11538, %v1880_v15   ;;  %vm1846_vm9 = vmand %vm1782_vm14, %vm19343_vm5  ;;  %vm20055_vm14 = vnez %v19894_v17  ;;  %vm19349_vm5 = vcmp.lt.s32.totalorder %v12254_v3, 8 }
  0x8f   : > { %v1879_v43 = vsel %vm1846_vm9, 1, %v19962_v22  ;;  %vm1785_vm12 = vmand %vm20054_vm10, %vm19344_vm2  ;;  %vm19350_vm10 = vcmp.ge.s32.totalorder %v12280_v12, 0 }
  0x90   : > { %1924 = vperm.xlu0 %11537, %v1879_v43   ;;  %vm1849_vm13 = vmand %vm1785_vm12, %vm19345_vm7  ;;  %vm20056_vm12 = vnez %v19900_v28  ;;  %vm19351_vm7 = vcmp.lt.s32.totalorder %v12280_v12, 8  ;;  %v20109_v28 = vld [vmem:[#allocation29_spill] sm:$0xff] }
  0x91   : > { %v1882_v15 = vsel %vm1849_vm13, 1, %v19962_v22  ;;  %vm1784_vm9 = vmand %vm20055_vm14, %vm19346_vm3  ;;  %vm19352_vm14 = vcmp.ge.s32.totalorder %v12304_v20, 0 }
  0x92   : > { %1933 = vperm.xlu1 %11538, %v1882_v15   ;;  %vm1848_vm2 = vmand %vm1784_vm9, %vm19347_vm15  ;;  %vm20057_vm9 = vnez %v19906_v37  ;;  %vm19353_vm15 = vcmp.lt.s32.totalorder %v12304_v20, 8 }
  0x93   : > { %v1881_v43 = vsel %vm1848_vm2, 1, %v19962_v22  ;;  %vm1787_vm13 = vmand %vm20056_vm12, %vm19348_vm4  ;;  %vm19354_vm12 = vcmp.ge.s32.totalorder %v12331_v32, 0 }
  0x94   : > { %1930 = vperm.xlu0 %11537, %v1881_v43   ;;  %vm1851_vm3 = vmand %vm1787_vm13, %vm19349_vm5  ;;  %vm20058_vm13 = vnez %v19911_v46  ;;  %vm19355_vm5 = vcmp.lt.s32.totalorder %v12331_v32, 8  ;;  %v20104_v46 = vld [vmem:[#allocation26_spill] sm:$0xff] }
  0x95   : > { %v1884_v15 = vsel %vm1851_vm3, 1, %v19962_v22  ;;  %vm1786_vm2 = vmand %vm20057_vm9, %vm19350_vm10  ;;  %vm19356_vm9 = vcmp.ge.s32.totalorder %v12355_v40, 0 }
  0x96   : > { %1939 = vperm.xlu1 %11538, %v1884_v15   ;;  %vm1850_vm4 = vmand %vm1786_vm2, %vm19351_vm7  ;;  %vm20059_vm2 = vnez %v19917_v60  ;;  %vm19357_vm7 = vcmp.lt.s32.totalorder %v12355_v40, 8  ;;  %v11634_v60 = vld [vmem:[%s19153_s10 + $0x88] sm:$0xff] }
  0x97   : > { %v1883_v43 = vsel %vm1850_vm4, 1, %v19962_v22  ;;  %vm1789_vm3 = vmand %vm20058_vm13, %vm19352_vm14  ;;  %vm19358_vm13 = vcmp.ge.s32.totalorder %v12379_v48, 0 }
  0x98   : > { %1936 = vperm.xlu0 %11537, %v1883_v43   ;;  %vm1853_vm10 = vmand %vm1789_vm3, %vm19353_vm15  ;;  %vm20060_vm3 = vnez %v19923_v6  ;;  %vm19359_vm15 = vcmp.lt.s32.totalorder %v12379_v48, 8 }
  0x99   : > { %v1886_v15 = vsel %vm1853_vm10, 1, %v19962_v22  ;;  %vm1788_vm4 = vmand %vm20059_vm2, %vm19354_vm12  ;;  %vm19360_vm2 = vcmp.ge.s32.totalorder %v12406_v62, 0 }
  0x9a   : > { %1945 = vperm.xlu1 %11538, %v1886_v15   ;;  %vm1852_vm14 = vmand %vm1788_vm4, %vm19355_vm5  ;;  %vm20061_vm4 = vnez %v19928_v25  ;;  %vm19361_vm5 = vcmp.lt.s32.totalorder %v12406_v62, 8  ;;  %v11633_v25 = vld [vmem:[%s19153_s10 + $0x50] sm:$0xff] }
  0x9b   : > { %v1885_v43 = vsel %vm1852_vm14, 1, %v19962_v22  ;;  %vm1791_vm10 = vmand %vm20060_vm3, %vm19356_vm9  ;;  %vm19362_vm3 = vcmp.ge.s32.totalorder %v12430_v13, 0 }
  0x9c   : > { %1942 = vperm.xlu0 %11537, %v1885_v43   ;;  %vm1855_vm12 = vmand %vm1791_vm10, %vm19357_vm7  ;;  %vm20062_vm10 = vnez %v19937_v49  ;;  %vm19363_vm7 = vcmp.lt.s32.totalorder %v12430_v13, 8 }
  0x9d   : > { %v1888_v15 = vsel %vm1855_vm12, 1, %v19962_v22  ;;  %vm1790_vm14 = vmand %vm20061_vm4, %vm19358_vm13  ;;  %vm19364_vm4 = vcmp.ge.s32.totalorder %v12456_v27, 0 }
  0x9e   : > { %1951 = vperm.xlu1 %11538, %v1888_v15   ;;  %vm1854_vm9 = vmand %vm1790_vm14, %vm19359_vm15  ;;  %vm20063_vm14 = vnez %v19945_v4  ;;  %vm19365_vm15 = vcmp.lt.s32.totalorder %v12456_v27, 8  ;;  %v20102_v4 = vmov 0  ;;  %v20198_v27 = vmov 0 }
  0x9f   : > { %v1887_v43 = vsel %vm1854_vm9, 1, %v19962_v22  ;;  %vm1793_vm12 = vmand %vm20062_vm10, %vm19360_vm2  ;;  %vm19366_vm10 = vcmp.ge.s32.totalorder %v12471_v36, 0 }
  0xa0   : > { %1948 = vperm.xlu0 %11537, %v1887_v43   ;;  %vm1857_vm13 = vmand %vm1793_vm12, %vm19361_vm5  ;;  %vm20064_vm12 = vnez %v19952_v63  ;;  %vm19367_vm5 = vcmp.lt.s32.totalorder %v12471_v36, 8  ;;  %v20093_v63 = vld [vmem:[#allocation38_spill] sm:$0xff]  ;;  %v20194_v36 = vld [vmem:[#allocation84_spill] sm:$0xff] }
  0xa1   : > { %v1890_v15 = vsel %vm1857_vm13, 1, %v19962_v22  ;;  %vm1792_vm9 = vmand %vm20063_vm14, %vm19362_vm3  ;;  %vm19368_vm14 = vcmp.ge.s32.totalorder %v12496_v54, 0 }
  0xa2   : > { %1957 = vperm.xlu1 %11538, %v1890_v15   ;;  %vm1856_vm2 = vmand %vm1792_vm9, %vm19363_vm7  ;;  %vm20065_vm9 = vnez %v19958_v45  ;;  %vm19369_vm7 = vcmp.lt.s32.totalorder %v12496_v54, 8  ;;  %v20099_v45 = vld [vmem:[#allocation41_spill] sm:$0xff]  ;;  %v20190_v54 = vmov 0 }
  0xa3   : > { %v1889_v43 = vsel %vm1856_vm2, 1, %v19962_v22  ;;  %vm1795_vm13 = vmand %vm20064_vm12, %vm19364_vm4  ;;  %vm19370_vm12 = vcmp.ge.s32.totalorder %v12522_v16, 0 }
  0xa4   : > { %1954 = vperm.xlu0 %11537, %v1889_v43   ;;  %vm1859_vm3 = vmand %vm1795_vm13, %vm19365_vm15  ;;  %vm20066_vm13 = vnez %v19964_v44  ;;  %vm19371_vm15 = vcmp.lt.s32.totalorder %v12522_v16, 8  ;;  %v11631_v44 = vld [vmem:[%s19153_s10 + $0x70] sm:$0xff]  ;;  %v20184_v16 = vld [vmem:[#allocation80_spill] sm:$0xff] }
  0xa5   : > { %v1892_v15 = vsel %vm1859_vm3, 1, %v19962_v22  ;;  %vm1794_vm2 = vmand %vm20065_vm9, %vm19366_vm10  ;;  %vm19372_vm9 = vcmp.ge.s32.totalorder %v12551_v41, 0 }
  0xa6   : > { %1963 = vperm.xlu1 %11538, %v1892_v15   ;;  %vm1858_vm4 = vmand %vm1794_vm2, %vm19367_vm5  ;;  %vm20067_vm2 = vnez %v19972_v10  ;;  %vm19373_vm5 = vcmp.lt.s32.totalorder %v12551_v41, 8  ;;  %v20096_v10 = vmov 0 }
  0xa7   : > { %v1891_v43 = vsel %vm1858_vm4, 1, %v19962_v22  ;;  %vm1797_vm3 = vmand %vm20066_vm13, %vm19368_vm14  ;;  %vm19374_vm13 = vcmp.ge.s32.totalorder %v12575_v1, 0 }
  0xa8   : > { %1960 = vperm.xlu0 %11537, %v1891_v43   ;;  %vm1861_vm10 = vmand %vm1797_vm3, %vm19369_vm7  ;;  %vm20068_vm3 = vnez %v19979_v24  ;;  %vm19375_vm7 = vcmp.lt.s32.totalorder %v12575_v1, 8  ;;  %v11630_v24 = vld [vmem:[%s19153_s10 + $0x78] sm:$0xff]  ;;  %v20163_v1 = vld [vmem:[#allocation69_spill] sm:$0xff] }
  0xa9   : > { %v1894_v15 = vsel %vm1861_vm10, 1, %v19962_v22  ;;  %vm1796_vm4 = vmand %vm20067_vm2, %vm19370_vm12  ;;  %vm19376_vm2 = vcmp.ge.s32.totalorder %v12602_v14, 0 }
  0xaa   : > { %1969 = vperm.xlu1 %11538, %v1894_v15   ;;  %vm1860_vm14 = vmand %vm1796_vm4, %vm19371_vm15  ;;  %vm20069_vm4 = vnez %v19987_v53  ;;  %vm19377_vm15 = vcmp.lt.s32.totalorder %v12602_v14, 8 }
  0xab   : > { %v1893_v43 = vsel %vm1860_vm14, 1, %v19962_v22  ;;  %vm1799_vm10 = vmand %vm20068_vm3, %vm19372_vm9  ;;  %vm19378_vm3 = vcmp.ge.s32.totalorder %v12628_v2, 0 }
  0xac   : > { %1966 = vperm.xlu0 %11537, %v1893_v43   ;;  %vm1863_vm12 = vmand %vm1799_vm10, %vm19373_vm5  ;;  %vm20070_vm10 = vnez %v19995_v34  ;;  %vm19379_vm5 = vcmp.lt.s32.totalorder %v12628_v2, 8  ;;  %v20157_v2 = vld [vmem:[#allocation66_spill] sm:$0xff] }
  0xad   : > { %v1896_v15 = vsel %vm1863_vm12, 1, %v19962_v22  ;;  %vm1798_vm14 = vmand %vm20069_vm4, %vm19374_vm13  ;;  %vm19380_vm4 = vcmp.ge.s32.totalorder %v12654_v59, 0 }
  0xae   : > { %1975 = vperm.xlu1 %11538, %v1896_v15   ;;  %vm1862_vm9 = vmand %vm1798_vm14, %vm19375_vm7  ;;  %vm20071_vm14 = vnez %v20003_v19  ;;  %vm19381_vm7 = vcmp.lt.s32.totalorder %v12654_v59, 8  ;;  %v20154_v59 = vmov 0 }
  0xaf   : > { %v1895_v43 = vsel %vm1862_vm9, 1, %v19962_v22  ;;  %vm1801_vm12 = vmand %vm20070_vm10, %vm19376_vm2  ;;  %vm19382_vm10 = vcmp.ge.s32.totalorder %v12696_v35, 0 }
  0xb0   : > { %1972 = vperm.xlu0 %11537, %v1895_v43   ;;  %vm1865_vm13 = vmand %vm1801_vm12, %vm19377_vm15  ;;  %vm20072_vm12 = vnez %v20010_v47  ;;  %vm19383_vm15 = vcmp.lt.s32.totalorder %v12696_v35, 8  ;;  %v20151_v35 = vld [vmem:[#allocation63_spill] sm:$0xff] }
  0xb1   : > { %v1898_v15 = vsel %vm1865_vm13, 1, %v19962_v22  ;;  %vm1800_vm9 = vmand %vm20071_vm14, %vm19378_vm3  ;;  %vm19384_vm14 = vcmp.ge.s32.totalorder %v12715_v18, 0 }
  0xb2   : > { %1981 = vperm.xlu1 %11538, %v1898_v15   ;;  %vm1864_vm2 = vmand %vm1800_vm9, %vm19379_vm5  ;;  %vm20073_vm9 = vnez %v20018_v51  ;;  %vm19396_vm5 = vcmp.lt.s32.totalorder %v12715_v18, 8  ;;  %v20084_v51 = vmov 0  ;;  %v20145_v18 = vld [vmem:[#allocation60_spill] sm:$0xff] }
  0xb3   : > { %v1897_v43 = vsel %vm1864_vm2, 1, %v19962_v22  ;;  %vm1803_vm13 = vmand %vm20072_vm12, %vm19380_vm4  ;;  %vm19386_vm12 = vcmp.ge.s32.totalorder %v12739_v58, 0 }
  0xb4   : > { %1978 = vperm.xlu0 %11537, %v1897_v43   ;;  %vm1867_vm3 = vmand %vm1803_vm13, %vm19381_vm7  ;;  %vm20074_vm13 = vnez %v20026_v39  ;;  %vm19391_vm7 = vcmp.lt.s32.totalorder %v12739_v58, 8  ;;  %v20139_v58 = vld [vmem:[#allocation56_spill] sm:$0xff] }
  0xb5   : > { %v1900_v15 = vsel %vm1867_vm3, 1, %v19962_v22  ;;  %vm1802_vm2 = vmand %vm20073_vm9, %vm19382_vm10  ;;  %vm19388_vm9 = vcmp.ge.s32.totalorder %v12772_v61, 0 }
  0xb6   : > { %1987 = vperm.xlu1 %11538, %v1900_v15   ;;  %vm1866_vm4 = vmand %vm1802_vm2, %vm19383_vm15  ;;  %vm20075_vm2 = vnez %v20031_v29  ;;  %vm19389_vm15 = vcmp.lt.s32.totalorder %v12772_v61, 8  ;;  %v20078_v29 = vmov 0 }
  0xb7   : > { %v1899_v43 = vsel %vm1866_vm4, 1, %v19962_v22  ;;  %vm1805_vm3 = vmand %vm20074_vm13, %vm19384_vm14  ;;  %vm19390_vm13 = vcmp.ge.s32.totalorder %v12799_v42, 0 }
  0xb8   : > { %1984 = vperm.xlu0 %11537, %v1899_v43   ;;  %vm1869_vm10 = vmand %vm1805_vm3, %vm19396_vm5  ;;  %v13177_v43 = vadd.s32 1, %v12855_v21  ;;  %vm19393_vm3 = vcmp.lt.s32.totalorder %v12799_v42, 8 }
  0xb9   : > { %v1902_v15 = vsel %vm1869_vm10, 1, %v19962_v22  ;;  %vm1804_vm4 = vmand %vm20075_vm2, %vm19386_vm12  ;;  %vm20111_vm2 = vcmp.lt.s32.totalorder %v20109_v28, 8 }
  0xba   : > { %1993 = vperm.xlu1 %11538, %v1902_v15   ;;  %vm1868_vm14 = vmand %vm1804_vm4, %vm19391_vm7  ;;  %20076 = vst [vmem:[#allocation106_spill] sm:$0xff] %v13177_v43  ;;  %v13188_v15 = vadd.s32 1, %v12868_v56 }
  0xbb   : > { %v1901_v39 = vsel %vm1868_vm14, 1, %v19962_v22  ;;  %vm1807_vm10 = vmand %vm12835_vm8, %vm19388_vm9  ;;  %vm19409_vm9 = vcmp.ge.s32.totalorder %v13177_v43, 0  ;;  %vm20101_vm8 = vcmp.lt.s32.totalorder %v20099_v45, 8 }
  0xbc   : > { %1990 = vperm.xlu0 %11537, %v1901_v39   ;;  %vm1871_vm12 = vmand %vm1807_vm10, %vm19389_vm15  ;;  %20077 = vst [vmem:[#allocation107_spill] sm:$0xff] %v13188_v15  ;;  %vm19401_vm10 = vcmp.lt.s32.totalorder %v13177_v43, 8  ;;  %vm19400_vm15 = vcmp.ge.s32.totalorder %v13188_v15, 0 }
  0xbd   : > { %v1904_v47 = vsel %vm1871_vm12, 1, %v19962_v22  ;;  %vm1806_vm14 = vmand %vm12848_vm1, %vm19390_vm13  ;;  %vm19397_vm13 = vcmp.lt.s32.totalorder %v13188_v15, 8 }
  0xbe   : > { %1999 = vperm.xlu1 %11538, %v1904_v47   ;;  %vm1870_vm4 = vmand %vm1806_vm14, %vm19393_vm3  ;;  %v13208_v47 = vpop.permute.xlu1 %1325  ;;  %vm3940_vm3 = vcmp.lt.s32.totalorder %v11628_v38, 8 }
  0xbf   : > { %v1903_v39 = vsel %vm1870_vm4, 1, %v19962_v22  ;;  %vm2924_vm12 = vmand %vm12133_vm0, %vm19409_vm9  ;;  %vm3908_vm0 = vcmp.ge.s32.totalorder %v11628_v38, 0 }
  0xc0   : > { %1996 = vperm.xlu0 %11537, %v1903_v39   ;;  %vm2988_vm7 = vmand %vm2924_vm12, %vm19401_vm10  ;;  %v13220_v39 = vpop.permute.xlu0 %1319  ;;  %vm3939_vm12 = vcmp.lt.s32.totalorder %v11629_v23, 8 }
  0xc1   : > { %v3021_v7 = vsel %vm2988_vm7, 1, %v19962_v22  ;;  %vm2923_vm14 = vmand %vm12074_vm11, %vm19400_vm15  ;;  %vm3907_vm11 = vcmp.ge.s32.totalorder %v11629_v23, 0  ;;  %v20087_v23 = vld [vmem:[#allocation35_spill] sm:$0xff] }
  0xc2   : > { %3056 = vperm.xlu1 %11538, %v3021_v7   ;;  %vm2987_vm4 = vmand %vm2923_vm14, %vm19397_vm13  ;;  %v20081_v7 = vld [vmem:[#allocation32_spill] sm:$0xff]  ;;  %v13234_v38 = vpop.permute.xlu1 %1328 }
  0xc3   : > { %v3020_v8 = vsel %vm2987_vm4, 1, %v19962_v22  ;;  %vm13223_vm7 = vmand %vm3908_vm0, %vm3940_vm3  ;;  %vm20082_vm14 = vcmp.ge.s32.totalorder %v20081_v7, 0  ;;  %vm20083_vm4 = vcmp.lt.s32.totalorder %v20081_v7, 8  ;;  %vm20088_vm0 = vcmp.ge.s32.totalorder %v20087_v23, 0  ;;  %v20127_v7 = vld [vmem:[#allocation51_spill] sm:$0xff] }
  0xc4   : > { %3053 = vperm.xlu0 %11537, %v3020_v8   ;;  %v20079_v29 = vsel %vm13223_vm7, 4294967295, %v20078_v29  ;;  %vm4004_vm5 = vmand %vm13223_vm7, %vm20082_vm14  ;;  %v13243_v34 = vpop.permute.xlu0 %1322  ;;  %vm20089_vm14 = vcmp.lt.s32.totalorder %v20087_v23, 8  ;;  %v11637_v23 = vld [vmem:[%s19153_s10 + $0x90] sm:$0xff] }
  0xc5   : > { %20080 = vst [vmem:[#allocation108_spill] sm:$0xff] %v20079_v29  ;;  %vm4036_vm13 = vmand %vm4004_vm5, %vm20083_vm4  ;;  %vm3910_vm5 = vcmp.ge.s32.totalorder %v11630_v24, 0  ;;  %vm20094_vm4 = vcmp.ge.s32.totalorder %v20093_v63, 0 }
  0xc6   : > { %v4070_v8 = vsel %vm4036_vm13, 1, %v19962_v22  ;;  %vm13239_vm3 = vmand %vm3907_vm11, %vm3939_vm12  ;;  %vm3942_vm13 = vcmp.lt.s32.totalorder %v11630_v24, 8  ;;  %v13255_v53 = vpop.permute.xlu1 %1334  ;;  %vm3941_vm12 = vcmp.lt.s32.totalorder %v11631_v44, 8 }
  0xc7   : > { %v20085_v51 = vsel %vm13239_vm3, 4294967295, %v20084_v51  ;;  %4129 = vperm.xlu1 %11538, %v4070_v8   ;;  %vm4003_vm15 = vmand %vm13239_vm3, %vm20088_vm0  ;;  %v20090_v8 = vmov 0 }
  0xc8   : > { %20086 = vst [vmem:[#allocation109_spill] sm:$0xff] %v20085_v51  ;;  %vm4035_vm10 = vmand %vm4003_vm15, %vm20089_vm14  ;;  %vm3909_vm15 = vcmp.ge.s32.totalorder %v11631_v44, 0  ;;  %v13268_v24 = vpop.permute.xlu0 %1331  ;;  %v11632_v44 = vld [vmem:[%s19153_s10 + $0x58] sm:$0xff] }
  0xc9   : > { %v4069_v19 = vsel %vm4035_vm10, 1, %v19962_v22  ;;  %vm13257_vm11 = vmand %vm3910_vm5, %vm3942_vm13  ;;  %vm20095_vm10 = vcmp.lt.s32.totalorder %v20093_v63, 8  ;;  %vm20100_vm13 = vcmp.ge.s32.totalorder %v20099_v45, 0  ;;  %v20121_v45 = vld [vmem:[#allocation47_spill] sm:$0xff] }
  0xca   : > { %4126 = vperm.xlu0 %11537, %v4069_v19   ;;  %v20091_v8 = vsel %vm13257_vm11, 4294967295, %v20090_v8  ;;  %vm4006_vm0 = vmand %vm13257_vm11, %vm20094_vm4  ;;  %v13287_v6 = vpop.permute.xlu1 %1340  ;;  %vm20258_vm11 = vcmp.ge.s32.totalorder %v12882_v26, 0 }
  0xcb   : > { %20092 = vst [vmem:[#allocation110_spill] sm:$0xff] %v20091_v8  ;;  %vm4038_vm14 = vmand %vm4006_vm0, %vm20095_vm10  ;;  %vm3906_vm0 = vcmp.ge.s32.totalorder %v11632_v44, 0  ;;  %vm3938_vm10 = vcmp.lt.s32.totalorder %v11632_v44, 8  ;;  %v20107_v44 = vmov 0 }
  0xcc   : > { %v4072_v19 = vsel %vm4038_vm14, 1, %v19962_v22  ;;  %vm13273_vm5 = vmand %vm3909_vm15, %vm3941_vm12  ;;  %vm20105_vm12 = vcmp.ge.s32.totalorder %v20104_v46, 0 }
  0xcd   : > { %v20097_v10 = vsel %vm13273_vm5, 4294967295, %v20096_v10  ;;  %4135 = vperm.xlu1 %11538, %v4072_v19   ;;  %vm4005_vm9 = vmand %vm13273_vm5, %vm20100_vm13  ;;  %v13289_v19 = vpop.permute.xlu0 %1337  ;;  %vm20106_vm13 = vcmp.lt.s32.totalorder %v20104_v46, 8 }
  0xce   : > { %20098 = vst [vmem:[#allocation111_spill] sm:$0xff] %v20097_v10  ;;  %vm4037_vm4 = vmand %vm4005_vm9, %vm20101_vm8  ;;  %vm3905_vm8 = vcmp.ge.s32.totalorder %v11633_v25, 0  ;;  %vm3937_vm9 = vcmp.lt.s32.totalorder %v11633_v25, 8  ;;  %v13313_v25 = vpop.permute.xlu1 %1346 }
  0xcf   : > { %v4071_v49 = vsel %vm4037_vm4, 1, %v19962_v22  ;;  %vm13291_vm15 = vmand %vm3906_vm0, %vm3938_vm10  ;;  %vm20110_vm10 = vcmp.ge.s32.totalorder %v20109_v28, 0  ;;  %v20130_v28 = vmov 0 }
  0xd0   : > { %4132 = vperm.xlu0 %11537, %v4071_v49   ;;  %v20103_v4 = vsel %vm13291_vm15, 4294967295, %v20102_v4  ;;  %vm4002_vm14 = vmand %vm13291_vm15, %vm20105_vm12 }
  0xd1   : > { %vm4034_vm4 = vmand %vm4002_vm14, %vm20106_vm13  ;;  %vm3912_vm14 = vcmp.ge.s32.totalorder %v11634_v60, 0  ;;  %v13321_v17 = vpop.permute.xlu0 %1343  ;;  %vm20116_vm13 = vcmp.ge.s32.totalorder %v20115_v0, 0 }
  0xd2   : > { %v4068_v49 = vsel %vm4034_vm4, 1, %v19962_v22  ;;  %vm13305_vm0 = vmand %vm3905_vm8, %vm3937_vm9  ;;  %vm3944_vm8 = vcmp.lt.s32.totalorder %v11634_v60, 8  ;;  %v13336_v60 = vpop.permute.xlu1 %1352 }
  0xd3   : > { %v20108_v44 = vsel %vm13305_vm0, 4294967295, %v20107_v44  ;;  %4123 = vperm.xlu1 %11538, %v4068_v49   ;;  %vm4001_vm1 = vmand %vm13305_vm0, %vm20110_vm10  ;;  %v20112_v49 = vmov 0  ;;  %vm20117_vm10 = vcmp.lt.s32.totalorder %v20115_v0, 8  ;;  %v11636_v0 = vld [vmem:[%s19153_s10 + $0x98] sm:$0xff] }
  0xd4   : > { %vm4033_vm12 = vmand %vm4001_vm1, %vm20111_vm2  ;;  %vm3911_vm1 = vcmp.ge.s32.totalorder %v11635_v9, 0  ;;  %vm3943_vm2 = vcmp.lt.s32.totalorder %v11635_v9, 8 }
  0xd5   : > { %v4067_v37 = vsel %vm4033_vm12, 1, %v19962_v22  ;;  %vm13323_vm9 = vmand %vm3912_vm14, %vm3944_vm8  ;;  %vm20122_vm8 = vcmp.ge.s32.totalorder %v20121_v45, 0  ;;  %v13347_v9 = vpop.permute.xlu0 %1349 }
  0xd6   : > { %4120 = vperm.xlu0 %11537, %v4067_v37   ;;  %v20113_v49 = vsel %vm13323_vm9, 4294967295, %v20112_v49  ;;  %vm4008_vm4 = vmand %vm13323_vm9, %vm20116_vm13  ;;  %vm20123_vm13 = vcmp.lt.s32.totalorder %v20121_v45, 8  ;;  %v13362_v45 = vpop.permute.xlu1 %1358 }
  0xd7   : > { %20114 = vst [vmem:[#allocation112_spill] sm:$0xff] %v20113_v49  ;;  %vm4040_vm12 = vmand %vm4008_vm4, %vm20117_vm10  ;;  %vm3914_vm4 = vcmp.ge.s32.totalorder %v11636_v0, 0  ;;  %vm3913_vm10 = vcmp.ge.s32.totalorder %v11637_v23, 0 }
  0xd8   : > { %v4074_v37 = vsel %vm4040_vm12, 1, %v19962_v22  ;;  %vm13339_vm14 = vmand %vm3911_vm1, %vm3943_vm2  ;;  %vm3946_vm1 = vcmp.lt.s32.totalorder %v11636_v0, 8  ;;  %vm3945_vm12 = vcmp.lt.s32.totalorder %v11637_v23, 8  ;;  %v20133_v23 = vld [vmem:[#allocation54_spill] sm:$0xff] }
  0xd9   : > { %v20119_v50 = vsel %vm13339_vm14, 4294967295, %v20118_v50  ;;  %4141 = vperm.xlu1 %11538, %v4074_v37   ;;  %vm4007_vm6 = vmand %vm13339_vm14, %vm20122_vm8  ;;  %v20124_v37 = vmov 0  ;;  %v13370_v0 = vpop.permute.xlu0 %1355  ;;  %vm20135_vm5 = vcmp.lt.s32.totalorder %v20133_v23, 8 }
  0xda   : > { %20120 = vst [vmem:[#allocation113_spill] sm:$0xff] %v20119_v50  ;;  %vm4039_vm9 = vmand %vm4007_vm6, %vm20123_vm13  ;;  %vm20128_vm6 = vcmp.ge.s32.totalorder %v20127_v7, 0  ;;  %v13387_v42 = vpop.permute.xlu1 %1364  ;;  %v20205_v50 = vld [vmem:[#allocation85_spill] sm:$0xff] }
  0xdb   : > { %v4073_v63 = vsel %vm4039_vm9, 1, %v19962_v22  ;;  %vm13355_vm2 = vmand %vm3914_vm4, %vm3946_vm1  ;;  %vm20129_vm9 = vcmp.lt.s32.totalorder %v20127_v7, 8  ;;  %vm20134_vm1 = vcmp.ge.s32.totalorder %v20133_v23, 0  ;;  %v11638_v7 = vld [vmem:[%s19153_s10 + $0xa8] sm:$0xff]  ;;  %v11639_v23 = vld [vmem:[%s19153_s10 + $0xa0] sm:$0xff] }
  0xdc   : > { %4138 = vperm.xlu0 %11537, %v4073_v63   ;;  %v20125_v37 = vsel %vm13355_vm2, 4294967295, %v20124_v37  ;;  %vm4010_vm8 = vmand %vm13355_vm2, %vm20128_vm6  ;;  %vm20147_vm2 = vcmp.lt.s32.totalorder %v20145_v18, 8 }
  0xdd   : > { %20126 = vst [vmem:[#allocation114_spill] sm:$0xff] %v20125_v37  ;;  %vm4042_vm13 = vmand %vm4010_vm8, %vm20129_vm9  ;;  %vm3916_vm8 = vcmp.ge.s32.totalorder %v11638_v7, 0  ;;  %vm3948_vm9 = vcmp.lt.s32.totalorder %v11638_v7, 8  ;;  %v13396_v61 = vpop.permute.xlu0 %1361  ;;  %v20142_v7 = vmov 0 }
  0xde   : > { %v4076_v63 = vsel %vm4042_vm13, 1, %v19962_v22  ;;  %vm13373_vm4 = vmand %vm3913_vm10, %vm3945_vm12  ;;  %vm20140_vm12 = vcmp.ge.s32.totalorder %v20139_v58, 0 }
  0xdf   : > { %v20131_v28 = vsel %vm13373_vm4, 4294967295, %v20130_v28  ;;  %4147 = vperm.xlu1 %11538, %v4076_v63   ;;  %vm4009_vm14 = vmand %vm13373_vm4, %vm20134_vm1  ;;  %v20136_v63 = vmov 0  ;;  %vm20141_vm1 = vcmp.lt.s32.totalorder %v20139_v58, 8  ;;  %v11640_v58 = vld [vmem:[%s19153_s10 + $0xb8] sm:$0xff] }
  0xe0   : > { %20132 = vst [vmem:[#allocation115_spill] sm:$0xff] %v20131_v28  ;;  %vm4041_vm6 = vmand %vm4009_vm14, %vm20135_vm5  ;;  %vm3915_vm5 = vcmp.ge.s32.totalorder %v11639_v23, 0  ;;  %vm3947_vm14 = vcmp.lt.s32.totalorder %v11639_v23, 8  ;;  %v13413_v23 = vpop.permute.xlu1 %1370 }
  0xe1   : > { %v4075_v46 = vsel %vm4041_vm6, 1, %v19962_v22  ;;  %vm13389_vm10 = vmand %vm3916_vm8, %vm3948_vm9  ;;  %vm20146_vm9 = vcmp.ge.s32.totalorder %v20145_v18, 0  ;;  %v13421_v43 = vpop.permute.xlu0 %1367  ;;  %v11641_v18 = vld [vmem:[%s19153_s10 + $0xb0] sm:$0xff] }
  0xe2   : > { %4144 = vperm.xlu0 %11537, %v4075_v46   ;;  %v20137_v63 = vsel %vm13389_vm10, 4294967295, %v20136_v63  ;;  %vm4012_vm13 = vmand %vm13389_vm10, %vm20140_vm12 }
  0xe3   : > { %20138 = vst [vmem:[#allocation116_spill] sm:$0xff] %v20137_v63  ;;  %vm4044_vm6 = vmand %vm4012_vm13, %vm20141_vm1  ;;  %vm3918_vm13 = vcmp.ge.s32.totalorder %v11640_v58, 0  ;;  %vm20152_vm1 = vcmp.ge.s32.totalorder %v20151_v35, 0 }
  0xe4   : > { %v4078_v46 = vsel %vm4044_vm6, 1, %v19962_v22  ;;  %vm13405_vm8 = vmand %vm3915_vm5, %vm3947_vm14  ;;  %vm3950_vm5 = vcmp.lt.s32.totalorder %v11640_v58, 8  ;;  %v13436_v58 = vpop.permute.xlu1 %1376 }
  0xe5   : > { %v20143_v7 = vsel %vm13405_vm8, 4294967295, %v20142_v7  ;;  %4153 = vperm.xlu1 %11538, %v4078_v46   ;;  %vm4011_vm4 = vmand %vm13405_vm8, %vm20146_vm9  ;;  %v20148_v46 = vmov 0  ;;  %vm20153_vm9 = vcmp.lt.s32.totalorder %v20151_v35, 8  ;;  %v11642_v35 = vld [vmem:[%s19153_s10 + $0xc8] sm:$0xff] }
  0xe6   : > { %20144 = vst [vmem:[#allocation117_spill] sm:$0xff] %v20143_v7  ;;  %vm4043_vm12 = vmand %vm4011_vm4, %vm20147_vm2  ;;  %vm3917_vm2 = vcmp.ge.s32.totalorder %v11641_v18, 0  ;;  %vm3949_vm4 = vcmp.lt.s32.totalorder %v11641_v18, 8  ;;  %v13447_v18 = vpop.permute.xlu0 %1373  ;;  %v20178_v7 = vld [vmem:[#allocation75_spill] sm:$0xff] }
  0xe7   : > { %v4077_v15 = vsel %vm4043_vm12, 1, %v19962_v22  ;;  %vm13423_vm14 = vmand %vm3918_vm13, %vm3950_vm5  ;;  %vm20158_vm5 = vcmp.ge.s32.totalorder %v20157_v2, 0 }
  0xe8   : > { %4150 = vperm.xlu0 %11537, %v4077_v15   ;;  %v20149_v46 = vsel %vm13423_vm14, 4294967295, %v20148_v46  ;;  %vm4014_vm6 = vmand %vm13423_vm14, %vm20152_vm1  ;;  %vm20159_vm1 = vcmp.lt.s32.totalorder %v20157_v2, 8  ;;  %v13462_v2 = vpop.permute.xlu1 %1382 }
  0xe9   : > { %20150 = vst [vmem:[#allocation118_spill] sm:$0xff] %v20149_v46  ;;  %vm4046_vm12 = vmand %vm4014_vm6, %vm20153_vm9  ;;  %vm3920_vm6 = vcmp.ge.s32.totalorder %v11642_v35, 0  ;;  %v20166_v46 = vmov 0 }
  0xea   : > { %v4080_v15 = vsel %vm4046_vm12, 1, %v19962_v22  ;;  %vm13439_vm13 = vmand %vm3917_vm2, %vm3949_vm4  ;;  %vm3952_vm2 = vcmp.lt.s32.totalorder %v11642_v35, 8 }
  0xeb   : > { %v20155_v59 = vsel %vm13439_vm13, 4294967295, %v20154_v59  ;;  %4159 = vperm.xlu1 %11538, %v4080_v15   ;;  %vm4013_vm8 = vmand %vm13439_vm13, %vm20158_vm5  ;;  %v20160_v15 = vmov 0 }
  0xec   : > { %20156 = vst [vmem:[#allocation119_spill] sm:$0xff] %v20155_v59  ;;  %vm4045_vm14 = vmand %vm4013_vm8, %vm20159_vm1  ;;  %v11643_v59 = vld [vmem:[%s19153_s10 + $0xc0] sm:$0xff]  ;;  %vm20164_vm8 = vcmp.ge.s32.totalorder %v20163_v1, 0  ;;  %v13487_v41 = vpop.permute.xlu1 %1388 }
  0xed   : > { %v4079_v14 = vsel %vm4045_vm14, 1, %v19962_v22  ;;  %vm13455_vm4 = vmand %vm3920_vm6, %vm3952_vm2  ;;  %vm3919_vm9 = vcmp.ge.s32.totalorder %v11643_v59, 0  ;;  %vm3951_vm12 = vcmp.lt.s32.totalorder %v11643_v59, 8  ;;  %vm20165_vm14 = vcmp.lt.s32.totalorder %v20163_v1, 8  ;;  %v20169_v59 = vld [vmem:[#allocation72_spill] sm:$0xff]  ;;  %v11644_v1 = vld [vmem:[%s19153_s10 + $0xd8] sm:$0xff] }
  0xee   : > { %4156 = vperm.xlu0 %11537, %v4079_v14   ;;  %v20161_v15 = vsel %vm13455_vm4, 4294967295, %v20160_v15  ;;  %vm4016_vm5 = vmand %vm13455_vm4, %vm20164_vm8  ;;  %v13470_v14 = vpop.permute.xlu0 %1379  ;;  %vm20170_vm2 = vcmp.ge.s32.totalorder %v20169_v59, 0  ;;  %vm20171_vm10 = vcmp.lt.s32.totalorder %v20169_v59, 8  ;;  %20172 = vst [vmem:[#allocation122_spill] sm:$0xff] %v13487_v41  ;;  %vm20187_vm4 = vcmp.lt.s32.totalorder %v20184_v16, 8 }
  0xef   : > { %20162 = vst [vmem:[#allocation120_spill] sm:$0xff] %v20161_v15  ;;  %vm4048_vm1 = vmand %vm4016_vm5, %vm20165_vm14  ;;  %vm3922_vm5 = vcmp.ge.s32.totalorder %v11644_v1, 0  ;;  %vm3954_vm14 = vcmp.lt.s32.totalorder %v11644_v1, 8 }
  0xf0   : > { %v4082_v35 = vsel %vm4048_vm1, 1, %v19962_v22  ;;  %vm13473_vm6 = vmand %vm3919_vm9, %vm3951_vm12 }
  0xf1   : > { %v20167_v46 = vsel %vm13473_vm6, 4294967295, %v20166_v46  ;;  %4165 = vperm.xlu1 %11538, %v4082_v35   ;;  %vm4015_vm13 = vmand %vm13473_vm6, %vm20170_vm2  ;;  %v20173_v35 = vmov 0  ;;  %vm20180_vm2 = vcmp.lt.s32.totalorder %v20178_v7, 8 }
  0xf2   : > { %20168 = vst [vmem:[#allocation121_spill] sm:$0xff] %v20167_v46  ;;  %vm4047_vm8 = vmand %vm4015_vm13, %vm20171_vm10  ;;  %v20176_v46 = vld [vmem:[#allocation73_spill] sm:$0xff]  ;;  %v13495_v59 = vpop.permute.xlu0 %1385  ;;  %vm20179_vm10 = vcmp.ge.s32.totalorder %v20178_v7, 0  ;;  %v13521_v7 = vld [vmem:[%s19145_s2] ss:$0 sm:$0xff] }
  0xf3   : > { %v4081_v15 = vsel %vm4047_vm8, 1, %v19962_v22  ;;  %vm13489_vm9 = vmand %vm3922_vm5, %vm3954_vm14  ;;  %vm3921_vm12 = vcmp.ge.s32.totalorder %v20176_v46, 0  ;;  %vm3953_vm1 = vcmp.lt.s32.totalorder %v20176_v46, 8  ;;  %20177 = vst [vmem:[#allocation73_spill] sm:$0xff] %v13495_v59  ;;  %vm20185_vm14 = vcmp.ge.s32.totalorder %v20184_v16, 0  ;;  %v13512_v46 = vpop.permute.xlu1 %1394 }
  0xf4   : > { %4162 = vperm.xlu0 %11537, %v4081_v15   ;;  %v20174_v35 = vsel %vm13489_vm9, 4294967295, %v20173_v35  ;;  %vm4018_vm13 = vmand %vm13489_vm9, %vm20179_vm10  ;;  %v20181_v15 = vmov 0  ;;  %20186 = vst [vmem:[#allocation125_spill] sm:$0xff] %v13512_v46  ;;  %v13529_v16 = vld [vmem:[%s19146_s3] ss:$0 sm:$0xff] }
  0xf5   : > { %20175 = vst [vmem:[#allocation123_spill] sm:$0xff] %v20174_v35  ;;  %vm4050_vm8 = vmand %vm4018_vm13, %vm20180_vm2  ;;  %v20188_v35 = vld [vmem:[#allocation77_spill] sm:$0xff] }
  0xf6   : > { %v4084_v1 = vsel %vm4050_vm8, 1, %v19962_v22  ;;  %vm13504_vm5 = vmand %vm3921_vm12, %vm3953_vm1  ;;  %vm3924_vm9 = vcmp.ge.s32.totalorder %v20188_v35, 0  ;;  %vm3956_vm13 = vcmp.lt.s32.totalorder %v20188_v35, 8  ;;  %v13524_v63 = vpop.permute.xlu0 %1391  ;;  %v20193_v35 = vld [vmem:[#allocation81_spill] sm:$0xff]  ;;  %vm20195_vm1 = vcmp.ge.s32.totalorder %v20194_v36, 0 }
  0xf7   : > { %v20182_v15 = vsel %vm13504_vm5, 4294967295, %v20181_v15  ;;  %4171 = vperm.xlu1 %11538, %v4084_v1   ;;  %vm4017_vm6 = vmand %vm13504_vm5, %vm20185_vm14  ;;  %20189 = vst [vmem:[#allocation77_spill] sm:$0xff] %v13524_v63  ;;  %vm3955_vm12 = vcmp.lt.s32.totalorder %v20193_v35, 8  ;;  %v13545_v59 = vpop.permute.xlu1 %1400 }
  0xf8   : > { %20183 = vst [vmem:[#allocation124_spill] sm:$0xff] %v20182_v15  ;;  %vm4049_vm10 = vmand %vm4017_vm6, %vm20187_vm4  ;;  %vm3923_vm6 = vcmp.ge.s32.totalorder %v20193_v35, 0 }
  0xf9   : > { %v4083_v1 = vsel %vm4049_vm10, 1, %v19962_v22  ;;  %vm13531_vm4 = vmand %vm3924_vm9, %vm3956_vm13  ;;  %vm20196_vm9 = vcmp.lt.s32.totalorder %v20194_v36, 8  ;;  %20197 = vst [vmem:[#allocation81_spill] sm:$0xff] %v13545_v59 }
  0xfa   : > { %4168 = vperm.xlu0 %11537, %v4083_v1   ;;  %v20191_v54 = vsel %vm13531_vm4, 4294967295, %v20190_v54  ;;  %vm4020_vm2 = vmand %vm13531_vm4, %vm20195_vm1  ;;  %vm3926_vm1 = vcmp.ge.s32.totalorder %v20205_v50, 0 }
  0xfb   : > { %20192 = vst [vmem:[#allocation126_spill] sm:$0xff] %v20191_v54  ;;  %vm4052_vm8 = vmand %vm4020_vm2, %vm20196_vm9  ;;  %v20201_v54 = vld [vmem:[#allocation88_spill] sm:$0xff]  ;;  %vm3958_vm2 = vcmp.lt.s32.totalorder %v20205_v50, 8  ;;  %v13578_v50 = vpop.permute.xlu1 %1406 }
  0xfc   : > { %vm13550_vm14 = vmand %vm3923_vm6, %vm3955_vm12  ;;  %vm20202_vm10 = vcmp.ge.s32.totalorder %v20201_v54, 0  ;;  %vm20204_vm6 = vcmp.lt.s32.totalorder %v20201_v54, 8  ;;  %v20207_v54 = vmov 0 }
  0xfd   : > { %v20199_v27 = vsel %vm13550_vm14, 4294967295, %v20198_v27  ;;  %vm4019_vm13 = vmand %vm13550_vm14, %vm20202_vm10 }
  0xfe   : > { %20200 = vst [vmem:[#allocation127_spill] sm:$0xff] %v20199_v27  ;;  %vm4051_vm12 = vmand %vm4019_vm13, %vm20204_vm6 }
  0xff   : > { %v4085_v27 = vsel %vm4051_vm12, 1, %v19962_v22  ;;  %vm13573_vm10 = vmand %vm3926_vm1, %vm3958_vm2 }
 0x100   : > { %4174 = vperm.xlu0 %11537, %v4085_v27   ;;  %v20208_v54 = vsel %vm13573_vm10, 4294967295, %v20207_v54  ;;  %v20211_v27 = vld [vmem:[#allocation92_spill] sm:$0xff] }
 0x101   : > { %20209 = vst [vmem:[#allocation85_spill] sm:$0xff] %v20208_v54  ;;  %vm20212_vm6 = vcmp.ge.s32.totalorder %v20211_v27, 0  ;;  %vm20213_vm1 = vcmp.lt.s32.totalorder %v20211_v27, 8  ;;  %v11564_v27 = vld [vmem:[%s19147_s4 + $0x28] sm:$0xff]  }
 0x102   : > { %vm4022_vm12 = vmand %vm13573_vm10, %vm20212_vm6 }
 0x103   : > { %vm4054_vm2 = vmand %vm4022_vm12, %vm20213_vm1 }
 0x10c   : > { %v10801_v15 = vpop.f32.mrb[0].mxu0 }
 0x10d   : > { %v783_v46 = vmul.f32 %v10801_v15, %v13521_v7  ;;  %v647_v28 = vpop.f32.mrb[1].mxu0  ;;  %v4086_v15 = vsel %vm4052_vm8, 1, %v19962_v22  ;;  %vm19545_vm8 = vcmask 523264  }
 0x10e   : > { %v781_v1 = vmul.f32 %v13521_v7, %v647_v28  ;;  %v10802_v63 = vpop.f32.mrb[2].mxu0  ;;  %4177 = vperm.xlu1 %11538, %v4086_v15   ;;  %v13558_v28 = vpop.permute.xlu0 %1397  ;;  %v11563_v15 = vld [vmem:[%s19147_s4 + $0x20] sm:$0xff]  }
 0x10f   : > { %v822_v41 = vadd.f32 %v13529_v16, %v783_v46  ;;  %v784_v35 = vmul.f32 %v10802_v63, %v13521_v7  ;;  %v650_v37 = vpop.f32.mrb[3].mxu0  ;;  %20203 = vst [vmem:[#allocation128_spill] sm:$0xff] %v13558_v28  ;;  %10831 = vmatprep.subr.bf16.mxu0 %v11563_v15 }
 0x110   : > { %v820_v46 = vadd.f32 %v13529_v16, %v781_v1  ;;  %v782_v59 = vmul.f32 %v13521_v7, %v650_v37  ;;  %10832 = vmatpush3.bf16.msra.mxu0 %v11563_v15  ;;  %v4088_v15 = vsel %vm4054_vm2, 1, %v19962_v22 }
 0x111   : > { %v854_v36 = vmax.f32 %v822_v41, 0.0  ;;  %v823_v63 = vadd.f32 %v13529_v16, %v784_v35  ;;  %v20206_v35 = vld [vmem:[#allocation89_spill] sm:$0xff]  ;;  %10833 = vmatprep.subr.bf16.mxu0 %v11564_v27 }
 0x112   : > { %v852_v41 = vmax.f32 %v820_v46, 0.0  ;;  %v821_v1 = vadd.f32 %v13529_v16, %v782_v59  ;;  %vm3925_vm9 = vcmp.ge.s32.totalorder %v20206_v35, 0  ;;  %vm3957_vm13 = vcmp.lt.s32.totalorder %v20206_v35, 8  ;;  %20210 = vst [vmem:[#allocation89_spill] sm:$0xff] %v13578_v50  ;;  %v13588_v62 = vpop.permute.xlu0 %1403  ;;  %4183 = vperm.xlu1 %11538, %v4088_v15  }
 0x113   : > { %v855_v28 = vmax.f32 %v823_v63, 0.0  ;;  %20214 = vst [vmem:[#allocation129_spill] sm:$0xff] %v13588_v62  ;;  %vm13597_vm6 = vmand %vm3925_vm9, %vm3957_vm13 }
 0x114   : > { %v10805_v37 = vpop.f32.mrb[4].mxu0  ;;  %v853_v49 = vmax.f32 %v821_v1, 0.0  ;;  %10834 = vmatpush3.bf16.msra.mxu0 %v11564_v27 }
 0x115   : > { %v885_v13 = vpack.c.bf16 %v855_v28, %v854_v36  ;;  %v787_v46 = vmul.f32 %v10805_v37, %v13521_v7  ;;  %v663_v63 = vpop.f32.mrb[5].mxu0  ;;  %v20215_v37 = vmov 0 }
 0x116   : > { %v785_v59 = vmul.f32 %v13521_v7, %v663_v63  ;;  %v884_v36 = vpack.c.bf16 %v853_v49, %v852_v41  ;;  %v10806_v1 = vpop.f32.mrb[6].mxu0  ;;  %v20216_v37 = vsel %vm13597_vm6, 4294967295, %v20215_v37 }
 0x117   : > { %902 = vst.msk [vmem:[#allocation2 + $0x10] sm:$0xff] %vm19545_vm8, %v885_v13  ;;  %v826_v28 = vadd.f32 %v13529_v16, %v787_v46  ;;  %20217 = vst [vmem:[#allocation130_spill] sm:$0xff] %v20216_v37  ;;  %v666_v63 = vpop.f32.mrb[7].mxu0  ;;  %v20218_v13 = vld [vmem:[#allocation94_spill] sm:$0xff]  ;;  %v788_v41 = vmul.f32 %v10806_v1, %v13521_v7  ;;  %v11645_v46 = vld [vmem:[%s19153_s10 + $0x8] sm:$0xff] }
 0x118   : > { %vm20219_vm12 = vcmp.ge.s32.totalorder %v20218_v13, 0  ;;  %901 = vst.msk [vmem:[#allocation2 + $0x8] sm:$0xff] %vm19545_vm8, %v884_v36  ;;  %v824_v49 = vadd.f32 %v13529_v16, %v785_v59  ;;  %v786_v35 = vmul.f32 %v13521_v7, %v666_v63  ;;  %vm20220_vm9 = vcmp.lt.s32.totalorder %v20218_v13, 8  ;;  %v13618_v36 = vpop.permute.xlu1 %1412  ;;  %v11646_v13 = vld [vmem:[%s19153_s10] sm:$0xff] }
 0x119   : > { %vm4021_vm1 = vmand %vm13597_vm6, %vm20219_vm12  ;;  %vm3896_vm2 = vcmp.ge.s32.totalorder %v11645_v46, 0  ;;  %vm3928_vm10 = vcmp.lt.s32.totalorder %v11645_v46, 8  ;;  %v858_v15 = vmax.f32 %v826_v28, 0.0  ;;  %20221 = vst [vmem:[#allocation131_spill] sm:$0xff] %v13618_v36  ;;  %v827_v1 = vadd.f32 %v13529_v16, %v788_v41  ;;  %v13630_v46 = vpop.permute.xlu0 %1409 }
 0x11a   : > { %vm4053_vm13 = vmand %vm4021_vm1, %vm20220_vm9  ;;  %v856_v59 = vmax.f32 %v824_v49, 0.0  ;;  %v825_v63 = vadd.f32 %v13529_v16, %v786_v35  ;;  %vm1414_vm1 = vcmp.eq.s32.totalorder %v13220_v39, 1  ;;  %v20222_v28 = vmov 0  ;;  %20225 = vst [vmem:[#allocation133_spill] sm:$0xff] %v13630_v46 }
 0x11b   : > { %v4087_v37 = vsel %vm4053_vm13, 1, %v19962_v22  ;;  %vm13626_vm9 = vmand %vm3896_vm2, %vm3928_vm10  ;;  %v859_v49 = vmax.f32 %v827_v1, 0.0  ;;  %vm20226_vm8 = vcmp.ge.s32.totalorder %v12855_v21, 0  ;;  %vm20227_vm2 = vcmp.lt.s32.totalorder %v12855_v21, 8 }
 0x11c   : > { %4180 = vperm.xlu0 %11537, %v4087_v37   ;;  %v20223_v28 = vsel %vm13626_vm9, 4294967295, %v20222_v28  ;;  %v857_v41 = vmax.f32 %v825_v63, 0.0  ;;  %vm4899_vm6 = vmand %vm13626_vm9, %vm20226_vm8  ;;  %v10809_v27 = vpop.f32.mrb[8].mxu0  ;;  %v11565_v37 = vld [vmem:[%s19147_s4 + $0x30] sm:$0xff]   ;;  %vm20230_vm14 = vcmp.lt.s32.totalorder %v11646_v13, 8  ;;  %vm20231_vm4 = vcmp.ge.s32.totalorder %v11646_v13, 0 }
 0x11d   : > { %20224 = vst [vmem:[#allocation132_spill] sm:$0xff] %v20223_v28  ;;  %vm4931_vm12 = vmand %vm4899_vm6, %vm20227_vm2  ;;  %v887_v39 = vpack.c.bf16 %v859_v49, %v858_v15  ;;  %v791_v1 = vmul.f32 %v10809_v27, %v13521_v7  ;;  %v20232_v28 = vmov 0  ;;  %v679_v21 = vpop.f32.mrb[9].mxu0  ;;  %10835 = vmatprep.subr.bf16.mxu0 %v11565_v37  ;;  %vm20235_vm10 = vcmp.ge.s32.totalorder %v12868_v56, 0  ;;  %v13662_v15 = vpop.permute.xlu1 %1909  ;;  %v11652_v13 = vld [vmem:[%s19153_s10 + $0x30] sm:$0xff] }
 0x11e   : > { %v886_v35 = vpack.c.bf16 %v857_v41, %v856_v59  ;;  %vm13643_vm13 = vmpackc.low %vm1414_vm1, %vm1414_vm1  ;;  %v4963_v54 = vsel %vm4931_vm12, 1, %v19962_v22  ;;  %10836 = vmatpush3.bf16.msra.mxu0 %v11565_v37  ;;  %vm20238_vm8 = vcmp.eq.s32.totalorder %v13234_v38, 1  ;;  %vm20241_vm1 = vcmp.lt.s32.totalorder %v12868_v56, 8  ;;  %v13686_v49 = vpop.permute.xlu0 %1906  ;;  %v10810_v37 = vpop.f32.mrb[10].mxu0  ;;  %v11649_v59 = vld [vmem:[%s19153_s10 + $0x28] sm:$0xff] }
 0x11f   : > { %vm13651_vm9 = vmand %vm20231_vm4, %vm20230_vm14  ;;  %4998 = vperm.xlu1 %11538, %v4963_v54   ;;  %vm20236_vm4 = vcmask 523264   ;;  %v11647_v54 = vld [vmem:[%s19153_s10 + $0x18] sm:$0xff]  ;;  %v830_v41 = vadd.f32 %v13529_v16, %v791_v1  ;;  %v789_v27 = vmul.f32 %v13521_v7, %v679_v21  ;;  %v20255_v1 = vmov 0 }
 0x120   : > { %v20233_v28 = vsel %vm13651_vm9, 4294967295, %v20232_v28  ;;  %vm4898_vm12 = vmand %vm13651_vm9, %vm20235_vm10  ;;  %904 = vst.msk [vmem:[#allocation2 + $0x20] sm:$0xff] %vm20236_vm4, %v887_v39  ;;  %vm3930_vm9 = vcmp.lt.s32.totalorder %v11647_v54, 8 }
 0x121   : > { %20234 = vst [vmem:[#allocation134_spill] sm:$0xff] %v20233_v28  ;;  %vm20237_vm14 = vmmov %vm20236_vm4  ;;  %vm20242_vm4 = vcmp.eq.s32.totalorder %v13243_v34, 1  ;;  %v13732_v56 = vpop.permute.xlu1 %1915  ;;  %v862_v28 = vmax.f32 %v830_v41, 0.0  ;;  %v20280_v34 = vmov 0 }
 0x122   : > { %903 = vst.msk [vmem:[#allocation2 + $0x18] sm:$0xff] %vm20237_vm14, %v886_v35  ;;  %vm13669_vm6 = vmpackc.low %vm20238_vm8, %vm20238_vm8  ;;  %vm20245_vm8 = vcmp.eq.s32.totalorder %v13208_v47, 1  ;;  %v792_v47 = vmul.f32 %v10810_v37, %v13521_v7  ;;  %v682_v35 = vpop.f32.mrb[11].mxu0 }
 0x123   : > { %vm4930_vm2 = vmand %vm4898_vm12, %vm20241_vm1  ;;  %vm20248_vm12 = vcmp.eq.s32.totalorder %v13255_v53, 1  ;;  %v11566_v53 = vld [vmem:[%s19147_s4 + $0x38] sm:$0xff]   ;;  %v790_v37 = vmul.f32 %v13521_v7, %v682_v35  ;;  %v20261_v35 = vmov 0 }
 0x124   : > { %vm13681_vm14 = vmpackc.low %vm20242_vm4, %vm20242_vm4  ;;  %v4962_v38 = vsel %vm4930_vm2, 1, %v19962_v22  ;;  %vm20251_vm2 = vcmp.eq.s32.totalorder %v13268_v24, 1  ;;  %v11648_v24 = vld [vmem:[%s19153_s10 + $0x10] sm:$0xff]  ;;  %10837 = vmatprep.subr.bf16.mxu0 %v11566_v53 }
 0x125   : > { %vm13693_vm1 = vmpackc.low %vm20245_vm8, %vm20245_vm8  ;;  %4995 = vperm.xlu0 %11537, %v4962_v38   ;;  %vm20254_vm8 = vcmp.ge.s32.totalorder %v11647_v54, 0  ;;  %vm3929_vm5 = vcmp.lt.s32.totalorder %v11648_v24, 8  ;;  %v828_v38 = vadd.f32 %v13529_v16, %v789_v27  ;;  %v831_v54 = vadd.f32 %v13529_v16, %v792_v47  ;;  %10838 = vmatpush3.bf16.msra.mxu0 %v11566_v53 }
 0x126   : > { %vm13700_vm4 = vmpackc.low %vm20248_vm12, %vm20248_vm12  ;;  %v829_v36 = vadd.f32 %v13529_v16, %v790_v37  ;;  %vm20260_vm7 = vcmp.ge.s32.totalorder %v11648_v24, 0  ;;  %v1479_v47 = vsel %vm13681_vm14, 65537, %v19962_v22  ;;  %vm3900_vm14 = vcmp.ge.s32.totalorder %v11649_v59, 0 }
 0x127   : > { %vm13707_vm10 = vmpackc.low %vm20251_vm2, %vm20251_vm2  ;;  %v860_v46 = vmax.f32 %v828_v38, 0.0  ;;  %vm1421_vm2 = vcmp.eq.s32.totalorder %v13287_v6, 1  ;;  %v13750_v6 = vpop.permute.xlu0 %1912  ;;  %v863_v41 = vmax.f32 %v831_v54, 0.0  ;;  %v1478_v24 = vsel %vm13643_vm13, 65537, %v19962_v22 }
 0x128   : > { %vm13716_vm12 = vmand %vm20254_vm8, %vm3930_vm9  ;;  %vm20259_vm9 = vcmp.lt.s32.totalorder %v12882_v26, 8  ;;  %v861_v53 = vmax.f32 %v829_v36, 0.0 }
 0x129   : > { %v20256_v1 = vsel %vm13716_vm12, 4294967295, %v20255_v1  ;;  %vm4901_vm3 = vmand %vm13716_vm12, %vm20258_vm11  ;;  %vm20264_vm11 = vcmp.ge.s32.totalorder %v12896_v31, 0  ;;  %v889_v36 = vpack.c.bf16 %v863_v41, %v862_v28  ;;  %v20271_v28 = vmov 0 }
 0x12a   : > { %20257 = vst [vmem:[#allocation135_spill] sm:$0xff] %v20256_v1  ;;  %vm4933_vm8 = vmand %vm4901_vm3, %vm20259_vm9  ;;  %v888_v54 = vpack.c.bf16 %v861_v53, %v860_v46  ;;  %v11651_v46 = vld [vmem:[%s19153_s10 + $0x38] sm:$0xff]  ;;  %v1480_v53 = vsel %vm13693_vm1, 65537, %v19962_v22  ;;  %vm1422_vm1 = vcmp.eq.s32.totalorder %v13321_v17, 1 }
 0x12b   : > { %v4965_v27 = vsel %vm4933_vm8, 1, %v19962_v22  ;;  %vm13738_vm0 = vmand %vm20260_vm7, %vm3929_vm5  ;;  %vm20265_vm7 = vcmp.lt.s32.totalorder %v12896_v31, 8  ;;  %vm3932_vm8 = vcmp.lt.s32.totalorder %v11649_v59, 8  ;;  %v9977_v31 = vcombine.low %v1478_v24, %v1479_v47  ;;  %v13786_v47 = vpop.permute.xlu1 %1921 }
 0x12c   : > { %v20262_v35 = vsel %vm13738_vm0, 4294967295, %v20261_v35  ;;  %5004 = vperm.xlu1 %11538, %v4965_v27   ;;  %vm4900_vm9 = vmand %vm13738_vm0, %vm20264_vm11  ;;  %v10813_v27 = vpop.f32.mrb[12].mxu0  ;;  %vm20268_vm11 = vcmp.eq.s32.totalorder %v13289_v19, 1  ;;  %v11650_v19 = vld [vmem:[%s19153_s10 + $0x20] sm:$0xff]  ;;  %v1483_v24 = vsel %vm13700_vm4, 65537, %v19962_v22 }
 0x12d   : > { %20263 = vst [vmem:[#allocation136_spill] sm:$0xff] %v20262_v35  ;;  %vm4932_vm5 = vmand %vm4900_vm9, %vm20265_vm7  ;;  %v795_v63 = vmul.f32 %v10813_v27, %v13521_v7  ;;  %v695_v59 = vpop.f32.mrb[13].mxu0  ;;  %v1481_v35 = vsel %vm13669_vm6, 65537, %v19962_v22  ;;  %vm20279_vm4 = vcmp.ge.s32.totalorder %v11650_v19, 0 }
 0x12e   : > { %vm13760_vm3 = vmpackc.low %vm1421_vm2, %vm1421_vm2  ;;  %v4964_v37 = vsel %vm4932_vm5, 1, %v19962_v22  ;;  %vm3902_vm5 = vcmp.ge.s32.totalorder %v11651_v46, 0  ;;  %vm3934_vm2 = vcmp.lt.s32.totalorder %v11651_v46, 8  ;;  %v10814_v27 = vpop.f32.mrb[14].mxu0 }
 0x12f   : > { %vm13768_vm9 = vmpackc.low %vm20268_vm11, %vm20268_vm11  ;;  %5001 = vperm.xlu0 %11537, %v4964_v37   ;;  %vm20274_vm11 = vcmask 523264   ;;  %v834_v41 = vadd.f32 %v13529_v16, %v795_v63  ;;  %v1482_v37 = vsel %vm13707_vm10, 65537, %v19962_v22  ;;  %v9978_v63 = vcombine.low %v1480_v53, %v1481_v35  ;;  %v698_v21 = vpop.f32.mrb[15].mxu0 }
 0x130   : > { %vm13776_vm13 = vmand %vm3900_vm14, %vm3932_vm8  ;;  %906 = vst.msk [vmem:[#allocation2 + $0x30] sm:$0xff] %vm20274_vm11, %v889_v36  ;;  %vm1423_vm14 = vcmp.eq.s32.totalorder %v13313_v25, 1  ;;  %vm20276_vm8 = vcmp.ge.s32.totalorder %v12910_v11, 0  ;;  %v13810_v36 = vpop.permute.xlu0 %1918  ;;  %v794_v53 = vmul.f32 %v13521_v7, %v698_v21  ;;  %v9979_v1 = vcombine.low %v1482_v37, %v1483_v24  ;;  %v13844_v37 = vpop.permute.xlu1 %1927 }
 0x131   : > { %v20272_v28 = vsel %vm13776_vm13, 4294967295, %v20271_v28  ;;  %vm20275_vm6 = vmmov %vm20274_vm11  ;;  %vm20277_vm11 = vcmp.lt.s32.totalorder %v12910_v11, 8  ;;  %v1563_v11 = vshll.u32 %v9977_v31, 16  ;;  %v1568_v21 = vshrl.u32 %v9978_v63, 16  ;;  %v10817_v46 = vpop.f32.mrb[16].mxu0 }
 0x132   : > { %20273 = vst [vmem:[#allocation137_spill] sm:$0xff] %v20272_v28  ;;  %905 = vst.msk [vmem:[#allocation2 + $0x28] sm:$0xff] %vm20275_vm6, %v888_v54  ;;  %v793_v54 = vmul.f32 %v13521_v7, %v695_v59  ;;  %v1560_v28 = vshrl.u32 %v9977_v31, 16  ;;  %v796_v59 = vmul.f32 %v10814_v27, %v13521_v7  ;;  %v1484_v31 = vsel %vm13768_vm9, 65537, %v19962_v22 }
 0x133   : > { %vm4903_vm0 = vmand %vm13776_vm13, %vm20276_vm8  ;;  %vm20278_vm8 = vcmp.lt.s32.totalorder %v11650_v19, 8  ;;  %v1485_v19 = vsel %vm13760_vm3, 65537, %v19962_v22  ;;  %v833_v26 = vadd.f32 %v13529_v16, %v794_v53  ;;  %vm3933_vm9 = vcmp.lt.s32.totalorder %v11652_v13, 8 }
 0x134   : > { %vm4935_vm6 = vmand %vm4903_vm0, %vm20277_vm11  ;;  %vm20283_vm0 = vcmp.ge.s32.totalorder %v12924_v33, 0  ;;  %v832_v35 = vadd.f32 %v13529_v16, %v793_v54  ;;  %vm20284_vm11 = vcmp.lt.s32.totalorder %v12924_v33, 8  ;;  %v835_v27 = vadd.f32 %v13529_v16, %v796_v59  ;;  %v13864_v17 = vpop.permute.xlu0 %1924 }
 0x135   : > { %v4967_v39 = vsel %vm4935_vm6, 1, %v19962_v22  ;;  %vm13817_vm7 = vmand %vm20279_vm4, %vm20278_vm8  ;;  %v1571_v33 = vshll.u32 %v9978_v63, 16  ;;  %v1565_v59 = vrot.slane %v1563_v11, 5  ;;  %v20289_v63 = vmov 0 }
 0x136   : > { %v20281_v34 = vsel %vm13817_vm7, 4294967295, %v20280_v34  ;;  %5010 = vperm.xlu1 %11538, %v4967_v39   ;;  %vm4902_vm10 = vmand %vm13817_vm7, %vm20283_vm0  ;;  %v866_v39 = vmax.f32 %v834_v41, 0.0  ;;  %v864_v38 = vmax.f32 %v832_v35, 0.0  ;;  %v11653_v41 = vld [vmem:[%s19153_s10 + $0x48] sm:$0xff]  ;;  %v1562_v35 = vrot.slane %v1560_v28, 4 }
 0x137   : > { %20282 = vst [vmem:[#allocation138_spill] sm:$0xff] %v20281_v34  ;;  %vm4934_vm6 = vmand %vm4902_vm10, %vm20284_vm11  ;;  %v867_v53 = vmax.f32 %v835_v27, 0.0  ;;  %v865_v34 = vmax.f32 %v833_v26, 0.0  ;;  %v1577_v62 = vshrl.u32 %v9979_v1, 16  ;;  %v9980_v50 = vcombine.low %v1484_v31, %v1485_v19  ;;  %v711_v31 = vpop.f32.mrb[17].mxu0 }
 0x138   : > { %vm13839_vm8 = vmpackc.low %vm1423_vm14, %vm1423_vm14  ;;  %v4966_v24 = vsel %vm4934_vm6, 1, %v19962_v22  ;;  %vm1425_vm11 = vcmp.eq.s32.totalorder %v13336_v60, 1  ;;  %v1570_v27 = vrot.slane %v1568_v21, 4  ;;  %v1573_v26 = vrot.slane %v1571_v33, 5  ;;  %v11654_v33 = vld [vmem:[%s19153_s10 + $0x40] sm:$0xff] }
 0x139   : > { %vm13851_vm3 = vmpackc.low %vm1422_vm1, %vm1422_vm1  ;;  %5007 = vperm.xlu0 %11537, %v4966_v24   ;;  %v1580_v24 = vshll.u32 %v9979_v1, 16  ;;  %vm20292_vm1 = vcmp.ge.s32.totalorder %v12938_v5, 0  ;;  %v891_v11 = vpack.c.bf16 %v867_v53, %v866_v39  ;;  %v890_v28 = vpack.c.bf16 %v865_v34, %v864_v38 }
 0x13a   : > { %vm13860_vm4 = vmand %vm3902_vm5, %vm3934_vm2  ;;  %vm1424_vm2 = vcmp.eq.s32.totalorder %v13347_v9, 1  ;;  %vm20293_vm5 = vcmp.lt.s32.totalorder %v12938_v5, 8  ;;  %vm20294_vm7 = vcmp.ge.s32.totalorder %v11652_v13, 0  ;;  %v20295_v19 = vmov 0  ;;  %v13892_v13 = vpop.permute.xlu1 %1933 }
 0x13b   : > { %v20290_v63 = vsel %vm13860_vm4, 4294967295, %v20289_v63  ;;  %vm4905_vm0 = vmand %vm13860_vm4, %vm20292_vm1  ;;  %vm2002_vm1 = vcmp.eq.s32.totalorder %v13662_v15, 1  ;;  %v799_v34 = vmul.f32 %v10817_v46, %v13521_v7  ;;  %v1579_v39 = vrot.slane %v1577_v62, 4 }
 0x13c   : > { %20291 = vst [vmem:[#allocation139_spill] sm:$0xff] %v20290_v63  ;;  %vm4937_vm6 = vmand %vm4905_vm0, %vm20293_vm5  ;;  %v13882_v63 = vor.u32 %v1565_v59, %v1562_v35  ;;  %vm20298_vm0 = vcmp.ge.s32.totalorder %v12952_v30, 0  ;;  %v1582_v38 = vrot.slane %v1580_v24, 5  ;;  %v1586_v21 = vshrl.u32 %v9980_v50, 16  ;;  %v13921_v24 = vpop.permute.xlu0 %1930 }
 0x13d   : > { %v4969_v1 = vsel %vm4937_vm6, 1, %v19962_v22  ;;  %vm13877_vm13 = vmand %vm20294_vm7, %vm3933_vm9  ;;  %vm20299_vm9 = vcmask 523264   ;;  %vm20303_vm7 = vcmp.lt.s32.totalorder %v12952_v30, 8  ;;  %vm3935_vm14 = vcmp.lt.s32.totalorder %v11654_v33, 8  ;;  %v1269_v30 = vld [vmem:[#allocation2] sm:$0xf8] }
 0x13e   : > { %v20296_v19 = vsel %vm13877_vm13, 4294967295, %v20295_v19  ;;  %5016 = vperm.xlu1 %11538, %v4969_v1   ;;  %vm4904_vm5 = vmand %vm13877_vm13, %vm20298_vm0  ;;  %908 = vst.msk [vmem:[#allocation2 + $0x40] sm:$0xff] %vm20299_vm9, %v891_v11  ;;  %v1589_v59 = vshll.u32 %v9980_v50, 16  ;;  %v838_v50 = vadd.f32 %v13529_v16, %v799_v34  ;;  %v797_v9 = vmul.f32 %v13521_v7, %v711_v31  ;;  %v10818_v11 = vpop.f32.mrb[18].mxu0 }
 0x13f   : > { %20297 = vst [vmem:[#allocation140_spill] sm:$0xff] %v20296_v19  ;;  %vm20300_vm6 = vmmov %vm20299_vm9  ;;  %v1487_v46 = vsel %vm13839_vm8, 65537, %v19962_v22  ;;  %v1486_v15 = vsel %vm13851_vm3, 65537, %v19962_v22  ;;  %v800_v1 = vmul.f32 %v10818_v11, %v13521_v7  ;;  %v714_v34 = vpop.f32.mrb[19].mxu0  ;;  %v20311_v54 = vmov 0 }
 0x140   : > { %907 = vst.msk [vmem:[#allocation2 + $0x38] sm:$0xff] %vm20300_vm6, %v890_v28  ;;  %vm13900_vm0 = vmpackc.low %vm1425_vm11, %vm1425_vm11  ;;  %v1574_v28 = vor.u32 %v1573_v26, %v1570_v27  ;;  %v836_v25 = vadd.f32 %v13529_v16, %v797_v9  ;;  %v798_v26 = vmul.f32 %v13521_v7, %v714_v34  ;;  %v13948_v31 = vor.u32 %v1582_v38, %v1579_v39  ;;  %v13959_v34 = vpop.permute.xlu1 %1939 }
 0x141   : > { %vm4936_vm10 = vmand %vm4904_vm5, %vm20303_vm7  ;;  %vm20309_vm5 = vcmp.lt.s32.totalorder %v11653_v41, 8  ;;  %vm20310_vm7 = vcmp.ge.s32.totalorder %v11653_v41, 0  ;;  %vm20314_vm8 = vcmp.ge.s32.totalorder %v12194_v52, 0  ;;  %v870_v41 = vmax.f32 %v838_v50, 0.0 }
 0x142   : > { %vm13909_vm9 = vmpackc.low %vm1424_vm2, %vm1424_vm2  ;;  %v4968_v62 = vsel %vm4936_vm10, 1, %v19962_v22  ;;  %vm20308_vm10 = vcmp.eq.s32.totalorder %v13686_v49, 1  ;;  %v11567_v49 = vld [vmem:[%s19147_s4 + $0x60] sm:$0xff]   ;;  %v839_v11 = vadd.f32 %v13529_v16, %v800_v1  ;;  %v1591_v5 = vrot.slane %v1589_v59, 5 }
 0x143   : > { %vm13917_vm11 = vmpackc.low %vm2002_vm1, %vm2002_vm1  ;;  %5013 = vperm.xlu0 %11537, %v4968_v62   ;;  %v1588_v62 = vrot.slane %v1586_v21, 4  ;;  %v13955_v9 = vcombine.low %v1486_v15, %v1487_v46  ;;  %v868_v39 = vmax.f32 %v836_v25, 0.0  ;;  %v837_v38 = vadd.f32 %v13529_v16, %v798_v26  ;;  %11231 = vmatprep.subr.bf16.mxu1 %v11567_v49  ;;  %v13975_v46 = vpop.permute.xlu0 %1936 }
 0x144   : > { %vm2033_vm2 = vmpackc.low %vm20308_vm10, %vm20308_vm10  ;;  %vm20315_vm10 = vcmp.lt.s32.totalorder %v12972_v57, 8  ;;  %v20317_v50 = vmov 0  ;;  %v871_v59 = vmax.f32 %v839_v11, 0.0  ;;  %11235 = vmatpush3.bf16.msra.mxu1 %v11567_v49  ;;  %v10821_v11 = vpop.f32.mrb[20].mxu0  ;;  %v14037_v35 = vpop.permute.xlu1 %1945  ;;  %vm2005_vm1 = vcmp.eq.s32.totalorder %v13810_v36, 1 }
 0x145   : > { %v2065_v27 = vsel %vm2033_vm2, 65537, %v19962_v22  ;;  %vm13939_vm6 = vmand %vm20310_vm7, %vm20309_vm5  ;;  %vm20316_vm5 = vcmp.ge.s32.totalorder %v11654_v33, 0  ;;  %v869_v15 = vmax.f32 %v837_v38, 0.0  ;;  %vm20392_vm13 = vcmask 1043456  }
 0x146   : > { %v20312_v54 = vsel %vm13939_vm6, 4294967295, %v20311_v54  ;;  %vm4907_vm3 = vmand %vm13939_vm6, %vm20314_vm8  ;;  %v9993_v21 = vcombine.low %v2065_v27, %v2065_v27  ;;  %vm1426_vm8 = vcmp.eq.s32.totalorder %v13370_v0, 1  ;;  %vm20323_vm6 = vcmp.lt.s32.totalorder %v12210_v55, 8 }
 0x147   : > { %20313 = vst [vmem:[#allocation141_spill] sm:$0xff] %v20312_v54  ;;  %vm4939_vm2 = vmand %vm4907_vm3, %vm20315_vm10  ;;  %vm20320_vm3 = vcmp.ge.s32.totalorder %v12210_v55, 0  ;;  %v13989_v27 = vor.u32 %v1591_v5, %v1588_v62  ;;  %v892_v49 = vpack.c.bf16 %v869_v15, %v868_v39  ;;  %v11568_v5 = vld [vmem:[%s19147_s4 + $0x68] sm:$0xff]   ;;  %v1488_v15 = vsel %vm13909_vm9, 65537, %v19962_v22  ;;  %v20438_v55 = vld [vmem:[#allocation52_spill] sm:$0xff] }
 0x148   : > { %v4971_v52 = vsel %vm4939_vm2, 1, %v19962_v22  ;;  %vm13965_vm7 = vmand %vm20316_vm5, %vm3935_vm14  ;;  %vm20321_vm14 = vcmp.ne.s16.totalorder %v13882_v63, 0  ;;  %vm20322_vm2 = vsmask.f32 3328  ;;  %vm1427_vm5 = vcmp.eq.s32.totalorder %v13362_v45, 1  ;;  %11232 = vmatprep.subr.bf16.mxu1 %v11568_v5  ;;  %v14105_v36 = vpop.permute.xlu1 %1951 }
 0x149   : > { %v20318_v50 = vsel %vm13965_vm7, 4294967295, %v20317_v50  ;;  %5022 = vperm.xlu1 %11538, %v4971_v52   ;;  %vm4906_vm10 = vmand %vm13965_vm7, %vm20320_vm3  ;;  %v13979_v33 = vsel %vm20321_vm14, %v1269_v30, 0  ;;  %v13983_v1 = vsel %vm20322_vm2, %v1574_v28, %v13948_v31  ;;  %v893_v52 = vpack.c.bf16 %v871_v59, %v870_v41  ;;  %v1872_v30 = vld [vmem:[#allocation2] sm:$0xf0]  ;;  %11236 = vmatpush3.bf16.msra.mxu1 %v11568_v5 }
 0x14a   : > { %20319 = vst [vmem:[#allocation142_spill] sm:$0xff] %v20318_v50  ;;  %vm4938_vm3 = vmand %vm4906_vm10, %vm20323_vm6  ;;  %vm20324_vm14 = vcmp.eq.s32.totalorder %v13732_v56, 1  ;;  %vm20327_vm6 = vsmask.f32 3328  ;;  %vm14009_vm10 = vcmp.ne.s16.totalorder %v9993_v21, 0  ;;  %vm20331_vm7 = vcmask 523264  }
 0x14b   : > { %v4970_v25 = vsel %vm4938_vm3, 1, %v19962_v22  ;;  %vm13997_vm2 = vmpackc.low %vm20324_vm14, %vm20324_vm14  ;;  %v14006_v62 = vsel %vm20327_vm6, %v13882_v63, %v1574_v28  ;;  %vm20330_vm3 = vcmp.eq.s32.totalorder %v13750_v6, 1  ;;  %910 = vst.msk [vmem:[#allocation2 + $0x50] sm:$0xff] %vm20331_vm7, %v893_v52  ;;  %v727_v56 = vpop.f32.mrb[21].mxu0  ;;  %v2475_v39 = vshrl.u32 %v13979_v33, 16  ;;  %v1270_v52 = vld [vmem:[#allocation2 + $0x8] sm:$0xff] }
 0x14c   : > { %5019 = vperm.xlu0 %11537, %v4970_v25   ;;  %vm2035_vm14 = vmpackc.low %vm20330_vm3, %vm20330_vm3  ;;  %v1489_v63 = vsel %vm13900_vm0, 65537, %v19962_v22  ;;  %v2066_v6 = vsel %vm13917_vm11, 65537, %v19962_v22  ;;  %vm20334_vm7 = vcmp.ge.s32.totalorder %v12254_v3, 0  ;;  %vm20335_vm0 = vcmask 523264  }
 0x14d   : > { %vm14025_vm6 = vmpackc.low %vm1427_vm5, %vm1427_vm5  ;;  %v2067_v21 = vsel %vm2035_vm14, 65537, %v19962_v22  ;;  %909 = vst.msk [vmem:[#allocation2 + $0x48] sm:$0xff] %vm20335_vm0, %v892_v49  ;;  %v803_v45 = vmul.f32 %v10821_v11, %v13521_v7  ;;  %vm20336_vm11 = vcmp.lt.s32.totalorder %v12254_v3, 8  ;;  %vm2006_vm14 = vcmp.eq.s32.totalorder %v13786_v47, 1  ;;  %v14062_v11 = vpop.permute.xlu0 %1942 }
 0x14e   : > { %vm4909_vm3 = vmand %vm13291_vm15, %vm20334_vm7  ;;  %v9994_v60 = vcombine.low %v2066_v6, %v2067_v21  ;;  %v2163_v53 = vsel %vm14009_vm10, %v1872_v30, 0  ;;  %vm20339_vm9 = vcmp.ge.s32.totalorder %v12280_v12, 0  ;;  %v801_v0 = vmul.f32 %v13521_v7, %v727_v56  ;;  %v10822_v6 = vpop.f32.mrb[22].mxu0 }
 0x14f   : > { %vm4941_vm5 = vmand %vm4909_vm3, %vm20336_vm11  ;;  %vm20340_vm3 = vnez %v20108_v44  ;;  %v842_v5 = vadd.f32 %v13529_v16, %v803_v45  ;;  %v1598_v21 = vshll.u32 %v13955_v9, 16  ;;  %vm20343_vm10 = vcmp.lt.s32.totalorder %v12280_v12, 8  ;;  %v730_v38 = vpop.f32.mrb[23].mxu0 }
 0x150   : > { %vm14051_vm7 = vmpackc.low %vm1426_vm8, %vm1426_vm8  ;;  %v4973_v49 = vsel %vm4941_vm5, 1, %v19962_v22  ;;  %vm14067_vm8 = vcmp.ne.s16.totalorder %v9994_v60, 0  ;;  %v804_v30 = vmul.f32 %v10822_v6, %v13521_v7  ;;  %v14074_v41 = vrot.slane %v2475_v39, 3  ;;  %v11569_v39 = vld [vmem:[%s19147_s4 + $0x70] sm:$0xff]  }
 0x151   : > { %vm4908_vm0 = vmand %vm20340_vm3, %vm20339_vm9  ;;  %5028 = vperm.xlu1 %11538, %v4973_v49   ;;  %v14076_v3 = vcombine.low %v1488_v15, %v1489_v63  ;;  %v2164_v60 = vsel %vm14067_vm8, %v1270_v52, 0  ;;  %v2207_v49 = vrot.slane %v2163_v53, 4  ;;  %v840_v63 = vadd.f32 %v13529_v16, %v801_v0  ;;  %11233 = vmatprep.subr.bf16.mxu1 %v11569_v39 }
 0x152   : > { %vm4940_vm11 = vmand %vm4908_vm0, %vm20343_vm10  ;;  %v2208_v47 = vrot.slane %v2164_v60, 4  ;;  %v843_v15 = vadd.f32 %v13529_v16, %v804_v30  ;;  %v2068_v59 = vsel %vm13997_vm2, 65537, %v19962_v22  ;;  %vm20346_vm8 = vcmp.ge.s32.totalorder %v12304_v20, 0  ;;  %v1271_v30 = vld [vmem:[#allocation2 + $0x10] sm:$0xff]  ;;  %11237 = vmatpush3.bf16.msra.mxu1 %v11569_v39 }
 0x153   : > { %v4972_v56 = vsel %vm4940_vm11, 1, %v19962_v22  ;;  %vm14082_vm5 = vmpackc.low %vm2006_vm14, %vm2006_vm14  ;;  %vm20347_vm10 = vnez %v20079_v29  ;;  %v874_v53 = vmax.f32 %v842_v5, 0.0  ;;  %v802_v0 = vmul.f32 %v13521_v7, %v730_v38  ;;  %v14119_v5 = vpop.permute.xlu0 %1948 }
 0x154   : > { %5025 = vperm.xlu0 %11537, %v4972_v56   ;;  %vm2037_vm0 = vmpackc.low %vm2005_vm1, %vm2005_vm1  ;;  %vm20348_vm14 = vcmp.lt.s32.totalorder %v12304_v20, 8  ;;  %vm2008_vm2 = vcmp.eq.s32.totalorder %v13844_v37, 1  ;;  %vm20349_vm3 = vcmask 1043456   ;;  %vm20352_vm1 = vcmask 523264  }
 0x155   : > { %v2069_v52 = vsel %vm2037_vm0, 65537, %v19962_v22  ;;  %vm4911_vm11 = vmand %vm20347_vm10, %vm20346_vm8  ;;  %v2209_v26 = vsel %vm20349_vm3, %v2207_v49, %v2208_v47  ;;  %vm20350_vm8 = vcmp.ge.s32.totalorder %v12331_v32, 0  ;;  %vm20351_vm10 = vnez %v20085_v51 }
 0x156   : > { %v9995_v6 = vcombine.low %v2068_v59, %v2069_v52  ;;  %vm4943_vm9 = vmand %vm4911_vm11, %vm20348_vm14  ;;  %10839 = vmatprep.mubr.msk.bf16.mxu0 %vm20352_vm1, %v2209_v26  ;;  %v872_v38 = vmax.f32 %v840_v63, 0.0  ;;  %v875_v60 = vmax.f32 %v843_v15, 0.0  ;;  %v841_v59 = vadd.f32 %v13529_v16, %v802_v0 }
 0x157   : > { %v4975_v56 = vsel %vm4943_vm9, 1, %v19962_v22  ;;  %vm4910_vm15 = vmand %vm20351_vm10, %vm20350_vm8  ;;  %v20353_v52 = vshrl.u32 %v13955_v9, 16  ;;  %v14127_v39 = vrot.slane %v1598_v21, 5  ;;  %vm20354_vm3 = vcmp.eq.s32.totalorder %v13387_v42, 1  ;;  %v14200_v25 = vpop.permute.xlu0 %1954 }
 0x158   : > { %vm14132_vm9 = vmpackc.low %vm20354_vm3, %vm20354_vm3  ;;  %vm20357_vm14 = vcmp.eq.s32.totalorder %v13396_v61, 1  ;;  %vm14143_vm1 = vcmp.ne.s16.totalorder %v9995_v6, 0  ;;  %5034 = vperm.xlu1 %11538, %v4975_v56   ;;  %vm20362_vm8 = vcmp.lt.s32.totalorder %v12331_v32, 8  ;;  %v20363_v42 = vshll.u32 %v13979_v33, 16  ;;  %v10825_v56 = vpop.f32.mrb[24].mxu0  ;;  %v11570_v33 = vld [vmem:[%s19147_s4 + $0x78] sm:$0xff]  }
 0x159   : > { %v14125_v49 = vrot.slane %v20353_v52, 4  ;;  %vm14139_vm11 = vmpackc.low %vm20357_vm14, %vm20357_vm14  ;;  %v2165_v0 = vsel %vm14143_vm1, %v1271_v30, 0  ;;  %v895_v6 = vpack.c.bf16 %v875_v60, %v874_v53  ;;  %v873_v26 = vmax.f32 %v841_v59, 0.0  ;;  %v743_v30 = vpop.f32.mrb[25].mxu0  ;;  %11234 = vmatprep.subr.bf16.mxu1 %v11570_v33  ;;  %v14262_v61 = vld [vmem:[#allocation2 + $0x20] sm:$0xff] }
 0x15a   : > { %vm4942_vm0 = vmand %vm4910_vm15, %vm20362_vm8  ;;  %v14151_v21 = vrot.slane %v20363_v42, 4  ;;  %v1604_v52 = vshrl.u32 %v14076_v3, 16  ;;  %v1607_v42 = vshll.u32 %v14076_v3, 16  ;;  %v1491_v37 = vsel %vm14025_vm6, 65537, %v19962_v22  ;;  %v14182_v3 = vpop.permute.xlu1 %1957  ;;  %11238 = vmatpush3.bf16.msra.mxu1 %v11570_v33 }
 0x15b   : > { %v4974_v15 = vsel %vm4942_vm0, 1, %v19962_v22  ;;  %vm14157_vm3 = vmpackc.low %vm2008_vm2, %vm2008_vm2  ;;  %vm20366_vm15 = vcmp.eq.s32.totalorder %v13864_v17, 1  ;;  %v2210_v53 = vrot.slane %v2165_v0, 4  ;;  %v2070_v60 = vsel %vm14082_vm5, 65537, %v19962_v22  ;;  %v1272_v0 = vld [vmem:[#allocation2 + $0x18] sm:$0xff] }
 0x15c   : > { %5031 = vperm.xlu0 %11537, %v4974_v15   ;;  %vm2039_vm2 = vmpackc.low %vm20366_vm15, %vm20366_vm15  ;;  %vm20367_vm0 = vcmp.ge.s32.totalorder %v12355_v40, 0  ;;  %vm20368_vm14 = vnez %v20091_v8  ;;  %vm20369_vm6 = vcmask 523264   ;;  %v894_v17 = vpack.c.bf16 %v873_v26, %v872_v38  ;;  %v10826_v26 = vpop.f32.mrb[26].mxu0  ;;  %v20561_v8 = vld [vmem:[#allocation107_spill] sm:$0xff] }
 0x15d   : > { %v2071_v59 = vsel %vm2039_vm2, 65537, %v19962_v22  ;;  %vm4913_vm1 = vmand %vm20368_vm14, %vm20367_vm0  ;;  %912 = vst.msk [vmem:[#allocation2 + $0x60] sm:$0xff] %vm20369_vm6, %v895_v6  ;;  %v807_v28 = vmul.f32 %v10825_v56, %v13521_v7  ;;  %v1490_v45 = vsel %vm14051_vm7, 65537, %v19962_v22  ;;  %vm20370_vm5 = vcmp.lt.s32.totalorder %v12355_v40, 8 }
 0x15e   : > { %v9996_v9 = vcombine.low %v2070_v60, %v2071_v59  ;;  %vm4945_vm8 = vmand %vm4913_vm1, %vm20370_vm5  ;;  %vm2010_vm15 = vcmp.eq.s32.totalorder %v13892_v13, 1  ;;  %vm20371_vm2 = vcmask 1043456   ;;  %vm20372_vm6 = vcmp.ge.s32.totalorder %v12379_v48, 0 }
 0x15f   : > { %v2211_v15 = vsel %vm20371_vm2, %v2208_v47, %v2210_v53  ;;  %v4977_v38 = vsel %vm4945_vm8, 1, %v19962_v22  ;;  %vm20373_vm14 = vnez %v20097_v10  ;;  %vm2009_vm7 = vcmp.eq.s32.totalorder %v13921_v24, 1 }
 0x160   : > { %vm4912_vm10 = vmand %vm20373_vm14, %vm20372_vm6  ;;  %vm20374_vm1 = vcmask 523264   ;;  %v846_v47 = vadd.f32 %v13529_v16, %v807_v28  ;;  %v805_v6 = vmul.f32 %v13521_v7, %v743_v30  ;;  %v1606_v56 = vrot.slane %v1604_v52, 4  ;;  %5040 = vperm.xlu1 %11538, %v4977_v38   ;;  %v20412_v52 = vld [vmem:[#allocation73_spill] sm:$0xff] }
 0x161   : > { %10840 = vmatmul.mubr.msk.bf16.vlgmr.msra.gmra.mrb[32].mxu0 %vm20374_vm1, %v2211_v15  ;;  %vm20375_vm5 = vmmov %vm20374_vm1  ;;  %v1609_v33 = vrot.slane %v1607_v42, 5  ;;  %vm14207_vm2 = vcmp.ne.s16.totalorder %v9996_v9, 0  ;;  %vm20378_vm6 = vcmp.lt.s32.totalorder %v12379_v48, 8  ;;  %v808_v59 = vmul.f32 %v10826_v26, %v13521_v7  ;;  %v14257_v26 = vpop.permute.xlu1 %1963 }
 0x162   : > { %911 = vst.msk [vmem:[#allocation2 + $0x58] sm:$0xff] %vm20375_vm5, %v894_v17  ;;  %vm4944_vm0 = vmand %vm4912_vm10, %vm20378_vm6  ;;  %v746_v17 = vpop.f32.mrb[27].mxu0  ;;  %v14214_v15 = vcombine.low %v1490_v45, %v1491_v37  ;;  %v2166_v42 = vsel %vm14207_vm2, %v1272_v0, 0  ;;  %v844_v28 = vadd.f32 %v13529_v16, %v805_v6  ;;  %vm20381_vm10 = vcmp.eq.s32.totalorder %v13413_v23, 1  ;;  %v20387_v6 = vld [vmem:[#allocation42_spill] sm:$0xff]  ;;  %v20440_v0 = vld [vmem:[#allocation116_spill] sm:$0xff] }
 0x163   : > { %v4976_v30 = vsel %vm4944_vm0, 1, %v19962_v22  ;;  %vm14220_vm1 = vmpackc.low %vm2010_vm15, %vm2010_vm15  ;;  %v2212_v13 = vrot.slane %v2166_v42, 4  ;;  %v878_v45 = vmax.f32 %v846_v47, 0.0  ;;  %v847_v9 = vadd.f32 %v13529_v16, %v808_v59  ;;  %v20389_v47 = vld [vmem:[#allocation112_spill] sm:$0xff] }
 0x164   : > { %vm14230_vm5 = vmpackc.low %vm20381_vm10, %vm20381_vm10  ;;  %5037 = vperm.xlu0 %11537, %v4976_v30   ;;  %v806_v23 = vmul.f32 %v13521_v7, %v746_v17  ;;  %vm20384_vm2 = vcmp.eq.s32.totalorder %v13421_v43, 1  ;;  %v2072_v38 = vsel %vm14157_vm3, 65537, %v19962_v22  ;;  %vm20390_vm6 = vnez %v20389_v47  ;;  %v20528_v47 = vld [vmem:[#allocation123_spill] sm:$0xff] }
 0x165   : > { %vm2041_vm15 = vmpackc.low %vm2009_vm7, %vm2009_vm7  ;;  %vm20388_vm7 = vcmp.ge.s32.totalorder %v20387_v6, 0  ;;  %vm2012_vm8 = vcmp.eq.s32.totalorder %v13959_v34, 1  ;;  %v876_v43 = vmax.f32 %v844_v28, 0.0  ;;  %v2213_v59 = vsel %vm20392_vm13, %v2210_v53, %v2212_v13  ;;  %v14277_v53 = vpop.permute.xlu0 %1960 }
 0x166   : > { %vm14244_vm10 = vmpackc.low %vm20384_vm2, %vm20384_vm2  ;;  %v2073_v24 = vsel %vm2041_vm15, 65537, %v19962_v22  ;;  %vm20391_vm2 = vcmp.lt.s32.totalorder %v20387_v6, 8  ;;  %v879_v17 = vmax.f32 %v847_v9, 0.0  ;;  %v845_v30 = vadd.f32 %v13529_v16, %v806_v23 }
 0x167   : > { %vm4915_vm0 = vmand %vm20390_vm6, %vm20388_vm7  ;;  %v9997_v60 = vcombine.low %v2072_v38, %v2073_v24  ;;  %v1493_v42 = vsel %vm14132_vm9, 65537, %v19962_v22  ;;  %v1492_v48 = vsel %vm14139_vm11, 65537, %v19962_v22  ;;  %v20393_v38 = vld [vmem:[#allocation45_spill] sm:$0xff]  ;;  %vm2011_vm15 = vcmp.eq.s32.totalorder %v13975_v46, 1  ;;  %v14323_v46 = vpop.permute.xlu1 %1969 }
 0x168   : > { %vm4947_vm14 = vmand %vm4915_vm0, %vm20391_vm2  ;;  %vm20394_vm3 = vcmp.ge.s32.totalorder %v20393_v38, 0  ;;  %v20395_v24 = vld [vmem:[#allocation113_spill] sm:$0xff]  ;;  %vm20397_vm7 = vcmask 523264   ;;  %v1613_v20 = vshrl.u32 %v14214_v15, 16  ;;  %vm20400_vm11 = vcmp.lt.s32.totalorder %v20393_v38, 8 }
 0x169   : > { %v4979_v28 = vsel %vm4947_vm14, 1, %v19962_v22  ;;  %vm20396_vm0 = vnez %v20395_v24  ;;  %10843 = vmatprep.mubr.msk.bf16.mxu0 %vm20397_vm7, %v2213_v59  ;;  %vm14281_vm9 = vcmp.ne.s16.totalorder %v9997_v60, 0  ;;  %v897_v63 = vpack.c.bf16 %v879_v17, %v878_v45  ;;  %vm14295_vm2 = vmpackc.low %vm2012_vm8, %vm2012_vm8  ;;  %v20526_v24 = vld [vmem:[#allocation70_spill] sm:$0xff] }
 0x16a   : > { %vm4914_vm13 = vmand %vm20396_vm0, %vm20394_vm3  ;;  %5046 = vperm.xlu1 %11538, %v4979_v28   ;;  %v877_v9 = vmax.f32 %v845_v30, 0.0  ;;  %v14289_v23 = vor.u32 %v14127_v39, %v14125_v49  ;;  %v2167_v59 = vsel %vm14281_vm9, %v14262_v61, 0  ;;  %v10829_v28 = vpop.f32.mrb[28].mxu0  ;;  %v1616_v49 = vshll.u32 %v14214_v15, 16  ;;  %v20404_v15 = vld [vmem:[#allocation48_spill] sm:$0xff] }
 0x16b   : > { %vm4946_vm14 = vmand %vm4914_vm13, %vm20400_vm11  ;;  %v14305_v39 = vcombine.low %v1492_v48, %v1493_v42  ;;  %v14310_v34 = vrot.slane %v2167_v59, 4  ;;  %v759_v30 = vpop.f32.mrb[29].mxu0  ;;  %v14313_v16 = vor.u32 %v1609_v33, %v1606_v56  ;;  %v2074_v45 = vsel %vm14220_vm1, 65537, %v19962_v22  ;;  %v20411_v33 = vld [vmem:[#allocation122_spill] sm:$0xff]  ;;  %v20419_v59 = vld [vmem:[#allocation49_spill] sm:$0xff] }
 0x16c   : > { %v4978_v6 = vsel %vm4946_vm14, 1, %v19962_v22  ;;  %vm2043_vm8 = vmpackc.low %vm2011_vm15, %vm2011_vm15  ;;  %v896_v17 = vpack.c.bf16 %v877_v9, %v876_v43  ;;  %vm20405_vm13 = vcmp.ge.s32.totalorder %v20404_v15, 0  ;;  %v811_v42 = vmul.f32 %v10829_v28, %v13521_v7  ;;  %v20421_v28 = vld [vmem:[#allocation115_spill] sm:$0xff] }
 0x16d   : > { %5043 = vperm.xlu0 %11537, %v4978_v6   ;;  %vm20403_vm3 = vmmov %vm20397_vm7  ;;  %v2075_v48 = vsel %vm2043_vm8, 65537, %v19962_v22  ;;  %v20406_v6 = vld [vmem:[#allocation114_spill] sm:$0xff]  ;;  %vm20408_vm15 = vcmp.eq.s32.totalorder %v13436_v58, 1  ;;  %vm20413_vm8 = vcmp.lt.s32.totalorder %v20404_v15, 8  ;;  %vm20415_vm0 = vcmask 523264   ;;  %v10830_v15 = vpop.f32.mrb[30].mxu0 }
 0x16e   : > { %914 = vst.msk [vmem:[#allocation2 + $0x70] sm:$0xff] %vm20403_vm3, %v897_v63  ;;  %vm20407_vm7 = vnez %v20406_v6  ;;  %v1615_v63 = vrot.slane %v1613_v20, 4  ;;  %vm14329_vm11 = vmpackc.low %vm20408_vm15, %vm20408_vm15  ;;  %v9998_v43 = vcombine.low %v2074_v45, %v2075_v48  ;;  %v14340_v20 = vld [vmem:[#allocation2 + $0x28] sm:$0xff]  ;;  %vm20416_vm15 = vcmp.eq.s32.totalorder %v13447_v18, 1  ;;  %v11655_v18 = vld [vmem:[%s19146_s3] ss:$0 sm:$0xff] }
 0x16f   : > { %vm4917_vm9 = vmand %vm20407_vm7, %vm20405_vm13  ;;  %vm20414_vm7 = vcmask 1043456   ;;  %913 = vst.msk [vmem:[#allocation2 + $0x68] sm:$0xff] %vm20415_vm0, %v896_v17  ;;  %v850_v45 = vadd.f32 %v11655_v18, %v811_v42  ;;  %v11656_v17 = vld [vmem:[%s19145_s2] ss:$0 sm:$0xff]  ;;  %v1618_v38 = vrot.slane %v1616_v49, 5  ;;  %v1622_v40 = vshrl.u32 %v14305_v39, 16 }
 0x170   : > { %vm4949_vm3 = vmand %vm4917_vm9, %vm20413_vm8  ;;  %v2215_v7 = vsel %vm20414_vm7, %v2212_v13, %v14310_v34  ;;  %vm20420_vm9 = vcmp.ge.s32.totalorder %v20419_v59, 0  ;;  %vm20422_vm8 = vnez %v20421_v28  ;;  %v14356_v13 = vpop.permute.xlu0 %1966  ;;  %v809_v48 = vmul.f32 %v11656_v17, %v759_v30  ;;  %v762_v12 = vpop.f32.mrb[31].mxu0  ;;  %v20446_v6 = vld [vmem:[#allocation117_spill] sm:$0xff] }
 0x171   : > { %vm14346_vm6 = vmpackc.low %vm20416_vm15, %vm20416_vm15  ;;  %v4981_v9 = vsel %vm4949_vm3, 1, %v19962_v22  ;;  %v1625_v42 = vshll.u32 %v14305_v39, 16  ;;  %v1495_v30 = vsel %vm14230_vm5, 65537, %v19962_v22  ;;  %vm20427_vm15 = vcmp.eq.s32.totalorder %v13462_v2, 1  ;;  %v14677_v49 = vld [vmem:[#allocation2 + $0x48] sm:$0xff] }
 0x172   : > { %vm4916_vm14 = vmand %vm20422_vm8, %vm20420_vm9  ;;  %5052 = vperm.xlu1 %11538, %v4981_v9   ;;  %vm20430_vm7 = vcmp.eq.s32.totalorder %v13470_v14, 1  ;;  %v1494_v14 = vsel %vm14244_vm10, 65537, %v19962_v22  ;;  %v2076_v57 = vsel %vm14295_vm2, 65537, %v19962_v22  ;;  %vm20441_vm10 = vnez %v20440_v0  ;;  %v20444_v0 = vld [vmem:[#allocation55_spill] sm:$0xff] }
 0x173   : > { %vm20423_vm1 = vmmov %vm20415_vm0  ;;  %vm14366_vm0 = vcmp.ne.s16.totalorder %v9998_v43, 0  ;;  %v810_v28 = vmul.f32 %v11656_v17, %v762_v12  ;;  %vm2015_vm8 = vcmp.eq.s32.totalorder %v14119_v5, 1  ;;  %vm20443_vm2 = vcmask 1043456  }
 0x174   : > { %10844 = vmatmul.mubr.msk.bf16.gmra.mrb[36].mxu0 %vm20423_vm1, %v2215_v7  ;;  %vm20426_vm1 = vcmp.lt.s32.totalorder %v20419_v59, 8  ;;  %v812_v7 = vmul.f32 %v11656_v17, %v10830_v15  ;;  %vm14379_vm9 = vmpackc.low %vm20427_vm15, %vm20427_vm15  ;;  %v2168_v2 = vsel %vm14366_vm0, %v14340_v20, 0  ;;  %v20437_v59 = vld [vmem:[#allocation125_spill] sm:$0xff]  ;;  %vm20439_vm0 = vcmp.ge.s32.totalorder %v20438_v55, 0 }
 0x175   : > { %vm4948_vm3 = vmand %vm4916_vm14, %vm20426_vm1  ;;  %vm20433_vm14 = vcmp.eq.s32.totalorder %v14037_v35, 1  ;;  %v2216_v15 = vrot.slane %v2168_v2, 4  ;;  %v848_v35 = vadd.f32 %v11655_v18, %v809_v48  ;;  %v14424_v48 = vld [vmem:[#allocation2 + $0x30] sm:$0xff]  ;;  %vm20448_vm4 = vcmask 523264   ;;  %20532 = vst [vmem:[#allocation125_spill] sm:$0xff] %v14677_v49 }
 0x176   : > { %vm14386_vm13 = vmpackc.low %vm20430_vm7, %vm20430_vm7  ;;  %v4980_v39 = vsel %vm4948_vm3, 1, %v19962_v22  ;;  %vm20436_vm7 = vcmp.eq.s32.totalorder %v14062_v11, 1  ;;  %v851_v9 = vadd.f32 %v11655_v18, %v812_v7  ;;  %v882_v11 = vmax.f32 %v850_v45, 0.0 }
 0x177   : > { %vm14394_vm5 = vmpackc.low %vm20433_vm14, %vm20433_vm14  ;;  %5049 = vperm.xlu0 %11537, %v4980_v39   ;;  %v14416_v39 = vpop.permute.xlu1 %1975  ;;  %vm20442_vm14 = vcmp.lt.s32.totalorder %v20438_v55, 8  ;;  %vm2016_vm3 = vcmp.eq.s32.totalorder %v14105_v36, 1  ;;  %v2217_v60 = vsel %vm20443_vm2, %v14310_v34, %v2216_v15  ;;  %v880_v12 = vmax.f32 %v848_v35, 0.0  ;;  %v20449_v55 = vld [vmem:[#allocation77_spill] sm:$0xff] }
 0x178   : > { %vm2045_vm1 = vmpackc.low %vm20436_vm7, %vm20436_vm7  ;;  %10847 = vmatprep.mubr.msk.bf16.mxu0 %vm20448_vm4, %v2217_v60  ;;  %v883_v45 = vmax.f32 %v851_v9, 0.0  ;;  %v849_v17 = vadd.f32 %v11655_v18, %v810_v28  ;;  %v1624_v9 = vrot.slane %v1622_v40, 4  ;;  %v9985_v60 = vcombine.low %v1494_v14, %v1495_v30  ;;  %v20464_v30 = vld [vmem:[#allocation58_spill] sm:$0xff] }
 0x179   : > { %v2077_v32 = vsel %vm2045_vm1, 65537, %v19962_v22  ;;  %vm4919_vm15 = vmand %vm20441_vm10, %vm20439_vm0  ;;  %vm20445_vm1 = vcmp.ge.s32.totalorder %v20444_v0, 0  ;;  %vm20447_vm0 = vnez %v20446_v6  ;;  %v1497_v34 = vsel %vm14329_vm11, 65537, %v19962_v22 }
 0x17a   : > { %v9999_v2 = vcombine.low %v2076_v57, %v2077_v32  ;;  %vm4951_vm7 = vmand %vm4919_vm15, %vm20442_vm14  ;;  %v14431_v57 = vpop.permute.xlu0 %1972  ;;  %v14434_v32 = vor.u32 %v1618_v38, %v1615_v63  ;;  %v899_v28 = vpack.c.bf16 %v883_v45, %v882_v11  ;;  %v881_v18 = vmax.f32 %v849_v17, 0.0  ;;  %v14499_v17 = vld [vmem:[#allocation2 + $0x38] sm:$0xff] }
 0x17b   : > { %v4983_v7 = vsel %vm4951_vm7, 1, %v19962_v22  ;;  %vm4918_vm10 = vmand %vm20447_vm0, %vm20445_vm1  ;;  %vm20452_vm7 = vcmp.lt.s32.totalorder %v20444_v0, 8  ;;  %vm20453_vm1 = vsmask.f32 3328  ;;  %v2078_v5 = vsel %vm14394_vm5, 65537, %v19962_v22  ;;  %v14489_v14 = vpop.permute.xlu1 %1981 }
 0x17c   : > { %vm14437_vm14 = vcmp.ne.s16.totalorder %v9999_v2, 0  ;;  %5058 = vperm.xlu1 %11538, %v4983_v7   ;;  %vm4950_vm2 = vmand %vm4918_vm10, %vm20452_vm7  ;;  %v14446_v6 = vsel %vm20453_vm1, %v13948_v31, %v13989_v27  ;;  %v1627_v2 = vrot.slane %v1625_v42, 5  ;;  %v20456_v31 = vld [vmem:[#allocation81_spill] sm:$0xff]  ;;  %v20457_v7 = vld [vmem:[#allocation128_spill] sm:$0xff]  ;;  %vm20461_vm1 = vcmp.eq.s32.totalorder %v20412_v52, 1 }
 0x17d   : > { %v4982_v35 = vsel %vm4950_vm2, 1, %v19962_v22  ;;  %vm14452_vm4 = vmpackc.low %vm2016_vm3, %vm2016_vm3  ;;  %v2169_v63 = vsel %vm14437_vm14, %v14424_v48, 0  ;;  %vm20458_vm14 = vcmp.eq.s32.totalorder %v20411_v33, 1  ;;  %vm20465_vm11 = vcmp.ge.s32.totalorder %v20464_v30, 0  ;;  %v20466_v33 = vld [vmem:[#allocation118_spill] sm:$0xff] }
 0x17e   : > { %5055 = vperm.xlu0 %11537, %v4982_v35   ;;  %vm2047_vm3 = vmpackc.low %vm2015_vm8, %vm2015_vm8  ;;  %v2218_v36 = vrot.slane %v2169_v63, 4  ;;  %vm20467_vm8 = vnez %v20466_v33  ;;  %vm20468_vm10 = vcmask 523264   ;;  %v898_v52 = vpack.c.bf16 %v881_v18, %v880_v12  ;;  %v20471_v35 = vld [vmem:[#allocation89_spill] sm:$0xff]  ;;  %v20474_v12 = vld [vmem:[#allocation119_spill] sm:$0xff]  ;;  %v14508_v58 = vpop.permute.xlu0 %1978 }
 0x17f   : > { %vm14470_vm2 = vmpackc.low %vm20458_vm14, %vm20458_vm14  ;;  %v2079_v56 = vsel %vm2047_vm3, 65537, %v19962_v22  ;;  %916 = vst.msk [vmem:[#allocation2 + $0x80] sm:$0xff] %vm20468_vm10, %v899_v28  ;;  %v1496_v11 = vsel %vm14346_vm6, 65537, %v19962_v22  ;;  %vm2018_vm3 = vcmp.eq.s32.totalorder %v14182_v3, 1  ;;  %vm20470_vm15 = vcmask 1043456   ;;  %v20472_v28 = vld [vmem:[#allocation61_spill] sm:$0xff] }
 0x180   : > { %vm14477_vm7 = vmpackc.low %vm20461_vm1, %vm20461_vm1  ;;  %v10000_v45 = vcombine.low %v2078_v5, %v2079_v56  ;;  %vm20469_vm1 = vcmp.lt.s32.totalorder %v20464_v30, 8  ;;  %v2219_v37 = vsel %vm20470_vm15, %v2216_v15, %v2218_v36  ;;  %vm20473_vm10 = vcmp.ge.s32.totalorder %v20472_v28, 0  ;;  %v20491_v30 = vld [vmem:[#allocation131_spill] sm:$0xff]  ;;  %v20501_v33 = vld [vmem:[#allocation121_spill] sm:$0xff] }
 0x181   : > { %vm4921_vm14 = vmand %vm20467_vm8, %vm20465_vm11  ;;  %vm20475_vm8 = vnez %v20474_v12  ;;  %vm2017_vm6 = vcmp.eq.s32.totalorder %v14200_v25, 1  ;;  %vm20478_vm15 = vsmask.f32 3328  ;;  %v1631_v18 = vshrl.u32 %v9985_v60, 16  ;;  %v20499_v12 = vld [vmem:[#allocation67_spill] sm:$0xff] }
 0x182   : > { %vm4953_vm5 = vmand %vm4921_vm14, %vm20469_vm1  ;;  %vm20476_vm14 = vcmask 523264   ;;  %v14515_v15 = vsel %vm20478_vm15, %v13989_v27, %v14289_v23  ;;  %v1499_v5 = vsel %vm14379_vm9, 65537, %v19962_v22  ;;  %v1498_v56 = vsel %vm14386_vm13, 65537, %v19962_v22 }
 0x183   : > { %v4985_v63 = vsel %vm4953_vm5, 1, %v19962_v22  ;;  %vm4920_vm0 = vmand %vm20475_vm8, %vm20473_vm10  ;;  %10848 = vmatmul.mubr.msk.bf16.gmra.mrb[40].mxu0 %vm20476_vm14, %v2219_v37  ;;  %vm14523_vm5 = vcmp.ne.s16.totalorder %v10000_v45, 0  ;;  %vm20481_vm10 = vcmp.lt.s32.totalorder %v20472_v28, 8  ;;  %v9986_v27 = vcombine.low %v1496_v11, %v1497_v34  ;;  %v20490_v34 = vld [vmem:[#allocation129_spill] sm:$0xff]  ;;  %v20492_v11 = vld [vmem:[#allocation64_spill] sm:$0xff]  ;;  %v14571_v28 = vpop.permute.xlu1 %1987 }
 0x184   : > { %vm20477_vm1 = vmmov %vm20476_vm14  ;;  %5064 = vperm.xlu1 %11538, %v4985_v63   ;;  %v2170_v43 = vsel %vm14523_vm5, %v14499_v17, 0  ;;  %v14540_v45 = vor.u32 %v1627_v2, %v1624_v9  ;;  %vm20484_vm13 = vcmp.eq.s32.totalorder %v20437_v59, 1  ;;  %v14561_v9 = vcombine.low %v1498_v56, %v1499_v5  ;;  %v20494_v63 = vld [vmem:[#allocation120_spill] sm:$0xff] }
 0x185   : > { %915 = vst.msk [vmem:[#allocation2 + $0x78] sm:$0xff] %vm20477_vm1, %v898_v52  ;;  %vm4952_vm14 = vmand %vm4920_vm0, %vm20481_vm10  ;;  %v1634_v52 = vshll.u32 %v9985_v60, 16  ;;  %vm20487_vm1 = vcmp.eq.s32.totalorder %v20449_v55, 1  ;;  %v2220_v59 = vrot.slane %v2170_v43, 4  ;;  %v2080_v55 = vsel %vm14452_vm4, 65537, %v19962_v22 }
 0x186   : > { %v4984_v37 = vsel %vm4952_vm14, 1, %v19962_v22  ;;  %vm14533_vm9 = vmpackc.low %vm2018_vm3, %vm2018_vm3  ;;  %vm20493_vm14 = vcmp.ge.s32.totalorder %v20492_v11, 0  ;;  %v1633_v5 = vrot.slane %v1631_v18, 4  ;;  %v1640_v0 = vshrl.u32 %v9986_v27, 16 }
 0x187   : > { %vm14545_vm0 = vmpackc.low %vm20484_vm13, %vm20484_vm13  ;;  %5061 = vperm.xlu0 %11537, %v4984_v37   ;;  %vm20495_vm13 = vnez %v20494_v63  ;;  %v14582_v37 = vld [vmem:[#allocation2 + $0x40] sm:$0xff]  ;;  %v1636_v43 = vrot.slane %v1634_v52, 5  ;;  %v1643_v18 = vshll.u32 %v9986_v27, 16  ;;  %v11657_v52 = vld [vmem:[%s19154_s11 + $0x18] sm:$0xff] }
 0x188   : > { %vm14552_vm3 = vmpackc.low %vm20487_vm1, %vm20487_vm1 }
 0x189   : > { %vm2049_vm10 = vmpackc.low %vm2017_vm6, %vm2017_vm6  ;;  %vm20497_vm6 = vcmp.lt.s32.totalorder %v20492_v11, 8  ;;  %v1649_v11 = vshrl.u32 %v14561_v9, 16  ;;  %v14660_v42 = vor.u32 %v1636_v43, %v1633_v5  ;;  %v11571_v5 = vld [vmem:[%s19147_s4] sm:$0xff]  }
 0x18a   : > { %v2081_v2 = vsel %vm2049_vm10, 65537, %v19962_v22  ;;  %vm4923_vm1 = vmand %vm20495_vm13, %vm20493_vm14  ;;  %vm20498_vm10 = vcmask 1043456   ;;  %vm20500_vm14 = vcmp.ge.s32.totalorder %v20499_v12, 0  ;;  %10871 = vmatprep.subr.bf16.mxu0 %v11571_v5 }
 0x18b   : > { %vm20496_vm5 = vmmov %vm20478_vm15  ;;  %v10001_v56 = vcombine.low %v2080_v55, %v2081_v2  ;;  %v2221_v38 = vsel %vm20498_vm10, %v2218_v36, %v2220_v59  ;;  %v20504_v55 = vld [vmem:[#allocation133_spill] sm:$0xff]  ;;  %v14603_v2 = vadd.s32 1, %v11657_v52  ;;  %v2082_v36 = vsel %vm14533_vm9, 65537, %v19962_v22  ;;  %10872 = vmatpush3.bf16.msra.mxu0 %v11571_v5 }
 0x18c   : > { %v14576_v25 = vsel %vm20496_vm5, %v14289_v23, %v14313_v16  ;;  %vm4955_vm15 = vmand %vm4923_vm1, %vm20497_vm6  ;;  %vm20502_vm5 = vnez %v20501_v33  ;;  %v14590_v23 = vpop.permute.xlu0 %1984  ;;  %vm20503_vm1 = vcmask 523264   ;;  %vm20512_vm6 = vcmp.eq.s32.totalorder %v20457_v7, 1 }
 0x18d   : > { %v4987_v63 = vsel %vm4955_vm15, 1, %v19962_v22  ;;  %vm4922_vm11 = vmand %vm20502_vm5, %vm20500_vm14  ;;  %10851 = vmatprep.mubr.msk.bf16.mxu0 %vm20503_vm1, %v2221_v38  ;;  %vm14594_vm10 = vcmp.ne.s16.totalorder %v10001_v56, 0  ;;  %vm20507_vm15 = vcmp.lt.s32.totalorder %v20499_v12, 8  ;;  %20508 = vst [vmem:[#allocation122_spill] sm:$0xff] %v14603_v2  ;;  %vm20509_vm14 = vcmp.eq.s32.totalorder %v20456_v31, 1  ;;  %v11658_v31 = vld [vmem:[%s19154_s11 + $0x10] sm:$0xff] }
 0x18e   : > { %5070 = vperm.xlu1 %11538, %v4987_v63   ;;  %vm4954_vm4 = vmand %vm4922_vm11, %vm20507_vm15  ;;  %vm20515_vm11 = vcmp.eq.s32.totalorder %v14257_v26, 1  ;;  %v14631_v52 = vadd.s32 1, %v11658_v31  ;;  %v2171_v7 = vsel %vm14594_vm10, %v14582_v37, 0  ;;  %v1652_v12 = vshll.u32 %v14561_v9, 16  ;;  %v11572_v63 = vld [vmem:[%s19147_s4 + $0x80] sm:$0xff]  }
 0x18f   : > { %vm14609_vm1 = vmpackc.low %vm20509_vm14, %vm20509_vm14  ;;  %v4986_v56 = vsel %vm4954_vm4, 1, %v19962_v22  ;;  %v1501_v26 = vsel %vm14470_vm2, 65537, %v19962_v22  ;;  %v1500_v33 = vsel %vm14477_vm7, 65537, %v19962_v22  ;;  %vm20519_vm4 = vcmp.eq.s32.totalorder %v20471_v35, 1  ;;  %10991 = vmatprep.subr.bf16.mxu1 %v11572_v63  ;;  %v20579_v63 = vld [vmem:[#allocation136_spill] sm:$0xff] }
 0x190   : > { %vm14616_vm13 = vmpackc.low %vm20512_vm6, %vm20512_vm6  ;;  %20518 = vst [vmem:[#allocation73_spill] sm:$0xff] %v14631_v52  ;;  %vm20522_vm14 = vcmp.eq.s32.totalorder %v20490_v34, 1  ;;  %v20523_v9 = vmov 0  ;;  %5067 = vperm.xlu0 %11537, %v4986_v56   ;;  %vm20525_vm2 = vcmp.eq.s32.totalorder %v14277_v53, 1  ;;  %v2222_v40 = vrot.slane %v2171_v7, 4  ;;  %v14670_v56 = vpop.permute.xlu1 %1993  ;;  %v20533_v7 = vld [vmem:[#allocation76_spill] sm:$0xff] }
 0x191   : > { %vm14624_vm15 = vmpackc.low %vm20515_vm11, %vm20515_vm11  ;;  %v1642_v35 = vrot.slane %v1640_v0, 4  ;;  %vm20527_vm7 = vcmp.ge.s32.totalorder %v20526_v24, 0  ;;  %v1645_v53 = vrot.slane %v1643_v18, 5  ;;  %v14682_v43 = vcombine.low %v1500_v33, %v1501_v26 }
 0x192   : > { %vm14646_vm6 = vmpackc.low %vm20519_vm4, %vm20519_vm4  ;;  %vm20529_vm4 = vnez %v20528_v47  ;;  %vm20534_vm9 = vcmp.ge.s32.totalorder %v20533_v7, 0  ;;  %v1651_v33 = vrot.slane %v1649_v11, 4  ;;  %v1654_v26 = vrot.slane %v1652_v12, 5  ;;  %v11660_v12 = vld [vmem:[%s19154_s11 + $0x20] sm:$0xff]  ;;  %v11663_v47 = vld [vmem:[%s19154_s11 + $0x48] sm:$0xff] }
 0x193   : > { %vm14653_vm10 = vmpackc.low %vm20522_vm14, %vm20522_vm14  ;;  %v1502_v11 = vsel %vm14552_vm3, 65537, %v19962_v22  ;;  %vm20553_vm3 = vsmask.f32 3328  ;;  %v1658_v5 = vshrl.u32 %v14682_v43, 16 }
 0x194   : > { %v20524_v9 = vsel %vm14653_vm10, 4294967295, %v20523_v9  ;;  %vm2051_vm11 = vmpackc.low %vm20525_vm2, %vm20525_vm2  ;;  %vm20530_vm2 = vcmp.lt.s32.totalorder %v20526_v24, 8  ;;  %vm20531_vm10 = vcmask 1043456   ;;  %v14696_v24 = vpop.permute.xlu0 %1990  ;;  %v14751_v3 = vsel %vm20553_vm3, %v14313_v16, %v14434_v32  ;;  %v14768_v16 = vpop.permute.xlu1 %1999 }
 0x195   : > { %v2083_v34 = vsel %vm2051_vm11, 65537, %v19962_v22  ;;  %vm4925_vm14 = vmand %vm20529_vm4, %vm20527_vm7  ;;  %v2223_v0 = vsel %vm20531_vm10, %v2220_v59, %v2222_v40  ;;  %v11659_v59 = vld [vmem:[%s19154_s11 + $0x28] sm:$0xff]  ;;  %vm20538_vm10 = vcmask 523264   ;;  %vm2023_vm4 = vcmp.eq.s32.totalorder %v14431_v57, 1 }
 0x196   : > { %v10002_v10 = vcombine.low %v2082_v36, %v2083_v34  ;;  %vm4957_vm5 = vmand %vm4925_vm14, %vm20530_vm2  ;;  %v20535_v36 = vld [vmem:[#allocation124_spill] sm:$0xff]  ;;  %v14694_v34 = vadd.s32 1, %v11659_v59  ;;  %10852 = vmatmul.mubr.msk.bf16.gmra.mrb[44].mxu0 %vm20538_vm10, %v2223_v0  ;;  %vm20542_vm2 = vcmp.eq.s32.totalorder %v20504_v55, 1  ;;  %vm20547_vm10 = vcmp.lt.s32.totalorder %v20533_v7, 8  ;;  %v20555_v59 = vld [vmem:[#allocation106_spill] sm:$0xff] }
 0x197   : > { %v4989_v18 = vsel %vm4957_vm5, 1, %v19962_v22  ;;  %vm20536_vm11 = vnez %v20535_v36  ;;  %vm20539_vm5 = vcmp.eq.s32.totalorder %v20491_v30, 1  ;;  %vm14709_vm12 = vmpackc.low %vm20542_vm2, %vm20542_vm2  ;;  %v14723_v30 = vadd.s32 1, %v11660_v12 }
 0x198   : > { %vm4924_vm7 = vmand %vm20536_vm11, %vm20534_vm9  ;;  %20537 = vst [vmem:[#allocation77_spill] sm:$0xff] %v14694_v34  ;;  %vm14713_vm14 = vcmp.ne.s16.totalorder %v10002_v10, 0  ;;  %5076 = vperm.xlu1 %11538, %v4989_v18   ;;  %v1503_v10 = vsel %vm14545_vm0, 65537, %v19962_v22  ;;  %v14743_v18 = vor.u32 %v1645_v53, %v1642_v35  ;;  %vm20552_vm0 = vcmp.eq.s32.totalorder %v14356_v13, 1 }
 0x199   : > { %vm14702_vm9 = vmpackc.low %vm20539_vm5, %vm20539_vm5  ;;  %20548 = vst [vmem:[#allocation81_spill] sm:$0xff] %v14723_v30  ;;  %v2172_v60 = vsel %vm14713_vm14, %v14677_v49, 0  ;;  %v1661_v35 = vshll.u32 %v14682_v43, 16  ;;  %v2084_v13 = vsel %vm14624_vm15, 65537, %v19962_v22  ;;  %vm20556_vm14 = vcmp.ge.s32.totalorder %v20555_v59, 0  ;;  %v14777_v43 = vld [vmem:[#allocation2 + $0x50] sm:$0xff] }
 0x19a   : > { %vm4956_vm8 = vmand %vm4924_vm7, %vm20547_vm10  ;;  %vm20549_vm7 = vcmp.eq.s32.totalorder %v14323_v46, 1  ;;  %v2224_v46 = vrot.slane %v2172_v60, 4  ;;  %v14770_v60 = vcombine.low %v1502_v11, %v1503_v10  ;;  %vm2024_vm5 = vcmp.eq.s32.totalorder %v14416_v39, 1  ;;  %v20563_v10 = vld [vmem:[#allocation134_spill] sm:$0xff]  ;;  %v14788_v11 = vpop.permute.xlu0 %1996 }
 0x19b   : > { %v4988_v55 = vsel %vm4956_vm8, 1, %v19962_v22  ;;  %vm14735_vm2 = vmpackc.low %vm20549_vm7, %vm20549_vm7  ;;  %vm19658_vm11 = vcmp.ge.s32.totalorder %v14694_v34, 0  ;;  %vm20560_vm15 = vcmask 1043456   ;;  %v14779_v7 = vor.u32 %v1654_v26, %v1651_v33 }
 0x19c   : > { %5073 = vperm.xlu0 %11537, %v4988_v55   ;;  %vm2053_vm8 = vmpackc.low %vm20552_vm0, %vm20552_vm0  ;;  %v20557_v55 = vld [vmem:[#allocation132_spill] sm:$0xff]  ;;  %v2225_v38 = vsel %vm20560_vm15, %v2222_v40, %v2224_v46  ;;  %v11661_v40 = vld [vmem:[%s19154_s11 + $0x38] sm:$0xff]  ;;  %v1505_v33 = vsel %vm14609_vm1, 65537, %v19962_v22  ;;  %v1504_v26 = vsel %vm14616_vm13, 65537, %v19962_v22  ;;  %vm20568_vm15 = vcmp.lt.s32.totalorder %v20561_v8, 8 }
 0x19d   : > { %vm20554_vm7 = vmmov %vm20553_vm3  ;;  %v2085_v53 = vsel %vm2053_vm8, 65537, %v19962_v22  ;;  %vm20558_vm0 = vnez %v20557_v55  ;;  %vm20562_vm8 = vcmp.ge.s32.totalorder %v20561_v8, 0  ;;  %vm20569_vm13 = vnez %v20524_v9 }
 0x19e   : > { %v14756_v12 = vsel %vm20554_vm7, %v14434_v32, %v14540_v45  ;;  %vm5541_vm3 = vmand %vm20558_vm0, %vm20556_vm14  ;;  %v10003_v32 = vcombine.low %v2084_v13, %v2085_v53  ;;  %vm20559_vm7 = vcmp.lt.s32.totalorder %v20555_v59, 8  ;;  %vm20564_vm14 = vnez %v20563_v10 }
 0x19f   : > { %vm5573_vm10 = vmand %vm5541_vm3, %vm20559_vm7  ;;  %v14793_v13 = vadd.s32 1, %v11661_v40  ;;  %vm20565_vm7 = vcmask 523264   ;;  %vm19657_vm3 = vcmp.ge.s32.totalorder %v14723_v30, 0  ;;  %v1506_v40 = vsel %vm20569_vm13, 65537, %v19962_v22 }
 0x1a0   : > { %v5622_v55 = vsel %vm5573_vm10, 1, %v19962_v22  ;;  %vm5540_vm0 = vmand %vm20564_vm14, %vm20562_vm8  ;;  %10855 = vmatprep.mubr.msk.bf16.mxu0 %vm20565_vm7, %v2225_v38  ;;  %vm14802_vm10 = vcmp.ne.s16.totalorder %v10003_v32, 0  ;;  %v11662_v38 = vld [vmem:[%s19154_s11 + $0x30] sm:$0xff]  ;;  %v11573_v32 = vld [vmem:[%s19147_s4 + $0x8] sm:$0xff]   ;;  %v1660_v8 = vrot.slane %v1658_v5, 4  ;;  %v1663_v10 = vrot.slane %v1661_v35, 5  ;;  %v14851_v35 = vpop.permute.xlu1 %3056 }
 0x1a1   : > { %5657 = vperm.xlu1 %11538, %v5622_v55   ;;  %vm5572_vm8 = vmand %vm5540_vm0, %vm20568_vm15  ;;  %v14812_v27 = vadd.s32 1, %v11662_v38  ;;  %v1507_v55 = vsel %vm14646_vm6, 65537, %v19962_v22  ;;  %vm19656_vm0 = vcmp.lt.s32.totalorder %v14723_v30, 8  ;;  %v2173_v31 = vsel %vm14802_vm10, %v14777_v43, 0  ;;  %v20573_v5 = vld [vmem:[#allocation135_spill] sm:$0xff]  ;;  %20575 = vst [vmem:[#allocation128_spill] sm:$0xff] %v14851_v35  ;;  %10873 = vmatprep.subr.bf16.mxu0 %v11573_v32 }
 0x1a2   : > { %v5621_v59 = vsel %vm5572_vm8, 1, %v19962_v22  ;;  %vm14830_vm1 = vmpackc.low %vm2024_vm5, %vm2024_vm5  ;;  %v1667_v9 = vshrl.u32 %v14770_v60, 16  ;;  %v2226_v39 = vrot.slane %v2173_v31, 4  ;;  %v1670_v51 = vshll.u32 %v14770_v60, 16  ;;  %v14859_v60 = vld [vmem:[#allocation2 + $0x58] sm:$0xff]  ;;  %10874 = vmatpush3.bf16.msra.mxu0 %v11573_v32  ;;  %v14932_v38 = vld [vmem:[#allocation2 + $0x60] sm:$0xff] }
 0x1a3   : > { %5654 = vperm.xlu0 %11537, %v5621_v59   ;;  %vm2055_vm6 = vmpackc.low %vm2023_vm4, %vm2023_vm4  ;;  %v9990_v29 = vcombine.low %v1504_v26, %v1505_v33  ;;  %v2086_v49 = vsel %vm14735_vm2, 65537, %v19962_v22  ;;  %vm20572_vm5 = vcmp.ge.s32.totalorder %v14603_v2, 0  ;;  %vm20574_vm7 = vnez %v20573_v5  ;;  %20594 = vst [vmem:[#allocation131_spill] sm:$0xff] %v14932_v38  ;;  %v11576_v30 = vld [vmem:[%s19147_s4 + $0x18] sm:$0xff]  }
 0x1a4   : > { %v2087_v53 = vsel %vm2055_vm6, 65537, %v19962_v22  ;;  %vm5543_vm10 = vmand %vm20574_vm7, %vm20572_vm5  ;;  %v14853_v57 = vcombine.low %v1506_v40, %v1507_v55  ;;  %vm20576_vm4 = vcmp.lt.s32.totalorder %v14603_v2, 8  ;;  %vm2026_vm8 = vcmp.eq.s32.totalorder %v14489_v14, 1 }
 0x1a5   : > { %v10004_v59 = vcombine.low %v2086_v49, %v2087_v53  ;;  %vm5575_vm15 = vmand %vm5543_vm10, %vm20576_vm4  ;;  %vm20577_vm13 = vcmask 1043456   ;;  %v1509_v33 = vsel %vm14702_vm9, 65537, %v19962_v22  ;;  %v1508_v26 = vsel %vm14709_vm12, 65537, %v19962_v22 }
 0x1a6   : > { %v2227_v0 = vsel %vm20577_vm13, %v2224_v46, %v2226_v39  ;;  %v5624_v49 = vsel %vm5575_vm15, 1, %v19962_v22  ;;  %vm20578_vm2 = vcmp.ge.s32.totalorder %v14631_v52, 0  ;;  %vm20580_vm6 = vnez %v20579_v63  ;;  %v14873_v46 = vpop.permute.xlu0 %3053 }
 0x1a7   : > { %vm5542_vm5 = vmand %vm20580_vm6, %vm20578_vm2  ;;  %vm2025_vm10 = vcmp.eq.s32.totalorder %v14508_v58, 1  ;;  %20581 = vst [vmem:[#allocation89_spill] sm:$0xff] %v14873_v46  ;;  %vm20582_vm4 = vcmask 523264   ;;  %v14876_v32 = vor.u32 %v1663_v10, %v1660_v8  ;;  %vm14878_vm9 = vcmp.ne.s16.totalorder %v10004_v59, 0  ;;  %5663 = vperm.xlu1 %11538, %v5624_v49   ;;  %v20595_v46 = vld [vmem:[#allocation138_spill] sm:$0xff] }
 0x1a8   : > { %10856 = vmatmul.mubr.msk.bf16.gmra.mrb[48].mxu0 %vm20582_vm4, %v2227_v0  ;;  %vm20585_vm12 = vcmp.lt.s32.totalorder %v14631_v52, 8  ;;  %v14887_v55 = vadd.s32 1, %v11663_v47  ;;  %vm20586_vm13 = vsmask.f32 3328  ;;  %v1676_v8 = vshrl.u32 %v9990_v29, 16  ;;  %vm14898_vm2 = vmpackc.low %vm2026_vm8, %vm2026_vm8  ;;  %v11574_v47 = vld [vmem:[%s19147_s4 + $0x10] sm:$0xff]  }
 0x1a9   : > { %vm5574_vm15 = vmand %vm5542_vm5, %vm20585_vm12  ;;  %v14892_v40 = vsel %vm20586_vm13, %v14540_v45, %v14660_v42  ;;  %v1679_v10 = vshll.u32 %v9990_v29, 16  ;;  %v2174_v59 = vsel %vm14878_vm9, %v14859_v60, 0  ;;  %v1669_v0 = vrot.slane %v1667_v9, 4  ;;  %v11664_v29 = vld [vmem:[%s19154_s11 + $0x40] sm:$0xff]  ;;  %10875 = vmatprep.subr.bf16.mxu0 %v11574_v47  ;;  %v20611_v52 = vld [vmem:[#allocation82_spill] sm:$0xff] }
 0x1aa   : > { %v5623_v31 = vsel %vm5574_vm15, 1, %v19962_v22  ;;  %v9992_v49 = vcombine.low %v1508_v26, %v1509_v33  ;;  %vm2057_vm5 = vmpackc.low %vm2025_vm10, %vm2025_vm10  ;;  %v14911_v14 = vadd.s32 1, %v11664_v29  ;;  %v2228_v45 = vrot.slane %v2174_v59, 4  ;;  %v20590_v26 = vld [vmem:[#allocation137_spill] sm:$0xff]  ;;  %10876 = vmatpush3.bf16.msra.mxu0 %v11574_v47 }
 0x1ab   : > { %5660 = vperm.xlu0 %11537, %v5623_v31   ;;  %v1672_v36 = vrot.slane %v1670_v51, 5  ;;  %v1685_v9 = vshrl.u32 %v14853_v57, 16  ;;  %v2088_v58 = vsel %vm14830_vm1, 65537, %v19962_v22  ;;  %v2089_v33 = vsel %vm2057_vm5, 65537, %v19962_v22  ;;  %v14925_v31 = vpop.permute.xlu1 %4129  ;;  %10877 = vmatprep.subr.bf16.mxu0 %v11576_v30 }
 0x1ac   : > { %20589 = vst [vmem:[#allocation129_spill] sm:$0xff] %v14911_v14  ;;  %vm20591_vm8 = vnez %v20590_v26  ;;  %v1688_v59 = vshll.u32 %v14853_v57, 16  ;;  %v10005_v29 = vcombine.low %v2088_v58, %v2089_v33  ;;  %vm20592_vm4 = vcmp.lt.s32.totalorder %v14694_v34, 8  ;;  %v14940_v57 = vpop.permute.xlu0 %4126 }
 0x1ad   : > { %vm5545_vm10 = vmand %vm20591_vm8, %vm19658_vm11  ;;  %vm2028_vm12 = vcmp.eq.s32.totalorder %v14571_v28, 1  ;;  %vm20593_vm15 = vcmask 1043456   ;;  %v1678_v5 = vrot.slane %v1676_v8, 4  ;;  %v1681_v63 = vrot.slane %v1679_v10, 5  ;;  %v11665_v10 = vld [vmem:[%s19154_s11 + $0x58] sm:$0xff]  ;;  %v11667_v28 = vld [vmem:[%s19154_s11 + $0x68] sm:$0xff] }
 0x1ae   : > { %vm5577_vm9 = vmand %vm5545_vm10, %vm20592_vm4  ;;  %v2229_v51 = vsel %vm20593_vm15, %v2226_v39, %v2228_v45  ;;  %vm20596_vm1 = vnez %v20595_v46  ;;  %vm2027_vm5 = vcmp.eq.s32.totalorder %v14590_v23, 1  ;;  %vm20597_vm10 = vcmask 523264   ;;  %v20604_v8 = vld [vmem:[#allocation78_spill] sm:$0xff]  ;;  %10878 = vmatpush3.bf16.msra.mxu0 %v11576_v30 }
 0x1af   : > { %v5626_v26 = vsel %vm5577_vm9, 1, %v19962_v22  ;;  %vm5544_vm13 = vmand %vm20596_vm1, %vm19657_vm3  ;;  %10859 = vmatprep.mubr.msk.bf16.mxu0 %vm20597_vm10, %v2229_v51  ;;  %v1694_v39 = vshrl.u32 %v9992_v49, 16  ;;  %v1697_v58 = vshll.u32 %v9992_v49, 16  ;;  %vm14944_vm15 = vcmp.ne.s16.totalorder %v10005_v29, 0  ;;  %v20606_v23 = vld [vmem:[#allocation126_spill] sm:$0xff] }
 0x1b0   : > { %5669 = vperm.xlu1 %11538, %v5626_v26   ;;  %vm5576_vm9 = vmand %vm5544_vm13, %vm19656_vm0  ;;  %v14953_v33 = vadd.s32 1, %v11665_v10  ;;  %v14955_v51 = vor.u32 %v1672_v36, %v1669_v0  ;;  %v11666_v26 = vld [vmem:[%s19154_s11 + $0x50] sm:$0xff]  ;;  %v2175_v0 = vsel %vm14944_vm15, %v14932_v38, 0  ;;  %v1687_v36 = vrot.slane %v1685_v9, 4 }
 0x1b1   : > { %v5625_v47 = vsel %vm5576_vm9, 1, %v19962_v22  ;;  %vm14961_vm10 = vmpackc.low %vm2028_vm12, %vm2028_vm12  ;;  %v14968_v29 = vadd.s32 1, %v11666_v26  ;;  %v1690_v10 = vrot.slane %v1688_v59, 5  ;;  %v14979_v46 = vadd.s32 1, %v11667_v28  ;;  %v15002_v28 = vld [vmem:[#allocation2 + $0x68] sm:$0xff] }
 0x1b2   : > { %5666 = vperm.xlu0 %11537, %v5625_v47   ;;  %vm2059_vm12 = vmpackc.low %vm2027_vm5, %vm2027_vm5  ;;  %v14981_v35 = vrot.slane %v2175_v0, 4  ;;  %v14983_v26 = vor.u32 %v1681_v63, %v1678_v5  ;;  %v2090_v9 = vsel %vm14898_vm2, 65537, %v19962_v22  ;;  %vm20605_vm13 = vcmp.ge.s32.totalorder %v20604_v8, 0  ;;  %v14994_v47 = vpop.permute.xlu1 %4135  ;;  %20610 = vst [vmem:[#allocation144_spill] sm:$0xff] %v15002_v28 }
 0x1b3   : > { %20602 = vst [vmem:[#allocation133_spill] sm:$0xff] %v14968_v29  ;;  %v2091_v59 = vsel %vm2059_vm12, 65537, %v19962_v22  ;;  %vm20607_vm5 = vnez %v20606_v23  ;;  %vm2030_vm9 = vcmp.eq.s32.totalorder %v14670_v56, 1  ;;  %v1696_v0 = vrot.slane %v1694_v39, 4  ;;  %v20613_v39 = vld [vmem:[#allocation127_spill] sm:$0xff]  ;;  %v11673_v23 = vld [vmem:[#allocation2 + $0x8] sm:$0xff] }
 0x1b4   : > { %20603 = vst [vmem:[#allocation143_spill] sm:$0xff] %v14983_v26  ;;  %vm4927_vm15 = vmand %vm20607_vm5, %vm20605_vm13  ;;  %v1699_v5 = vrot.slane %v1697_v58, 5  ;;  %v10006_v63 = vcombine.low %v2090_v9, %v2091_v59  ;;  %vm20608_vm3 = vcmp.lt.s32.totalorder %v20604_v8, 8  ;;  %vm20609_vm12 = vcmask 1043456   ;;  %v15014_v58 = vpop.permute.xlu0 %4132  ;;  %v11669_v59 = vld [vmem:[%s19154_s11 + $0x78] sm:$0xff] }
 0x1b5   : > { %vm4959_vm11 = vmand %vm4927_vm15, %vm20608_vm3  ;;  %v2231_v53 = vsel %vm20609_vm12, %v2228_v45, %v14981_v35  ;;  %vm20612_vm13 = vcmp.ge.s32.totalorder %v20611_v52, 0  ;;  %vm20614_vm0 = vnez %v20613_v39  ;;  %vm2029_vm3 = vcmp.eq.s32.totalorder %v14696_v24, 1  ;;  %v11668_v45 = vld [vmem:[%s19154_s11 + $0x60] sm:$0xff]  ;;  %v20627_v24 = vld [vmem:[#allocation86_spill] sm:$0xff] }
 0x1b6   : > { %v4991_v34 = vsel %vm4959_vm11, 1, %v19962_v22  ;;  %vm4926_vm4 = vmand %vm20614_vm0, %vm20612_vm13  ;;  %v15019_v9 = vadd.s32 1, %v11668_v45  ;;  %v15024_v8 = vadd.s32 1, %v11669_v59  ;;  %vm20615_vm11 = vcmask 523264   ;;  %v11670_v45 = vld [vmem:[%s19154_s11 + $0x70] sm:$0xff]  ;;  %v15090_v39 = vpop.permute.xlu1 %4123 }
 0x1b7   : > { %10860 = vmatmul.mubr.msk.bf16.gmra.mrb[52].mxu0 %vm20615_vm11, %v2231_v53  ;;  %v15027_v2 = vor.u32 %v1690_v10, %v1687_v36  ;;  %vm15029_vm12 = vcmp.ne.s16.totalorder %v10006_v63, 0  ;;  %5082 = vperm.xlu1 %11538, %v4991_v34   ;;  %vm20619_vm13 = vcmp.lt.s32.totalorder %v20611_v52, 8  ;;  %v15039_v59 = vadd.s32 1, %v11670_v45  ;;  %v11671_v36 = vld [vmem:[%s19154_s11 + $0x88] sm:$0xff]  ;;  %v11672_v53 = vld [vmem:[%s19154_s11 + $0x80] sm:$0xff] }
 0x1b8   : > { %vm4958_vm15 = vmand %vm4926_vm4, %vm20619_vm13  ;;  %v15044_v10 = vadd.s32 1, %v11671_v36  ;;  %v15058_v45 = vadd.s32 1, %v11672_v53  ;;  %v2176_v36 = vsel %vm15029_vm12, %v15002_v28, 0  ;;  %v15068_v52 = vor.u32 %v1699_v5, %v1696_v0  ;;  %v20629_v5 = vld [vmem:[#allocation85_spill] sm:$0xff] }
 0x1b9   : > { %20616 = vst [vmem:[#allocation145_spill] sm:$0xff] %v15027_v2  ;;  %v4990_v34 = vsel %vm4958_vm15, 1, %v19962_v22  ;;  %vm15050_vm4 = vmpackc.low %vm2030_vm9, %vm2030_vm9  ;;  %vm20624_vm15 = vsmask.f32 3328  ;;  %v15074_v53 = vrot.slane %v2176_v36, 4  ;;  %vm20626_vm12 = vcmp.ne.s16.totalorder %v14006_v62, 0  ;;  %v15123_v2 = vpop.permute.xlu0 %4120 }
 0x1ba   : > { %20620 = vst [vmem:[#allocation146_spill] sm:$0xff] %v15044_v10  ;;  %20623 = vst [vmem:[#allocation147_spill] sm:$0xff] %v15058_v45  ;;  %v15066_v56 = vsel %vm20624_vm15, %v14660_v42, %v14743_v18  ;;  %5079 = vperm.xlu0 %11537, %v4990_v34   ;;  %v15078_v30 = vsel %vm20626_vm12, %v11673_v23, 0  ;;  %v2092_v42 = vsel %vm14961_vm10, 65537, %v19962_v22  ;;  %vm20628_vm15 = vcmp.ge.s32.totalorder %v20627_v24, 0  ;;  %v11674_v62 = vld [vmem:[%s19154_s11 + $0x98] sm:$0xff] }
 0x1bb   : > { %20625 = vst [vmem:[#allocation148_spill] sm:$0xff] %v15068_v52  ;;  %vm2061_vm9 = vmpackc.low %vm2029_vm3, %vm2029_vm3  ;;  %vm20630_vm3 = vnez %v20629_v5  ;;  %v15095_v23 = vadd.s32 1, %v11674_v62  ;;  %vm20632_vm10 = vcmp.lt.s32.totalorder %v20627_v24, 8  ;;  %v11675_v34 = vld [vmem:[%s19154_s11 + $0x90] sm:$0xff]  ;;  %v11676_v5 = vld [vmem:[%s19154_s11 + $0xa8] sm:$0xff]  ;;  %v2483_v28 = vshrl.u32 %v15078_v30, 16 }
 0x1bc   : > { %v2093_v0 = vsel %vm2061_vm9, 65537, %v19962_v22  ;;  %vm4929_vm2 = vmand %vm20630_vm3, %vm20628_vm15  ;;  %v15104_v36 = vadd.s32 1, %v11675_v34  ;;  %v15109_v62 = vadd.s32 1, %v11676_v5  ;;  %vm20635_vm15 = vcmask 1043456   ;;  %v20637_v52 = vld [vmem:[#allocation90_spill] sm:$0xff]  ;;  %v11677_v5 = vld [vmem:[%s19154_s11 + $0xa0] sm:$0xff] }
 0x1bd   : > { %20631 = vst [vmem:[#allocation149_spill] sm:$0xff] %v15095_v23  ;;  %v10007_v49 = vcombine.low %v2092_v42, %v2093_v0  ;;  %vm4961_vm9 = vmand %vm4929_vm2, %vm20632_vm10  ;;  %v2233_v42 = vsel %vm20635_vm15, %v14981_v35, %v15074_v53  ;;  %v15114_v0 = vld [vmem:[#allocation2 + $0x70] sm:$0xff]  ;;  %vm20638_vm10 = vcmp.ge.s32.totalorder %v20637_v52, 0  ;;  %v15128_v35 = vadd.s32 1, %v11677_v5 }
 0x1be   : > { %20633 = vst [vmem:[#allocation150_spill] sm:$0xff] %v15104_v36  ;;  %20634 = vst [vmem:[#allocation151_spill] sm:$0xff] %v15109_v62  ;;  %v4993_v24 = vsel %vm4961_vm9, 1, %v19962_v22  ;;  %v20639_v34 = vld [vmem:[#allocation130_spill] sm:$0xff]  ;;  %vm20642_vm15 = vcmask 523264   ;;  %vm20646_vm13 = vcmp.lt.s32.totalorder %v20637_v52, 8 }
 0x1bf   : > { %20636 = vst [vmem:[#allocation152_spill] sm:$0xff] %v15114_v0  ;;  %vm20640_vm11 = vnez %v20639_v34  ;;  %20641 = vst [vmem:[#allocation153_spill] sm:$0xff] %v15128_v35  ;;  %10863 = vmatprep.mubr.msk.bf16.mxu0 %vm20642_vm15, %v2233_v42  ;;  %vm20643_vm9 = vsmask.f32 3328  ;;  %5088 = vperm.xlu1 %11538, %v4993_v24   ;;  %v11678_v42 = vld [vmem:[%s19154_s11 + $0xb8] sm:$0xff]  ;;  %v2486_v35 = vshll.u32 %v15078_v30, 16 }
 0x1c0   : > { %vm4928_vm12 = vmand %vm20640_vm11, %vm20638_vm10  ;;  %v15135_v38 = vsel %vm20643_vm9, %v14743_v18, %v14779_v7  ;;  %vm15137_vm10 = vcmp.ne.s16.totalorder %v10007_v49, 0  ;;  %v15147_v5 = vadd.s32 1, %v11678_v42  ;;  %v11679_v18 = vld [vmem:[%s19154_s11 + $0xb0] sm:$0xff]  ;;  %v11680_v42 = vld [vmem:[%s19154_s11 + $0xc8] sm:$0xff]  ;;  %vm20651_vm9 = vcmp.ne.s16.totalorder %v13983_v1, 0 }
 0x1c1   : > { %vm4960_vm2 = vmand %vm4928_vm12, %vm20646_vm13  ;;  %v15152_v49 = vadd.s32 1, %v11679_v18  ;;  %vm20649_vm13 = vcmp.eq.s32.totalorder %v14768_v16, 1  ;;  %v15163_v52 = vadd.s32 1, %v11680_v42  ;;  %v2177_v18 = vsel %vm15137_vm10, %v15114_v0, 0  ;;  %v11682_v42 = vld [vmem:[%s19154_s11 + $0xc0] sm:$0xff]  ;;  %v20656_v0 = vld [vmem:[#allocation139_spill] sm:$0xff] }
 0x1c2   : > { %20647 = vst [vmem:[#allocation154_spill] sm:$0xff] %v15147_v5  ;;  %v4992_v24 = vsel %vm4960_vm2, 1, %v19962_v22  ;;  %vm2064_vm12 = vmpackc.low %vm20649_vm13, %vm20649_vm13  ;;  %vm20652_vm2 = vcmp.eq.s32.totalorder %v14788_v11, 1  ;;  %v2234_v34 = vrot.slane %v2177_v18, 4  ;;  %vm20654_vm10 = vsmask.f32 3328  ;;  %v15194_v18 = vpop.permute.xlu1 %4141 }
 0x1c3   : > { %20648 = vst [vmem:[#allocation155_spill] sm:$0xff] %v15152_v49  ;;  %20650 = vst [vmem:[#allocation156_spill] sm:$0xff] %v15163_v52  ;;  %v11681_v49 = vld [vmem:[#allocation2 + $0x10] sm:$0xff]  ;;  %5085 = vperm.xlu0 %11537, %v4992_v24   ;;  %v2096_v16 = vsel %vm2064_vm12, 65537, %v19962_v22  ;;  %v15178_v52 = vadd.s32 1, %v11682_v42  ;;  %v15183_v1 = vsel %vm20654_vm10, %v14779_v7, %v14876_v32  ;;  %v2094_v11 = vsel %vm15050_vm4, 65537, %v19962_v22 }
 0x1c4   : > { %v1721_v30 = vsel %vm20651_vm9, %v11681_v49, 0  ;;  %vm2063_vm13 = vmpackc.low %vm20652_vm2, %vm20652_vm2  ;;  %v10009_v49 = vcombine.low %v2096_v16, %v2096_v16  ;;  %vm20655_vm12 = vcmp.ge.s32.totalorder %v14793_v13, 0  ;;  %vm20657_vm9 = vnez %v20656_v0  ;;  %v1285_v42 = vld [vmem:[#allocation2 + $0x80] sm:$0xf]  ;;  %v15202_v16 = vld [vmem:[#allocation2 + $0x78] sm:$0xff] }
 0x1c5   : > { %20653 = vst [vmem:[#allocation157_spill] sm:$0xff] %v15178_v52  ;;  %v2095_v24 = vsel %vm2063_vm13, 65537, %v19962_v22  ;;  %vm5547_vm2 = vmand %vm20657_vm9, %vm20655_vm12  ;;  %v2485_v52 = vrot.slane %v2483_v28, 3  ;;  %vm20658_vm8 = vcmp.lt.s32.totalorder %v14793_v13, 8  ;;  %vm20659_vm13 = vcmask 1043456  }
 0x1c6   : > { %v10008_v7 = vcombine.low %v2094_v11, %v2095_v24  ;;  %vm5579_vm4 = vmand %vm5547_vm2, %vm20658_vm8  ;;  %v2235_v63 = vsel %vm20659_vm13, %v15074_v53, %v2234_v34  ;;  %v2488_v0 = vrot.slane %v2486_v35, 4  ;;  %v2492_v5 = vshrl.u32 %v1721_v30, 16  ;;  %v15214_v11 = vpop.permute.xlu0 %4138  ;;  %v11683_v35 = vld [vmem:[#allocation2 + $0x18] sm:$0xff] }
 0x1c7   : > { %vm15204_vm12 = vcmp.ne.s16.totalorder %v10009_v49, 0  ;;  %v5628_v28 = vsel %vm5579_vm4, 1, %v19962_v22  ;;  %vm20662_vm15 = vcmp.ge.s32.totalorder %v14812_v27, 0  ;;  %vm20663_vm10 = vnez %v20296_v19 }
 0x1c8   : > { %vm5546_vm8 = vmand %vm20663_vm10, %vm20662_vm15  ;;  %vm20664_vm13 = vcmask 523264   ;;  %v2495_v53 = vshll.u32 %v1721_v30, 16  ;;  %vm20665_vm1 = vcmp.ne.s16.totalorder %v14446_v6, 0  ;;  %vm2161_vm9 = vcmp.ne.s16.totalorder %v10008_v7, 0  ;;  %5675 = vperm.xlu1 %11538, %v5628_v28  }
 0x1c9   : > { %10864 = vmatmul.mubr.msk.bf16.gmra.mrb[56].mxu0 %vm20664_vm13, %v2235_v63  ;;  %v1722_v49 = vsel %vm20665_vm1, %v11683_v35, 0  ;;  %vm20666_vm4 = vcmp.lt.s32.totalorder %v14812_v27, 8  ;;  %v2179_v24 = vsel %vm15204_vm12, %v1285_v42, 0  ;;  %vm20667_vm2 = vcmp.ne.s16.totalorder %v14515_v15, 0  ;;  %v15242_v35 = vpop.permute.xlu1 %4147 }
 0x1ca   : > { %vm5578_vm7 = vmand %vm5546_vm8, %vm20666_vm4  ;;  %v1723_v63 = vsel %vm20667_vm2, %v14262_v61, 0  ;;  %v2178_v6 = vsel %vm2161_vm9, %v15202_v16, 0  ;;  %v2238_v7 = vrot.slane %v2179_v24, 4  ;;  %vm20668_vm1 = vcmp.ne.s16.totalorder %v14576_v25, 0 }
 0x1cb   : > { %v5627_v30 = vsel %vm5578_vm7, 1, %v19962_v22  ;;  %v1724_v28 = vsel %vm20668_vm1, %v14340_v20, 0  ;;  %v2236_v26 = vrot.slane %v2178_v6, 4  ;;  %v15235_v42 = vor.u32 %v2488_v0, %v2485_v52 }
 0x1cc   : > { %5672 = vperm.xlu0 %11537, %v5627_v30   ;;  %v2501_v61 = vshrl.u32 %v1722_v49, 16  ;;  %v2504_v15 = vshll.u32 %v1722_v49, 16  ;;  %vm20669_vm2 = vcmp.ge.s32.totalorder %v14887_v55, 0  ;;  %vm20670_vm9 = vnez %v20312_v54 }
 0x1cd   : > { %vm5549_vm4 = vmand %vm20670_vm9, %vm20669_vm2  ;;  %v2494_v20 = vrot.slane %v2492_v5, 3  ;;  %v2497_v25 = vrot.slane %v2495_v53, 4  ;;  %v2510_v24 = vshrl.u32 %v1723_v63, 16  ;;  %v2513_v30 = vshll.u32 %v1723_v63, 16  ;;  %v15257_v5 = vpop.permute.xlu0 %4144  ;;  %v11685_v63 = vld [vmem:[%s19154_s11 + $0xd0] sm:$0xff] }
 0x1ce   : > { %vm20671_vm12 = vcmp.lt.s32.totalorder %v14887_v55, 8  ;;  %vm20672_vm8 = vcmask 1043456   ;;  %v2519_v49 = vshrl.u32 %v1724_v28, 16  ;;  %v2522_v6 = vshll.u32 %v1724_v28, 16  ;;  %v11686_v28 = vld [vmem:[%s19154_s11 + $0xe8] sm:$0xff] }
 0x1cf   : > { %vm5581_vm13 = vmand %vm5549_vm4, %vm20671_vm12  ;;  %v2237_v52 = vsel %vm20672_vm8, %v2234_v34, %v2236_v26  ;;  %vm20674_vm2 = vcmp.ge.s32.totalorder %v14911_v14, 0  ;;  %vm20675_vm15 = vnez %v20318_v50  ;;  %v11684_v34 = vld [vmem:[%s19154_s11 + $0xd8] sm:$0xff]  ;;  %v2506_v50 = vrot.slane %v2504_v15, 4 }
 0x1d0   : > { %vm20673_vm7 = vmmov %vm20672_vm8  ;;  %v5630_v54 = vsel %vm5581_vm13, 1, %v19962_v22  ;;  %v15262_v53 = vadd.s32 1, %v11684_v34  ;;  %vm20678_vm13 = vcmask 523264   ;;  %vm20679_vm8 = vcmp.lt.s32.totalorder %v14911_v14, 8 }
 0x1d1   : > { %v2239_v0 = vsel %vm20673_vm7, %v2236_v26, %v2238_v7  ;;  %vm5548_vm9 = vmand %vm20675_vm15, %vm20674_vm2  ;;  %v15267_v7 = vadd.s32 1, %v11685_v63  ;;  %10867 = vmatprep.mubr.msk.bf16.mxu0 %vm20678_vm13, %v2237_v52  ;;  %5681 = vperm.xlu1 %11538, %v5630_v54   ;;  %v15276_v26 = vadd.s32 1, %v11686_v28  ;;  %v2503_v34 = vrot.slane %v2501_v61, 3 }
 0x1d2   : > { %20676 = vst [vmem:[#allocation158_spill] sm:$0xff] %v15262_v53  ;;  %vm5580_vm12 = vmand %vm5548_vm9, %vm20679_vm8  ;;  %vm20681_vm4 = vcmp.ne.s16.totalorder %v14751_v3, 0  ;;  %vm20682_vm2 = vcmp.eq.s32.totalorder %v14925_v31, 1  ;;  %v20684_v54 = vor.u32 %v14151_v21, %v14074_v41  ;;  %vm20685_vm7 = vsmask.f32 4352  ;;  %v15304_v21 = vpop.permute.xlu1 %4153 }
 0x1d3   : > { %20677 = vst [vmem:[#allocation159_spill] sm:$0xff] %v15267_v7  ;;  %20680 = vst [vmem:[#allocation160_spill] sm:$0xff] %v15276_v26  ;;  %v1725_v63 = vsel %vm20681_vm4, %v14424_v48, 0  ;;  %v5629_v52 = vsel %vm5580_vm12, 1, %v19962_v22  ;;  %v2498_v15 = vor.u32 %v2497_v25, %v2494_v20  ;;  %v2512_v28 = vrot.slane %v2510_v24, 3 }
 0x1d4   : > { %vm4230_vm9 = vmpackc.low %vm20682_vm2, %vm20682_vm2  ;;  %v2490_v61 = vsel %vm20685_vm7, %v20684_v54, %v15235_v42  ;;  %5678 = vperm.xlu0 %11537, %v5629_v52   ;;  %vm20686_vm12 = vcmp.eq.s32.totalorder %v14940_v57, 1  ;;  %v2515_v3 = vrot.slane %v2513_v30, 4  ;;  %v2521_v31 = vrot.slane %v2519_v49, 3  ;;  %v11687_v57 = vld [vmem:[%s19154_s11 + $0xe0] sm:$0xff] }
 0x1d5   : > { %vm20683_vm8 = vmmov %vm20678_vm13  ;;  %v4262_v48 = vsel %vm4230_vm9, 65537, %v19962_v22  ;;  %vm20688_vm7 = vcmp.ge.s32.totalorder %v14953_v33, 0  ;;  %vm20689_vm10 = vnez %v20103_v4  ;;  %v15309_v20 = vadd.s32 1, %v11687_v57 }
 0x1d6   : > { %10868 = vmatmul.mubr.msk.bf16.gmra.mrb[60].mxu0 %vm20683_vm8, %v2239_v0  ;;  %vm4229_vm4 = vmpackc.low %vm20686_vm12, %vm20686_vm12  ;;  %v2524_v0 = vrot.slane %v2522_v6, 4  ;;  %v2528_v25 = vshrl.u32 %v1725_v63, 16  ;;  %v2531_v24 = vshll.u32 %v1725_v63, 16  ;;  %v2507_v4 = vor.u32 %v2506_v50, %v2503_v34  ;;  %v15326_v63 = vpop.permute.xlu0 %4150  ;;  %v11688_v50 = vld [vmem:[%s19154_s11 + $0xf8] sm:$0xff] }
 0x1d7   : > { %vm20687_vm13 = vmmov %vm20683_vm8  ;;  %v4261_v41 = vsel %vm4229_vm4, 65537, %v19962_v22  ;;  %20690 = vst [vmem:[#allocation161_spill] sm:$0xff] %v15309_v20  ;;  %vm20694_vm8 = vnez %v20108_v44  ;;  %v15331_v34 = vadd.s32 1, %v11688_v50  ;;  %v2516_v52 = vor.u32 %v2515_v3, %v2512_v28 }
 0x1d8   : > { %10879 = vmatprep.mubr.msk.bf16.mxu0 %vm20687_vm13, %v2490_v61  ;;  %vm5551_vm9 = vmand %vm20689_vm10, %vm20688_vm7  ;;  %v15311_v30 = vcombine.low %v4261_v41, %v4262_v48  ;;  %vm20691_vm13 = vcmp.lt.s32.totalorder %v14953_v33, 8  ;;  %vm20692_vm10 = vcmp.ne.s16.totalorder %v14756_v12, 0  ;;  %vm20693_vm7 = vcmp.ge.s32.totalorder %v14968_v29, 0  ;;  %v20699_v61 = vld [vmem:[#allocation125_spill] sm:$0xff] }
 0x1d9   : > { %vm5583_vm12 = vmand %vm5551_vm9, %vm20691_vm13  ;;  %v1726_v49 = vsel %vm20692_vm10, %v14499_v17, 0  ;;  %20695 = vst [vmem:[#allocation162_spill] sm:$0xff] %v15331_v34  ;;  %vm20696_vm9 = vsmask.f32 4352  ;;  %vm20697_vm13 = vcmp.ne.s16.totalorder %v14892_v40, 0  ;;  %v2525_v54 = vor.u32 %v2524_v0, %v2521_v31  ;;  %v20705_v31 = vld [vmem:[#allocation108_spill] sm:$0xff]  ;;  %v15362_v0 = vpop.permute.xlu1 %4159 }
 0x1da   : > { %v5632_v6 = vsel %vm5583_vm12, 1, %v19962_v22  ;;  %vm5550_vm6 = vmand %vm20694_vm8, %vm20693_vm7  ;;  %v2499_v17 = vsel %vm20696_vm9, %v15235_v42, %v2498_v15  ;;  %v1727_v12 = vsel %vm20697_vm13, %v14582_v37, 0  ;;  %v4378_v44 = vshll.u32 %v15311_v30, 16 }
 0x1db   : > { %5687 = vperm.xlu1 %11538, %v5632_v6   ;;  %vm20698_vm8 = vcmp.lt.s32.totalorder %v14968_v29, 8  ;;  %vm20700_vm7 = vcmp.ne.s16.totalorder %v15066_v56, 0  ;;  %vm20701_vm9 = vcmp.eq.s32.totalorder %v14994_v47, 1  ;;  %v2530_v37 = vrot.slane %v2528_v25, 3 }
 0x1dc   : > { %vm5582_vm12 = vmand %vm5550_vm6, %vm20698_vm8  ;;  %v1728_v48 = vsel %vm20700_vm7, %v20699_v61, 0  ;;  %v2533_v40 = vrot.slane %v2531_v24, 4  ;;  %v2537_v41 = vshrl.u32 %v1726_v49, 16  ;;  %vm20702_vm6 = vcmp.eq.s32.totalorder %v15014_v58, 1 }
 0x1dd   : > { %v5631_v42 = vsel %vm5582_vm12, 1, %v19962_v22  ;;  %vm4232_vm13 = vmpackc.low %vm20701_vm9, %vm20701_vm9  ;;  %vm20703_vm10 = vsmask.f32 4352  ;;  %v2540_v28 = vshll.u32 %v1726_v49, 16  ;;  %v2546_v47 = vshrl.u32 %v1727_v12, 16 }
 0x1de   : > { %5684 = vperm.xlu0 %11537, %v5631_v42   ;;  %v4264_v57 = vsel %vm4232_vm13, 65537, %v19962_v22  ;;  %vm4231_vm8 = vmpackc.low %vm20702_vm6, %vm20702_vm6  ;;  %v2508_v56 = vsel %vm20703_vm10, %v2498_v15, %v2507_v4  ;;  %vm20704_vm12 = vcmp.ge.s32.totalorder %v14979_v46, 0  ;;  %vm20706_vm9 = vnez %v20705_v31  ;;  %v15412_v31 = vpop.permute.xlu1 %4165 }
 0x1df   : > { %v4263_v3 = vsel %vm4231_vm8, 65537, %v19962_v22  ;;  %vm5553_vm15 = vmand %vm20706_vm9, %vm20704_vm12  ;;  %vm20707_vm13 = vcmask 523264   ;;  %v2549_v58 = vshll.u32 %v1727_v12, 16  ;;  %v2555_v25 = vshrl.u32 %v1728_v48, 16  ;;  %v20713_v12 = vld [vmem:[#allocation109_spill] sm:$0xff] }
 0x1e0   : > { %10880 = vmatmul.mubr.msk.bf16.vlgmr.msra.gmra.mrb[32].mxu0 %vm20707_vm13, %v2499_v17  ;;  %v2558_v24 = vshll.u32 %v1728_v48, 16  ;;  %v15365_v6 = vrot.slane %v4378_v44, 1  ;;  %v15367_v15 = vcombine.low %v4263_v3, %v4264_v57  ;;  %vm20708_vm10 = vcmp.lt.s32.totalorder %v14979_v46, 8  ;;  %vm20709_vm7 = vmmov %vm20707_vm13  ;;  %v15381_v44 = vpop.permute.xlu0 %4156 }
 0x1e1   : > { %vm5585_vm6 = vmand %vm5553_vm15, %vm20708_vm10  ;;  %vm19684_vm8 = vcmp.ge.s32.totalorder %v15044_v10, 0  ;;  %10883 = vmatprep.mubr.msk.bf16.mxu0 %vm20709_vm7, %v2508_v56  ;;  %vm20710_vm12 = vsmask.f32 4352  ;;  %vm20712_vm13 = vcmp.ge.s32.totalorder %v15019_v9, 0  ;;  %vm20714_vm1 = vnez %v20713_v12 }
 0x1e2   : > { %v2517_v49 = vsel %vm20710_vm12, %v2507_v4, %v2516_v52  ;;  %vm20711_vm9 = vmmov %vm20710_vm12  ;;  %v5634_v17 = vsel %vm5585_vm6, 1, %v19962_v22  ;;  %v15383_v61 = vor.u32 %v2533_v40, %v2530_v37  ;;  %v2539_v48 = vrot.slane %v2537_v41, 3 }
 0x1e3   : > { %v2526_v50 = vsel %vm20711_vm9, %v2516_v52, %v2525_v54  ;;  %vm5552_vm2 = vmand %vm20714_vm1, %vm20712_vm13  ;;  %vm20715_vm15 = vcmp.ne.s16.totalorder %v15135_v38, 0  ;;  %v4382_v52 = vshrl.u32 %v15311_v30, 16  ;;  %v4386_v42 = vshll.u32 %v15367_v15, 16  ;;  %5693 = vperm.xlu1 %11538, %v5634_v17  }
 0x1e4   : > { %v1729_v4 = vsel %vm20715_vm15, %v14777_v43, 0  ;;  %vm20716_vm7 = vcmp.lt.s32.totalorder %v15019_v9, 8  ;;  %v2542_v57 = vrot.slane %v2540_v28, 4  ;;  %v2548_v56 = vrot.slane %v2546_v47, 3  ;;  %v20720_v47 = vld [vmem:[#allocation110_spill] sm:$0xff] }
 0x1e5   : > { %vm5584_vm10 = vmand %vm5552_vm2, %vm20716_vm7  ;;  %vm20717_vm6 = vcmp.eq.s32.totalorder %v15090_v39, 1  ;;  %v2551_v43 = vrot.slane %v2549_v58, 4  ;;  %v2557_v38 = vrot.slane %v2555_v25, 3  ;;  %v2560_v30 = vrot.slane %v2558_v24, 4 }
 0x1e6   : > { %v5633_v37 = vsel %vm5584_vm10, 1, %v19962_v22  ;;  %vm4228_vm12 = vmpackc.low %vm20717_vm6, %vm20717_vm6  ;;  %v4384_v40 = vor.u32 %v4382_v52, %v15365_v6  ;;  %v15399_v41 = vrot.slane %v4386_v42, 1  ;;  %vm20718_vm2 = vcmp.eq.s32.totalorder %v15123_v2, 1  ;;  %v11689_v42 = vld [vmem:[#allocation2 + $0x38] sm:$0xff] }
 0x1e7   : > { %5690 = vperm.xlu0 %11537, %v5633_v37   ;;  %v4260_v3 = vsel %vm4228_vm12, 65537, %v19962_v22  ;;  %vm4227_vm13 = vmpackc.low %vm20718_vm2, %vm20718_vm2  ;;  %v2564_v39 = vshrl.u32 %v1729_v4, 16  ;;  %vm20719_vm7 = vcmp.ge.s32.totalorder %v15024_v8, 0  ;;  %vm20721_vm10 = vnez %v20720_v47 }
 0x1e8   : > { %v4259_v28 = vsel %vm4227_vm13, 65537, %v19962_v22  ;;  %vm5555_vm6 = vmand %vm20721_vm10, %vm20719_vm7  ;;  %v2567_v2 = vshll.u32 %v1729_v4, 16  ;;  %vm1713_vm2 = vcmp.ne.s16.totalorder %v15183_v1, 0  ;;  %vm20723_vm15 = vcmp.lt.s32.totalorder %v15024_v8, 8  ;;  %v15431_v1 = vpop.permute.xlu0 %4162 }
 0x1e9   : > { %vm20722_vm12 = vmmov %vm20711_vm9  ;;  %v10107_v25 = vcombine.low %v4259_v28, %v4260_v3  ;;  %vm20724_vm4 = vsmask.f32 7424  ;;  %v2543_v17 = vor.u32 %v2542_v57, %v2539_v48  ;;  %v1730_v12 = vsel %vm1713_vm2, %v14859_v60, 0 }
 0x1ea   : > { %v15416_v58 = vsel %vm20722_vm12, %v2525_v54, %v15383_v61  ;;  %vm5587_vm13 = vmand %vm5555_vm6, %vm20723_vm15  ;;  %v4389_v24 = vsel %vm20724_vm4, %v4384_v40, %v15399_v41  ;;  %vm20725_vm7 = vcmp.ge.s32.totalorder %v15039_v59, 0  ;;  %v20726_v54 = vld [vmem:[#allocation111_spill] sm:$0xff]  ;;  %vm20728_vm6 = vcmask 523264  }
 0x1eb   : > { %v5636_v52 = vsel %vm5587_vm13, 1, %v19962_v22  ;;  %vm20727_vm10 = vnez %v20726_v54  ;;  %vm4464_vm15 = vcmp.ne.s16.totalorder %v4389_v24, 0  ;;  %10884 = vmatmul.mubr.msk.bf16.gmra.mrb[36].mxu0 %vm20728_vm6, %v2517_v49  ;;  %v2552_v4 = vor.u32 %v2551_v43, %v2548_v56 }
 0x1ec   : > { %vm5554_vm12 = vmand %vm20727_vm10, %vm20725_vm7  ;;  %vm20729_vm4 = vsmask.f32 3328  ;;  %v4370_v60 = vshll.u32 %v10107_v25, 16  ;;  %5699 = vperm.xlu1 %11538, %v5636_v52   ;;  %vm20730_vm2 = vcmp.lt.s32.totalorder %v15039_v59, 8  ;;  %v15440_v57 = vsel %vm4464_vm15, %v11689_v42, 0  ;;  %v20744_v52 = vld [vmem:[#allocation113_spill] sm:$0xff] }
 0x1ed   : > { %v1674_v48 = vsel %vm20729_vm4, %v14876_v32, %v14955_v51  ;;  %vm5586_vm13 = vmand %vm5554_vm12, %vm20730_vm2  ;;  %v15443_v37 = vor.u32 %v2560_v30, %v2557_v38  ;;  %v2566_v49 = vrot.slane %v2564_v39, 3  ;;  %vm20732_vm10 = vcmp.eq.s32.totalorder %v15194_v18, 1  ;;  %v20735_v30 = vld [vmem:[#allocation112_spill] sm:$0xff]  ;;  %v15464_v39 = vpop.permute.xlu1 %4171 }
 0x1ee   : > { %vm20731_vm7 = vmmov %vm20728_vm6  ;;  %v5635_v56 = vsel %vm5586_vm13, 1, %v19962_v22  ;;  %v4554_v32 = vshrl.u32 %v15440_v57, 16  ;;  %v2569_v43 = vrot.slane %v2567_v2, 4  ;;  %v2573_v40 = vshrl.u32 %v1730_v12, 16 }
 0x1ef   : > { %10887 = vmatprep.mubr.msk.bf16.mxu0 %vm20731_vm7, %v2526_v50  ;;  %vm4234_vm6 = vmpackc.low %vm20732_vm10, %vm20732_vm10  ;;  %v15451_v3 = vrot.slane %v4370_v60, 1  ;;  %v4374_v28 = vshrl.u32 %v10107_v25, 16  ;;  %5696 = vperm.xlu0 %11537, %v5635_v56   ;;  %vm20734_vm12 = vcmp.eq.s32.totalorder %v15214_v11, 1  ;;  %v2576_v18 = vshll.u32 %v1730_v12, 16  ;;  %v20741_v12 = vld [vmem:[#allocation143_spill] sm:$0xff]  ;;  %v15494_v60 = vpop.permute.xlu0 %4168 }
 0x1f0   : > { %v4266_v50 = vsel %vm4234_vm6, 65537, %v19962_v22  ;;  %vm4233_vm15 = vmpackc.low %vm20734_vm12, %vm20734_vm12  ;;  %vm20736_vm7 = vnez %v20735_v30  ;;  %vm1714_vm12 = vcmp.ne.s16.totalorder %v1674_v48, 0  ;;  %v15492_v54 = vrot.slane %v4554_v32, 7 }
 0x1f1   : > { %20733 = vst [vmem:[#allocation125_spill] sm:$0xff] %v15451_v3  ;;  %v4265_v38 = vsel %vm4233_vm15, 65537, %v19962_v22  ;;  %vm5557_vm10 = vmand %vm20736_vm7, %vm19684_vm8  ;;  %v4376_v2 = vor.u32 %v4374_v28, %v15451_v3  ;;  %vm20739_vm15 = vcmp.lt.s32.totalorder %v15044_v10, 8  ;;  %v2575_v42 = vrot.slane %v2573_v40, 3  ;;  %v20747_v28 = vld [vmem:[#allocation153_spill] sm:$0xff]  ;;  %v15534_v30 = vpop.permute.xlu1 %4177 }
 0x1f2   : > { %vm20737_vm6 = vmmov %vm20711_vm9  ;;  %v15472_v25 = vcombine.low %v4265_v38, %v4266_v50  ;;  %v4390_v56 = vshrl.u32 %v15367_v15, 16  ;;  %v2578_v32 = vrot.slane %v2576_v18, 4  ;;  %v4557_v15 = vshll.u32 %v15440_v57, 16  ;;  %v15523_v57 = vld [vmem:[#allocation2 + $0x30] sm:$0xff] }
 0x1f3   : > { %v2544_v11 = vsel %vm20737_vm6, %v15383_v61, %v2543_v17  ;;  %vm20738_vm1 = vmmov %vm20737_vm6  ;;  %vm20750_vm9 = vcmask 523264  }
 0x1f4   : > { %v15469_v47 = vsel %vm20738_vm1, %v2543_v17, %v2552_v4  ;;  %vm5589_vm13 = vmand %vm5557_vm10, %vm20739_vm15  ;;  %vm19687_vm15 = vcmp.ge.s32.totalorder %v20747_v28, 0  ;;  %vm19685_vm10 = vcmp.lt.s32.totalorder %v20747_v28, 8  ;;  %10888 = vmatmul.mubr.msk.bf16.gmra.mrb[40].mxu0 %vm20750_vm9, %v15416_v58  ;;  %v4559_v18 = vor.u32 %v4557_v15, %v15492_v54  ;;  %v21094_v28 = vld [vmem:[#allocation16_spill] sm:$0xff] }
 0x1f5   : > { %vm20740_vm8 = vmmov %vm20738_vm1  ;;  %v5638_v17 = vsel %vm5589_vm13, 1, %v19962_v22  ;;  %vm20743_vm1 = vcmp.ge.s32.totalorder %v15058_v45, 0  ;;  %10891 = vmatprep.mubr.msk.bf16.mxu0 %vm20750_vm9, %v2544_v11 }
 0x1f6   : > { %v15479_v24 = vsel %vm20740_vm8, %v2552_v4, %v15443_v37  ;;  %vm20742_vm6 = vmmov %vm20729_vm4  ;;  %vm20745_vm4 = vnez %v20744_v52  ;;  %v15496_v4 = vor.u32 %v2569_v43, %v2566_v49  ;;  %5705 = vperm.xlu1 %11538, %v5638_v17   ;;  %vm20746_vm8 = vcmp.lt.s32.totalorder %v15058_v45, 8  ;;  %v20751_v49 = vld [vmem:[#allocation131_spill] sm:$0xff]  ;;  %v20759_v52 = vld [vmem:[#allocation154_spill] sm:$0xff] }
 0x1f7   : > { %v15484_v61 = vsel %vm20742_vm6, %v14955_v51, %v20741_v12  ;;  %vm5556_vm2 = vmand %vm20745_vm4, %vm20743_vm1  ;;  %v4394_v51 = vshll.u32 %v15472_v25, 16  ;;  %vm20748_vm4 = vsmask.f32 7424  ;;  %vm20749_vm6 = vcmp.eq.s32.totalorder %v15242_v35, 1 }
 0x1f8   : > { %vm5588_vm13 = vmand %vm5556_vm2, %vm20746_vm8  ;;  %v4381_v50 = vsel %vm20748_vm4, %v4376_v2, %v15365_v6  ;;  %v15515_v43 = vsel %vm1714_vm12, %v20751_v49, 0  ;;  %v4392_v6 = vor.u32 %v4390_v56, %v15399_v41  ;;  %vm20752_vm2 = vcmp.eq.s32.totalorder %v15257_v5, 1  ;;  %v20754_v41 = vld [vmem:[#allocation114_spill] sm:$0xff]  ;;  %v15556_v49 = vpop.permute.xlu0 %4174 }
 0x1f9   : > { %v5637_v38 = vsel %vm5588_vm13, 1, %v19962_v22  ;;  %vm4236_vm1 = vmpackc.low %vm20749_vm6, %vm20749_vm6  ;;  %vm4463_vm7 = vcmp.ne.s16.totalorder %v4381_v50, 0  ;;  %v4396_v40 = vrot.slane %v4394_v51, 1  ;;  %vm20753_vm12 = vcmp.ge.s32.totalorder %v15095_v23, 0 }
 0x1fa   : > { %5702 = vperm.xlu0 %11537, %v5637_v38   ;;  %v4268_v35 = vsel %vm4236_vm1, 65537, %v19962_v22  ;;  %vm4235_vm8 = vmpackc.low %vm20752_vm2, %vm20752_vm2  ;;  %v4480_v58 = vsel %vm4463_vm7, %v15523_v57, 0  ;;  %vm20755_vm4 = vnez %v20754_v41  ;;  %vm20756_vm2 = vsmask.f32 4352 }
 0x1fb   : > { %v4267_v48 = vsel %vm4235_vm8, 65537, %v19962_v22  ;;  %vm5559_vm6 = vmand %vm20755_vm4, %vm20753_vm12  ;;  %v4546_v5 = vshrl.u32 %v4480_v58, 16  ;;  %v15539_v2 = vsel %vm20756_vm2, %v15443_v37, %v15496_v4  ;;  %vm20757_vm7 = vsmask.f32 7424  ;;  %v20761_v37 = vld [vmem:[#allocation115_spill] sm:$0xff] }
 0x1fc   : > { %v4397_v11 = vsel %vm20757_vm7, %v4392_v6, %v4396_v40  ;;  %v15542_v17 = vcombine.low %v4267_v48, %v4268_v35  ;;  %vm20758_vm8 = vcmp.lt.s32.totalorder %v15095_v23, 8  ;;  %v15547_v56 = vor.u32 %v2578_v32, %v2575_v42  ;;  %v20764_v32 = vld [vmem:[#allocation155_spill] sm:$0xff]  ;;  %v11691_v35 = vld [vmem:[#allocation2 + $0x40] sm:$0xff]  ;;  %v21092_v23 = vld [vmem:[#allocation81_spill] sm:$0xff] }
 0x1fd   : > { %vm5591_vm9 = vmand %vm5559_vm6, %vm20758_vm8  ;;  %v2582_v51 = vshrl.u32 %v15515_v43, 16  ;;  %vm4465_vm4 = vcmp.ne.s16.totalorder %v4397_v11, 0  ;;  %vm20760_vm1 = vcmp.ge.s32.totalorder %v15104_v36, 0  ;;  %vm20762_vm2 = vnez %v20761_v37 }
 0x1fe   : > { %v5640_v50 = vsel %vm5591_vm9, 1, %v19962_v22  ;;  %vm5558_vm13 = vmand %vm20762_vm2, %vm20760_vm1  ;;  %v4548_v38 = vrot.slane %v4546_v5, 7  ;;  %v4549_v15 = vshll.u32 %v4480_v58, 16  ;;  %v4398_v6 = vshrl.u32 %v15472_v25, 16 }
 0x1ff   : > { %v4402_v42 = vshll.u32 %v15542_v17, 16  ;;  %5711 = vperm.xlu1 %11538, %v5640_v50   ;;  %vm20763_vm6 = vcmp.lt.s32.totalorder %v15104_v36, 8  ;;  %v4482_v48 = vsel %vm4465_vm4, %v11691_v35, 0  ;;  %v2585_v41 = vshll.u32 %v15515_v43, 16 }
 0x200   : > { %vm5590_vm8 = vmand %vm5558_vm13, %vm20763_vm6  ;;  %vm20765_vm1 = vcmp.eq.s32.totalorder %v15304_v21, 1  ;;  %v15569_v25 = vor.u32 %v4549_v15, %v4548_v38  ;;  %vm20767_vm12 = vsmask.f32 256  ;;  %v4562_v5 = vshrl.u32 %v4482_v48, 16 }
 0x201   : > { %v5639_v11 = vsel %vm5590_vm8, 1, %v19962_v22  ;;  %vm4238_vm2 = vmpackc.low %vm20765_vm1, %vm20765_vm1  ;;  %v4560_v58 = vsel %vm20767_vm12, %v4548_v38, %v4559_v18  ;;  %v4400_v50 = vor.u32 %v4398_v6, %v4396_v40  ;;  %v4404_v37 = vrot.slane %v4402_v42, 1  ;;  %v20771_v18 = vld [vmem:[#allocation116_spill] sm:$0xff] }
 0x202   : > { %20766 = vst [vmem:[#allocation108_spill] sm:$0xff] %v15569_v25  ;;  %5708 = vperm.xlu0 %11537, %v5639_v11   ;;  %v4270_v35 = vsel %vm4238_vm2, 65537, %v19962_v22  ;;  %vm20768_vm13 = vcmp.eq.s32.totalorder %v15326_v63, 1  ;;  %vm20769_vm8 = vcmask 523264   ;;  %v2584_v21 = vrot.slane %v2582_v51, 3  ;;  %v15586_v63 = vpop.permute.xlu1 %4183  ;;  %v20776_v6 = vld [vmem:[#allocation156_spill] sm:$0xff] }
 0x203   : > { %vm4237_vm4 = vmpackc.low %vm20768_vm13, %vm20768_vm13  ;;  %10971 = vmatprep.mubr.msk.bf16.mxu1 %vm20769_vm8, %v4560_v58  ;;  %vm20770_vm1 = vcmp.ge.s32.totalorder %v15109_v62, 0  ;;  %vm20772_vm12 = vnez %v20771_v18  ;;  %v15584_v40 = vrot.slane %v4562_v5, 7  ;;  %v4565_v38 = vshll.u32 %v4482_v48, 16  ;;  %v20780_v11 = vld [vmem:[#allocation117_spill] sm:$0xff]  ;;  %v15614_v58 = vpop.permute.xlu0 %4180 }
 0x204   : > { %v4269_v43 = vsel %vm4237_vm4, 65537, %v19962_v22  ;;  %vm5561_vm7 = vmand %vm20772_vm12, %vm20770_vm1  ;;  %vm1715_vm13 = vcmp.ne.s16.totalorder %v15484_v61, 0  ;;  %vm20775_vm4 = vcmp.lt.s32.totalorder %v15109_v62, 8  ;;  %vm19688_vm1 = vcmp.ge.s32.totalorder %v20776_v6, 0  ;;  %v21076_v62 = vld [vmem:[#allocation122_spill] sm:$0xff] }
 0x205   : > { %vm20773_vm2 = vmmov %vm20769_vm8  ;;  %vm20774_vm8 = vsmask.f32 7424  ;;  %v15592_v15 = vcombine.low %v4269_v43, %v4270_v35  ;;  %vm20778_vm9 = vsmask.f32 4352  ;;  %v2587_v5 = vrot.slane %v2585_v41, 4  ;;  %v20782_v35 = vld [vmem:[#allocation157_spill] sm:$0xff] }
 0x206   : > { %10892 = vmatmul.mubr.msk.bf16.gmra.mrb[44].mxu0 %vm20773_vm2, %v15469_v47  ;;  %v4405_v51 = vsel %vm20774_vm8, %v4400_v50, %v4404_v37  ;;  %vm5593_vm6 = vmand %vm5561_vm7, %vm20775_vm4  ;;  %v15602_v42 = vsel %vm20778_vm9, %v15496_v4, %v15547_v56  ;;  %v20779_v47 = vld [vmem:[#allocation144_spill] sm:$0xff]  ;;  %vm20781_vm7 = vnez %v20780_v11  ;;  %v4406_v4 = vshrl.u32 %v15542_v17, 16  ;;  %v11692_v43 = vld [vmem:[#allocation2 + $0x48] sm:$0xff] }
 0x207   : > { %vm20777_vm12 = vmmov %vm20773_vm2  ;;  %v15605_v48 = vsel %vm1715_vm13, %v20779_v47, 0  ;;  %vm4466_vm2 = vcmp.ne.s16.totalorder %v4405_v51, 0  ;;  %v5642_v61 = vsel %vm5593_vm6, 1, %v19962_v22  ;;  %v4410_v50 = vshll.u32 %v15592_v15, 16  ;;  %v11575_v51 = vld [vmem:[%s19147_s4 + $0x88] sm:$0xff]  }
 0x208   : > { %10895 = vmatprep.mubr.msk.bf16.mxu0 %vm20777_vm12, %v15479_v24  ;;  %vm5560_vm8 = vmand %vm20781_vm7, %vm19687_vm15  ;;  %v4567_v24 = vor.u32 %v4565_v38, %v15584_v40  ;;  %5717 = vperm.xlu1 %11538, %v5642_v61   ;;  %v4483_v18 = vsel %vm4466_vm2, %v11692_v43, 0  ;;  %v20783_v38 = vld [vmem:[#allocation145_spill] sm:$0xff]  ;;  %vm20784_vm13 = vsmask.f32 3328  ;;  %vm20785_vm12 = vcmp.eq.s32.totalorder %v15362_v0, 1 }
 0x209   : > { %vm5592_vm9 = vmand %vm5560_vm8, %vm19685_vm10  ;;  %v1692_v41 = vsel %vm20784_vm13, %v20741_v12, %v20783_v38  ;;  %vm20786_vm10 = vsmask.f32 256  ;;  %v4570_v61 = vshrl.u32 %v4483_v18, 16  ;;  %v2591_v11 = vshrl.u32 %v15605_v48, 16 }
 0x20a   : > { %v5641_v17 = vsel %vm5592_vm9, 1, %v19962_v22  ;;  %vm4240_vm7 = vmpackc.low %vm20785_vm12, %vm20785_vm12  ;;  %v4568_v47 = vsel %vm20786_vm10, %v15492_v54, %v4567_v24  ;;  %v4408_v43 = vor.u32 %v4406_v4, %v4404_v37  ;;  %v4412_v25 = vrot.slane %v4410_v50, 1  ;;  %v20790_v54 = vld [vmem:[#allocation118_spill] sm:$0xff]  ;;  %v15649_v4 = vpop.permute.xlu1 %4998 }
 0x20b   : > { %5714 = vperm.xlu0 %11537, %v5641_v17   ;;  %v4272_v3 = vsel %vm4240_vm7, 65537, %v19962_v22  ;;  %vm20787_vm2 = vcmp.eq.s32.totalorder %v15381_v44, 1  ;;  %vm20788_vm12 = vcmask 523264   ;;  %v2594_v0 = vshll.u32 %v15605_v48, 16  ;;  %v11693_v44 = vld [vmem:[%s19147_s4 + $0x80] sm:$0xff]  }
 0x20c   : > { %vm4239_vm9 = vmpackc.low %vm20787_vm2, %vm20787_vm2  ;;  %10972 = vmatmul.mubr.msk.bf16.vlgmr.msra.gmra.mrb[0].mxu1 %vm20788_vm12, %v4568_v47  ;;  %vm20789_vm10 = vcmp.ge.s32.totalorder %v20759_v52, 0  ;;  %vm20791_vm15 = vnez %v20790_v54  ;;  %v15647_v37 = vrot.slane %v4570_v61, 7  ;;  %v4573_v24 = vshll.u32 %v4483_v18, 16  ;;  %v20794_v18 = vld [vmem:[#allocation152_spill] sm:$0xff] }
 0x20d   : > { %v4271_v12 = vsel %vm4239_vm9, 65537, %v19962_v22  ;;  %vm5563_vm8 = vmand %vm20791_vm15, %vm20789_vm10  ;;  %10992 = vmatpush3.bf16.msra.mxu1 %v11693_v44  ;;  %vm1716_vm7 = vcmp.ne.s16.totalorder %v1692_v41, 0  ;;  %vm20792_vm2 = vsmask.f32 7424  ;;  %vm20793_vm9 = vcmp.lt.s32.totalorder %v20759_v52, 8  ;;  %v20796_v41 = vld [vmem:[#allocation119_spill] sm:$0xff] }
 0x20e   : > { %v4413_v48 = vsel %vm20792_vm2, %v4408_v43, %v4412_v25  ;;  %v15655_v50 = vcombine.low %v4271_v12, %v4272_v3  ;;  %vm5595_vm12 = vmand %vm5563_vm8, %vm20793_vm9  ;;  %10993 = vmatprep.subr.bf16.mxu1 %v11575_v51  ;;  %v15660_v17 = vor.u32 %v2587_v5, %v2584_v21  ;;  %v15663_v47 = vsel %vm1716_vm7, %v20794_v18, 0  ;;  %v15672_v43 = vpop.permute.xlu0 %4995  ;;  %v11577_v21 = vld [vmem:[%s19147_s4 + $0x90] sm:$0xff]  }
 0x20f   : > { %vm4467_vm10 = vcmp.ne.s16.totalorder %v4413_v48, 0  ;;  %v5644_v61 = vsel %vm5595_vm12, 1, %v19962_v22  ;;  %vm20795_vm13 = vcmp.ge.s32.totalorder %v20764_v32, 0  ;;  %vm20797_vm2 = vnez %v20796_v41 }
 0x210   : > { %vm5562_vm6 = vmand %vm20797_vm2, %vm20795_vm13  ;;  %v4575_v3 = vor.u32 %v4573_v24, %v15647_v37  ;;  %vm20798_vm8 = vcmask 523264   ;;  %v2593_v5 = vrot.slane %v2591_v11, 3  ;;  %v4414_v12 = vshrl.u32 %v15592_v15, 16  ;;  %5723 = vperm.xlu1 %11538, %v5644_v61   ;;  %v15684_v24 = vld [vmem:[#allocation2 + $0x50] sm:$0xff] }
 0x211   : > { %10896 = vmatmul.mubr.msk.bf16.gmra.mrb[48].mxu0 %vm20798_vm8, %v15539_v2  ;;  %v4418_v54 = vshll.u32 %v15655_v50, 16  ;;  %vm20799_vm13 = vcmp.lt.s32.totalorder %v20764_v32, 8  ;;  %v4484_v44 = vsel %vm4467_vm10, %v15684_v24, 0  ;;  %vm20800_vm12 = vmmov %vm20798_vm8  ;;  %v2596_v48 = vrot.slane %v2594_v0, 4  ;;  %10994 = vmatpush3.bf16.msra.mxu1 %v11575_v51 }
 0x212   : > { %vm5594_vm7 = vmand %vm5562_vm6, %vm20799_vm13  ;;  %10899 = vmatprep.mubr.msk.bf16.mxu0 %vm20800_vm12, %v15602_v42  ;;  %vm20801_vm2 = vcmp.eq.s32.totalorder %v15412_v31, 1  ;;  %vm20802_vm6 = vsmask.f32 256  ;;  %v4578_v11 = vshrl.u32 %v4484_v44, 16  ;;  %v2600_v18 = vshrl.u32 %v15663_v47, 16  ;;  %v11578_v31 = vld [vmem:[%s19147_s4 + $0x98] sm:$0xff]   ;;  %10995 = vmatprep.subr.bf16.mxu1 %v11577_v21 }
 0x213   : > { %v5643_v2 = vsel %vm5594_vm7, 1, %v19962_v22  ;;  %vm4242_vm8 = vmpackc.low %vm20801_vm2, %vm20801_vm2  ;;  %v4576_v15 = vsel %vm20802_vm6, %v15584_v40, %v4575_v3  ;;  %v4416_v61 = vor.u32 %v4414_v12, %v4412_v25  ;;  %v4420_v41 = vrot.slane %v4418_v54, 1  ;;  %v20805_v25 = vld [vmem:[#allocation120_spill] sm:$0xff]  ;;  %v15714_v3 = vpop.permute.xlu1 %5004 }
 0x214   : > { %5720 = vperm.xlu0 %11537, %v5643_v2   ;;  %v4274_v42 = vsel %vm4242_vm8, 65537, %v19962_v22  ;;  %vm20803_vm10 = vcmp.eq.s32.totalorder %v15431_v1, 1  ;;  %vm20804_vm7 = vmmov %vm20800_vm12  ;;  %v2603_v40 = vshll.u32 %v15663_v47, 16  ;;  %vm20806_vm12 = vnez %v20805_v25 }
 0x215   : > { %vm4241_vm13 = vmpackc.low %vm20803_vm10, %vm20803_vm10  ;;  %10975 = vmatprep.mubr.msk.bf16.mxu1 %vm20804_vm7, %v4576_v15  ;;  %vm4211_vm8 = vcmp.eq.s32.totalorder %v15494_v60, 1  ;;  %v15712_v1 = vrot.slane %v4578_v11, 7  ;;  %v4581_v0 = vshll.u32 %v4484_v44, 16  ;;  %vm20807_vm6 = vsmask.f32 7424  ;;  %v20811_v15 = vld [vmem:[#allocation121_spill] sm:$0xff]  ;;  %10996 = vmatpush3.bf16.msra.mxu1 %v11577_v21 }
 0x216   : > { %v4273_v51 = vsel %vm4241_vm13, 65537, %v19962_v22  ;;  %vm5565_vm2 = vmand %vm20806_vm12, %vm19688_vm1  ;;  %v4421_v12 = vsel %vm20807_vm6, %v4416_v61, %v4420_v41  ;;  %vm20808_vm10 = vcmp.lt.s32.totalorder %v20776_v6, 8  ;;  %vm20809_vm12 = vsmask.f32 4352  ;;  %v15734_v61 = vpop.permute.xlu0 %5001  ;;  %10997 = vmatprep.subr.bf16.mxu1 %v11578_v31  ;;  %v11696_v21 = vld [vmem:[%s19154_s11 + $0xf0] sm:$0xff] }
 0x217   : > { %v15717_v54 = vcombine.low %v4273_v51, %v4274_v42  ;;  %vm5597_vm13 = vmand %vm5565_vm2, %vm20808_vm10  ;;  %v2589_v47 = vsel %vm20809_vm12, %v15547_v56, %v15660_v17  ;;  %v15725_v2 = vor.u32 %v2596_v48, %v2593_v5  ;;  %vm4468_vm1 = vcmp.ne.s16.totalorder %v4421_v12, 0  ;;  %v15741_v48 = vld [vmem:[#allocation2 + $0x58] sm:$0xff] }
 0x218   : > { %v5646_v44 = vsel %vm5597_vm13, 1, %v19962_v22  ;;  %vm20810_vm4 = vcmp.ge.s32.totalorder %v20782_v35, 0  ;;  %vm20812_vm6 = vnez %v20811_v15  ;;  %v4583_v11 = vor.u32 %v4581_v0, %v15712_v1 }
 0x219   : > { %vm5564_vm9 = vmand %vm20812_vm6, %vm20810_vm4  ;;  %v2602_v42 = vrot.slane %v2600_v18, 3  ;;  %v4422_v56 = vshrl.u32 %v15655_v50, 16  ;;  %v4426_v5 = vshll.u32 %v15717_v54, 16  ;;  %5729 = vperm.xlu1 %11538, %v5646_v44   ;;  %vm20813_vm2 = vcmp.lt.s32.totalorder %v20782_v35, 8  ;;  %10998 = vmatpush3.bf16.msra.mxu1 %v11578_v31  ;;  %v20827_v31 = vld [vmem:[#allocation124_spill] sm:$0xff] }
 0x21a   : > { %vm5596_vm10 = vmand %vm5564_vm9, %vm20813_vm2  ;;  %v4485_v51 = vsel %vm4468_vm1, %v15741_v48, 0  ;;  %v2605_v25 = vrot.slane %v2603_v40, 4  ;;  %vm20814_vm4 = vcmp.eq.s32.totalorder %v15464_v39, 1  ;;  %vm20815_vm6 = vsmask.f32 256 }
 0x21b   : > { %v5645_v0 = vsel %vm5596_vm10, 1, %v19962_v22  ;;  %vm4244_vm12 = vmpackc.low %vm20814_vm4, %vm20814_vm4  ;;  %v4584_v50 = vsel %vm20815_vm6, %v15647_v37, %v4583_v11  ;;  %v15753_v18 = vadd.s32 1, %v11696_v21  ;;  %v4586_v12 = vshrl.u32 %v4485_v51, 16  ;;  %v15772_v11 = vpop.permute.xlu1 %5010 }
 0x21c   : > { %vm20817_vm9 = vmmov %vm20804_vm7  ;;  %v4424_v44 = vor.u32 %v4422_v56, %v4420_v41  ;;  %v4428_v40 = vrot.slane %v4426_v5, 1  ;;  %5726 = vperm.xlu0 %11537, %v5645_v0   ;;  %v4276_v15 = vsel %vm4244_vm12, 65537, %v19962_v22  ;;  %vm20819_vm10 = vsmask.f32 4352 }
 0x21d   : > { %20816 = vst [vmem:[#allocation109_spill] sm:$0xff] %v15753_v18  ;;  %10900 = vmatmul.mubr.msk.bf16.gmra.mrb[52].mxu0 %vm20817_vm9, %v2589_v47  ;;  %vm4243_vm1 = vmpackc.low %vm4211_vm8, %vm4211_vm8  ;;  %v2598_v39 = vsel %vm20819_vm10, %v15660_v17, %v15725_v2  ;;  %vm20820_vm4 = vcmp.ge.s32.totalorder %v15262_v53, 0  ;;  %v20821_v47 = vld [vmem:[#allocation123_spill] sm:$0xff]  ;;  %v15770_v41 = vrot.slane %v4586_v12, 7  ;;  %v4589_v60 = vshll.u32 %v4485_v51, 16 }
 0x21e   : > { %vm20818_vm2 = vmmov %vm20804_vm7  ;;  %v4275_v37 = vsel %vm4243_vm1, 65537, %v19962_v22  ;;  %vm20822_vm6 = vnez %v20821_v47  ;;  %vm20824_vm12 = vsmask.f32 7424  ;;  %vm20825_vm1 = vcmp.lt.s32.totalorder %v15262_v53, 8 }
 0x21f   : > { %10976 = vmatmul.mubr.msk.bf16.gmra.mrb[4].mxu1 %vm20818_vm2, %v4584_v50  ;;  %vm5567_vm9 = vmand %vm20822_vm6, %vm20820_vm4  ;;  %v4429_v56 = vsel %vm20824_vm12, %v4424_v44, %v4428_v40  ;;  %v15776_v17 = vcombine.low %v4275_v37, %v4276_v15  ;;  %vm4214_vm10 = vcmp.eq.s32.totalorder %v15534_v30, 1  ;;  %vm19701_vm4 = vcmp.ge.s32.totalorder %v15331_v34, 0  ;;  %v15792_v50 = vpop.permute.xlu0 %5007  ;;  %v15804_v44 = vld [vmem:[#allocation2 + $0x60] sm:$0xff] }
 0x220   : > { %vm20823_vm8 = vmmov %vm20818_vm2  ;;  %v15782_v5 = vor.u32 %v2605_v25, %v2602_v42  ;;  %vm4469_vm6 = vcmp.ne.s16.totalorder %v4429_v56, 0  ;;  %vm20826_vm13 = vcmp.ge.s32.totalorder %v15267_v7, 0  ;;  %vm4213_vm12 = vcmp.eq.s32.totalorder %v15556_v49, 1  ;;  %v11697_v25 = vld [vmem:[%s19153_s10 + $0x8] sm:$0xff]  ;;  %v20836_v49 = vld [vmem:[#allocation148_spill] sm:$0xff] }
 0x221   : > { %10903 = vmatprep.mubr.msk.bf16.mxu0 %vm20823_vm8, %v2598_v39  ;;  %vm5599_vm2 = vmand %vm5567_vm9, %vm20825_vm1  ;;  %vm20828_vm8 = vnez %v20827_v31  ;;  %vm19700_vm7 = vcmp.lt.s32.totalorder %v15331_v34, 8  ;;  %v4591_v0 = vor.u32 %v4589_v60, %v15770_v41  ;;  %v4430_v21 = vshrl.u32 %v15717_v54, 16  ;;  %v11699_v39 = vld [vmem:[%s19153_s10] sm:$0xff] }
 0x222   : > { %v5648_v51 = vsel %vm5599_vm2, 1, %v19962_v22  ;;  %vm5566_vm15 = vmand %vm20828_vm8, %vm20826_vm13  ;;  %v4434_v42 = vshll.u32 %v15776_v17, 16  ;;  %vm20829_vm9 = vcmp.lt.s32.totalorder %v15267_v7, 8  ;;  %v15802_v12 = vadd.s32 1, %v11697_v25 }
 0x223   : > { %5735 = vperm.xlu1 %11538, %v5648_v51   ;;  %vm5598_vm1 = vmand %vm5566_vm15, %vm20829_vm9  ;;  %v4486_v15 = vsel %vm4469_vm6, %v15804_v44, 0  ;;  %v15815_v37 = vadd.s32 1, %v11699_v39  ;;  %vm20830_vm8 = vsmask.f32 256  ;;  %v4432_v56 = vor.u32 %v4430_v21, %v4428_v40  ;;  %v15834_v21 = vpop.permute.xlu1 %5016 }
 0x224   : > { %v5647_v54 = vsel %vm5598_vm1, 1, %v19962_v22  ;;  %vm4246_vm13 = vmpackc.low %vm4214_vm10, %vm4214_vm10  ;;  %v4592_v47 = vsel %vm20830_vm8, %v15712_v1, %v4591_v0  ;;  %v4594_v60 = vshrl.u32 %v4486_v15, 16  ;;  %v4436_v51 = vrot.slane %v4434_v42, 1 }
 0x225   : > { %5732 = vperm.xlu0 %11537, %v5647_v54   ;;  %v4278_v31 = vsel %vm4246_vm13, 65537, %v19962_v22  ;;  %vm4245_vm10 = vmpackc.low %vm4213_vm12, %vm4213_vm12  ;;  %vm20831_vm6 = vcmask 523264   ;;  %vm20832_vm9 = vsmask.f32 4352  ;;  %vm20833_vm1 = vcmp.ge.s32.totalorder %v15276_v26, 0 }
 0x226   : > { %10979 = vmatprep.mubr.msk.bf16.mxu1 %vm20831_vm6, %v4592_v47  ;;  %v2607_v30 = vsel %vm20832_vm9, %v15725_v2, %v15782_v5  ;;  %v4277_v25 = vsel %vm4245_vm10, 65537, %v19962_v22  ;;  %vm5569_vm8 = vmand %vm20607_vm5, %vm20833_vm1  ;;  %v15832_v40 = vrot.slane %v4594_v60, 7  ;;  %v4597_v0 = vshll.u32 %v4486_v15, 16  ;;  %v11700_v15 = vld [vmem:[%s19153_s10 + $0x18] sm:$0xff] }
 0x227   : > { %vm20835_vm13 = vmmov %vm20831_vm6  ;;  %vm20837_vm12 = vsmask.f32 3328  ;;  %vm20838_vm9 = vsmask.f32 7424  ;;  %v15842_v54 = vcombine.low %v4277_v25, %v4278_v31  ;;  %vm20839_vm10 = vcmp.lt.s32.totalorder %v15276_v26, 8  ;;  %v15867_v25 = vld [vmem:[#allocation2 + $0x68] sm:$0xff] }
 0x228   : > { %10904 = vmatmul.mubr.msk.bf16.gmra.mrb[56].mxu0 %vm20835_vm13, %v2607_v30  ;;  %v1701_v42 = vsel %vm20837_vm12, %v20783_v38, %v20836_v49  ;;  %v4437_v2 = vsel %vm20838_vm9, %v4432_v56, %v4436_v51  ;;  %vm5601_vm5 = vmand %vm5569_vm8, %vm20839_vm10  ;;  %vm4216_vm1 = vcmp.eq.s32.totalorder %v15586_v63, 1  ;;  %v15852_v38 = vadd.s32 1, %v11700_v15  ;;  %v15861_v56 = vpop.permute.xlu0 %5013  ;;  %v11702_v63 = vld [vmem:[%s19153_s10 + $0x10] sm:$0xff] }
 0x229   : > { %vm4470_vm13 = vcmp.ne.s16.totalorder %v4437_v2, 0  ;;  %v5650_v39 = vsel %vm5601_vm5, 1, %v19962_v22  ;;  %vm20840_vm12 = vcmp.ge.s32.totalorder %v15309_v20, 0  ;;  %vm4215_vm9 = vcmp.eq.s32.totalorder %v15614_v58, 1 }
 0x22a   : > { %vm5568_vm8 = vmand %vm20614_vm0, %vm20840_vm12  ;;  %v4599_v60 = vor.u32 %v4597_v0, %v15832_v40  ;;  %v4438_v31 = vshrl.u32 %v15776_v17, 16  ;;  %v4442_v30 = vshll.u32 %v15842_v54, 16  ;;  %5741 = vperm.xlu1 %11538, %v5650_v39   ;;  %vm20842_vm10 = vcmp.lt.s32.totalorder %v15309_v20, 8 }
 0x22b   : > { %vm5600_vm15 = vmand %vm5568_vm8, %vm20842_vm10  ;;  %v4487_v1 = vsel %vm4470_vm13, %v15867_v25, 0  ;;  %vm1717_vm5 = vcmp.ne.s16.totalorder %v1701_v42, 0  ;;  %vm6492_vm12 = vcmp.ge.s32.totalorder %v15815_v37, 0  ;;  %vm6524_vm2 = vcmp.lt.s32.totalorder %v15815_v37, 8 }
 0x22c   : > { %v5649_v2 = vsel %vm5600_vm15, 1, %v19962_v22  ;;  %vm4248_vm0 = vmpackc.low %vm4216_vm1, %vm4216_vm1  ;;  %vm20843_vm6 = vsmask.f32 256  ;;  %v4602_v0 = vshrl.u32 %v4487_v1, 16  ;;  %v1734_v15 = vsel %vm1717_vm5, %v15202_v16, 0  ;;  %v15915_v16 = vld [vmem:[#allocation2 + $0x70] sm:$0xff] }
 0x22d   : > { %v4600_v17 = vsel %vm20843_vm6, %v15770_v41, %v4599_v60  ;;  %v4440_v39 = vor.u32 %v4438_v31, %v4436_v51  ;;  %v4444_v47 = vrot.slane %v4442_v30, 1  ;;  %5738 = vperm.xlu0 %11537, %v5649_v2   ;;  %v4280_v42 = vsel %vm4248_vm0, 65537, %v19962_v22  ;;  %vm4247_vm15 = vmpackc.low %vm4215_vm9, %vm4215_vm9  ;;  %v15897_v60 = vpop.permute.xlu1 %5022 }
 0x22e   : > { %vm20844_vm1 = vcmask 523264   ;;  %v15887_v19 = vadd.s32 1, %v11702_v63  ;;  %v4279_v41 = vsel %vm4247_vm15, 65537, %v19962_v22  ;;  %vm5571_vm6 = vmand %vm20630_vm3, %vm19701_vm4  ;;  %vm5091_vm13 = vcmp.eq.s32.totalorder %v15649_v4, 1  ;;  %v20867_v4 = vld [vmem:[#allocation7_spill] sm:$0xff] }
 0x22f   : > { %10980 = vmatmul.mubr.msk.bf16.gmra.mrb[8].mxu1 %vm20844_vm1, %v4600_v17  ;;  %v15895_v58 = vrot.slane %v4602_v0, 7  ;;  %v4605_v51 = vshll.u32 %v4487_v1, 16  ;;  %vm20846_vm8 = vsmask.f32 7424  ;;  %v10117_v30 = vcombine.low %v4279_v41, %v4280_v42  ;;  %vm5603_vm9 = vmand %vm5571_vm6, %vm19700_vm7  ;;  %v15909_v0 = vpop.permute.xlu0 %5019 }
 0x230   : > { %v4445_v31 = vsel %vm20846_vm8, %v4440_v39, %v4444_v47  ;;  %vm5090_vm10 = vcmp.eq.s32.totalorder %v15672_v43, 1  ;;  %v2609_v2 = vshrl.u32 %v1734_v15, 16  ;;  %v5652_v17 = vsel %vm5603_vm9, 1, %v19962_v22 }
 0x231   : > { %vm4471_vm5 = vcmp.ne.s16.totalorder %v4445_v31, 0  ;;  %vm20847_vm3 = vcmp.ge.s32.totalorder %v15753_v18, 0  ;;  %v4607_v1 = vor.u32 %v4605_v51, %v15895_v58  ;;  %v2612_v39 = vshll.u32 %v1734_v15, 16  ;;  %5747 = vperm.xlu1 %11538, %v5652_v17   ;;  %v11704_v17 = vld [vmem:[#allocation2 + $0x80] sm:$0xf] }
 0x232   : > { %vm5570_vm0 = vmand %vm20640_vm11, %vm20847_vm3  ;;  %v4446_v42 = vshrl.u32 %v15842_v54, 16  ;;  %v4450_v41 = vshll.u32 %v10117_v30, 16  ;;  %vm20849_vm15 = vcmp.lt.s32.totalorder %v15753_v18, 8  ;;  %vm6495_vm6 = vcmp.ge.s32.totalorder %v15852_v38, 0  ;;  %v21447_v15 = vld [vmem:[#allocation132_spill] sm:$0xff] }
 0x233   : > { %vm5602_vm1 = vmand %vm5570_vm0, %vm20849_vm15  ;;  %v4488_v31 = vsel %vm4471_vm5, %v15915_v16, 0  ;;  %vm20852_vm8 = vsmask.f32 256  ;;  %vm20853_vm9 = vcmp.ne.s16.totalorder %v20836_v49, 0  ;;  %v4454_v53 = vshrl.u32 %v10117_v30, 16 }
 0x234   : > { %v5651_v63 = vsel %vm5602_vm1, 1, %v19962_v22  ;;  %vm15922_vm11 = vmpackc.low %vm5091_vm13, %vm5091_vm13  ;;  %v4608_v54 = vsel %vm20852_vm8, %v15832_v40, %v4607_v1  ;;  %v4610_v51 = vshrl.u32 %v4488_v31, 16  ;;  %v1735_v34 = vsel %vm20853_vm9, %v11704_v17, 0  ;;  %v4056_v1 = vld [vmem:[#allocation2 + $0x80] sm:$0xff] }
 0x235   : > { %v4448_v18 = vor.u32 %v4446_v42, %v4444_v47  ;;  %v4452_v26 = vrot.slane %v4450_v41, 1  ;;  %5744 = vperm.xlu0 %11537, %v5651_v63   ;;  %vm15933_vm5 = vmpackc.low %vm5090_vm10, %vm5090_vm10  ;;  %vm20856_vm13 = vcmask 523264   ;;  %v2611_v20 = vrot.slane %v2609_v2, 3  ;;  %v15947_v47 = vpop.permute.xlu1 %5028 }
 0x236   : > { %10983 = vmatprep.mubr.msk.bf16.mxu1 %vm20856_vm13, %v4608_v54  ;;  %vm20857_vm3 = vcmp.lt.s32.totalorder %v15802_v12, 8  ;;  %vm20858_vm0 = vcmp.ge.s32.totalorder %v15802_v12, 0  ;;  %vm6527_vm1 = vcmp.lt.s32.totalorder %v15852_v38, 8  ;;  %v4612_v49 = vrot.slane %v4610_v51, 7  ;;  %v20862_v12 = vld [vmem:[#allocation10_spill] sm:$0xff]  ;;  %v11705_v54 = vld [vmem:[#allocation2 + $0x78] sm:$0xff] }
 0x237   : > { %vm15942_vm15 = vmand %vm20858_vm0, %vm20857_vm3  ;;  %v4613_v43 = vshll.u32 %v4488_v31, 16  ;;  %v2614_v30 = vrot.slane %v2612_v39, 4  ;;  %vm20861_vm10 = vsmask.f32 7424  ;;  %v4456_v41 = vor.u32 %v4454_v53, %v4452_v26  ;;  %v15962_v53 = vpop.permute.xlu0 %5025  ;;  %v11706_v38 = vld [vmem:[%s19153_s10 + $0x28] sm:$0xff] }
 0x238   : > { %v4453_v42 = vsel %vm20861_vm10, %v4448_v18, %v4452_v26  ;;  %v5155_v2 = vsel %vm15922_vm11, 65537, %v19962_v22  ;;  %vm20863_vm8 = vcmp.ge.s32.totalorder %v20862_v12, 0  ;;  %v2618_v63 = vshrl.u32 %v1735_v34, 16  ;;  %vm15969_vm11 = vmand %vm6492_vm12, %vm6524_vm2 }
 0x239   : > { %vm6589_vm9 = vmand %vm15942_vm15, %vm20863_vm8  ;;  %vm4472_vm13 = vcmp.ne.s16.totalorder %v4453_v42, 0  ;;  %v5154_v31 = vsel %vm15933_vm5, 65537, %v19962_v22  ;;  %vm20864_vm3 = vcmp.lt.s32.totalorder %v20862_v12, 8  ;;  %v4615_v18 = vor.u32 %v4613_v43, %v4612_v49 }
 0x23a   : > { %vm6621_vm0 = vmand %vm6589_vm9, %vm20864_vm3  ;;  %v2615_v26 = vor.u32 %v2614_v30, %v2611_v20  ;;  %vm4473_vm10 = vcmp.ne.s16.totalorder %v4456_v41, 0  ;;  %vm5093_vm5 = vcmp.eq.s32.totalorder %v15714_v3, 1  ;;  %v4489_v51 = vsel %vm4472_vm13, %v11705_v54, 0 }
 0x23b   : > { %v6655_v39 = vsel %vm6621_vm0, 1, %v19962_v22  ;;  %v4490_v17 = vsel %vm4473_vm10, %v4056_v1, 0  ;;  %vm20868_vm8 = vcmp.ge.s32.totalorder %v20867_v4, 0  ;;  %vm5092_vm3 = vcmp.eq.s32.totalorder %v15734_v61, 1  ;;  %vm15988_vm13 = vmpackc.low %vm5093_vm5, %vm5093_vm5  ;;  %v16014_v61 = vpop.permute.xlu0 %5031 }
 0x23c   : > { %6690 = vperm.xlu1 %11538, %v6655_v39   ;;  %vm6588_vm9 = vmand %vm15969_vm11, %vm20868_vm8  ;;  %vm20869_vm0 = vsmask.f32 256  ;;  %v4618_v37 = vshrl.u32 %v4489_v51, 16  ;;  %v10146_v43 = vcombine.low %v5154_v31, %v5155_v2  ;;  %vm20870_vm2 = vcmp.lt.s32.totalorder %v20867_v4, 8  ;;  %v20889_v39 = vld [vmem:[#allocation6_spill] sm:$0xff] }
 0x23d   : > { %v4616_v20 = vsel %vm20869_vm0, %v15895_v58, %v4615_v18  ;;  %vm6620_vm12 = vmand %vm6588_vm9, %vm20870_vm2  ;;  %vm20871_vm7 = vcmask 523264   ;;  %v4621_v30 = vshll.u32 %v4489_v51, 16  ;;  %v4626_v1 = vshrl.u32 %v4490_v17, 16  ;;  %v15992_v18 = vpop.permute.xlu1 %5034 }
 0x23e   : > { %10984 = vmatmul.mubr.msk.bf16.gmra.mrb[12].mxu1 %vm20871_vm7, %v4616_v20  ;;  %v2620_v42 = vrot.slane %v2618_v63, 3  ;;  %v6654_v41 = vsel %vm6620_vm12, 1, %v19962_v22  ;;  %v4620_v58 = vrot.slane %v4618_v37, 7  ;;  %vm20874_vm10 = vsmask.f32 4352  ;;  %vm15999_vm7 = vmpackc.low %vm5092_vm3, %vm5092_vm3  ;;  %v20880_v20 = vld [vmem:[#allocation9_spill] sm:$0xff] }
 0x23f   : > { %v2616_v2 = vsel %vm20874_vm10, %v15782_v5, %v2615_v26  ;;  %v2621_v31 = vshll.u32 %v1735_v34, 16  ;;  %6687 = vperm.xlu0 %11537, %v6654_v41   ;;  %v4628_v3 = vrot.slane %v4626_v1, 7  ;;  %v4629_v54 = vshll.u32 %v4490_v17, 16  ;;  %vm16008_vm8 = vmand %vm6495_vm6, %vm6527_vm1 }
 0x240   : > { %vm20877_vm5 = vcmask 523264   ;;  %v20878_v51 = vmov 0  ;;  %vm6494_vm9 = vcmp.ge.s32.totalorder %v15887_v19, 0  ;;  %vm6526_vm0 = vcmp.lt.s32.totalorder %v15887_v19, 8  ;;  %v11707_v19 = vld [vmem:[%s19153_s10 + $0x20] sm:$0xff] }
 0x241   : > { %10907 = vmatprep.mubr.msk.bf16.mxu0 %vm20877_vm5, %v2616_v2  ;;  %v20879_v51 = vsel %vm16008_vm8, 4294967295, %v20878_v51  ;;  %v4623_v34 = vor.u32 %v4621_v30, %v4620_v58  ;;  %v2623_v5 = vrot.slane %v2621_v31, 4  ;;  %vm20881_vm3 = vcmp.ge.s32.totalorder %v20880_v20, 0  ;;  %vm16041_vm5 = vmand %vm6494_vm9, %vm6526_vm0  ;;  %v16056_v63 = vpop.permute.xlu1 %5040 }
 0x242   : > { %vm6591_vm2 = vmand %vm16008_vm8, %vm20881_vm3  ;;  %v6465_v17 = vadd.s32 1, %v11706_v38  ;;  %v4631_v37 = vor.u32 %v4629_v54, %v4628_v3  ;;  %vm16023_vm6 = vcmp.ne.s16.totalorder %v10146_v43, 0  ;;  %v5157_v30 = vsel %vm15988_vm13, 65537, %v19962_v22 }
 0x243   : > { %v5156_v41 = vsel %vm15999_vm7, 65537, %v19962_v22  ;;  %vm20884_vm1 = vcmp.lt.s32.totalorder %v20880_v20, 8  ;;  %vm20885_vm10 = vsmask.f32 256  ;;  %v2624_v31 = vor.u32 %v2623_v5, %v2620_v42  ;;  %v11708_v5 = vld [vmem:[#allocation2 + $0x8] sm:$0xff] }
 0x244   : > { %vm6623_vm12 = vmand %vm6591_vm2, %vm20884_vm1  ;;  %v4624_v2 = vsel %vm20885_vm10, %v4612_v49, %v4623_v34  ;;  %v20886_v43 = vmov 0  ;;  %vm5095_vm13 = vcmp.eq.s32.totalorder %v15772_v11, 1  ;;  %vm20888_vm3 = vcmask 523264  }
 0x245   : > { %v6657_v3 = vsel %vm6623_vm12, 1, %v19962_v22  ;;  %v20887_v43 = vsel %vm16041_vm5, 4294967295, %v20886_v43  ;;  %10987 = vmatprep.mubr.msk.bf16.mxu1 %vm20888_vm3, %v4624_v2  ;;  %vm20890_vm7 = vcmp.ge.s32.totalorder %v20889_v39, 0  ;;  %v6464_v49 = vadd.s32 1, %v11707_v19  ;;  %vm20891_vm9 = vmmov %vm20885_vm10 }
 0x246   : > { %6696 = vperm.xlu1 %11538, %v6657_v3   ;;  %vm6590_vm2 = vmand %vm16041_vm5, %vm20890_vm7  ;;  %v4632_v42 = vsel %vm20891_vm9, %v4620_v58, %v4631_v37  ;;  %vm20892_vm0 = vsmask.f32 4352  ;;  %v10147_v34 = vcombine.low %v5156_v41, %v5157_v30  ;;  %vm20893_vm12 = vcmp.lt.s32.totalorder %v20889_v39, 8  ;;  %v20902_v41 = vld [vmem:[#allocation12_spill] sm:$0xff] }
 0x247   : > { %v2625_v54 = vsel %vm20892_vm0, %v2615_v26, %v2624_v31  ;;  %vm6622_vm10 = vmand %vm6590_vm2, %vm20893_vm12  ;;  %vm6497_vm3 = vcmp.ge.s32.totalorder %v6465_v17, 0  ;;  %vm6529_vm4 = vcmp.lt.s32.totalorder %v6465_v17, 8  ;;  %vm20894_vm7 = vcmask 523264   ;;  %v16070_v26 = vpop.permute.xlu0 %5037  ;;  %v16094_v31 = vpop.permute.xlu1 %5046  ;;  %v11579_v3 = vld [vmem:[%s19147_s4 + $0xa0] sm:$0xff]  }
 0x248   : > { %10988 = vmatmul.mubr.msk.bf16.gmra.mrb[16].mxu1 %vm20894_vm7, %v4632_v42  ;;  %v5250_v38 = vsel %vm16023_vm6, %v11708_v5, 0  ;;  %vm20895_vm1 = vmmov %vm20894_vm7  ;;  %v6656_v58 = vsel %vm6622_vm10, 1, %v19962_v22  ;;  %vm20897_vm2 = vcmp.eq.s32.totalorder %v15792_v50, 1  ;;  %v20898_v1 = vmov 0  ;;  %v11709_v50 = vld [vmem:[%s19153_s10 + $0x38] sm:$0xff]  ;;  %v20909_v5 = vld [vmem:[#allocation13_spill] sm:$0xff]  ;;  %11031 = vmatprep.subr.bf16.mxu1 %v11579_v3 }
 0x249   : > { %10908 = vmatmul.mubr.msk.bf16.gmra.mrb[60].mxu0 %vm20895_vm1, %v2625_v54  ;;  %vm5127_vm9 = vmpackc.low %vm5095_vm13, %vm5095_vm13  ;;  %6693 = vperm.xlu0 %11537, %v6656_v58   ;;  %vm6528_vm10 = vcmp.lt.s32.totalorder %v6464_v49, 8  ;;  %vm16081_vm13 = vcmp.ne.s16.totalorder %v10147_v34, 0  ;;  %vm20903_vm7 = vcmp.ge.s32.totalorder %v20902_v41, 0  ;;  %v6467_v2 = vadd.s32 1, %v11709_v50  ;;  %v11710_v54 = vld [vmem:[#allocation2 + $0x10] sm:$0xff] }
 0x24a   : > { %vm20896_vm0 = vmmov %vm20895_vm1  ;;  %v5159_v17 = vsel %vm5127_vm9, 65537, %v19962_v22  ;;  %vm6496_vm1 = vcmp.ge.s32.totalorder %v6464_v49, 0  ;;  %v20905_v49 = vmov 0  ;;  %v5251_v34 = vsel %vm16081_vm13, %v11710_v54, 0  ;;  %v20918_v54 = vld [vmem:[#allocation15_spill] sm:$0xff] }
 0x24b   : > { %10999 = vmatprep.mubr.msk.bf16.mxu1 %vm20896_vm0, %v5250_v38  ;;  %vm5126_vm12 = vmpackc.low %vm20897_vm2, %vm20897_vm2  ;;  %v11711_v38 = vld [vmem:[%s19153_s10 + $0x30] sm:$0xff]  ;;  %vm6499_vm13 = vcmp.ge.s32.totalorder %v6467_v2, 0  ;;  %vm20912_vm2 = vcmask 523264   ;;  %v20955_v39 = vmov 0 }
 0x24c   : > { %v5158_v37 = vsel %vm5126_vm12, 65537, %v19962_v22  ;;  %vm16077_vm6 = vmand %vm6497_vm3, %vm6529_vm4  ;;  %vm20904_vm4 = vcmp.lt.s32.totalorder %v20902_v41, 8  ;;  %v6466_v58 = vadd.s32 1, %v11711_v38 }
 0x24d   : > { %v20899_v1 = vsel %vm16077_vm6, 4294967295, %v20898_v1  ;;  %v10148_v30 = vcombine.low %v5158_v37, %v5159_v17  ;;  %vm6593_vm9 = vmand %vm16077_vm6, %vm20903_vm7  ;;  %vm20910_vm7 = vcmp.ge.s32.totalorder %v20909_v5, 0  ;;  %v16119_v17 = vpop.permute.xlu0 %5043  ;;  %v11712_v37 = vld [vmem:[#allocation2 + $0x18] sm:$0xff]  ;;  %vm20926_vm6 = vcmask 523264  }
 0x24e   : > { %vm6625_vm3 = vmand %vm6593_vm9, %vm20904_vm4 }
 0x24f   : > { %v6659_v19 = vsel %vm6625_vm3, 1, %v19962_v22  ;;  %vm16100_vm0 = vmand %vm6496_vm1, %vm6528_vm10  ;;  %vm16105_vm12 = vcmp.ne.s16.totalorder %v10148_v30, 0  ;;  %vm20911_vm10 = vcmp.lt.s32.totalorder %v20909_v5, 8  ;;  %vm6531_vm3 = vcmp.lt.s32.totalorder %v6467_v2, 8 }
 0x250   : > { %v20906_v49 = vsel %vm16100_vm0, 4294967295, %v20905_v49  ;;  %6702 = vperm.xlu1 %11538, %v6659_v19   ;;  %vm6592_vm9 = vmand %vm16100_vm0, %vm20910_vm7  ;;  %11000 = vmatmul.mubr.msk.bf16.vlgmr.msra.gmra.mrb[20].mxu1 %vm20912_vm2, %v5251_v34  ;;  %v5252_v11 = vsel %vm16105_vm12, %v11712_v37, 0  ;;  %vm20913_vm7 = vcmp.eq.s32.totalorder %v15834_v21, 1  ;;  %v20916_v19 = vmov 0  ;;  %v16140_v21 = vpop.permute.xlu1 %5052 }
 0x251   : > { %vm6624_vm4 = vmand %vm6592_vm9, %vm20911_vm10  ;;  %11032 = vmatpush3.bf16.msra.mxu1 %v11579_v3  ;;  %vm20915_vm9 = vcmp.eq.s32.totalorder %v15861_v56, 1  ;;  %vm6498_vm12 = vcmp.ge.s32.totalorder %v6466_v58, 0  ;;  %v11580_v3 = vld [vmem:[%s19147_s4 + $0xa8] sm:$0xff]   ;;  %v16154_v38 = vpop.permute.xlu0 %5049  ;;  %v20921_v37 = vmov 0 }
 0x252   : > { %v6658_v30 = vsel %vm6624_vm4, 1, %v19962_v22  ;;  %vm5129_vm1 = vmpackc.low %vm20913_vm7, %vm20913_vm7  ;;  %vm6530_vm4 = vcmp.lt.s32.totalorder %v6466_v58, 8  ;;  %v11713_v56 = vld [vmem:[%s19153_s10 + $0x48] sm:$0xff]  ;;  %11033 = vmatprep.subr.bf16.mxu1 %v11580_v3 }
 0x253   : > { %vm20914_vm14 = vmmov %vm20912_vm2  ;;  %6699 = vperm.xlu0 %11537, %v6658_v30   ;;  %v5161_v50 = vsel %vm5129_vm1, 65537, %v19962_v22  ;;  %v6469_v34 = vadd.s32 1, %v11713_v56  ;;  %v11714_v30 = vld [vmem:[%s19153_s10 + $0x40] sm:$0xff] }
 0x254   : > { %11003 = vmatprep.mubr.msk.bf16.mxu1 %vm20914_vm14, %v5252_v11  ;;  %vm5128_vm2 = vmpackc.low %vm20915_vm9, %vm20915_vm9  ;;  %vm20919_vm14 = vcmp.ge.s32.totalorder %v20918_v54, 0  ;;  %vm5099_vm9 = vcmp.eq.s32.totalorder %v15897_v60, 1  ;;  %v20923_v11 = vld [vmem:[#allocation17_spill] sm:$0xff] }
 0x255   : > { %v5160_v2 = vsel %vm5128_vm2, 65537, %v19962_v22  ;;  %vm16136_vm10 = vmand %vm6499_vm13, %vm6531_vm3  ;;  %vm20920_vm13 = vcmp.lt.s32.totalorder %v20918_v54, 8  ;;  %11034 = vmatpush3.bf16.msra.mxu1 %v11580_v3  ;;  %v16174_v3 = vpop.permute.xlu1 %5058  ;;  %v20932_v54 = vmov 0 }
 0x256   : > { %v20917_v19 = vsel %vm16136_vm10, 4294967295, %v20916_v19  ;;  %v10149_v42 = vcombine.low %v5160_v2, %v5161_v50  ;;  %vm6595_vm1 = vmand %vm16136_vm10, %vm20919_vm14  ;;  %vm20924_vm14 = vcmp.ge.s32.totalorder %v20923_v11, 0  ;;  %v6468_v50 = vadd.s32 1, %v11714_v30  ;;  %v11715_v2 = vld [vmem:[#allocation2 + $0x20] sm:$0xff] }
 0x257   : > { %vm6627_vm3 = vmand %vm6595_vm1, %vm20920_vm13  ;;  %vm5098_vm1 = vcmp.eq.s32.totalorder %v15909_v0, 1  ;;  %vm6501_vm13 = vcmp.ge.s32.totalorder %v6469_v34, 0  ;;  %v11581_v0 = vld [vmem:[%s19147_s4 + $0xb0] sm:$0xff]   ;;  %v20927_v30 = vmov 0 }
 0x258   : > { %v6661_v58 = vsel %vm6627_vm3, 1, %v19962_v22  ;;  %vm16157_vm7 = vmand %vm6498_vm12, %vm6530_vm4  ;;  %vm5237_vm2 = vcmp.ne.s16.totalorder %v10149_v42, 0  ;;  %vm20925_vm12 = vcmp.lt.s32.totalorder %v20923_v11, 8  ;;  %vm6533_vm3 = vcmp.lt.s32.totalorder %v6469_v34, 8  ;;  %v16185_v34 = vpop.permute.xlu0 %5055  ;;  %11035 = vmatprep.subr.bf16.mxu1 %v11581_v0 }
 0x259   : > { %v20922_v37 = vsel %vm16157_vm7, 4294967295, %v20921_v37  ;;  %6708 = vperm.xlu1 %11538, %v6661_v58   ;;  %vm6594_vm10 = vmand %vm16157_vm7, %vm20924_vm14  ;;  %v5253_v56 = vsel %vm5237_vm2, %v11715_v2, 0  ;;  %vm6532_vm14 = vcmp.lt.s32.totalorder %v6468_v50, 8  ;;  %11036 = vmatpush3.bf16.msra.mxu1 %v11581_v0  ;;  %v11717_v0 = vld [vmem:[%s19153_s10 + $0x50] sm:$0xff]  ;;  %v16210_v41 = vpop.permute.xlu1 %5064 }
 0x25a   : > { %vm6626_vm4 = vmand %vm6594_vm10, %vm20925_vm12  ;;  %11004 = vmatmul.mubr.msk.bf16.gmra.mrb[24].mxu1 %vm20926_vm6, %v5253_v56  ;;  %vm6500_vm6 = vcmp.ge.s32.totalorder %v6468_v50, 0  ;;  %v20929_v56 = vld [vmem:[#allocation21_spill] sm:$0xff] }
 0x25b   : > { %v6660_v60 = vsel %vm6626_vm4, 1, %v19962_v22  ;;  %vm5131_vm0 = vmpackc.low %vm5099_vm9, %vm5099_vm9  ;;  %vm20930_vm9 = vcmp.ge.s32.totalorder %v20929_v56, 0 }
 0x25c   : > { %6705 = vperm.xlu0 %11537, %v6660_v60   ;;  %v5163_v42 = vsel %vm5131_vm0, 65537, %v19962_v22  ;;  %vm5130_vm2 = vmpackc.low %vm5098_vm1, %vm5098_vm1  ;;  %v11716_v60 = vld [vmem:[%s19153_s10 + $0x58] sm:$0xff]  ;;  %vm20931_vm0 = vcmp.lt.s32.totalorder %v20929_v56, 8 }
 0x25d   : > { %v5162_v58 = vsel %vm5130_vm2, 65537, %v19962_v22  ;;  %vm16181_vm10 = vmand %vm6501_vm13, %vm6533_vm3  ;;  %v6471_v11 = vadd.s32 1, %v11716_v60  ;;  %vm5101_vm13 = vcmp.eq.s32.totalorder %v15947_v47, 1  ;;  %v11718_v60 = vld [vmem:[#allocation2 + $0x28] sm:$0xff] }
 0x25e   : > { %v20928_v30 = vsel %vm16181_vm10, 4294967295, %v20927_v30  ;;  %v10150_v2 = vcombine.low %v5162_v58, %v5163_v42  ;;  %vm6597_vm12 = vmand %vm16181_vm10, %vm20930_vm9  ;;  %v20934_v42 = vld [vmem:[#allocation23_spill] sm:$0xff]  ;;  %vm5100_vm10 = vcmp.eq.s32.totalorder %v15962_v53, 1  ;;  %v6470_v58 = vadd.s32 1, %v11717_v0  ;;  %v16222_v0 = vpop.permute.xlu0 %5061  ;;  %v11719_v53 = vld [vmem:[%s19153_s10 + $0x68] sm:$0xff] }
 0x25f   : > { %vm6629_vm1 = vmand %vm6597_vm12, %vm20931_vm0  ;;  %vm20935_vm2 = vcmp.ge.s32.totalorder %v20934_v42, 0  ;;  %vm6503_vm12 = vcmp.ge.s32.totalorder %v6471_v11, 0  ;;  %vm6535_vm0 = vcmp.lt.s32.totalorder %v6471_v11, 8 }
 0x260   : > { %v6663_v50 = vsel %vm6629_vm1, 1, %v19962_v22  ;;  %vm16197_vm4 = vmand %vm6500_vm6, %vm6532_vm14  ;;  %vm5238_vm3 = vcmp.ne.s16.totalorder %v10150_v2, 0  ;;  %v11582_v2 = vld [vmem:[%s19147_s4 + $0xb8] sm:$0xff]   ;;  %vm20936_vm6 = vcmp.lt.s32.totalorder %v20934_v42, 8  ;;  %vm20937_vm1 = vcmask 523264   ;;  %v20940_v42 = vld [vmem:[#allocation26_spill] sm:$0xff] }
 0x261   : > { %v20933_v54 = vsel %vm16197_vm4, 4294967295, %v20932_v54  ;;  %6714 = vperm.xlu1 %11538, %v6663_v50   ;;  %vm6596_vm9 = vmand %vm16197_vm4, %vm20935_vm2  ;;  %v5254_v56 = vsel %vm5238_vm3, %v11718_v60, 0  ;;  %11037 = vmatprep.subr.bf16.mxu1 %v11582_v2  ;;  %vm5102_vm4 = vcmp.eq.s32.totalorder %v16014_v61, 1 }
 0x262   : > { %vm6628_vm14 = vmand %vm6596_vm9, %vm20936_vm6  ;;  %11007 = vmatprep.mubr.msk.bf16.mxu1 %vm20937_vm1, %v5254_v56  ;;  %11038 = vmatpush3.bf16.msra.mxu1 %v11582_v2  ;;  %v20938_v56 = vmov 0  ;;  %vm6502_vm6 = vcmp.ge.s32.totalorder %v6470_v58, 0  ;;  %v16242_v2 = vpop.permute.xlu1 %5070  ;;  %v16259_v20 = vpop.permute.xlu0 %5067 }
 0x263   : > { %v6662_v50 = vsel %vm6628_vm14, 1, %v19962_v22  ;;  %vm5133_vm2 = vmpackc.low %vm5101_vm13, %vm5101_vm13  ;;  %vm6534_vm14 = vcmp.lt.s32.totalorder %v6470_v58, 8  ;;  %vm20941_vm13 = vcmp.ge.s32.totalorder %v20940_v42, 0  ;;  %v20943_v58 = vmov 0 }
 0x264   : > { %6711 = vperm.xlu0 %11537, %v6662_v50   ;;  %v5165_v60 = vsel %vm5133_vm2, 65537, %v19962_v22  ;;  %vm5132_vm3 = vmpackc.low %vm5100_vm10, %vm5100_vm10  ;;  %v6473_v50 = vadd.s32 1, %v11719_v53  ;;  %vm20942_vm10 = vcmp.lt.s32.totalorder %v20940_v42, 8  ;;  %v11720_v42 = vld [vmem:[%s19153_s10 + $0x60] sm:$0xff] }
 0x265   : > { %v5164_v11 = vsel %vm5132_vm3, 65537, %v19962_v22  ;;  %vm16229_vm9 = vmand %vm6503_vm12, %vm6535_vm0  ;;  %vm5103_vm0 = vcmp.eq.s32.totalorder %v15992_v18, 1 }
 0x266   : > { %v20939_v56 = vsel %vm16229_vm9, 4294967295, %v20938_v56  ;;  %v10151_v47 = vcombine.low %v5164_v11, %v5165_v60  ;;  %vm6599_vm1 = vmand %vm16229_vm9, %vm20941_vm13  ;;  %v20945_v60 = vld [vmem:[#allocation29_spill] sm:$0xff]  ;;  %v6472_v11 = vadd.s32 1, %v11720_v42  ;;  %v11721_v42 = vld [vmem:[%s19153_s10 + $0x78] sm:$0xff] }
 0x267   : > { %vm6631_vm2 = vmand %vm6599_vm1, %vm20942_vm10  ;;  %vm20946_vm13 = vcmp.ge.s32.totalorder %v20945_v60, 0  ;;  %vm6505_vm1 = vcmp.ge.s32.totalorder %v6473_v50, 0  ;;  %vm6537_vm10 = vcmp.lt.s32.totalorder %v6473_v50, 8 }
 0x268   : > { %v6665_v5 = vsel %vm6631_vm2, 1, %v19962_v22  ;;  %vm16245_vm12 = vmand %vm6502_vm6, %vm6534_vm14  ;;  %vm5239_vm3 = vcmp.ne.s16.totalorder %v10151_v47, 0  ;;  %vm20947_vm6 = vcmp.lt.s32.totalorder %v20945_v60, 8  ;;  %vm20948_vm2 = vcmask 523264   ;;  %v16271_v47 = vpop.permute.xlu1 %5076  ;;  %v20952_v60 = vld [vmem:[#allocation32_spill] sm:$0xff] }
 0x269   : > { %v20944_v58 = vsel %vm16245_vm12, 4294967295, %v20943_v58  ;;  %6720 = vperm.xlu1 %11538, %v6665_v5   ;;  %vm6598_vm9 = vmand %vm16245_vm12, %vm20946_vm13  ;;  %v5255_v53 = vsel %vm5239_vm3, %v15523_v57, 0  ;;  %v20949_v57 = vmov 0  ;;  %vm6504_vm3 = vcmp.ge.s32.totalorder %v6472_v11, 0 }
 0x26a   : > { %vm6630_vm14 = vmand %vm6598_vm9, %vm20947_vm6  ;;  %11008 = vmatmul.mubr.msk.bf16.gmra.mrb[28].mxu1 %vm20948_vm2, %v5255_v53  ;;  %vm6536_vm5 = vcmp.lt.s32.totalorder %v6472_v11, 8  ;;  %vm20953_vm9 = vcmp.ge.s32.totalorder %v20952_v60, 0  ;;  %v6475_v53 = vadd.s32 1, %v11721_v42  ;;  %v11723_v42 = vld [vmem:[#allocation2 + $0x38] sm:$0xff] }
 0x26b   : > { %v6664_v18 = vsel %vm6630_vm14, 1, %v19962_v22  ;;  %vm5135_vm13 = vmpackc.low %vm5103_vm0, %vm5103_vm0  ;;  %vm5105_vm14 = vcmp.eq.s32.totalorder %v16056_v63, 1 }
 0x26c   : > { %6717 = vperm.xlu0 %11537, %v6664_v18   ;;  %v5167_v61 = vsel %vm5135_vm13, 65537, %v19962_v22  ;;  %vm5134_vm12 = vmpackc.low %vm5102_vm4, %vm5102_vm4  ;;  %vm20954_vm4 = vcmp.lt.s32.totalorder %v20952_v60, 8  ;;  %v16282_v18 = vpop.permute.xlu0 %5073  ;;  %vm5104_vm13 = vcmp.eq.s32.totalorder %v16070_v26, 1 }
 0x26d   : > { %v5166_v5 = vsel %vm5134_vm12, 65537, %v19962_v22  ;;  %vm16267_vm7 = vmand %vm6505_vm1, %vm6537_vm10 }
 0x26e   : > { %v20950_v57 = vsel %vm16267_vm7, 4294967295, %v20949_v57  ;;  %v10152_v50 = vcombine.low %v5166_v5, %v5167_v61  ;;  %vm6601_vm0 = vmand %vm16267_vm7, %vm20953_vm9  ;;  %v20957_v61 = vld [vmem:[#allocation35_spill] sm:$0xff]  ;;  %v11722_v5 = vld [vmem:[%s19153_s10 + $0x70] sm:$0xff]  ;;  %vm6507_vm9 = vcmp.ge.s32.totalorder %v6475_v53, 0 }
 0x26f   : > { %20951 = vst [vmem:[#allocation110_spill] sm:$0xff] %v20950_v57  ;;  %vm6633_vm12 = vmand %vm6601_vm0, %vm20954_vm4  ;;  %vm20958_vm10 = vcmp.ge.s32.totalorder %v20957_v61, 0  ;;  %v6474_v60 = vadd.s32 1, %v11722_v5  ;;  %vm6539_vm0 = vcmp.lt.s32.totalorder %v6475_v53, 8  ;;  %vm20960_vm4 = vcmask 523264  }
 0x270   : > { %v6667_v11 = vsel %vm6633_vm12, 1, %v19962_v22  ;;  %vm16285_vm6 = vmand %vm6504_vm3, %vm6536_vm5  ;;  %vm5240_vm1 = vcmp.ne.s16.totalorder %v10152_v50, 0  ;;  %vm20959_vm5 = vcmp.lt.s32.totalorder %v20957_v61, 8  ;;  %v16302_v50 = vpop.permute.xlu1 %5657  ;;  %v20961_v5 = vmov 0  ;;  %v16310_v53 = vpop.permute.xlu0 %5654  ;;  %v20964_v61 = vld [vmem:[#allocation38_spill] sm:$0xff] }
 0x271   : > { %v20956_v39 = vsel %vm16285_vm6, 4294967295, %v20955_v39  ;;  %6726 = vperm.xlu1 %11538, %v6667_v11   ;;  %vm6600_vm2 = vmand %vm16285_vm6, %vm20958_vm10  ;;  %v5256_v12 = vsel %vm5240_vm1, %v11723_v42, 0  ;;  %vm6506_vm1 = vcmp.ge.s32.totalorder %v6474_v60, 0  ;;  %v11724_v42 = vld [vmem:[%s19153_s10 + $0x88] sm:$0xff] }
 0x272   : > { %vm6632_vm3 = vmand %vm6600_vm2, %vm20959_vm5  ;;  %11011 = vmatprep.mubr.msk.bf16.mxu1 %vm20960_vm4, %v5256_v12  ;;  %vm6538_vm2 = vcmp.lt.s32.totalorder %v6474_v60, 8  ;;  %vm20965_vm5 = vcmp.ge.s32.totalorder %v20964_v61, 0  ;;  %v20967_v60 = vmov 0 }
 0x273   : > { %v6666_v63 = vsel %vm6632_vm3, 1, %v19962_v22  ;;  %vm5137_vm12 = vmpackc.low %vm5105_vm14, %vm5105_vm14 }
 0x274   : > { %6723 = vperm.xlu0 %11537, %v6666_v63   ;;  %v5169_v26 = vsel %vm5137_vm12, 65537, %v19962_v22  ;;  %vm5136_vm10 = vmpackc.low %vm5104_vm13, %vm5104_vm13  ;;  %v6477_v63 = vadd.s32 1, %v11724_v42  ;;  %vm20966_vm13 = vcmp.lt.s32.totalorder %v20964_v61, 8  ;;  %v11726_v42 = vld [vmem:[#allocation2 + $0x40] sm:$0xff]  ;;  %v16335_v6 = vpop.permute.xlu1 %5663 }
 0x275   : > { %v5168_v11 = vsel %vm5136_vm10, 65537, %v19962_v22  ;;  %vm16306_vm7 = vmand %vm6507_vm9, %vm6539_vm0  ;;  %vm5107_vm0 = vcmp.eq.s32.totalorder %v16094_v31, 1  ;;  %v16341_v31 = vpop.permute.xlu0 %5660 }
 0x276   : > { %v20962_v5 = vsel %vm16306_vm7, 4294967295, %v20961_v5  ;;  %v10153_v12 = vcombine.low %v5168_v11, %v5169_v26  ;;  %vm6603_vm14 = vmand %vm16306_vm7, %vm20965_vm5  ;;  %v20970_v26 = vld [vmem:[#allocation41_spill] sm:$0xff]  ;;  %vm5106_vm5 = vcmp.eq.s32.totalorder %v16119_v17, 1  ;;  %v11725_v11 = vld [vmem:[%s19153_s10 + $0x80] sm:$0xff] }
 0x277   : > { %20963 = vst [vmem:[#allocation111_spill] sm:$0xff] %v20962_v5  ;;  %vm6635_vm3 = vmand %vm6603_vm14, %vm20966_vm13  ;;  %vm20971_vm12 = vcmp.ge.s32.totalorder %v20970_v26, 0  ;;  %v6476_v61 = vadd.s32 1, %v11725_v11  ;;  %vm6509_vm14 = vcmp.ge.s32.totalorder %v6477_v63, 0  ;;  %vm6541_vm13 = vcmp.lt.s32.totalorder %v6477_v63, 8 }
 0x278   : > { %v6669_v4 = vsel %vm6635_vm3, 1, %v19962_v22  ;;  %vm16322_vm9 = vmand %vm6506_vm1, %vm6538_vm2  ;;  %vm5241_vm4 = vcmp.ne.s16.totalorder %v10153_v12, 0  ;;  %vm20972_vm1 = vcmp.lt.s32.totalorder %v20970_v26, 8  ;;  %vm20973_vm3 = vcmask 523264   ;;  %v20977_v26 = vld [vmem:[#allocation44_spill] sm:$0xff] }
 0x279   : > { %v20968_v60 = vsel %vm16322_vm9, 4294967295, %v20967_v60  ;;  %6732 = vperm.xlu1 %11538, %v6669_v4   ;;  %vm6602_vm10 = vmand %vm16322_vm9, %vm20971_vm12  ;;  %v5257_v7 = vsel %vm5241_vm4, %v11726_v42, 0  ;;  %v20974_v11 = vmov 0  ;;  %v16374_v35 = vpop.permute.xlu0 %5666  ;;  %v21070_v5 = vmov 0 }
 0x27a   : > { %20969 = vst [vmem:[#allocation112_spill] sm:$0xff] %v20968_v60  ;;  %vm6634_vm2 = vmand %vm6602_vm10, %vm20972_vm1  ;;  %11012 = vmatmul.mubr.msk.bf16.gmra.mrb[0].mxu1 %vm20973_vm3, %v5257_v7  ;;  %vm6508_vm10 = vcmp.ge.s32.totalorder %v6476_v61, 0  ;;  %vm6540_vm1 = vcmp.lt.s32.totalorder %v6476_v61, 8  ;;  %vm20978_vm3 = vcmp.ge.s32.totalorder %v20977_v26, 0  ;;  %v11727_v7 = vld [vmem:[%s19153_s10 + $0x98] sm:$0xff]  ;;  %v20980_v61 = vmov 0 }
 0x27b   : > { %v6668_v4 = vsel %vm6634_vm2, 1, %v19962_v22  ;;  %vm5139_vm12 = vmpackc.low %vm5107_vm0, %vm5107_vm0  ;;  %v6479_v42 = vadd.s32 1, %v11727_v7  ;;  %v11729_v7 = vld [vmem:[#allocation2 + $0x48] sm:$0xff] }
 0x27c   : > { %6729 = vperm.xlu0 %11537, %v6668_v4   ;;  %v5171_v17 = vsel %vm5139_vm12, 65537, %v19962_v22  ;;  %vm5138_vm9 = vmpackc.low %vm5106_vm5, %vm5106_vm5  ;;  %vm20979_vm5 = vcmp.lt.s32.totalorder %v20977_v26, 8  ;;  %v16358_v4 = vpop.permute.xlu1 %5669 }
 0x27d   : > { %v5170_v12 = vsel %vm5138_vm9, 65537, %v19962_v22  ;;  %vm16345_vm4 = vmand %vm6509_vm14, %vm6541_vm13  ;;  %vm5109_vm14 = vcmp.eq.s32.totalorder %v16140_v21, 1 }
 0x27e   : > { %v20975_v11 = vsel %vm16345_vm4, 4294967295, %v20974_v11  ;;  %v10154_v63 = vcombine.low %v5170_v12, %v5171_v17  ;;  %vm6605_vm0 = vmand %vm16345_vm4, %vm20978_vm3  ;;  %v20983_v17 = vld [vmem:[#allocation47_spill] sm:$0xff]  ;;  %vm5108_vm4 = vcmp.eq.s32.totalorder %v16154_v38, 1  ;;  %v11728_v12 = vld [vmem:[%s19153_s10 + $0x90] sm:$0xff] }
 0x27f   : > { %20976 = vst [vmem:[#allocation143_spill] sm:$0xff] %v20975_v11  ;;  %vm6637_vm9 = vmand %vm6605_vm0, %vm20979_vm5  ;;  %vm20984_vm12 = vcmp.ge.s32.totalorder %v20983_v17, 0  ;;  %v6478_v26 = vadd.s32 1, %v11728_v12  ;;  %vm6511_vm0 = vcmp.ge.s32.totalorder %v6479_v42, 0  ;;  %vm6543_vm5 = vcmp.lt.s32.totalorder %v6479_v42, 8  ;;  %v20990_v12 = vld [vmem:[#allocation51_spill] sm:$0xff] }
 0x280   : > { %v6671_v52 = vsel %vm6637_vm9, 1, %v19962_v22  ;;  %vm16361_vm2 = vmand %vm6508_vm10, %vm6540_vm1  ;;  %vm5242_vm13 = vcmp.ne.s16.totalorder %v10154_v63, 0  ;;  %vm20985_vm10 = vcmp.lt.s32.totalorder %v20983_v17, 8  ;;  %vm20986_vm9 = vcmask 523264   ;;  %v16386_v17 = vpop.permute.xlu1 %5082 }
 0x281   : > { %v20981_v61 = vsel %vm16361_vm2, 4294967295, %v20980_v61  ;;  %6738 = vperm.xlu1 %11538, %v6671_v52   ;;  %vm6604_vm3 = vmand %vm16361_vm2, %vm20984_vm12  ;;  %v5258_v11 = vsel %vm5242_vm13, %v11729_v7, 0  ;;  %v20987_v63 = vmov 0  ;;  %vm6510_vm13 = vcmp.ge.s32.totalorder %v6478_v26, 0 }
 0x282   : > { %20982 = vst [vmem:[#allocation113_spill] sm:$0xff] %v20981_v61  ;;  %vm6636_vm1 = vmand %vm6604_vm3, %vm20985_vm10  ;;  %11015 = vmatprep.mubr.msk.bf16.mxu1 %vm20986_vm9, %v5258_v11  ;;  %vm6542_vm6 = vcmp.lt.s32.totalorder %v6478_v26, 8  ;;  %vm20991_vm3 = vcmp.ge.s32.totalorder %v20990_v12, 0  ;;  %v11730_v11 = vld [vmem:[%s19153_s10 + $0xa8] sm:$0xff]  ;;  %v20993_v61 = vmov 0 }
 0x283   : > { %v6670_v52 = vsel %vm6636_vm1, 1, %v19962_v22  ;;  %vm5141_vm12 = vmpackc.low %vm5109_vm14, %vm5109_vm14  ;;  %v6481_v7 = vadd.s32 1, %v11730_v11  ;;  %vm5111_vm1 = vcmp.eq.s32.totalorder %v16174_v3, 1 }
 0x284   : > { %6735 = vperm.xlu0 %11537, %v6670_v52   ;;  %v5173_v21 = vsel %vm5141_vm12, 65537, %v19962_v22  ;;  %vm5140_vm2 = vmpackc.low %vm5108_vm4, %vm5108_vm4  ;;  %vm20992_vm4 = vcmp.lt.s32.totalorder %v20990_v12, 8  ;;  %v16397_v52 = vpop.permute.xlu0 %5079  ;;  %vm5110_vm12 = vcmp.eq.s32.totalorder %v16185_v34, 1 }
 0x285   : > { %v5172_v38 = vsel %vm5140_vm2, 65537, %v19962_v22  ;;  %vm16382_vm7 = vmand %vm6511_vm0, %vm6543_vm5 }
 0x286   : > { %v20988_v63 = vsel %vm16382_vm7, 4294967295, %v20987_v63  ;;  %v10155_v42 = vcombine.low %v5172_v38, %v5173_v21  ;;  %vm6607_vm14 = vmand %vm16382_vm7, %vm20991_vm3  ;;  %v20996_v21 = vld [vmem:[#allocation54_spill] sm:$0xff]  ;;  %v11731_v38 = vld [vmem:[%s19153_s10 + $0xa0] sm:$0xff]  ;;  %vm6513_vm3 = vcmp.ge.s32.totalorder %v6481_v7, 0 }
 0x287   : > { %20989 = vst [vmem:[#allocation131_spill] sm:$0xff] %v20988_v63  ;;  %vm6639_vm2 = vmand %vm6607_vm14, %vm20992_vm4  ;;  %vm20997_vm5 = vcmp.ge.s32.totalorder %v20996_v21, 0  ;;  %v6480_v12 = vadd.s32 1, %v11731_v38  ;;  %vm6545_vm14 = vcmp.lt.s32.totalorder %v6481_v7, 8  ;;  %vm20999_vm4 = vcmask 523264   ;;  %v21003_v38 = vld [vmem:[#allocation56_spill] sm:$0xff] }
 0x288   : > { %v6673_v26 = vsel %vm6639_vm2, 1, %v19962_v22  ;;  %vm16400_vm10 = vmand %vm6510_vm13, %vm6542_vm6  ;;  %vm5243_vm0 = vcmp.ne.s16.totalorder %v10155_v42, 0  ;;  %vm20998_vm6 = vcmp.lt.s32.totalorder %v20996_v21, 8  ;;  %v16418_v42 = vpop.permute.xlu1 %5088  ;;  %v16426_v7 = vpop.permute.xlu0 %5085  ;;  %v21067_v63 = vld [vmem:[#allocation92_spill] sm:$0xff] }
 0x289   : > { %v20994_v61 = vsel %vm16400_vm10, 4294967295, %v20993_v61  ;;  %6744 = vperm.xlu1 %11538, %v6673_v26   ;;  %vm6606_vm9 = vmand %vm16400_vm10, %vm20997_vm5  ;;  %v5259_v11 = vsel %vm5243_vm0, %v15684_v24, 0  ;;  %v21000_v24 = vmov 0  ;;  %vm6512_vm0 = vcmp.ge.s32.totalorder %v6480_v12, 0 }
 0x28a   : > { %20995 = vst [vmem:[#allocation114_spill] sm:$0xff] %v20994_v61  ;;  %vm6638_vm13 = vmand %vm6606_vm9, %vm20998_vm6  ;;  %11016 = vmatmul.mubr.msk.bf16.gmra.mrb[4].mxu1 %vm20999_vm4, %v5259_v11  ;;  %vm6544_vm9 = vcmp.lt.s32.totalorder %v6480_v12, 8  ;;  %vm21004_vm6 = vcmp.ge.s32.totalorder %v21003_v38, 0  ;;  %v11732_v11 = vld [vmem:[%s19153_s10 + $0xb8] sm:$0xff]  ;;  %v21006_v12 = vmov 0 }
 0x28b   : > { %v6672_v3 = vsel %vm6638_vm13, 1, %v19962_v22  ;;  %vm5143_vm2 = vmpackc.low %vm5111_vm1, %vm5111_vm1 }
 0x28c   : > { %6741 = vperm.xlu0 %11537, %v6672_v3   ;;  %v5175_v34 = vsel %vm5143_vm2, 65537, %v19962_v22  ;;  %vm5142_vm5 = vmpackc.low %vm5110_vm12, %vm5110_vm12  ;;  %v6483_v3 = vadd.s32 1, %v11732_v11  ;;  %vm21005_vm12 = vcmp.lt.s32.totalorder %v21003_v38, 8 }
 0x28d   : > { %v5174_v26 = vsel %vm5142_vm5, 65537, %v19962_v22  ;;  %vm16422_vm10 = vmand %vm6513_vm3, %vm6545_vm14  ;;  %vm5113_vm14 = vcmp.eq.s32.totalorder %v16210_v41, 1 }
 0x28e   : > { %v21001_v24 = vsel %vm16422_vm10, 4294967295, %v21000_v24  ;;  %v10156_v21 = vcombine.low %v5174_v26, %v5175_v34  ;;  %vm6609_vm1 = vmand %vm16422_vm10, %vm21004_vm6  ;;  %v21009_v34 = vld [vmem:[#allocation60_spill] sm:$0xff]  ;;  %vm5112_vm6 = vcmp.eq.s32.totalorder %v16222_v0, 1  ;;  %v11733_v26 = vld [vmem:[%s19153_s10 + $0xb0] sm:$0xff]  ;;  %v16458_v0 = vpop.permute.xlu0 %5672 }
 0x28f   : > { %21002 = vst [vmem:[#allocation115_spill] sm:$0xff] %v21001_v24  ;;  %vm6641_vm13 = vmand %vm6609_vm1, %vm21005_vm12  ;;  %vm21010_vm2 = vcmp.ge.s32.totalorder %v21009_v34, 0  ;;  %v6482_v38 = vadd.s32 1, %v11733_v26  ;;  %v16452_v24 = vpop.permute.xlu1 %5675  ;;  %vm6515_vm1 = vcmp.ge.s32.totalorder %v6483_v3, 0  ;;  %vm6547_vm12 = vcmp.lt.s32.totalorder %v6483_v3, 8  ;;  %v11734_v26 = vld [vmem:[%s19153_s10 + $0xc8] sm:$0xff] }
 0x290   : > { %v6675_v61 = vsel %vm6641_vm13, 1, %v19962_v22  ;;  %vm16438_vm3 = vmand %vm6512_vm0, %vm6544_vm9  ;;  %vm5244_vm4 = vcmp.ne.s16.totalorder %v10156_v21, 0  ;;  %vm21011_vm0 = vcmp.lt.s32.totalorder %v21009_v34, 8  ;;  %vm21012_vm13 = vcmask 523264   ;;  %v21016_v34 = vld [vmem:[#allocation63_spill] sm:$0xff] }
 0x291   : > { %v21007_v12 = vsel %vm16438_vm3, 4294967295, %v21006_v12  ;;  %6750 = vperm.xlu1 %11538, %v6675_v61   ;;  %vm6608_vm5 = vmand %vm16438_vm3, %vm21010_vm2  ;;  %v5260_v11 = vsel %vm5244_vm4, %v15741_v48, 0  ;;  %v21013_v21 = vmov 0 }
 0x292   : > { %21008 = vst [vmem:[#allocation116_spill] sm:$0xff] %v21007_v12  ;;  %vm6640_vm9 = vmand %vm6608_vm5, %vm21011_vm0  ;;  %11019 = vmatprep.mubr.msk.bf16.mxu1 %vm21012_vm13, %v5260_v11  ;;  %vm6514_vm5 = vcmp.ge.s32.totalorder %v6482_v38, 0  ;;  %vm6546_vm0 = vcmp.lt.s32.totalorder %v6482_v38, 8  ;;  %vm21017_vm13 = vcmp.ge.s32.totalorder %v21016_v34, 0  ;;  %v6485_v11 = vadd.s32 1, %v11734_v26 }
 0x293   : > { %v6674_v41 = vsel %vm6640_vm9, 1, %v19962_v22  ;;  %vm5145_vm2 = vmpackc.low %vm5113_vm14, %vm5113_vm14  ;;  %v21019_v38 = vmov 0 }
 0x294   : > { %6747 = vperm.xlu0 %11537, %v6674_v41   ;;  %v5177_v61 = vsel %vm5145_vm2, 65537, %v19962_v22  ;;  %vm5144_vm10 = vmpackc.low %vm5112_vm6, %vm5112_vm6  ;;  %vm21018_vm6 = vcmp.lt.s32.totalorder %v21016_v34, 8  ;;  %v16475_v41 = vpop.permute.xlu1 %5681 }
 0x295   : > { %v5176_v48 = vsel %vm5144_vm10, 65537, %v19962_v22  ;;  %vm16462_vm4 = vmand %vm6515_vm1, %vm6547_vm12  ;;  %vm5115_vm1 = vcmp.eq.s32.totalorder %v16242_v2, 1 }
 0x296   : > { %v21014_v21 = vsel %vm16462_vm4, 4294967295, %v21013_v21  ;;  %v10157_v3 = vcombine.low %v5176_v48, %v5177_v61  ;;  %vm6611_vm14 = vmand %vm16462_vm4, %vm21017_vm13  ;;  %v21022_v61 = vld [vmem:[#allocation66_spill] sm:$0xff]  ;;  %vm5114_vm4 = vcmp.eq.s32.totalorder %v16259_v20, 1  ;;  %v11735_v48 = vld [vmem:[%s19153_s10 + $0xc0] sm:$0xff] }
 0x297   : > { %21015 = vst [vmem:[#allocation144_spill] sm:$0xff] %v21014_v21  ;;  %vm6643_vm10 = vmand %vm6611_vm14, %vm21018_vm6  ;;  %vm21023_vm2 = vcmp.ge.s32.totalorder %v21022_v61, 0  ;;  %v6484_v34 = vadd.s32 1, %v11735_v48  ;;  %v16492_v21 = vpop.permute.xlu0 %5678  ;;  %vm6517_vm14 = vcmp.ge.s32.totalorder %v6485_v11, 0  ;;  %vm6549_vm6 = vcmp.lt.s32.totalorder %v6485_v11, 8  ;;  %v11736_v48 = vld [vmem:[%s19153_s10 + $0xd8] sm:$0xff] }
 0x298   : > { %v6677_v12 = vsel %vm6643_vm10, 1, %v19962_v22  ;;  %vm16478_vm9 = vmand %vm6514_vm5, %vm6546_vm0  ;;  %vm5245_vm12 = vcmp.ne.s16.totalorder %v10157_v3, 0  ;;  %vm21024_vm5 = vcmp.lt.s32.totalorder %v21022_v61, 8  ;;  %vm21025_vm10 = vcmask 523264   ;;  %v16504_v3 = vpop.permute.xlu1 %5687  ;;  %v21029_v61 = vld [vmem:[#allocation69_spill] sm:$0xff] }
 0x299   : > { %v21020_v38 = vsel %vm16478_vm9, 4294967295, %v21019_v38  ;;  %6756 = vperm.xlu1 %11538, %v6677_v12   ;;  %vm6610_vm13 = vmand %vm16478_vm9, %vm21023_vm2  ;;  %v5261_v26 = vsel %vm5245_vm12, %v15804_v44, 0  ;;  %v21026_v44 = vmov 0  ;;  %vm6516_vm12 = vcmp.ge.s32.totalorder %v6484_v34, 0 }
 0x29a   : > { %21021 = vst [vmem:[#allocation117_spill] sm:$0xff] %v21020_v38  ;;  %vm6642_vm0 = vmand %vm6610_vm13, %vm21024_vm5  ;;  %11020 = vmatmul.mubr.msk.bf16.gmra.mrb[8].mxu1 %vm21025_vm10, %v5261_v26  ;;  %vm6548_vm7 = vcmp.lt.s32.totalorder %v6484_v34, 8  ;;  %vm21030_vm13 = vcmp.ge.s32.totalorder %v21029_v61, 0  ;;  %v6487_v26 = vadd.s32 1, %v11736_v48  ;;  %v21032_v38 = vmov 0 }
 0x29b   : > { %v6676_v2 = vsel %vm6642_vm0, 1, %v19962_v22  ;;  %vm5147_vm2 = vmpackc.low %vm5115_vm1, %vm5115_vm1  ;;  %vm5117_vm0 = vcmp.eq.s32.totalorder %v16271_v47, 1 }
 0x29c   : > { %6753 = vperm.xlu0 %11537, %v6676_v2   ;;  %v5179_v20 = vsel %vm5147_vm2, 65537, %v19962_v22  ;;  %vm5146_vm9 = vmpackc.low %vm5114_vm4, %vm5114_vm4  ;;  %vm21031_vm4 = vcmp.lt.s32.totalorder %v21029_v61, 8  ;;  %v16515_v2 = vpop.permute.xlu0 %5684  ;;  %vm5116_vm2 = vcmp.eq.s32.totalorder %v16282_v18, 1 }
 0x29d   : > { %v5178_v12 = vsel %vm5146_vm9, 65537, %v19962_v22  ;;  %vm16500_vm3 = vmand %vm6517_vm14, %vm6549_vm6 }
 0x29e   : > { %v21027_v44 = vsel %vm16500_vm3, 4294967295, %v21026_v44  ;;  %v10158_v11 = vcombine.low %v5178_v12, %v5179_v20  ;;  %vm6613_vm1 = vmand %vm16500_vm3, %vm21030_vm13  ;;  %v21035_v20 = vld [vmem:[#allocation72_spill] sm:$0xff]  ;;  %v11737_v12 = vld [vmem:[%s19153_s10 + $0xd0] sm:$0xff]  ;;  %vm6519_vm13 = vcmp.ge.s32.totalorder %v6487_v26, 0 }
 0x29f   : > { %21028 = vst [vmem:[#allocation145_spill] sm:$0xff] %v21027_v44  ;;  %vm6645_vm9 = vmand %vm6613_vm1, %vm21031_vm4  ;;  %vm21036_vm6 = vcmp.ge.s32.totalorder %v21035_v20, 0  ;;  %v6486_v61 = vadd.s32 1, %v11737_v12  ;;  %vm6551_vm1 = vcmp.lt.s32.totalorder %v6487_v26, 8  ;;  %vm21038_vm4 = vcmask 523264   ;;  %v21042_v12 = vld [vmem:[#allocation75_spill] sm:$0xff] }
 0x2a0   : > { %v6679_v34 = vsel %vm6645_vm9, 1, %v19962_v22  ;;  %vm16518_vm5 = vmand %vm6516_vm12, %vm6548_vm7  ;;  %vm5246_vm14 = vcmp.ne.s16.totalorder %v10158_v11, 0  ;;  %vm21037_vm7 = vcmp.lt.s32.totalorder %v21035_v20, 8  ;;  %v16536_v11 = vpop.permute.xlu1 %5693  ;;  %v16544_v26 = vpop.permute.xlu0 %5690 }
 0x2a1   : > { %v21033_v38 = vsel %vm16518_vm5, 4294967295, %v21032_v38  ;;  %6762 = vperm.xlu1 %11538, %v6679_v34   ;;  %vm6612_vm10 = vmand %vm16518_vm5, %vm21036_vm6  ;;  %v5262_v48 = vsel %vm5246_vm14, %v15867_v25, 0  ;;  %v21039_v25 = vmov 0  ;;  %vm6518_vm14 = vcmp.ge.s32.totalorder %v6486_v61, 0 }
 0x2a2   : > { %21034 = vst [vmem:[#allocation118_spill] sm:$0xff] %v21033_v38  ;;  %vm6644_vm12 = vmand %vm6612_vm10, %vm21037_vm7  ;;  %11023 = vmatprep.mubr.msk.bf16.mxu1 %vm21038_vm4, %v5262_v48  ;;  %vm6550_vm10 = vcmp.lt.s32.totalorder %v6486_v61, 8  ;;  %vm21043_vm7 = vcmp.ge.s32.totalorder %v21042_v12, 0  ;;  %v11738_v48 = vld [vmem:[%s19153_s10 + $0xe8] sm:$0xff]  ;;  %v21045_v61 = vmov 0 }
 0x2a3   : > { %v6678_v47 = vsel %vm6644_vm12, 1, %v19962_v22  ;;  %vm5149_vm9 = vmpackc.low %vm5117_vm0, %vm5117_vm0 }
 0x2a4   : > { %6759 = vperm.xlu0 %11537, %v6678_v47   ;;  %v5181_v18 = vsel %vm5149_vm9, 65537, %v19962_v22  ;;  %vm5148_vm6 = vmpackc.low %vm5116_vm2, %vm5116_vm2  ;;  %v6489_v47 = vadd.s32 1, %v11738_v48  ;;  %vm21044_vm2 = vcmp.lt.s32.totalorder %v21042_v12, 8 }
 0x2a5   : > { %v5180_v34 = vsel %vm5148_vm6, 65537, %v19962_v22  ;;  %vm16540_vm3 = vmand %vm6519_vm13, %vm6551_vm1  ;;  %vm5750_vm1 = vcmp.eq.s32.totalorder %v16302_v50, 1 }
 0x2a6   : > { %v21040_v25 = vsel %vm16540_vm3, 4294967295, %v21039_v25  ;;  %v10159_v20 = vcombine.low %v5180_v34, %v5181_v18  ;;  %vm6615_vm0 = vmand %vm16540_vm3, %vm21043_vm7  ;;  %v21048_v18 = vld [vmem:[#allocation80_spill] sm:$0xff]  ;;  %vm5749_vm7 = vcmp.eq.s32.totalorder %v16310_v53, 1  ;;  %v16576_v53 = vpop.permute.xlu0 %5696 }
 0x2a7   : > { %21041 = vst [vmem:[#allocation152_spill] sm:$0xff] %v21040_v25  ;;  %vm6647_vm12 = vmand %vm6615_vm0, %vm21044_vm2  ;;  %vm21049_vm9 = vcmp.ge.s32.totalorder %v21048_v18, 0  ;;  %v11739_v34 = vld [vmem:[%s19153_s10 + $0xe0] sm:$0xff]  ;;  %v16570_v25 = vpop.permute.xlu1 %5699  ;;  %vm6521_vm0 = vcmp.ge.s32.totalorder %v6489_v47, 0  ;;  %vm6553_vm2 = vcmp.lt.s32.totalorder %v6489_v47, 8 }
 0x2a8   : > { %v6681_v44 = vsel %vm6647_vm12, 1, %v19962_v22  ;;  %vm16556_vm13 = vmand %vm6518_vm14, %vm6550_vm10  ;;  %vm5247_vm4 = vcmp.ne.s16.totalorder %v10159_v20, 0  ;;  %v6488_v12 = vadd.s32 1, %v11739_v34  ;;  %vm21050_vm14 = vcmp.lt.s32.totalorder %v21048_v18, 8  ;;  %v21055_v18 = vld [vmem:[#allocation84_spill] sm:$0xff]  ;;  %v11740_v34 = vld [vmem:[%s19153_s10 + $0xf8] sm:$0xff] }
 0x2a9   : > { %v21046_v61 = vsel %vm16556_vm13, 4294967295, %v21045_v61  ;;  %6768 = vperm.xlu1 %11538, %v6681_v44   ;;  %vm6614_vm6 = vmand %vm16556_vm13, %vm21049_vm9  ;;  %v5263_v48 = vsel %vm5247_vm4, %v15915_v16, 0  ;;  %vm21051_vm12 = vcmask 523264   ;;  %v21052_v20 = vmov 0 }
 0x2aa   : > { %21047 = vst [vmem:[#allocation119_spill] sm:$0xff] %v21046_v61  ;;  %vm6646_vm10 = vmand %vm6614_vm6, %vm21050_vm14  ;;  %11024 = vmatmul.mubr.msk.bf16.gmra.mrb[12].mxu1 %vm21051_vm12, %v5263_v48  ;;  %vm6520_vm6 = vcmp.ge.s32.totalorder %v6488_v12, 0  ;;  %vm6552_vm14 = vcmp.lt.s32.totalorder %v6488_v12, 8  ;;  %vm21056_vm12 = vcmp.ge.s32.totalorder %v21055_v18, 0  ;;  %v6491_v48 = vadd.s32 1, %v11740_v34  ;;  %v16609_v34 = vpop.permute.xlu0 %5702 }
 0x2ab   : > { %v6680_v50 = vsel %vm6646_vm10, 1, %v19962_v22  ;;  %vm5782_vm9 = vmpackc.low %vm5750_vm1, %vm5750_vm1  ;;  %v21058_v12 = vmov 0 }
 0x2ac   : > { %6765 = vperm.xlu0 %11537, %v6680_v50   ;;  %v5814_v44 = vsel %vm5782_vm9, 65537, %v19962_v22  ;;  %vm5781_vm13 = vmpackc.low %vm5749_vm7, %vm5749_vm7  ;;  %vm21057_vm7 = vcmp.lt.s32.totalorder %v21055_v18, 8  ;;  %v16593_v50 = vpop.permute.xlu1 %5705 }
 0x2ad   : > { %v5813_v16 = vsel %vm5781_vm13, 65537, %v19962_v22  ;;  %vm16580_vm4 = vmand %vm6521_vm0, %vm6553_vm2  ;;  %vm5752_vm0 = vcmp.eq.s32.totalorder %v16335_v6, 1 }
 0x2ae   : > { %v21053_v20 = vsel %vm16580_vm4, 4294967295, %v21052_v20  ;;  %v10190_v47 = vcombine.low %v5813_v16, %v5814_v44  ;;  %vm6617_vm1 = vmand %vm16580_vm4, %vm21056_vm12  ;;  %v21061_v44 = vld [vmem:[#allocation88_spill] sm:$0xff]  ;;  %vm5751_vm12 = vcmp.eq.s32.totalorder %v16341_v31, 1  ;;  %v11741_v16 = vld [vmem:[%s19153_s10 + $0xf0] sm:$0xff] }
 0x2af   : > { %21054 = vst [vmem:[#allocation120_spill] sm:$0xff] %v21053_v20  ;;  %vm6649_vm13 = vmand %vm6617_vm1, %vm21057_vm7  ;;  %vm21062_vm2 = vcmp.ge.s32.totalorder %v21061_v44, 0  ;;  %v6490_v18 = vadd.s32 1, %v11741_v16  ;;  %vm6523_vm1 = vcmp.ge.s32.totalorder %v6491_v48, 0  ;;  %vm6555_vm7 = vcmp.lt.s32.totalorder %v6491_v48, 8  ;;  %v16617_v31 = vld [vmem:[%s19147_s4 + $0xc0] sm:$0xff]  }
 0x2b0   : > { %v6683_v61 = vsel %vm6649_vm13, 1, %v19962_v22  ;;  %vm16596_vm10 = vmand %vm6520_vm6, %vm6552_vm14  ;;  %v5894_v20 = vshrl.u32 %v10190_v47, 16  ;;  %vm21063_vm6 = vcmp.lt.s32.totalorder %v21061_v44, 8  ;;  %v16625_v48 = vpop.permute.xlu1 %5711  ;;  %11071 = vmatprep.subr.bf16.mxu1 %v16617_v31  ;;  %v5897_v32 = vshll.u32 %v10190_v47, 16 }
 0x2b1   : > { %v21059_v12 = vsel %vm16596_vm10, 4294967295, %v21058_v12  ;;  %6774 = vperm.xlu1 %11538, %v6683_v61   ;;  %vm6616_vm9 = vmand %vm16596_vm10, %vm21062_vm2  ;;  %vm21081_vm10 = vsmask.f32 256 }
 0x2b2   : > { %21060 = vst [vmem:[#allocation121_spill] sm:$0xff] %v21059_v12  ;;  %vm6648_vm14 = vmand %vm6616_vm9, %vm21063_vm6  ;;  %v21064_v12 = vmov 0  ;;  %vm6522_vm9 = vcmp.ge.s32.totalorder %v6490_v18, 0  ;;  %vm6554_vm6 = vcmp.lt.s32.totalorder %v6490_v18, 8  ;;  %v5896_v44 = vrot.slane %v5894_v20, 7  ;;  %v21073_v20 = vld [vmem:[#allocation94_spill] sm:$0xff] }
 0x2b3   : > { %v6682_v6 = vsel %vm6648_vm14, 1, %v19962_v22  ;;  %vm5784_vm13 = vmpackc.low %vm5752_vm0, %vm5752_vm0  ;;  %vm21068_vm0 = vcmp.ge.s32.totalorder %v21067_v63, 0 }
 0x2b4   : > { %6771 = vperm.xlu0 %11537, %v6682_v6   ;;  %v5816_v61 = vsel %vm5784_vm13, 65537, %v19962_v22  ;;  %vm5783_vm2 = vmpackc.low %vm5751_vm12, %vm5751_vm12  ;;  %vm21069_vm12 = vcmp.lt.s32.totalorder %v21067_v63, 8  ;;  %v16634_v6 = vpop.permute.xlu0 %5708  ;;  %v5899_v63 = vor.u32 %v5897_v32, %v5896_v44  ;;  %v21078_v32 = vld [vmem:[#allocation11_spill] sm:$0xff] }
 0x2b5   : > { %v5815_v16 = vsel %vm5783_vm2, 65537, %v19962_v22  ;;  %vm16621_vm4 = vmand %vm6523_vm1, %vm6555_vm7  ;;  %vm5754_vm7 = vcmp.eq.s32.totalorder %v16358_v4, 1  ;;  %vm21074_vm2 = vcmp.ge.s32.totalorder %v21073_v20, 0 }
 0x2b6   : > { %v21065_v12 = vsel %vm16621_vm4, 4294967295, %v21064_v12  ;;  %v10191_v38 = vcombine.low %v5815_v16, %v5816_v61  ;;  %vm6619_vm14 = vmand %vm16621_vm4, %vm21068_vm0 }
 0x2b7   : > { %21066 = vst [vmem:[#allocation123_spill] sm:$0xff] %v21065_v12  ;;  %vm6651_vm13 = vmand %vm6619_vm14, %vm21069_vm12  ;;  %vm5753_vm14 = vcmp.eq.s32.totalorder %v16374_v35, 1  ;;  %vm21075_vm12 = vcmp.lt.s32.totalorder %v21073_v20, 8  ;;  %v16650_v12 = vpop.permute.xlu1 %5717 }
 0x2b8   : > { %v5901_v60 = vshrl.u32 %v10191_v38, 16  ;;  %v6685_v18 = vsel %vm6651_vm13, 1, %v19962_v22  ;;  %vm16637_vm1 = vmand %vm6522_vm9, %vm6554_vm6  ;;  %v5904_v47 = vshll.u32 %v10191_v38, 16  ;;  %v16658_v35 = vpop.permute.xlu0 %5714 }
 0x2b9   : > { %v21071_v5 = vsel %vm16637_vm1, 4294967295, %v21070_v5  ;;  %6780 = vperm.xlu1 %11538, %v6685_v18   ;;  %vm6618_vm0 = vmand %vm16637_vm1, %vm21074_vm2  ;;  %vm21077_vm2 = vcmp.ge.s32.totalorder %v21076_v62, 0  ;;  %vm21079_vm1 = vnez %v21078_v32  ;;  %v5604_v32 = vld [vmem:[#allocation2 + $0x8] sm:$0xff] }
 0x2ba   : > { %21072 = vst [vmem:[#allocation124_spill] sm:$0xff] %v21071_v5  ;;  %v5903_v61 = vrot.slane %v5901_v60, 7  ;;  %vm6650_vm13 = vmand %vm6618_vm0, %vm21075_vm12  ;;  %vm6020_vm0 = vcmp.ne.s16.totalorder %v5899_v63, 0 }
 0x2bb   : > { %v6684_v16 = vsel %vm6650_vm13, 1, %v19962_v22  ;;  %vm5786_vm9 = vmpackc.low %vm5754_vm7, %vm5754_vm7  ;;  %vm21080_vm7 = vcmp.lt.s32.totalorder %v21076_v62, 8  ;;  %vm5119_vm13 = vcmp.eq.s32.totalorder %v16386_v17, 1  ;;  %v21089_v62 = vld [vmem:[#allocation14_spill] sm:$0xff] }
 0x2bc   : > { %v5906_v4 = vor.u32 %v5904_v47, %v5903_v61  ;;  %6777 = vperm.xlu0 %11537, %v6684_v16   ;;  %v5818_v18 = vsel %vm5786_vm9, 65537, %v19962_v22  ;;  %vm5785_vm6 = vmpackc.low %vm5753_vm14, %vm5753_vm14  ;;  %v21082_v47 = vld [vmem:[#allocation73_spill] sm:$0xff]  ;;  %v21084_v16 = vld [vmem:[#allocation8_spill] sm:$0xff] }
 0x2bd   : > { %v5817_v5 = vsel %vm5785_vm6, 65537, %v19962_v22  ;;  %vm2926_vm4 = vmand %vm21079_vm1, %vm21077_vm2  ;;  %vm21083_vm14 = vcmp.ge.s32.totalorder %v21082_v47, 0  ;;  %vm21085_vm9 = vnez %v21084_v16  ;;  %vm5118_vm1 = vcmp.eq.s32.totalorder %v16397_v52, 1  ;;  %v5605_v52 = vld [vmem:[#allocation2 + $0x10] sm:$0xff]  ;;  %v21087_v16 = vld [vmem:[#allocation77_spill] sm:$0xff] }
 0x2be   : > { %v10192_v60 = vcombine.low %v5817_v5, %v5818_v18  ;;  %vm2990_vm12 = vmand %vm2926_vm4, %vm21080_vm7  ;;  %v5907_v38 = vsel %vm21081_vm10, %v5896_v44, %v5906_v4  ;;  %vm21086_vm2 = vcmp.lt.s32.totalorder %v21082_v47, 8  ;;  %v6037_v5 = vsel %vm6020_vm0, %v5604_v32, 0  ;;  %v16673_v44 = vpop.permute.xlu1 %5723  ;;  %v16685_v32 = vpop.permute.xlu0 %5720 }
 0x2bf   : > { %v3023_v20 = vsel %vm2990_vm12, 1, %v19962_v22  ;;  %vm2925_vm6 = vmand %vm21085_vm9, %vm21083_vm14  ;;  %vm6021_vm4 = vcmp.ne.s16.totalorder %v5907_v38, 0  ;;  %vm21088_vm12 = vcmp.ge.s32.totalorder %v21087_v16, 0  ;;  %vm21090_vm14 = vnez %v21089_v62 }
 0x2c0   : > { %v5909_v57 = vshrl.u32 %v10192_v60, 16  ;;  %3062 = vperm.xlu1 %11538, %v3023_v20   ;;  %vm2989_vm3 = vmand %vm2925_vm6, %vm21086_vm2  ;;  %v5912_v4 = vshll.u32 %v10192_v60, 16  ;;  %v16683_v38 = vsel %vm6021_vm4, %v5605_v52, 0  ;;  %vm5121_vm9 = vcmp.eq.s32.totalorder %v16418_v42, 1 }
 0x2c1   : > { %v3022_v17 = vsel %vm2989_vm3, 1, %v19962_v22  ;;  %vm5151_vm10 = vmpackc.low %vm5119_vm13, %vm5119_vm13  ;;  %vm21091_vm3 = vcmp.lt.s32.totalorder %v21087_v16, 8  ;;  %v6066_v60 = vshll.u32 %v6037_v5, 16  ;;  %vm21093_vm6 = vcmp.ge.s32.totalorder %v21092_v23, 0 }
 0x2c2   : > { %v16675_v63 = vrot.slane %v5909_v57, 7  ;;  %3059 = vperm.xlu0 %11537, %v3022_v17   ;;  %v5183_v18 = vsel %vm5151_vm10, 65537, %v19962_v22  ;;  %vm5150_vm7 = vmpackc.low %vm5118_vm1, %vm5118_vm1  ;;  %vm21095_vm1 = vnez %v21094_v28  ;;  %vm5120_vm4 = vcmp.eq.s32.totalorder %v16426_v7, 1 }
 0x2c3   : > { %v5182_v20 = vsel %vm5150_vm7, 65537, %v19962_v22  ;;  %vm2928_vm0 = vmand %vm21090_vm14, %vm21088_vm12  ;;  %vm21096_vm10 = vsmask.f32 256  ;;  %vm21097_vm7 = vcmp.lt.s32.totalorder %v21092_v23, 8  ;;  %v6068_v7 = vrot.slane %v6066_v60, 1  ;;  %v21104_v23 = vld [vmem:[#allocation22_spill] sm:$0xff] }
 0x2c4   : > { %v5914_v57 = vor.u32 %v5912_v4, %v16675_v63  ;;  %v10160_v47 = vcombine.low %v5182_v20, %v5183_v18  ;;  %vm2992_vm13 = vmand %vm2928_vm0, %vm21091_vm3  ;;  %v6071_v4 = vshll.u32 %v16683_v38, 16  ;;  %v11742_v18 = vld [vmem:[#allocation2 + $0x78] sm:$0xff]  ;;  %v16702_v20 = vpop.permute.xlu1 %5729  ;;  %v6064_v60 = vshrl.u32 %v6037_v5, 16  ;;  %v11743_v5 = vld [vmem:[#allocation2 + $0x80] sm:$0xff] }
 0x2c5   : > { %v3025_v17 = vsel %vm2992_vm13, 1, %v19962_v22  ;;  %vm2927_vm2 = vmand %vm21095_vm1, %vm21093_vm6  ;;  %vm21098_vm6 = vcmask 523264   ;;  %vm21099_vm1 = vcmp.ge.s32.totalorder %v14793_v13, 0 }
 0x2c6   : > { %v5915_v62 = vsel %vm21096_vm10, %v5903_v61, %v5914_v57  ;;  %3068 = vperm.xlu1 %11538, %v3025_v17   ;;  %vm2991_vm12 = vmand %vm2927_vm2, %vm21097_vm7  ;;  %vm5248_vm14 = vcmp.ne.s16.totalorder %v10160_v47, 0  ;;  %v5606_v61 = vld [vmem:[#allocation2 + $0x18] sm:$0xff]  ;;  %v21100_v57 = vld [vmem:[#allocation20_spill] sm:$0xff]  ;;  %v16712_v17 = vpop.permute.xlu0 %5726 }
 0x2c7   : > { %vm6022_vm0 = vcmp.ne.s16.totalorder %v5915_v62, 0  ;;  %v3024_v42 = vsel %vm2991_vm12, 1, %v19962_v22  ;;  %vm5153_vm3 = vmpackc.low %vm5121_vm9, %vm5121_vm9  ;;  %v5264_v52 = vsel %vm5248_vm14, %v11742_v18, 0  ;;  %vm21101_vm2 = vnez %v21100_v57 }
 0x2c8   : > { %3065 = vperm.xlu0 %11537, %v3024_v42   ;;  %v5185_v28 = vsel %vm5153_vm3, 65537, %v19962_v22  ;;  %vm5152_vm13 = vmpackc.low %vm5120_vm4, %vm5120_vm4  ;;  %11027 = vmatprep.mubr.msk.bf16.mxu1 %vm21098_vm6, %v5264_v52  ;;  %vm5756_vm9 = vcmp.eq.s32.totalorder %v16452_v24, 1  ;;  %v16715_v42 = vsel %vm6022_vm0, %v5606_v61, 0  ;;  %vm21102_vm4 = vcmp.lt.s32.totalorder %v14793_v13, 8  ;;  %v16729_v61 = vpop.permute.xlu1 %5735 }
 0x2c9   : > { %v5184_v47 = vsel %vm5152_vm13, 65537, %v19962_v22  ;;  %vm2930_vm10 = vmand %vm21101_vm2, %vm21099_vm1  ;;  %v6073_v52 = vrot.slane %v6071_v4, 1  ;;  %vm21103_vm12 = vcmp.ge.s32.totalorder %v14812_v27, 0  ;;  %vm21105_vm14 = vnez %v21104_v23 }
 0x2ca   : > { %v10161_v18 = vcombine.low %v5184_v47, %v5185_v28  ;;  %vm2994_vm7 = vmand %vm2930_vm10, %vm21102_vm4  ;;  %vm5755_vm13 = vcmp.eq.s32.totalorder %v16458_v0, 1  ;;  %vm21106_vm6 = vcmp.lt.s32.totalorder %v14812_v27, 8  ;;  %v6069_v24 = vor.u32 %v6068_v7, %v6064_v60  ;;  %v21110_v7 = vld [vmem:[#allocation25_spill] sm:$0xff]  ;;  %v16740_v47 = vpop.permute.xlu0 %5732  ;;  %v21115_v60 = vld [vmem:[#allocation28_spill] sm:$0xff] }
 0x2cb   : > { %v3027_v16 = vsel %vm2994_vm7, 1, %v19962_v22  ;;  %vm2929_vm3 = vmand %vm21105_vm14, %vm21103_vm12  ;;  %v6079_v28 = vshll.u32 %v16715_v42, 16  ;;  %vm21107_vm4 = vcmask 523264   ;;  %vm21108_vm7 = vsmask.f32 7424 }
 0x2cc   : > { %3074 = vperm.xlu1 %11538, %v3027_v16   ;;  %vm2993_vm0 = vmand %vm2929_vm3, %vm21106_vm6  ;;  %vm5249_vm1 = vcmp.ne.s16.totalorder %v10161_v18, 0  ;;  %v6074_v0 = vsel %vm21108_vm7, %v6069_v24, %v6073_v52  ;;  %vm21109_vm12 = vcmp.ge.s32.totalorder %v14887_v55, 0  ;;  %vm21113_vm6 = vcmp.lt.s32.totalorder %v14887_v55, 8 }
 0x2cd   : > { %v3026_v62 = vsel %vm2993_vm0, 1, %v19962_v22  ;;  %vm5788_vm2 = vmpackc.low %vm5756_vm9, %vm5756_vm9  ;;  %v5265_v4 = vsel %vm5249_vm1, %v11743_v5, 0  ;;  %vm21111_vm9 = vnez %v21110_v7  ;;  %vm21114_vm1 = vcmp.ge.s32.totalorder %v14911_v14, 0 }
 0x2ce   : > { %3071 = vperm.xlu0 %11537, %v3026_v62   ;;  %v5820_v23 = vsel %vm5788_vm2, 65537, %v19962_v22  ;;  %vm5787_vm10 = vmpackc.low %vm5755_vm13, %vm5755_vm13  ;;  %11028 = vmatmul.mubr.msk.bf16.gmra.mrb[16].mxu1 %vm21107_vm4, %v5265_v4  ;;  %vm5758_vm13 = vcmp.eq.s32.totalorder %v16475_v41, 1  ;;  %vm21116_vm2 = vnez %v21115_v60  ;;  %v6075_v24 = vshrl.u32 %v16683_v38, 16 }
 0x2cf   : > { %v5819_v16 = vsel %vm5787_vm10, 65537, %v19962_v22  ;;  %vm2932_vm14 = vmand %vm21111_vm9, %vm21109_vm12  ;;  %v6081_v62 = vrot.slane %v6079_v28, 1  ;;  %vm21117_vm7 = vcmp.lt.s32.totalorder %v14911_v14, 8  ;;  %v21118_v28 = vld [vmem:[#allocation97_spill] sm:$0xff] }
 0x2d0   : > { %vm21112_vm3 = vmmov %vm21107_vm4  ;;  %v10193_v57 = vcombine.low %v5819_v16, %v5820_v23  ;;  %vm5757_vm4 = vcmp.eq.s32.totalorder %v16492_v21, 1  ;;  %v6077_v41 = vor.u32 %v6075_v24, %v6073_v52  ;;  %v16755_v23 = vpop.permute.xlu1 %5741  ;;  %v11584_v21 = vld [vmem:[%s19147_s4 + $0xc8] sm:$0xff]  }
 0x2d1   : > { %11039 = vmatprep.mubr.msk.bf16.mxu1 %vm21112_vm3, %v6074_v0  ;;  %vm2996_vm0 = vmand %vm2932_vm14, %vm21113_vm6  ;;  %vm21119_vm3 = vcmp.ge.s32.totalorder %v21118_v28, 0 }
 0x2d2   : > { %v3029_v18 = vsel %vm2996_vm0, 1, %v19962_v22  ;;  %vm2931_vm10 = vmand %vm21116_vm2, %vm21114_vm1  ;;  %v5917_v5 = vshrl.u32 %v10193_v57, 16  ;;  %v5920_v16 = vshll.u32 %v10193_v57, 16  ;;  %vm21120_vm0 = vsmask.f32 7424 }
 0x2d3   : > { %3080 = vperm.xlu1 %11538, %v3029_v18   ;;  %vm2995_vm12 = vmand %vm2931_vm10, %vm21117_vm7  ;;  %v6082_v52 = vsel %vm21120_vm0, %v6077_v41, %v6081_v62  ;;  %v16767_v18 = vpop.permute.xlu0 %5738  ;;  %vm5760_vm2 = vcmp.eq.s32.totalorder %v16504_v3, 1  ;;  %vm21122_vm10 = vcmask 523264   ;;  %v11585_v41 = vld [vmem:[%s19147_s4 + $0xd0] sm:$0xff]  }
 0x2d4   : > { %v3028_v4 = vsel %vm2995_vm12, 1, %v19962_v22  ;;  %vm5790_vm9 = vmpackc.low %vm5758_vm13, %vm5758_vm13  ;;  %v5919_v0 = vrot.slane %v5917_v5, 7  ;;  %vm21121_vm13 = vcmp.lt.s32.totalorder %v21118_v28, 8  ;;  %v21123_v5 = vld [vmem:[#allocation98_spill] sm:$0xff]  ;;  %vm5759_vm12 = vcmp.eq.s32.totalorder %v16515_v2, 1 }
 0x2d5   : > { %3077 = vperm.xlu0 %11537, %v3028_v4   ;;  %v5822_v7 = vsel %vm5790_vm9, 65537, %v19962_v22  ;;  %vm5789_vm14 = vmpackc.low %vm5757_vm4, %vm5757_vm4  ;;  %vm21124_vm4 = vcmp.ge.s32.totalorder %v21123_v5, 0  ;;  %vm21125_vm9 = vcmp.lt.s32.totalorder %v21123_v5, 8  ;;  %v6083_v5 = vshrl.u32 %v16715_v42, 16 }
 0x2d6   : > { %v5821_v38 = vsel %vm5789_vm14, 65537, %v19962_v22  ;;  %vm7530_vm6 = vmand %vm15942_vm15, %vm21119_vm3  ;;  %v5922_v57 = vor.u32 %v5920_v16, %v5919_v0  ;;  %11040 = vmatmul.mubr.msk.bf16.vlgmr.msra.gmra.mrb[20].mxu1 %vm21122_vm10, %v6082_v52  ;;  %vm21126_vm3 = vsmask.f32 256 }
 0x2d7   : > { %v10194_v60 = vcombine.low %v5821_v38, %v5822_v7  ;;  %vm7562_vm1 = vmand %vm7530_vm6, %vm21121_vm13  ;;  %11072 = vmatpush3.bf16.msra.mxu1 %v16617_v31  ;;  %v5607_v7 = vld [vmem:[#allocation2 + $0x20] sm:$0xff]  ;;  %v16788_v38 = vpop.permute.xlu1 %5747  ;;  %v6085_v42 = vor.u32 %v6083_v5, %v6081_v62 }
 0x2d8   : > { %v7595_v24 = vsel %vm7562_vm1, 1, %v19962_v22  ;;  %vm7529_vm7 = vmand %vm15969_vm11, %vm21124_vm4  ;;  %v5923_v3 = vsel %vm21126_vm3, %v16675_v63, %v5922_v57  ;;  %11073 = vmatprep.subr.bf16.mxu1 %v11584_v21  ;;  %vm5761_vm3 = vcmp.eq.s32.totalorder %v16544_v26, 1 }
 0x2d9   : > { %v5925_v4 = vshrl.u32 %v10194_v60, 16  ;;  %7630 = vperm.xlu1 %11538, %v7595_v24   ;;  %vm7561_vm14 = vmand %vm7529_vm7, %vm21125_vm9  ;;  %vm6023_vm0 = vcmp.ne.s16.totalorder %v5923_v3, 0  ;;  %v5928_v28 = vshll.u32 %v10194_v60, 16  ;;  %v21127_v24 = vld [vmem:[#allocation99_spill] sm:$0xff]  ;;  %vm5762_vm7 = vcmp.eq.s32.totalorder %v16536_v11, 1 }
 0x2da   : > { %v7594_v16 = vsel %vm7561_vm14, 1, %v19962_v22  ;;  %vm5792_vm6 = vmpackc.low %vm5760_vm2, %vm5760_vm2  ;;  %v6040_v63 = vsel %vm6023_vm0, %v5607_v7, 0  ;;  %vm21128_vm1 = vcmp.ge.s32.totalorder %v21127_v24, 0  ;;  %vm21129_vm10 = vcmp.lt.s32.totalorder %v21127_v24, 8  ;;  %v21130_v7 = vld [vmem:[#allocation100_spill] sm:$0xff]  ;;  %v5608_v24 = vld [vmem:[#allocation2 + $0x28] sm:$0xff] }
 0x2db   : > { %v5927_v31 = vrot.slane %v5925_v4, 7  ;;  %7627 = vperm.xlu0 %11537, %v7594_v16   ;;  %v5824_v52 = vsel %vm5792_vm6, 65537, %v19962_v22  ;;  %vm5791_vm13 = vmpackc.low %vm5759_vm12, %vm5759_vm12  ;;  %v6087_v3 = vshll.u32 %v6040_v63, 16  ;;  %v16800_v4 = vpop.permute.xlu0 %5744  ;;  %11074 = vmatpush3.bf16.msra.mxu1 %v11584_v21  ;;  %vm21131_vm12 = vcmp.ge.s32.totalorder %v21130_v7, 0  ;;  %v11586_v21 = vld [vmem:[%s19147_s4 + $0xd8] sm:$0xff]   ;;  %v16819_v62 = vpop.permute.xlu1 %6690 }
 0x2dc   : > { %v5823_v57 = vsel %vm5791_vm13, 65537, %v19962_v22  ;;  %vm7532_vm2 = vmand %vm16008_vm8, %vm21128_vm1  ;;  %11075 = vmatprep.subr.bf16.mxu1 %v11585_v41  ;;  %vm21132_vm9 = vnez %v20887_v43  ;;  %vm21133_vm6 = vcmp.lt.s32.totalorder %v21130_v7, 8  ;;  %vm21134_vm13 = vsmask.f32 256  ;;  %v21138_v7 = vld [vmem:[#allocation34_spill] sm:$0xff] }
 0x2dd   : > { %v5930_v60 = vor.u32 %v5928_v28, %v5927_v31  ;;  %v10195_v16 = vcombine.low %v5823_v57, %v5824_v52  ;;  %vm7564_vm4 = vmand %vm7532_vm2, %vm21129_vm10  ;;  %v6089_v14 = vrot.slane %v6087_v3, 1  ;;  %vm21135_vm2 = vsmask.f32 7424 }
 0x2de   : > { %v7597_v2 = vsel %vm7564_vm4, 1, %v19962_v22  ;;  %vm7531_vm14 = vmand %vm21132_vm9, %vm21131_vm12  ;;  %vm21136_vm12 = vcmask 523264  }
 0x2df   : > { %v5933_v28 = vshrl.u32 %v10195_v16, 16  ;;  %7636 = vperm.xlu1 %11538, %v7597_v2   ;;  %vm7563_vm0 = vmand %vm7531_vm14, %vm21133_vm6  ;;  %v5931_v11 = vsel %vm21134_vm13, %v5919_v0, %v5930_v60  ;;  %v6090_v57 = vsel %vm21135_vm2, %v6085_v42, %v6089_v14  ;;  %11076 = vmatpush3.bf16.msra.mxu1 %v11585_v41  ;;  %v5936_v3 = vshll.u32 %v10195_v16, 16  ;;  %v16831_v16 = vpop.permute.xlu0 %6687 }
 0x2e0   : > { %v7596_v52 = vsel %vm7563_vm0, 1, %v19962_v22  ;;  %vm5794_vm1 = vmpackc.low %vm5762_vm7, %vm5762_vm7  ;;  %vm6024_vm10 = vcmp.ne.s16.totalorder %v5931_v11, 0  ;;  %11043 = vmatprep.mubr.msk.bf16.mxu1 %vm21136_vm12, %v6090_v57  ;;  %vm21137_vm7 = vcmp.ge.s32.totalorder %v14968_v29, 0  ;;  %vm21139_vm14 = vnez %v21138_v7  ;;  %11077 = vmatprep.subr.bf16.mxu1 %v11586_v21  ;;  %v16847_v7 = vpop.permute.xlu1 %6696 }
 0x2e1   : > { %v5935_v5 = vrot.slane %v5933_v28, 7  ;;  %7633 = vperm.xlu0 %11537, %v7596_v52   ;;  %v5826_v2 = vsel %vm5794_vm1, 65537, %v19962_v22  ;;  %vm5793_vm4 = vmpackc.low %vm5761_vm3, %vm5761_vm3  ;;  %v6041_v0 = vsel %vm6024_vm10, %v5608_v24, 0  ;;  %v6091_v41 = vshrl.u32 %v6040_v63, 16  ;;  %v21141_v52 = vld [vmem:[#allocation102_spill] sm:$0xff] }
 0x2e2   : > { %v5825_v60 = vsel %vm5793_vm4, 65537, %v19962_v22  ;;  %vm2933_vm6 = vmand %vm21139_vm14, %vm21137_vm7  ;;  %v6095_v42 = vshll.u32 %v6041_v0, 16  ;;  %vm21140_vm0 = vcmp.lt.s32.totalorder %v14968_v29, 8  ;;  %vm5764_vm13 = vcmp.eq.s32.totalorder %v16570_v25, 1 }
 0x2e3   : > { %v5938_v28 = vor.u32 %v5936_v3, %v5935_v5  ;;  %v10196_v11 = vcombine.low %v5825_v60, %v5826_v2  ;;  %vm2997_vm3 = vmand %vm2933_vm6, %vm21140_vm0  ;;  %vm21142_vm1 = vcmp.ge.s32.totalorder %v21141_v52, 0  ;;  %vm21143_vm2 = vnez %v20906_v49  ;;  %11078 = vmatpush3.bf16.msra.mxu1 %v11586_v21  ;;  %v5609_v60 = vld [vmem:[#allocation2 + $0x30] sm:$0xff] }
 0x2e4   : > { %v3030_v26 = vsel %vm2997_vm3, 1, %v19962_v22  ;;  %vm7533_vm10 = vmand %vm21143_vm2, %vm21142_vm1  ;;  %vm5763_vm4 = vcmp.eq.s32.totalorder %v16576_v53, 1  ;;  %v6093_v63 = vor.u32 %v6091_v41, %v6089_v14  ;;  %v6097_v57 = vrot.slane %v6095_v42, 1  ;;  %v21149_v42 = vld [vmem:[#allocation40_spill] sm:$0xff] }
 0x2e5   : > { %v5941_v24 = vshrl.u32 %v10196_v11, 16  ;;  %3083 = vperm.xlu1 %11538, %v3030_v26   ;;  %vm21144_vm12 = vcmp.lt.s32.totalorder %v21141_v52, 8  ;;  %vm21145_vm14 = vsmask.f32 256  ;;  %vm5796_vm6 = vmpackc.low %vm5764_vm13, %vm5764_vm13  ;;  %vm21146_vm0 = vsmask.f32 7424 }
 0x2e6   : > { %vm7565_vm7 = vmand %vm7533_vm10, %vm21144_vm12  ;;  %v5939_v3 = vsel %vm21145_vm14, %v5927_v31, %v5938_v28  ;;  %v6098_v2 = vsel %vm21146_vm0, %v6093_v63, %v6097_v57  ;;  %v5944_v14 = vshll.u32 %v10196_v11, 16  ;;  %v5828_v21 = vsel %vm5796_vm6, 65537, %v19962_v22  ;;  %v16859_v11 = vpop.permute.xlu0 %6693 }
 0x2e7   : > { %v7598_v25 = vsel %vm7565_vm7, 1, %v19962_v22  ;;  %vm6025_vm3 = vcmp.ne.s16.totalorder %v5939_v3, 0  ;;  %v5943_v29 = vrot.slane %v5941_v24, 7  ;;  %vm5795_vm1 = vmpackc.low %vm5763_vm4, %vm5763_vm4  ;;  %vm21147_vm10 = vcmask 523264   ;;  %v21153_v24 = vld [vmem:[#allocation31_spill] sm:$0xff] }
 0x2e8   : > { %7639 = vperm.xlu0 %11537, %v7598_v25   ;;  %11044 = vmatmul.mubr.msk.bf16.gmra.mrb[24].mxu1 %vm21147_vm10, %v6098_v2  ;;  %v6042_v31 = vsel %vm6025_vm3, %v5609_v60, 0  ;;  %v5827_v41 = vsel %vm5795_vm1, 65537, %v19962_v22  ;;  %vm21148_vm13 = vcmp.ge.s32.totalorder %v15019_v9, 0  ;;  %vm21150_vm12 = vnez %v21149_v42 }
 0x2e9   : > { %vm2935_vm7 = vmand %vm21150_vm12, %vm21148_vm13  ;;  %v6099_v28 = vshrl.u32 %v6041_v0, 16  ;;  %v6103_v26 = vshll.u32 %v6042_v31, 16  ;;  %v5946_v52 = vor.u32 %v5944_v14, %v5943_v29  ;;  %v10197_v63 = vcombine.low %v5827_v41, %v5828_v21  ;;  %v5610_v14 = vld [vmem:[#allocation2 + $0x38] sm:$0xff]  ;;  %v16875_v21 = vpop.permute.xlu1 %6702 }
 0x2ea   : > { %vm21151_vm14 = vcmp.lt.s32.totalorder %v15019_v9, 8  ;;  %vm5766_vm4 = vcmp.eq.s32.totalorder %v16593_v50, 1  ;;  %vm21152_vm0 = vcmp.ge.s32.totalorder %v14953_v33, 0  ;;  %vm21154_vm3 = vnez %v21153_v24 }
 0x2eb   : > { %vm2999_vm6 = vmand %vm2935_vm7, %vm21151_vm14  ;;  %vm5765_vm10 = vcmp.eq.s32.totalorder %v16609_v34, 1  ;;  %v6101_v0 = vor.u32 %v6099_v28, %v6097_v57  ;;  %v6105_v3 = vrot.slane %v6103_v26, 1  ;;  %v5949_v25 = vshrl.u32 %v10197_v63, 16  ;;  %v21159_v26 = vld [vmem:[#allocation101_spill] sm:$0xff] }
 0x2ec   : > { %v3032_v53 = vsel %vm2999_vm6, 1, %v19962_v22  ;;  %vm2934_vm1 = vmand %vm21154_vm3, %vm21152_vm0  ;;  %vm21155_vm13 = vcmp.lt.s32.totalorder %v14953_v33, 8  ;;  %vm21156_vm2 = vsmask.f32 256  ;;  %vm21157_vm14 = vsmask.f32 7424 }
 0x2ed   : > { %3089 = vperm.xlu1 %11538, %v3032_v53   ;;  %vm2998_vm12 = vmand %vm2934_vm1, %vm21155_vm13  ;;  %v5947_v2 = vsel %vm21156_vm2, %v5935_v5, %v5946_v52  ;;  %v6106_v60 = vsel %vm21157_vm14, %v6101_v0, %v6105_v3  ;;  %v5951_v41 = vrot.slane %v5949_v25, 7  ;;  %v5952_v42 = vshll.u32 %v10197_v63, 16  ;;  %v16887_v63 = vpop.permute.xlu0 %6699  ;;  %v21164_v25 = vld [vmem:[#allocation37_spill] sm:$0xff] }
 0x2ee   : > { %v3031_v50 = vsel %vm2998_vm12, 1, %v19962_v22  ;;  %vm5798_vm7 = vmpackc.low %vm5766_vm4, %vm5766_vm4  ;;  %vm6026_vm6 = vcmp.ne.s16.totalorder %v5947_v2, 0  ;;  %vm21158_vm3 = vcmask 523264   ;;  %vm21160_vm2 = vcmp.ge.s32.totalorder %v21159_v26, 0 }
 0x2ef   : > { %3086 = vperm.xlu0 %11537, %v3031_v50   ;;  %v5830_v57 = vsel %vm5798_vm7, 65537, %v19962_v22  ;;  %vm5797_vm0 = vmpackc.low %vm5765_vm10, %vm5765_vm10  ;;  %11047 = vmatprep.mubr.msk.bf16.mxu1 %vm21158_vm3, %v6106_v60  ;;  %v6043_v5 = vsel %vm6026_vm6, %v5610_v14, 0  ;;  %vm21161_vm4 = vnez %v20899_v1  ;;  %v6107_v52 = vshrl.u32 %v6042_v31, 16 }
 0x2f0   : > { %v5829_v28 = vsel %vm5797_vm0, 65537, %v19962_v22  ;;  %vm7534_vm1 = vmand %vm21161_vm4, %vm21160_vm2  ;;  %v6111_v53 = vshll.u32 %v6043_v5, 16  ;;  %v5954_v24 = vor.u32 %v5952_v42, %v5951_v41  ;;  %vm21162_vm13 = vcmp.lt.s32.totalorder %v21159_v26, 8  ;;  %v5611_v42 = vld [vmem:[#allocation2 + $0x40] sm:$0xff] }
 0x2f1   : > { %v10198_v0 = vcombine.low %v5829_v28, %v5830_v57  ;;  %vm7566_vm12 = vmand %vm7534_vm1, %vm21162_vm13  ;;  %vm5768_vm10 = vcmp.eq.s32.totalorder %v16625_v48, 1  ;;  %vm21163_vm7 = vcmp.ge.s32.totalorder %v14979_v46, 0  ;;  %vm21165_vm14 = vnez %v21164_v25  ;;  %v16903_v57 = vpop.permute.xlu1 %6708 }
 0x2f2   : > { %v7599_v34 = vsel %vm7566_vm12, 1, %v19962_v22  ;;  %vm2936_vm6 = vmand %vm21165_vm14, %vm21163_vm7  ;;  %vm5767_vm0 = vcmp.eq.s32.totalorder %v16634_v6, 1  ;;  %v6109_v31 = vor.u32 %v6107_v52, %v6105_v3  ;;  %v6113_v2 = vrot.slane %v6111_v53, 1  ;;  %v21170_v53 = vld [vmem:[#allocation103_spill] sm:$0xff] }
 0x2f3   : > { %v5957_v50 = vshrl.u32 %v10198_v0, 16  ;;  %7642 = vperm.xlu1 %11538, %v7599_v34   ;;  %vm21166_vm3 = vcmp.lt.s32.totalorder %v14979_v46, 8  ;;  %vm21167_vm4 = vsmask.f32 256  ;;  %vm5800_vm1 = vmpackc.low %vm5768_vm10, %vm5768_vm10  ;;  %vm21168_vm13 = vsmask.f32 7424 }
 0x2f4   : > { %vm3000_vm2 = vmand %vm2936_vm6, %vm21166_vm3  ;;  %v5955_v60 = vsel %vm21167_vm4, %v5943_v29, %v5954_v24  ;;  %v6114_v14 = vsel %vm21168_vm13, %v6109_v31, %v6113_v2  ;;  %v5960_v26 = vshll.u32 %v10198_v0, 16  ;;  %v5832_v3 = vsel %vm5800_vm1, 65537, %v19962_v22  ;;  %v16915_v0 = vpop.permute.xlu0 %6705 }
 0x2f5   : > { %v3033_v48 = vsel %vm3000_vm2, 1, %v19962_v22  ;;  %vm6027_vm12 = vcmp.ne.s16.totalorder %v5955_v60, 0  ;;  %v5959_v28 = vrot.slane %v5957_v50, 7  ;;  %vm5799_vm7 = vmpackc.low %vm5767_vm0, %vm5767_vm0  ;;  %vm21169_vm14 = vcmask 523264   ;;  %v21174_v50 = vld [vmem:[#allocation104_spill] sm:$0xff] }
 0x2f6   : > { %3092 = vperm.xlu0 %11537, %v3033_v48   ;;  %11048 = vmatmul.mubr.msk.bf16.gmra.mrb[28].mxu1 %vm21169_vm14, %v6114_v14  ;;  %v6044_v29 = vsel %vm6027_vm12, %v5611_v42, 0  ;;  %v5831_v52 = vsel %vm5799_vm7, 65537, %v19962_v22  ;;  %vm21171_vm4 = vcmp.ge.s32.totalorder %v21170_v53, 0  ;;  %vm21172_vm10 = vnez %v20917_v19 }
 0x2f7   : > { %vm7536_vm6 = vmand %vm21172_vm10, %vm21171_vm4  ;;  %v6115_v24 = vshrl.u32 %v6043_v5, 16  ;;  %v6119_v34 = vshll.u32 %v6044_v29, 16  ;;  %v5962_v25 = vor.u32 %v5960_v26, %v5959_v28  ;;  %v10199_v31 = vcombine.low %v5831_v52, %v5832_v3  ;;  %v5612_v26 = vld [vmem:[#allocation2 + $0x48] sm:$0xff]  ;;  %v16931_v3 = vpop.permute.xlu1 %6714 }
 0x2f8   : > { %vm21173_vm3 = vcmp.lt.s32.totalorder %v21170_v53, 8  ;;  %vm5770_vm0 = vcmp.eq.s32.totalorder %v16650_v12, 1  ;;  %vm21175_vm1 = vcmp.ge.s32.totalorder %v21174_v50, 0  ;;  %vm21176_vm13 = vnez %v20922_v37 }
 0x2f9   : > { %vm7568_vm2 = vmand %vm7536_vm6, %vm21173_vm3  ;;  %vm5769_vm7 = vcmp.eq.s32.totalorder %v16658_v35, 1  ;;  %v6117_v5 = vor.u32 %v6115_v24, %v6113_v2  ;;  %v6121_v60 = vrot.slane %v6119_v34, 1  ;;  %v5965_v48 = vshrl.u32 %v10199_v31, 16  ;;  %v21182_v34 = vld [vmem:[#allocation46_spill] sm:$0xff] }
 0x2fa   : > { %v7601_v6 = vsel %vm7568_vm2, 1, %v19962_v22  ;;  %vm7535_vm12 = vmand %vm21176_vm13, %vm21175_vm1  ;;  %vm21177_vm14 = vcmp.lt.s32.totalorder %v21174_v50, 8  ;;  %vm21178_vm10 = vsmask.f32 256  ;;  %vm21179_vm3 = vsmask.f32 7424 }
 0x2fb   : > { %7648 = vperm.xlu1 %11538, %v7601_v6   ;;  %vm7567_vm4 = vmand %vm7535_vm12, %vm21177_vm14  ;;  %v5963_v14 = vsel %vm21178_vm10, %v5951_v41, %v5962_v25  ;;  %v6122_v42 = vsel %vm21179_vm3, %v6117_v5, %v6121_v60  ;;  %v5967_v52 = vrot.slane %v5965_v48, 7  ;;  %v5968_v53 = vshll.u32 %v10199_v31, 16  ;;  %v16943_v31 = vpop.permute.xlu0 %6711  ;;  %v21185_v48 = vld [vmem:[#allocation19_spill] sm:$0xff] }
 0x2fc   : > { %v7600_v12 = vsel %vm7567_vm4, 1, %v19962_v22  ;;  %vm5802_vm6 = vmpackc.low %vm5770_vm0, %vm5770_vm0  ;;  %vm6028_vm2 = vcmp.ne.s16.totalorder %v5963_v14, 0  ;;  %vm21180_vm12 = vcmask 523264   ;;  %vm21181_vm10 = vcmp.ge.s32.totalorder %v15039_v59, 0 }
 0x2fd   : > { %7645 = vperm.xlu0 %11537, %v7600_v12   ;;  %v5834_v2 = vsel %vm5802_vm6, 65537, %v19962_v22  ;;  %vm5801_vm1 = vmpackc.low %vm5769_vm7, %vm5769_vm7  ;;  %11051 = vmatprep.mubr.msk.bf16.mxu1 %vm21180_vm12, %v6122_v42  ;;  %v6045_v41 = vsel %vm6028_vm2, %v5612_v26, 0  ;;  %vm21183_vm0 = vnez %v21182_v34  ;;  %v6123_v25 = vshrl.u32 %v6044_v29, 16 }
 0x2fe   : > { %v5833_v24 = vsel %vm5801_vm1, 65537, %v19962_v22  ;;  %vm2937_vm14 = vmand %vm21183_vm0, %vm21181_vm10  ;;  %v6127_v6 = vshll.u32 %v6045_v41, 16  ;;  %v5970_v50 = vor.u32 %v5968_v53, %v5967_v52  ;;  %vm21184_vm4 = vcmp.lt.s32.totalorder %v15039_v59, 8  ;;  %v5613_v53 = vld [vmem:[#allocation2 + $0x50] sm:$0xff] }
 0x2ff   : > { %v10200_v5 = vcombine.low %v5833_v24, %v5834_v2  ;;  %vm3001_vm6 = vmand %vm2937_vm14, %vm21184_vm4  ;;  %vm5772_vm7 = vcmp.eq.s32.totalorder %v16673_v44, 1  ;;  %vm21186_vm3 = vcmp.ge.s32.totalorder %v21185_v48, 0  ;;  %vm21187_vm2 = vnez %v20933_v54  ;;  %v16959_v2 = vpop.permute.xlu1 %6720 }
 0x300   : > { %v3034_v35 = vsel %vm3001_vm6, 1, %v19962_v22  ;;  %vm7537_vm1 = vmand %vm21187_vm2, %vm21186_vm3  ;;  %vm5771_vm12 = vcmp.eq.s32.totalorder %v16685_v32, 1  ;;  %v6125_v29 = vor.u32 %v6123_v25, %v6121_v60  ;;  %v6129_v14 = vrot.slane %v6127_v6, 1  ;;  %v21193_v6 = vld [vmem:[#allocation53_spill] sm:$0xff] }
 0x301   : > { %v5973_v12 = vshrl.u32 %v10200_v5, 16  ;;  %3095 = vperm.xlu1 %11538, %v3034_v35   ;;  %vm21188_vm10 = vcmp.lt.s32.totalorder %v21185_v48, 8  ;;  %vm21189_vm13 = vsmask.f32 256  ;;  %vm5804_vm14 = vmpackc.low %vm5772_vm7, %vm5772_vm7  ;;  %vm21190_vm4 = vsmask.f32 7424 }
 0x302   : > { %vm7569_vm0 = vmand %vm7537_vm1, %vm21188_vm10  ;;  %v5971_v42 = vsel %vm21189_vm13, %v5959_v28, %v5970_v50  ;;  %v6130_v26 = vsel %vm21190_vm4, %v6125_v29, %v6129_v14  ;;  %v5976_v34 = vshll.u32 %v10200_v5, 16  ;;  %v5836_v60 = vsel %vm5804_vm14, 65537, %v19962_v22  ;;  %v16971_v5 = vpop.permute.xlu0 %6717 }
 0x303   : > { %v7602_v44 = vsel %vm7569_vm0, 1, %v19962_v22  ;;  %vm6029_vm6 = vcmp.ne.s16.totalorder %v5971_v42, 0  ;;  %v5975_v24 = vrot.slane %v5973_v12, 7  ;;  %vm5803_vm3 = vmpackc.low %vm5771_vm12, %vm5771_vm12  ;;  %vm21191_vm1 = vcmask 523264   ;;  %v21197_v12 = vld [vmem:[#allocation43_spill] sm:$0xff] }
 0x304   : > { %7651 = vperm.xlu0 %11537, %v7602_v44   ;;  %11052 = vmatmul.mubr.msk.bf16.gmra.mrb[0].mxu1 %vm21191_vm1, %v6130_v26  ;;  %v6046_v28 = vsel %vm6029_vm6, %v5613_v53, 0  ;;  %v5835_v25 = vsel %vm5803_vm3, 65537, %v19962_v22  ;;  %vm21192_vm13 = vcmp.ge.s32.totalorder %v15058_v45, 0  ;;  %vm21194_vm7 = vnez %v21193_v6 }
 0x305   : > { %vm2939_vm10 = vmand %vm21194_vm7, %vm21192_vm13  ;;  %v6131_v50 = vshrl.u32 %v6045_v41, 16  ;;  %v6135_v35 = vshll.u32 %v6046_v28, 16  ;;  %v5978_v48 = vor.u32 %v5976_v34, %v5975_v24  ;;  %v10201_v29 = vcombine.low %v5835_v25, %v5836_v60  ;;  %v5614_v34 = vld [vmem:[#allocation2 + $0x58] sm:$0xff]  ;;  %v16987_v60 = vpop.permute.xlu1 %6726 }
 0x306   : > { %vm21195_vm0 = vcmp.lt.s32.totalorder %v15058_v45, 8  ;;  %vm5774_vm12 = vcmp.eq.s32.totalorder %v16702_v20, 1  ;;  %vm21196_vm4 = vcmp.ge.s32.totalorder %v15024_v8, 0  ;;  %vm21198_vm6 = vnez %v21197_v12 }
 0x307   : > { %vm3003_vm14 = vmand %vm2939_vm10, %vm21195_vm0  ;;  %vm5773_vm1 = vcmp.eq.s32.totalorder %v16712_v17, 1  ;;  %v6133_v41 = vor.u32 %v6131_v50, %v6129_v14  ;;  %v6137_v42 = vrot.slane %v6135_v35, 1  ;;  %v5981_v44 = vshrl.u32 %v10201_v29, 16  ;;  %v21203_v35 = vld [vmem:[#allocation18_spill] sm:$0xff] }
 0x308   : > { %v3036_v32 = vsel %vm3003_vm14, 1, %v19962_v22  ;;  %vm2938_vm3 = vmand %vm21198_vm6, %vm21196_vm4  ;;  %vm21199_vm13 = vcmp.lt.s32.totalorder %v15024_v8, 8  ;;  %vm21200_vm2 = vsmask.f32 256  ;;  %vm21201_vm0 = vsmask.f32 7424 }
 0x309   : > { %3101 = vperm.xlu1 %11538, %v3036_v32   ;;  %vm3002_vm7 = vmand %vm2938_vm3, %vm21199_vm13  ;;  %v5979_v26 = vsel %vm21200_vm2, %v5967_v52, %v5978_v48  ;;  %v6138_v53 = vsel %vm21201_vm0, %v6133_v41, %v6137_v42  ;;  %v5983_v25 = vrot.slane %v5981_v44, 7  ;;  %v5984_v6 = vshll.u32 %v10201_v29, 16  ;;  %v16999_v29 = vpop.permute.xlu0 %6723  ;;  %v21206_v44 = vld [vmem:[#allocation105_spill] sm:$0xff] }
 0x30a   : > { %v3035_v20 = vsel %vm3002_vm7, 1, %v19962_v22  ;;  %vm5806_vm10 = vmpackc.low %vm5774_vm12, %vm5774_vm12  ;;  %vm6030_vm14 = vcmp.ne.s16.totalorder %v5979_v26, 0  ;;  %vm21202_vm6 = vcmask 523264   ;;  %vm21204_vm2 = vcmp.ge.s32.totalorder %v21203_v35, 0  ;;  %v21209_v26 = vld [vmem:[#allocation50_spill] sm:$0xff] }
 0x30b   : > { %3098 = vperm.xlu0 %11537, %v3035_v20   ;;  %v5838_v14 = vsel %vm5806_vm10, 65537, %v19962_v22  ;;  %vm5805_vm4 = vmpackc.low %vm5773_vm1, %vm5773_vm1  ;;  %11055 = vmatprep.mubr.msk.bf16.mxu1 %vm21202_vm6, %v6138_v53  ;;  %v6047_v52 = vsel %vm6030_vm14, %v5614_v34, 0  ;;  %vm21205_vm12 = vnez %v20928_v30  ;;  %v6139_v48 = vshrl.u32 %v6046_v28, 16 }
 0x30c   : > { %v5837_v50 = vsel %vm5805_vm4, 65537, %v19962_v22  ;;  %vm7538_vm3 = vmand %vm21205_vm12, %vm21204_vm2  ;;  %v6143_v32 = vshll.u32 %v6047_v52, 16  ;;  %v5986_v12 = vor.u32 %v5984_v6, %v5983_v25  ;;  %vm21207_vm13 = vcmp.lt.s32.totalorder %v21206_v44, 8 }
 0x30d   : > { %v10202_v41 = vcombine.low %v5837_v50, %v5838_v14  ;;  %vm7570_vm7 = vmand %vm7538_vm3, %vm21207_vm13  ;;  %vm5776_vm1 = vcmp.eq.s32.totalorder %v16729_v61, 1  ;;  %vm21208_vm10 = vcmp.ge.s32.totalorder %v15044_v10, 0  ;;  %vm21210_vm0 = vnez %v21209_v26  ;;  %v5615_v14 = vld [vmem:[#allocation2 + $0x60] sm:$0xff]  ;;  %v17015_v50 = vpop.permute.xlu1 %6732 }
 0x30e   : > { %v7603_v17 = vsel %vm7570_vm7, 1, %v19962_v22  ;;  %vm2940_vm14 = vmand %vm21210_vm0, %vm21208_vm10  ;;  %vm5775_vm4 = vcmp.eq.s32.totalorder %v16740_v47, 1  ;;  %v6141_v28 = vor.u32 %v6139_v48, %v6137_v42  ;;  %v6145_v20 = vrot.slane %v6143_v32, 1  ;;  %v21215_v32 = vld [vmem:[#allocation24_spill] sm:$0xff] }
 0x30f   : > { %v5989_v53 = vshrl.u32 %v10202_v41, 16  ;;  %7654 = vperm.xlu1 %11538, %v7603_v17   ;;  %vm21211_vm6 = vcmp.lt.s32.totalorder %v15044_v10, 8  ;;  %vm21212_vm12 = vsmask.f32 256  ;;  %vm5808_vm3 = vmpackc.low %vm5776_vm1, %vm5776_vm1  ;;  %vm21213_vm13 = vsmask.f32 7424 }
 0x310   : > { %vm3004_vm2 = vmand %vm2940_vm14, %vm21211_vm6  ;;  %v5987_v34 = vsel %vm21212_vm12, %v5975_v24, %v5986_v12  ;;  %v6146_v6 = vsel %vm21213_vm13, %v6141_v28, %v6145_v20  ;;  %v5992_v44 = vshll.u32 %v10202_v41, 16  ;;  %v5840_v42 = vsel %vm5808_vm3, 65537, %v19962_v22  ;;  %v17027_v41 = vpop.permute.xlu0 %6729 }
 0x311   : > { %v3037_v61 = vsel %vm3004_vm2, 1, %v19962_v22  ;;  %vm6031_vm7 = vcmp.ne.s16.totalorder %v5987_v34, 0  ;;  %v5991_v35 = vrot.slane %v5989_v53, 7  ;;  %vm5807_vm10 = vmpackc.low %vm5775_vm4, %vm5775_vm4  ;;  %vm21214_vm0 = vcmask 523264   ;;  %v21219_v53 = vld [vmem:[#allocation27_spill] sm:$0xff] }
 0x312   : > { %3104 = vperm.xlu0 %11537, %v3037_v61   ;;  %11056 = vmatmul.mubr.msk.bf16.gmra.mrb[4].mxu1 %vm21214_vm0, %v6146_v6  ;;  %v6048_v24 = vsel %vm6031_vm7, %v5615_v14, 0  ;;  %v5839_v48 = vsel %vm5807_vm10, 65537, %v19962_v22  ;;  %vm21216_vm12 = vcmp.ge.s32.totalorder %v21215_v32, 0  ;;  %vm21217_vm1 = vnez %v20939_v56  ;;  %v11587_v61 = vld [vmem:[%s19147_s4 + $0x40] sm:$0xff]  }
 0x313   : > { %vm7540_vm14 = vmand %vm21217_vm1, %vm21216_vm12  ;;  %v6147_v12 = vshrl.u32 %v6047_v52, 16  ;;  %v6151_v17 = vshll.u32 %v6048_v24, 16  ;;  %v5994_v26 = vor.u32 %v5992_v44, %v5991_v35  ;;  %v10203_v28 = vcombine.low %v5839_v48, %v5840_v42  ;;  %v5616_v42 = vld [vmem:[#allocation2 + $0x68] sm:$0xff]  ;;  %10911 = vmatprep.subr.bf16.mxu0 %v11587_v61 }
 0x314   : > { %vm21218_vm6 = vcmp.lt.s32.totalorder %v21215_v32, 8  ;;  %vm5778_vm4 = vcmp.eq.s32.totalorder %v16755_v23, 1  ;;  %vm21220_vm3 = vcmp.ge.s32.totalorder %v21219_v53, 0  ;;  %vm21221_vm13 = vnez %v20944_v58  ;;  %10912 = vmatpush3.bf16.msra.mxu0 %v11587_v61  ;;  %v11588_v61 = vld [vmem:[%s19147_s4 + $0x48] sm:$0xff]  }
 0x315   : > { %vm7572_vm2 = vmand %vm7540_vm14, %vm21218_vm6  ;;  %vm5777_vm10 = vcmp.eq.s32.totalorder %v16767_v18, 1  ;;  %v6149_v52 = vor.u32 %v6147_v12, %v6145_v20  ;;  %v6153_v34 = vrot.slane %v6151_v17, 1  ;;  %v5997_v6 = vshrl.u32 %v10203_v28, 16  ;;  %v17046_v20 = vpop.permute.xlu1 %6738  ;;  %10913 = vmatprep.subr.bf16.mxu0 %v11588_v61 }
 0x316   : > { %v7605_v47 = vsel %vm7572_vm2, 1, %v19962_v22  ;;  %vm7539_vm7 = vmand %vm21221_vm13, %vm21220_vm3  ;;  %vm21222_vm0 = vcmp.lt.s32.totalorder %v21219_v53, 8  ;;  %vm21223_vm14 = vsmask.f32 256  ;;  %vm21224_vm2 = vsmask.f32 7424 }
 0x317   : > { %7660 = vperm.xlu1 %11538, %v7605_v47   ;;  %vm7571_vm12 = vmand %vm7539_vm7, %vm21222_vm0  ;;  %v5995_v23 = vsel %vm21223_vm14, %v5983_v25, %v5994_v26  ;;  %v6154_v44 = vsel %vm21224_vm2, %v6149_v52, %v6153_v34  ;;  %v5999_v48 = vrot.slane %v5997_v6, 7  ;;  %v6000_v32 = vshll.u32 %v10203_v28, 16  ;;  %v21227_v26 = vld [vmem:[#allocation59_spill] sm:$0xff]  ;;  %v17058_v28 = vpop.permute.xlu0 %6735 }
 0x318   : > { %v7604_v14 = vsel %vm7571_vm12, 1, %v19962_v22  ;;  %vm5810_vm6 = vmpackc.low %vm5778_vm4, %vm5778_vm4  ;;  %vm6032_vm3 = vcmp.ne.s16.totalorder %v5995_v23, 0  ;;  %vm21225_vm0 = vcmask 523264   ;;  %vm21226_vm4 = vcmp.ge.s32.totalorder %v15104_v36, 0  ;;  %v21230_v23 = vld [vmem:[#allocation33_spill] sm:$0xff]  ;;  %10914 = vmatpush3.bf16.msra.mxu0 %v11588_v61  ;;  %v11589_v61 = vld [vmem:[%s19147_s4 + $0x50] sm:$0xff]  }
 0x319   : > { %7657 = vperm.xlu0 %11537, %v7604_v14   ;;  %v5842_v12 = vsel %vm5810_vm6, 65537, %v19962_v22  ;;  %vm5809_vm7 = vmpackc.low %vm5777_vm10, %vm5777_vm10  ;;  %11059 = vmatprep.mubr.msk.bf16.mxu1 %vm21225_vm0, %v6154_v44  ;;  %v6049_v25 = vsel %vm6032_vm3, %v5616_v42, 0  ;;  %vm21228_vm12 = vnez %v21227_v26  ;;  %v6155_v47 = vshrl.u32 %v6048_v24, 16 }
 0x31a   : > { %v5841_v17 = vsel %vm5809_vm7, 65537, %v19962_v22  ;;  %vm2941_vm14 = vmand %vm21228_vm12, %vm21226_vm4  ;;  %v6159_v53 = vshll.u32 %v6049_v25, 16  ;;  %v6002_v52 = vor.u32 %v6000_v32, %v5999_v48  ;;  %vm21229_vm6 = vcmp.lt.s32.totalorder %v15104_v36, 8  ;;  %10915 = vmatprep.subr.bf16.mxu0 %v11589_v61  ;;  %v21255_v36 = vld [vmem:[#allocation151_spill] sm:$0xff] }
 0x31b   : > { %v10204_v6 = vcombine.low %v5841_v17, %v5842_v12  ;;  %vm3005_vm10 = vmand %vm2941_vm14, %vm21229_vm6  ;;  %vm5780_vm2 = vcmp.eq.s32.totalorder %v16788_v38, 1  ;;  %vm21231_vm3 = vcmp.ge.s32.totalorder %v21230_v23, 0  ;;  %vm21232_vm7 = vnez %v20956_v39  ;;  %v5617_v12 = vld [vmem:[#allocation2 + $0x70] sm:$0xff] }
 0x31c   : > { %v3038_v18 = vsel %vm3005_vm10, 1, %v19962_v22  ;;  %vm7541_vm0 = vmand %vm21232_vm7, %vm21231_vm3  ;;  %vm5779_vm4 = vcmp.eq.s32.totalorder %v16800_v4, 1  ;;  %v6157_v24 = vor.u32 %v6155_v47, %v6153_v34  ;;  %v6161_v14 = vrot.slane %v6159_v53, 1  ;;  %v17077_v34 = vpop.permute.xlu1 %6744  ;;  %10916 = vmatpush3.bf16.msra.mxu0 %v11589_v61 }
 0x31d   : > { %v6005_v44 = vshrl.u32 %v10204_v6, 16  ;;  %3107 = vperm.xlu1 %11538, %v3038_v18   ;;  %vm21233_vm12 = vcmp.lt.s32.totalorder %v21230_v23, 8  ;;  %vm21234_vm6 = vsmask.f32 256  ;;  %vm5812_vm10 = vmpackc.low %vm5780_vm2, %vm5780_vm2  ;;  %vm21235_vm13 = vsmask.f32 7424 }
 0x31e   : > { %vm7573_vm14 = vmand %vm7541_vm0, %vm21233_vm12  ;;  %v6003_v38 = vsel %vm21234_vm6, %v5991_v35, %v6002_v52  ;;  %v6162_v32 = vsel %vm21235_vm13, %v6157_v24, %v6161_v14  ;;  %v6008_v26 = vshll.u32 %v10204_v6, 16  ;;  %v5844_v47 = vsel %vm5812_vm10, 65537, %v19962_v22  ;;  %v21237_v52 = vld [vmem:[#allocation153_spill] sm:$0xff]  ;;  %v17091_v6 = vpop.permute.xlu0 %6741 }
 0x31f   : > { %v7606_v42 = vsel %vm7573_vm14, 1, %v19962_v22  ;;  %vm6033_vm3 = vcmp.ne.s16.totalorder %v6003_v38, 0  ;;  %v17079_v17 = vrot.slane %v6005_v44, 7  ;;  %vm5811_vm0 = vmpackc.low %vm5779_vm4, %vm5779_vm4  ;;  %vm21236_vm12 = vcmask 523264   ;;  %v21239_v18 = vld [vmem:[#allocation65_spill] sm:$0xff] }
 0x320   : > { %7663 = vperm.xlu0 %11537, %v7606_v42   ;;  %11060 = vmatmul.mubr.msk.bf16.gmra.mrb[8].mxu1 %vm21236_vm12, %v6162_v32  ;;  %v6050_v35 = vsel %vm6033_vm3, %v5617_v12, 0  ;;  %v5843_v53 = vsel %vm5811_vm0, 65537, %v19962_v22  ;;  %vm21238_vm13 = vcmp.ge.s32.totalorder %v21237_v52, 0  ;;  %vm21240_vm2 = vnez %v21239_v18  ;;  %v21242_v42 = vld [vmem:[#allocation149_spill] sm:$0xff]  ;;  %v5618_v18 = vld [vmem:[#allocation2 + $0x78] sm:$0xff] }
 0x321   : > { %vm2943_vm14 = vmand %vm21240_vm2, %vm21238_vm13  ;;  %v6163_v23 = vshrl.u32 %v6049_v25, 16  ;;  %v6167_v24 = vshll.u32 %v6050_v35, 16  ;;  %v6010_v44 = vor.u32 %v6008_v26, %v17079_v17  ;;  %v10205_v4 = vcombine.low %v5843_v53, %v5844_v47  ;;  %v21244_v32 = vld [vmem:[#allocation57_spill] sm:$0xff]  ;;  %v17112_v47 = vld [vmem:[%s19147_s4 + $0xe0] sm:$0xff]  }
 0x322   : > { %vm21241_vm4 = vcmp.lt.s32.totalorder %v21237_v52, 8  ;;  %vm6783_vm10 = vcmp.eq.s32.totalorder %v16819_v62, 1  ;;  %vm21243_vm3 = vcmp.ge.s32.totalorder %v21242_v42, 0  ;;  %vm21245_vm0 = vnez %v21244_v32  ;;  %v5620_v32 = vld [vmem:[#allocation2 + $0x88] sm:$0x1]  ;;  %v21250_v52 = vld [vmem:[#allocation30_spill] sm:$0xff]  ;;  %11111 = vmatprep.subr.bf16.mxu1 %v17112_v47 }
 0x323   : > { %vm3007_vm6 = vmand %vm2943_vm14, %vm21241_vm4  ;;  %vm6782_vm13 = vcmp.eq.s32.totalorder %v16831_v16, 1  ;;  %v6165_v25 = vor.u32 %v6163_v23, %v6161_v14  ;;  %v6169_v12 = vrot.slane %v6167_v24, 1  ;;  %v6013_v26 = vshrl.u32 %v10205_v4, 16  ;;  %v17116_v23 = vpop.permute.xlu1 %6750 }
 0x324   : > { %v3040_v38 = vsel %vm3007_vm6, 1, %v19962_v22  ;;  %vm2942_vm12 = vmand %vm21245_vm0, %vm21243_vm3  ;;  %vm21246_vm2 = vcmp.lt.s32.totalorder %v21242_v42, 8  ;;  %vm21247_vm4 = vsmask.f32 256  ;;  %vm21248_vm3 = vsmask.f32 7424 }
 0x325   : > { %3113 = vperm.xlu1 %11538, %v3040_v38   ;;  %vm3006_vm14 = vmand %vm2942_vm12, %vm21246_vm2  ;;  %v6011_v62 = vsel %vm21247_vm4, %v5999_v48, %v6010_v44  ;;  %v6170_v14 = vsel %vm21248_vm3, %v6165_v25, %v6169_v12  ;;  %v6015_v24 = vrot.slane %v6013_v26, 7  ;;  %v6016_v38 = vshll.u32 %v10205_v4, 16  ;;  %v21257_v42 = vld [vmem:[#allocation62_spill] sm:$0xff] }
 0x326   : > { %v3039_v53 = vsel %vm3006_vm14, 1, %v19962_v22  ;;  %vm6815_vm6 = vmpackc.low %vm6783_vm10, %vm6783_vm10  ;;  %vm6034_vm0 = vcmp.ne.s16.totalorder %v6011_v62, 0  ;;  %vm21249_vm2 = vcmask 523264   ;;  %vm21251_vm10 = vcmp.ge.s32.totalorder %v21250_v52, 0  ;;  %v21252_v62 = vld [vmem:[#allocation110_spill] sm:$0xff] }
 0x327   : > { %3110 = vperm.xlu0 %11537, %v3039_v53   ;;  %v6847_v48 = vsel %vm6815_vm6, 65537, %v19962_v22  ;;  %vm6814_vm12 = vmpackc.low %vm6782_vm13, %vm6782_vm13  ;;  %11063 = vmatprep.mubr.msk.bf16.mxu1 %vm21249_vm2, %v6170_v14  ;;  %v6051_v44 = vsel %vm6034_vm0, %v5618_v18, 0  ;;  %vm21253_vm14 = vnez %v21252_v62  ;;  %v6171_v4 = vshrl.u32 %v6050_v35, 16  ;;  %v17129_v53 = vpop.permute.xlu0 %6747 }
 0x328   : > { %v6846_v25 = vsel %vm6814_vm12, 65537, %v19962_v22  ;;  %vm7542_vm4 = vmand %vm21253_vm14, %vm21251_vm10  ;;  %v6175_v26 = vshll.u32 %v6051_v44, 16  ;;  %v6018_v16 = vor.u32 %v6016_v38, %v6015_v24  ;;  %vm6036_vm13 = vcmp.ne.s16.totalorder %v6015_v24, 0  ;;  %v11591_v24 = vld [vmem:[%s19147_s4 + $0x58] sm:$0xff]  }
 0x329   : > { %v10234_v14 = vcombine.low %v6846_v25, %v6847_v48  ;;  %vm21254_vm6 = vcmp.lt.s32.totalorder %v21250_v52, 8  ;;  %vm21256_vm2 = vcmp.ge.s32.totalorder %v21255_v36, 0  ;;  %vm21258_vm10 = vnez %v21257_v42  ;;  %10917 = vmatprep.subr.bf16.mxu0 %v11591_v24 }
 0x32a   : > { %vm7574_vm0 = vmand %vm7542_vm4, %vm21254_vm6  ;;  %v6173_v35 = vor.u32 %v6171_v4, %v6169_v12  ;;  %v6177_v45 = vrot.slane %v6175_v26, 1  ;;  %v6053_v61 = vsel %vm6036_vm13, %v5620_v32, 0  ;;  %vm21259_vm4 = vcmp.lt.s32.totalorder %v21255_v36, 8  ;;  %v5619_v12 = vld [vmem:[#allocation2 + $0x80] sm:$0xff]  ;;  %v17152_v4 = vpop.permute.xlu1 %6756  ;;  %10918 = vmatpush3.bf16.msra.mxu0 %v11591_v24  ;;  %v6652_v36 = vld [vmem:[#allocation2 + $0x8] sm:$0xf8] }
 0x32b   : > { %v7607_v18 = vsel %vm7574_vm0, 1, %v19962_v22  ;;  %vm2944_vm3 = vmand %vm21258_vm10, %vm21256_vm2  ;;  %v6927_v38 = vshrl.u32 %v10234_v14, 16  ;;  %v6930_v48 = vshll.u32 %v10234_v14, 16  ;;  %vm21260_vm0 = vsmask.f32 256 }
 0x32c   : > { %7666 = vperm.xlu1 %11538, %v7607_v18   ;;  %vm3008_vm6 = vmand %vm2944_vm3, %vm21259_vm4  ;;  %v6019_v52 = vsel %vm21260_vm0, %v17079_v17, %v6018_v16  ;;  %vm21261_vm2 = vcmp.eq.s32.totalorder %v16847_v7, 1  ;;  %vm21262_vm13 = vsmask.f32 7424  ;;  %v6191_v32 = vshll.u32 %v6053_v61, 16  ;;  %v21265_v16 = vld [vmem:[#allocation36_spill] sm:$0xff] }
 0x32d   : > { %v3041_v25 = vsel %vm3008_vm6, 1, %v19962_v22  ;;  %vm6817_vm10 = vmpackc.low %vm21261_vm2, %vm21261_vm2  ;;  %v6178_v42 = vsel %vm21262_vm13, %v6173_v35, %v6177_v45  ;;  %vm6035_vm12 = vcmp.ne.s16.totalorder %v6019_v52, 0  ;;  %v6929_v26 = vrot.slane %v6927_v38, 4  ;;  %v21267_v35 = vld [vmem:[#allocation111_spill] sm:$0xff] }
 0x32e   : > { %v6932_v14 = vrot.slane %v6930_v48, 5  ;;  %3116 = vperm.xlu0 %11537, %v3041_v25   ;;  %v6849_v18 = vsel %vm6817_vm10, 65537, %v19962_v22  ;;  %vm21263_vm3 = vcmp.eq.s32.totalorder %v16859_v11, 1  ;;  %vm21264_vm6 = vcmask 523264   ;;  %v17164_v48 = vpop.permute.xlu0 %6753  ;;  %v11744_v11 = vld [vmem:[%s19147_s4 + $0x60] sm:$0xff]  }
 0x32f   : > { %vm6816_vm4 = vmpackc.low %vm21263_vm3, %vm21263_vm3  ;;  %11064 = vmatmul.mubr.msk.bf16.gmra.mrb[12].mxu1 %vm21264_vm6, %v6178_v42  ;;  %v6052_v7 = vsel %vm6035_vm12, %v5619_v12, 0  ;;  %vm21266_vm0 = vcmp.ge.s32.totalorder %v21265_v16, 0  ;;  %vm21268_vm2 = vnez %v21267_v35  ;;  %v6179_v61 = vshrl.u32 %v6051_v44, 16  ;;  %10951 = vmatprep.subr.bf16.mxu0 %v11744_v11  ;;  %v21270_v42 = vld [vmem:[#allocation39_spill] sm:$0xff]  ;;  %v21272_v12 = vld [vmem:[#allocation112_spill] sm:$0xff] }
 0x330   : > { %v6848_v17 = vsel %vm6816_vm4, 65537, %v19962_v22  ;;  %vm7544_vm13 = vmand %vm21268_vm2, %vm21266_vm0  ;;  %v6183_v38 = vshll.u32 %v6052_v7, 16  ;;  %v6933_v52 = vor.u32 %v6932_v14, %v6929_v26  ;;  %vm21269_vm10 = vcmp.lt.s32.totalorder %v21265_v16, 8 }
 0x331   : > { %v10235_v25 = vcombine.low %v6848_v17, %v6849_v18  ;;  %vm7576_vm3 = vmand %vm7544_vm13, %vm21269_vm10  ;;  %vm6787_vm6 = vcmp.eq.s32.totalorder %v16875_v21, 1  ;;  %vm21271_vm4 = vcmp.ge.s32.totalorder %v21270_v42, 0  ;;  %vm21273_vm0 = vnez %v21272_v12 }
 0x332   : > { %v7609_v44 = vsel %vm7576_vm3, 1, %v19962_v22  ;;  %vm7543_vm2 = vmand %vm21273_vm0, %vm21271_vm4  ;;  %v6181_v24 = vor.u32 %v6179_v61, %v6177_v45  ;;  %v6185_v26 = vrot.slane %v6183_v38, 1  ;;  %v6187_v14 = vshrl.u32 %v6052_v7, 16  ;;  %v17185_v7 = vpop.permute.xlu1 %6762 }
 0x333   : > { %vm7069_vm13 = vcmp.ne.s16.totalorder %v6933_v52, 0  ;;  %v6935_v18 = vshrl.u32 %v10235_v25, 16  ;;  %v6938_v17 = vshll.u32 %v10235_v25, 16  ;;  %7672 = vperm.xlu1 %11538, %v7609_v44   ;;  %vm21274_vm10 = vcmp.lt.s32.totalorder %v21270_v42, 8  ;;  %vm6819_vm3 = vmpackc.low %vm6787_vm6, %vm6787_vm6  ;;  %v21280_v42 = vld [vmem:[#allocation71_spill] sm:$0xff] }
 0x334   : > { %vm7575_vm12 = vmand %vm7543_vm2, %vm21274_vm10  ;;  %v6193_v16 = vrot.slane %v6191_v32, 1  ;;  %vm21275_vm7 = vsmask.f32 7424  ;;  %v6189_v45 = vor.u32 %v6187_v14, %v6185_v26  ;;  %v7086_v61 = vsel %vm7069_vm13, %v6652_v36, 0  ;;  %v21278_v32 = vld [vmem:[#allocation155_spill] sm:$0xff] }
 0x335   : > { %v7608_v11 = vsel %vm7575_vm12, 1, %v19962_v22  ;;  %v6186_v10 = vsel %vm21275_vm7, %v6181_v24, %v6185_v26  ;;  %v6937_v38 = vrot.slane %v6935_v18, 4  ;;  %v6940_v25 = vrot.slane %v6938_v17, 5  ;;  %v17198_v26 = vpop.permute.xlu0 %6759  ;;  %v21286_v17 = vld [vmem:[#allocation113_spill] sm:$0xff] }
 0x336   : > { %7669 = vperm.xlu0 %11537, %v7608_v11   ;;  %v6851_v44 = vsel %vm6819_vm3, 65537, %v19962_v22  ;;  %vm21276_vm2 = vcmp.eq.s32.totalorder %v16887_v63, 1  ;;  %vm21277_vm12 = vcmask 523264   ;;  %vm21279_vm6 = vcmp.ge.s32.totalorder %v21278_v32, 0  ;;  %v21284_v63 = vld [vmem:[#allocation45_spill] sm:$0xff] }
 0x337   : > { %vm6818_vm4 = vmpackc.low %vm21276_vm2, %vm21276_vm2  ;;  %11067 = vmatprep.mubr.msk.bf16.mxu1 %vm21277_vm12, %v6186_v10  ;;  %vm21281_vm7 = vnez %v21280_v42  ;;  %vm21282_vm10 = vsmask.f32 7424  ;;  %v7113_v24 = vshrl.u32 %v7086_v61, 16  ;;  %v6941_v14 = vor.u32 %v6940_v25, %v6937_v38 }
 0x338   : > { %v6850_v21 = vsel %vm6818_vm4, 65537, %v19962_v22  ;;  %vm2945_vm13 = vmand %vm21281_vm7, %vm21279_vm6  ;;  %v6194_v36 = vsel %vm21282_vm10, %v6189_v45, %v6193_v16  ;;  %vm21283_vm3 = vcmp.lt.s32.totalorder %v21278_v32, 8  ;;  %vm6789_vm2 = vcmp.eq.s32.totalorder %v16903_v57, 1 }
 0x339   : > { %v10236_v18 = vcombine.low %v6850_v21, %v6851_v44  ;;  %vm3009_vm0 = vmand %vm2945_vm13, %vm21283_vm3  ;;  %11068 = vmatmul.mubr.msk.bf16.gmra.mrb[16].mxu1 %vm21277_vm12, %v6194_v36  ;;  %vm21285_vm4 = vcmp.ge.s32.totalorder %v21284_v63, 0  ;;  %vm21287_vm6 = vnez %v21286_v17  ;;  %vm6788_vm10 = vcmp.eq.s32.totalorder %v16915_v0, 1  ;;  %v17214_v44 = vpop.permute.xlu1 %6768  ;;  %v11745_v36 = vld [vmem:[#allocation2 + $0x10] sm:$0xff]  ;;  %v21297_v17 = vld [vmem:[#allocation68_spill] sm:$0xff] }
 0x33a   : > { %v3042_v10 = vsel %vm3009_vm0, 1, %v19962_v22  ;;  %vm7545_vm7 = vmand %vm21287_vm6, %vm21285_vm4  ;;  %v7116_v16 = vshll.u32 %v7086_v61, 16  ;;  %vm21288_vm14 = vcmp.lt.s32.totalorder %v21284_v63, 8  ;;  %vm21289_vm3 = vsmask.f32 3328  ;;  %v21292_v63 = vld [vmem:[#allocation79_spill] sm:$0xff] }
 0x33b   : > { %v6944_v11 = vshrl.u32 %v10236_v18, 16  ;;  %v6947_v45 = vshll.u32 %v10236_v18, 16  ;;  %3119 = vperm.xlu1 %11538, %v3042_v10   ;;  %vm7577_vm13 = vmand %vm7545_vm7, %vm21288_vm14  ;;  %v6942_v57 = vsel %vm21289_vm3, %v6933_v52, %v6941_v14  ;;  %v7115_v25 = vrot.slane %v7113_v24, 3  ;;  %v21290_v10 = vld [vmem:[#allocation157_spill] sm:$0xff] }
 0x33c   : > { %v7610_v38 = vsel %vm7577_vm13, 1, %v19962_v22  ;;  %vm6821_vm12 = vmpackc.low %vm6789_vm2, %vm6789_vm2  ;;  %vm7070_vm0 = vcmp.ne.s16.totalorder %v6942_v57, 0  ;;  %vm21291_vm14 = vcmp.ge.s32.totalorder %v21290_v10, 0  ;;  %vm21293_vm2 = vnez %v21292_v63 }
 0x33d   : > { %v6946_v21 = vrot.slane %v6944_v11, 4  ;;  %v6949_v42 = vrot.slane %v6947_v45, 5  ;;  %7675 = vperm.xlu0 %11537, %v7610_v38   ;;  %v6853_v61 = vsel %vm6821_vm12, 65537, %v19962_v22  ;;  %vm6820_vm4 = vmpackc.low %vm6788_vm10, %vm6788_vm10  ;;  %v7087_v18 = vsel %vm7070_vm0, %v11745_v36, 0  ;;  %v17225_v45 = vpop.permute.xlu0 %6765  ;;  %v21295_v36 = vld [vmem:[#allocation154_spill] sm:$0xff] }
 0x33e   : > { %v6852_v52 = vsel %vm6820_vm4, 65537, %v19962_v22  ;;  %vm2947_vm7 = vmand %vm21293_vm2, %vm21291_vm14  ;;  %v7118_v24 = vrot.slane %v7116_v16, 4  ;;  %v7121_v57 = vshrl.u32 %v7087_v18, 16  ;;  %v7124_v11 = vshll.u32 %v7087_v18, 16 }
 0x33f   : > { %v6950_v38 = vor.u32 %v6949_v42, %v6946_v21  ;;  %v10237_v32 = vcombine.low %v6852_v52, %v6853_v61  ;;  %vm21294_vm13 = vcmp.lt.s32.totalorder %v21290_v10, 8  ;;  %vm6791_vm10 = vcmp.eq.s32.totalorder %v16931_v3, 1  ;;  %v11746_v10 = vld [vmem:[#allocation2 + $0x18] sm:$0xff] }
 0x340   : > { %vm3011_vm3 = vmand %vm2947_vm7, %vm21294_vm13  ;;  %vm21296_vm12 = vcmp.ge.s32.totalorder %v21295_v36, 0  ;;  %vm21298_vm0 = vnez %v21297_v17  ;;  %vm6790_vm14 = vcmp.eq.s32.totalorder %v16943_v31, 1  ;;  %v7123_v16 = vrot.slane %v7121_v57, 3  ;;  %v17240_v17 = vpop.permute.xlu1 %6774 }
 0x341   : > { %v3044_v0 = vsel %vm3011_vm3, 1, %v19962_v22  ;;  %vm2946_vm4 = vmand %vm21298_vm0, %vm21296_vm12  ;;  %v7126_v18 = vrot.slane %v7124_v11, 4  ;;  %vm21299_vm2 = vsmask.f32 3328  ;;  %v6953_v21 = vshrl.u32 %v10237_v32, 16 }
 0x342   : > { %v6951_v63 = vsel %vm21299_vm2, %v6941_v14, %v6950_v38  ;;  %v6956_v42 = vshll.u32 %v10237_v32, 16  ;;  %3125 = vperm.xlu1 %11538, %v3044_v0   ;;  %vm21300_vm7 = vcmp.lt.s32.totalorder %v21295_v36, 8  ;;  %vm6823_vm3 = vmpackc.low %vm6791_vm10, %vm6791_vm10  ;;  %v7119_v61 = vor.u32 %v7118_v24, %v7115_v25  ;;  %v21301_v36 = vld [vmem:[#allocation42_spill] sm:$0xff]  ;;  %v21303_v25 = vld [vmem:[#allocation143_spill] sm:$0xff]  ;;  %v17252_v24 = vpop.permute.xlu0 %6771 }
 0x343   : > { %vm3010_vm13 = vmand %vm2946_vm4, %vm21300_vm7  ;;  %vm7071_vm6 = vcmp.ne.s16.totalorder %v6951_v63, 0  ;;  %v7127_v52 = vor.u32 %v7126_v18, %v7123_v16  ;;  %v6955_v57 = vrot.slane %v6953_v21, 4  ;;  %v6855_v14 = vsel %vm6823_vm3, 65537, %v19962_v22  ;;  %v21310_v21 = vld [vmem:[#allocation74_spill] sm:$0xff] }
 0x344   : > { %v3043_v3 = vsel %vm3010_vm13, 1, %v19962_v22  ;;  %v7088_v12 = vsel %vm7071_vm6, %v11746_v10, 0  ;;  %v6958_v11 = vrot.slane %v6956_v42, 5  ;;  %vm6822_vm12 = vmpackc.low %vm6790_vm14, %vm6790_vm14  ;;  %vm21302_vm10 = vcmp.ge.s32.totalorder %v21301_v36, 0 }
 0x345   : > { %3122 = vperm.xlu0 %11537, %v3043_v3   ;;  %v7130_v32 = vshrl.u32 %v7088_v12, 16  ;;  %v7133_v0 = vshll.u32 %v7088_v12, 16  ;;  %v6854_v63 = vsel %vm6822_vm12, 65537, %v19962_v22  ;;  %vm21304_vm0 = vnez %v21303_v25  ;;  %v21308_v12 = vld [vmem:[#allocation156_spill] sm:$0xff] }
 0x346   : > { %vm7546_vm4 = vmand %vm21304_vm0, %vm21302_vm10  ;;  %vm21305_vm2 = vsmask.f32 4352  ;;  %v6959_v16 = vor.u32 %v6958_v11, %v6955_v57  ;;  %v10238_v18 = vcombine.low %v6854_v63, %v6855_v14  ;;  %vm21306_vm6 = vcmp.lt.s32.totalorder %v21301_v36, 8  ;;  %v17268_v14 = vpop.permute.xlu1 %6780 }
 0x347   : > { %v7128_v10 = vsel %vm21305_vm2, %v7119_v61, %v7127_v52  ;;  %vm7578_vm7 = vmand %vm7546_vm4, %vm21306_vm6  ;;  %vm6793_vm14 = vcmp.eq.s32.totalorder %v16959_v2, 1  ;;  %vm21307_vm13 = vcmask 523264   ;;  %vm21309_vm3 = vcmp.ge.s32.totalorder %v21308_v12, 0 }
 0x348   : > { %11079 = vmatprep.mubr.msk.bf16.mxu1 %vm21307_vm13, %v7128_v10  ;;  %v7611_v31 = vsel %vm7578_vm7, 1, %v19962_v22  ;;  %vm21311_vm12 = vnez %v21310_v21  ;;  %vm6792_vm2 = vcmp.eq.s32.totalorder %v16971_v5, 1  ;;  %v7132_v42 = vrot.slane %v7130_v32, 3  ;;  %vm6825_vm7 = vmpackc.low %vm6793_vm14, %vm6793_vm14  ;;  %v21314_v21 = vld [vmem:[#allocation48_spill] sm:$0xff]  ;;  %v17283_v5 = vpop.permute.xlu0 %6777 }
 0x349   : > { %vm2948_vm10 = vmand %vm21311_vm12, %vm21309_vm3  ;;  %v7135_v3 = vrot.slane %v7133_v0, 4  ;;  %v6962_v61 = vshrl.u32 %v10238_v18, 16  ;;  %v6965_v57 = vshll.u32 %v10238_v18, 16  ;;  %7678 = vperm.xlu1 %11538, %v7611_v31   ;;  %vm21312_vm4 = vcmp.lt.s32.totalorder %v21308_v12, 8  ;;  %v11747_v0 = vld [vmem:[#allocation2 + $0x20] sm:$0xff]  ;;  %v21321_v12 = vld [vmem:[#allocation49_spill] sm:$0xff] }
 0x34a   : > { %vm3012_vm6 = vmand %vm2948_vm10, %vm21312_vm4  ;;  %vm21313_vm0 = vsmask.f32 3328  ;;  %v6857_v32 = vsel %vm6825_vm7, 65537, %v19962_v22  ;;  %vm21318_vm10 = vsmask.f32 4352  ;;  %vm21320_vm7 = vcmask 523264  }
 0x34b   : > { %v6960_v2 = vsel %vm21313_vm0, %v6950_v38, %v6959_v16  ;;  %v3045_v36 = vsel %vm3012_vm6, 1, %v19962_v22  ;;  %v7136_v11 = vor.u32 %v7135_v3, %v7132_v42  ;;  %v6964_v63 = vrot.slane %v6962_v61, 4  ;;  %vm6824_vm3 = vmpackc.low %vm6792_vm2, %vm6792_vm2  ;;  %v11592_v38 = vld [vmem:[%s19147_s4 + $0xe8] sm:$0xff]   ;;  %v21316_v42 = vld [vmem:[#allocation131_spill] sm:$0xff] }
 0x34c   : > { %vm7072_vm13 = vcmp.ne.s16.totalorder %v6960_v2, 0  ;;  %v6967_v10 = vrot.slane %v6965_v57, 5  ;;  %3128 = vperm.xlu0 %11537, %v3045_v36   ;;  %v6856_v31 = vsel %vm6824_vm3, 65537, %v19962_v22  ;;  %vm21315_vm0 = vcmp.ge.s32.totalorder %v21314_v21, 0 }
 0x34d   : > { %v7089_v18 = vsel %vm7072_vm13, %v11747_v0, 0  ;;  %vm21317_vm14 = vnez %v21316_v42  ;;  %v7137_v3 = vsel %vm21318_vm10, %v7127_v52, %v7136_v11  ;;  %v10239_v36 = vcombine.low %v6856_v31, %v6857_v32  ;;  %v21323_v42 = vld [vmem:[#allocation114_spill] sm:$0xff] }
 0x34e   : > { %vm7548_vm12 = vmand %vm21317_vm14, %vm21315_vm0  ;;  %v7139_v61 = vshrl.u32 %v7089_v18, 16  ;;  %v7142_v57 = vshll.u32 %v7089_v18, 16  ;;  %v6968_v2 = vor.u32 %v6967_v10, %v6964_v63  ;;  %vm21319_vm2 = vcmp.lt.s32.totalorder %v21314_v21, 8  ;;  %11080 = vmatmul.mubr.msk.bf16.vlgmr.msra.gmra.mrb[20].mxu1 %vm21320_vm7, %v7137_v3  ;;  %v11593_v31 = vld [vmem:[%s19147_s4 + $0xf0] sm:$0xff]   ;;  %v17306_v3 = vpop.permute.xlu1 %3062 }
 0x34f   : > { %vm7580_vm4 = vmand %vm7548_vm12, %vm21319_vm2  ;;  %vm6795_vm6 = vcmp.eq.s32.totalorder %v16987_v60, 1  ;;  %vm21322_vm13 = vcmp.ge.s32.totalorder %v21321_v12, 0  ;;  %vm21324_vm3 = vnez %v21323_v42  ;;  %vm6794_vm10 = vcmp.eq.s32.totalorder %v16999_v29, 1  ;;  %11112 = vmatpush3.bf16.msra.mxu1 %v17112_v47  ;;  %v21327_v60 = vld [vmem:[#allocation159_spill] sm:$0xff] }
 0x350   : > { %v7613_v0 = vsel %vm7580_vm4, 1, %v19962_v22  ;;  %vm7547_vm0 = vmand %vm21324_vm3, %vm21322_vm13  ;;  %v7141_v52 = vrot.slane %v7139_v61, 3  ;;  %v7144_v18 = vrot.slane %v7142_v57, 4  ;;  %v6971_v63 = vshrl.u32 %v10239_v36, 16  ;;  %11113 = vmatprep.subr.bf16.mxu1 %v11592_v38  ;;  %v11748_v57 = vld [vmem:[#allocation2 + $0x28] sm:$0xff]  ;;  %v21329_v42 = vld [vmem:[#allocation87_spill] sm:$0xff] }
 0x351   : > { %v6974_v10 = vshll.u32 %v10239_v36, 16  ;;  %7684 = vperm.xlu1 %11538, %v7613_v0   ;;  %vm21325_vm12 = vcmp.lt.s32.totalorder %v21321_v12, 8  ;;  %vm21326_vm7 = vsmask.f32 3328  ;;  %vm6827_vm4 = vmpackc.low %vm6795_vm6, %vm6795_vm6  ;;  %vm21330_vm6 = vnez %v21329_v42 }
 0x352   : > { %vm7579_vm2 = vmand %vm7547_vm0, %vm21325_vm12  ;;  %v6969_v32 = vsel %vm21326_vm7, %v6959_v16, %v6968_v2  ;;  %v7145_v47 = vor.u32 %v7144_v18, %v7141_v52  ;;  %v6973_v61 = vrot.slane %v6971_v63, 4  ;;  %v6859_v16 = vsel %vm6827_vm4, 65537, %v19962_v22 }
 0x353   : > { %v7612_v21 = vsel %vm7579_vm2, 1, %v19962_v22  ;;  %vm7073_vm13 = vcmp.ne.s16.totalorder %v6969_v32, 0  ;;  %v6976_v12 = vrot.slane %v6974_v10, 5  ;;  %vm6826_vm0 = vmpackc.low %vm6794_vm10, %vm6794_vm10  ;;  %vm21328_vm12 = vcmp.ge.s32.totalorder %v21327_v60, 0  ;;  %v17318_v10 = vpop.permute.xlu0 %3059  ;;  %11114 = vmatpush3.bf16.msra.mxu1 %v11592_v38  ;;  %v21332_v32 = vld [vmem:[#allocation128_spill] sm:$0xff] }
 0x354   : > { %7681 = vperm.xlu0 %11537, %v7612_v21   ;;  %v7090_v36 = vsel %vm7073_vm13, %v11748_v57, 0  ;;  %v6858_v0 = vsel %vm6826_vm0, 65537, %v19962_v22  ;;  %vm2949_vm2 = vmand %vm21330_vm6, %vm21328_vm12  ;;  %vm21331_vm7 = vsmask.f32 4352  ;;  %vm21333_vm10 = vcmp.lt.s32.totalorder %v21327_v60, 8  ;;  %11115 = vmatprep.subr.bf16.mxu1 %v11593_v31  ;;  %v21335_v57 = vld [vmem:[#allocation55_spill] sm:$0xff] }
 0x355   : > { %v7146_v52 = vsel %vm21331_vm7, %v7136_v11, %v7145_v47  ;;  %v7148_v18 = vshrl.u32 %v7090_v36, 16  ;;  %v7151_v63 = vshll.u32 %v7090_v36, 16  ;;  %v6977_v29 = vor.u32 %v6976_v12, %v6973_v61  ;;  %vm3013_vm13 = vmand %vm2949_vm2, %vm21333_vm10  ;;  %v11594_v11 = vld [vmem:[%s19147_s4 + $0xf8] sm:$0xff]   ;;  %v21337_v38 = vld [vmem:[#allocation116_spill] sm:$0xff] }
 0x356   : > { %v10240_v21 = vcombine.low %v6858_v0, %v6859_v16  ;;  %vm21334_vm3 = vcmask 523264   ;;  %v3046_v42 = vsel %vm3013_vm13, 1, %v19962_v22  ;;  %vm21336_vm12 = vcmp.ge.s32.totalorder %v21335_v57, 0 }
 0x357   : > { %11083 = vmatprep.mubr.msk.bf16.mxu1 %vm21334_vm3, %v7146_v52  ;;  %vm21338_vm6 = vnez %v21337_v38  ;;  %v7150_v61 = vrot.slane %v7148_v18, 3  ;;  %v7153_v12 = vrot.slane %v7151_v63, 4  ;;  %3131 = vperm.xlu1 %11538, %v3046_v42   ;;  %vm21339_vm3 = vcmp.lt.s32.totalorder %v21335_v57, 8  ;;  %v21341_v52 = vld [vmem:[#allocation89_spill] sm:$0xff]  ;;  %v17342_v18 = vpop.permute.xlu1 %3068 }
 0x358   : > { %vm7549_vm7 = vmand %vm21338_vm6, %vm21336_vm12  ;;  %v6980_v16 = vshrl.u32 %v10240_v21, 16  ;;  %v6983_v36 = vshll.u32 %v10240_v21, 16  ;;  %vm21340_vm10 = vsmask.f32 3328  ;;  %vm21342_vm13 = vcmp.eq.s32.totalorder %v17015_v50, 1  ;;  %11116 = vmatpush3.bf16.msra.mxu1 %v11593_v31  ;;  %v11749_v50 = vld [vmem:[#allocation2 + $0x30] sm:$0xff] }
 0x359   : > { %vm7581_vm2 = vmand %vm7549_vm7, %vm21339_vm3  ;;  %v6978_v0 = vsel %vm21340_vm10, %v6968_v2, %v6977_v29  ;;  %v7154_v38 = vor.u32 %v7153_v12, %v7150_v61  ;;  %vm21343_vm6 = vcmp.eq.s32.totalorder %v21332_v32, 1  ;;  %vm21346_vm7 = vcmp.eq.s32.totalorder %v17027_v41, 1  ;;  %11117 = vmatprep.subr.bf16.mxu1 %v11594_v11  ;;  %v21347_v32 = vld [vmem:[#allocation161_spill] sm:$0xff] }
 0x35a   : > { %v7614_v60 = vsel %vm7581_vm2, 1, %v19962_v22  ;;  %vm6829_vm12 = vmpackc.low %vm21342_vm13, %vm21342_vm13  ;;  %vm7074_vm4 = vcmp.ne.s16.totalorder %v6978_v0, 0  ;;  %v6982_v2 = vrot.slane %v6980_v16, 4  ;;  %v6985_v21 = vrot.slane %v6983_v36, 5  ;;  %v21349_v61 = vld [vmem:[#allocation93_spill] sm:$0xff]  ;;  %v17361_v36 = vpop.permute.xlu0 %3065 }
 0x35b   : > { %vm17347_vm14 = vmpackc.low %vm21343_vm6, %vm21343_vm6  ;;  %7687 = vperm.xlu0 %11537, %v7614_v60   ;;  %v6861_v42 = vsel %vm6829_vm12, 65537, %v19962_v22  ;;  %v7091_v57 = vsel %vm7074_vm4, %v11749_v50, 0  ;;  %vm21348_vm2 = vcmp.ge.s32.totalorder %v21347_v32, 0  ;;  %vm21350_vm6 = vnez %v21349_v61 }
 0x35c   : > { %vm6828_vm3 = vmpackc.low %vm21346_vm7, %vm21346_vm7  ;;  %vm21351_vm13 = vsmask.f32 4352  ;;  %v7157_v16 = vshrl.u32 %v7091_v57, 16  ;;  %v7160_v60 = vshll.u32 %v7091_v57, 16  ;;  %v6986_v0 = vor.u32 %v6985_v21, %v6982_v2  ;;  %v21357_v57 = vld [vmem:[#allocation158_spill] sm:$0xff]  ;;  %v21359_v2 = vld [vmem:[#allocation83_spill] sm:$0xff]  ;;  %11118 = vmatpush3.bf16.msra.mxu1 %v11594_v11 }
 0x35d   : > { %v6860_v31 = vsel %vm6828_vm3, 65537, %v19962_v22  ;;  %vm2951_vm10 = vmand %vm21350_vm6, %vm21348_vm2  ;;  %v7155_v12 = vsel %vm21351_vm13, %v7145_v47, %v7154_v38  ;;  %vm21352_vm12 = vcmp.lt.s32.totalorder %v21347_v32, 8  ;;  %vm6799_vm4 = vcmp.eq.s32.totalorder %v17046_v20, 1 }
 0x35e   : > { %v10241_v41 = vcombine.low %v6860_v31, %v6861_v42  ;;  %vm3015_vm7 = vmand %vm2951_vm10, %vm21352_vm12  ;;  %vm21353_vm0 = vcmask 523264   ;;  %vm21354_vm3 = vcmp.eq.s32.totalorder %v21341_v52, 1  ;;  %vm21358_vm2 = vcmp.ge.s32.totalorder %v21357_v57, 0 }
 0x35f   : > { %11084 = vmatmul.mubr.msk.bf16.gmra.mrb[24].mxu1 %vm21353_vm0, %v7155_v12  ;;  %vm17370_vm1 = vmpackc.low %vm21354_vm3, %vm21354_vm3  ;;  %v3048_v47 = vsel %vm3015_vm7, 1, %v19962_v22  ;;  %vm21360_vm6 = vnez %v21359_v2  ;;  %vm6798_vm10 = vcmp.eq.s32.totalorder %v17058_v28, 1  ;;  %v7159_v21 = vrot.slane %v7157_v16, 3  ;;  %v17384_v2 = vpop.permute.xlu1 %3074  ;;  %v11750_v16 = vld [vmem:[#allocation2 + $0x38] sm:$0xff] }
 0x360   : > { %vm2950_vm13 = vmand %vm21360_vm6, %vm21358_vm2  ;;  %v7162_v20 = vrot.slane %v7160_v60, 4  ;;  %v6989_v42 = vshrl.u32 %v10241_v41, 16  ;;  %v6992_v31 = vshll.u32 %v10241_v41, 16  ;;  %3137 = vperm.xlu1 %11538, %v3048_v47   ;;  %vm21361_vm0 = vcmp.lt.s32.totalorder %v21357_v57, 8  ;;  %v21363_v41 = vld [vmem:[#allocation52_spill] sm:$0xff]  ;;  %v21365_v47 = vld [vmem:[#allocation115_spill] sm:$0xff] }
 0x361   : > { %vm3014_vm12 = vmand %vm2950_vm13, %vm21361_vm0  ;;  %vm21362_vm3 = vsmask.f32 3328  ;;  %vm21364_vm6 = vcmp.ge.s32.totalorder %v21363_v41, 0  ;;  %vm21367_vm0 = vsmask.f32 4352  ;;  %v21372_v57 = vld [vmem:[#allocation91_spill] sm:$0xff] }
 0x362   : > { %v6987_v52 = vsel %vm21362_vm3, %v6977_v29, %v6986_v0  ;;  %v3047_v61 = vsel %vm3014_vm12, 1, %v19962_v22  ;;  %vm6831_vm7 = vmpackc.low %vm6799_vm4, %vm6799_vm4  ;;  %v7163_v12 = vor.u32 %v7162_v20, %v7159_v21  ;;  %v6991_v32 = vrot.slane %v6989_v42, 4 }
 0x363   : > { %vm7075_vm8 = vcmp.ne.s16.totalorder %v6987_v52, 0  ;;  %v6994_v25 = vrot.slane %v6992_v31, 5  ;;  %3134 = vperm.xlu0 %11537, %v3047_v61   ;;  %v6863_v11 = vsel %vm6831_vm7, 65537, %v19962_v22  ;;  %vm6830_vm2 = vmpackc.low %vm6798_vm10, %vm6798_vm10  ;;  %vm21366_vm4 = vnez %v21365_v47  ;;  %v17396_v31 = vpop.permute.xlu0 %3071 }
 0x364   : > { %v7092_v60 = vsel %vm7075_vm8, %v11750_v16, 0  ;;  %v6862_v29 = vsel %vm6830_vm2, 65537, %v19962_v22  ;;  %vm7550_vm13 = vmand %vm21366_vm4, %vm21364_vm6  ;;  %v7164_v21 = vsel %vm21367_vm0, %v7154_v38, %v7163_v12  ;;  %vm21368_vm12 = vcmp.lt.s32.totalorder %v21363_v41, 8  ;;  %v21370_v16 = vld [vmem:[#allocation160_spill] sm:$0xff]  ;;  %v17415_v41 = vpop.permute.xlu1 %3080 }
 0x365   : > { %v7166_v20 = vshrl.u32 %v7092_v60, 16  ;;  %v7169_v42 = vshll.u32 %v7092_v60, 16  ;;  %v6995_v52 = vor.u32 %v6994_v25, %v6991_v32  ;;  %v10242_v61 = vcombine.low %v6862_v29, %v6863_v11  ;;  %vm7582_vm10 = vmand %vm7550_vm13, %vm21368_vm12 }
 0x366   : > { %vm6801_vm8 = vcmp.eq.s32.totalorder %v17077_v34, 1  ;;  %vm21369_vm3 = vcmask 523264   ;;  %v7615_v28 = vsel %vm7582_vm10, 1, %v19962_v22  ;;  %vm21371_vm7 = vcmp.ge.s32.totalorder %v21370_v16, 0 }
 0x367   : > { %11087 = vmatprep.mubr.msk.bf16.mxu1 %vm21369_vm3, %v7164_v21  ;;  %vm21373_vm2 = vnez %v21372_v57  ;;  %vm6800_vm0 = vcmp.eq.s32.totalorder %v17091_v6, 1  ;;  %v7168_v38 = vrot.slane %v7166_v20, 3  ;;  %v7171_v60 = vrot.slane %v7169_v42, 4  ;;  %7690 = vperm.xlu1 %11538, %v7615_v28   ;;  %vm6833_vm10 = vmpackc.low %vm6801_vm8, %vm6801_vm8  ;;  %v21376_v28 = vld [vmem:[#allocation58_spill] sm:$0xff] }
 0x368   : > { %vm2952_vm6 = vmand %vm21373_vm2, %vm21371_vm7  ;;  %v6998_v25 = vshrl.u32 %v10242_v61, 16  ;;  %v7001_v32 = vshll.u32 %v10242_v61, 16  ;;  %vm21374_vm13 = vcmp.lt.s32.totalorder %v21370_v16, 8  ;;  %vm21375_vm4 = vsmask.f32 3328  ;;  %v21378_v16 = vld [vmem:[#allocation144_spill] sm:$0xff] }
 0x369   : > { %vm3016_vm12 = vmand %vm2952_vm6, %vm21374_vm13  ;;  %v6996_v34 = vsel %vm21375_vm4, %v6986_v0, %v6995_v52  ;;  %v3213_v11 = vsel %vm17347_vm14, 65537, %v19962_v22  ;;  %v7172_v57 = vor.u32 %v7171_v60, %v7168_v38  ;;  %v6865_v42 = vsel %vm6833_vm10, 65537, %v19962_v22  ;;  %v11751_v0 = vld [vmem:[#allocation2 + $0x40] sm:$0xff] }
 0x36a   : > { %v3049_v29 = vsel %vm3016_vm12, 1, %v19962_v22  ;;  %vm7076_vm3 = vcmp.ne.s16.totalorder %v6996_v34, 0  ;;  %v7000_v21 = vrot.slane %v6998_v25, 4  ;;  %v7003_v20 = vrot.slane %v7001_v32, 5  ;;  %vm6832_vm4 = vmpackc.low %vm6800_vm0, %vm6800_vm0  ;;  %v17427_v32 = vpop.permute.xlu0 %3077 }
 0x36b   : > { %3140 = vperm.xlu0 %11537, %v3049_v29   ;;  %v7093_v61 = vsel %vm7076_vm3, %v11751_v0, 0  ;;  %v6864_v63 = vsel %vm6832_vm4, 65537, %v19962_v22  ;;  %vm21377_vm14 = vcmp.ge.s32.totalorder %v21376_v28, 0  ;;  %vm21379_vm8 = vnez %v21378_v16 }
 0x36c   : > { %vm7552_vm7 = vmand %vm21379_vm8, %vm21377_vm14  ;;  %vm21380_vm2 = vsmask.f32 4352  ;;  %v7175_v60 = vshrl.u32 %v7093_v61, 16  ;;  %v7178_v25 = vshll.u32 %v7093_v61, 16  ;;  %v3212_v6 = vsel %vm17370_vm1, 65537, %v19962_v22  ;;  %v21385_v61 = vld [vmem:[#allocation117_spill] sm:$0xff] }
 0x36d   : > { %v7173_v38 = vsel %vm21380_vm2, %v7163_v12, %v7172_v57  ;;  %v7004_v34 = vor.u32 %v7003_v20, %v7000_v21  ;;  %v10243_v29 = vcombine.low %v6864_v63, %v6865_v42  ;;  %vm21381_vm6 = vcmp.lt.s32.totalorder %v21376_v28, 8  ;;  %v21383_v12 = vld [vmem:[#allocation61_spill] sm:$0xff] }
 0x36e   : > { %vm7584_vm0 = vmand %vm7552_vm7, %vm21381_vm6  ;;  %vm6803_vm13 = vcmp.eq.s32.totalorder %v17116_v23, 1  ;;  %vm21382_vm12 = vcmask 523264   ;;  %vm21384_vm10 = vcmp.ge.s32.totalorder %v21383_v12, 0  ;;  %vm21386_vm3 = vnez %v21385_v61 }
 0x36f   : > { %11088 = vmatmul.mubr.msk.bf16.gmra.mrb[28].mxu1 %vm21382_vm12, %v7173_v38  ;;  %v7617_v0 = vsel %vm7584_vm0, 1, %v19962_v22  ;;  %vm7551_vm4 = vmand %vm21386_vm3, %vm21384_vm10  ;;  %vm6802_vm14 = vcmp.eq.s32.totalorder %v17129_v53, 1  ;;  %v7177_v50 = vrot.slane %v7175_v60, 3  ;;  %v7180_v16 = vrot.slane %v7178_v25, 4  ;;  %v17448_v38 = vpop.permute.xlu1 %7630 }
 0x370   : > { %v7007_v21 = vshrl.u32 %v10243_v29, 16  ;;  %v7010_v20 = vshll.u32 %v10243_v29, 16  ;;  %7696 = vperm.xlu1 %11538, %v7617_v0   ;;  %vm21387_vm1 = vcmp.lt.s32.totalorder %v21383_v12, 8  ;;  %vm21388_vm2 = vsmask.f32 3328  ;;  %vm6835_vm6 = vmpackc.low %vm6803_vm13, %vm6803_vm13  ;;  %v11752_v29 = vld [vmem:[#allocation2 + $0x48] sm:$0xff] }
 0x371   : > { %vm7583_vm7 = vmand %vm7551_vm4, %vm21387_vm1  ;;  %v7005_v23 = vsel %vm21388_vm2, %v6995_v52, %v7004_v34  ;;  %v17445_v42 = vcombine.low %v3212_v6, %v3213_v11  ;;  %v7181_v28 = vor.u32 %v7180_v16, %v7177_v50  ;;  %v6867_v25 = vsel %vm6835_vm6, 65537, %v19962_v22  ;;  %v21389_v6 = vld [vmem:[#allocation109_spill] sm:$0xff]  ;;  %v21391_v0 = vld [vmem:[#allocation96_spill] sm:$0xff] }
 0x372   : > { %v7616_v63 = vsel %vm7583_vm7, 1, %v19962_v22  ;;  %vm7077_vm0 = vcmp.ne.s16.totalorder %v7005_v23, 0  ;;  %v7009_v61 = vrot.slane %v7007_v21, 4  ;;  %v7012_v60 = vrot.slane %v7010_v20, 5  ;;  %vm6834_vm12 = vmpackc.low %vm6802_vm14, %vm6802_vm14  ;;  %v17460_v21 = vpop.permute.xlu0 %7627 }
 0x373   : > { %7693 = vperm.xlu0 %11537, %v7616_v63   ;;  %v7094_v52 = vsel %vm7077_vm0, %v11752_v29, 0  ;;  %v6866_v11 = vsel %vm6834_vm12, 65537, %v19962_v22  ;;  %vm21390_vm10 = vcmp.ge.s32.totalorder %v21389_v6, 0  ;;  %vm21392_vm13 = vnez %v21391_v0  ;;  %v21396_v63 = vld [vmem:[#allocation67_spill] sm:$0xff]  ;;  %v21403_v29 = vld [vmem:[#allocation145_spill] sm:$0xff] }
 0x374   : > { %vm2953_vm4 = vmand %vm21392_vm13, %vm21390_vm10  ;;  %vm21393_vm1 = vsmask.f32 4352  ;;  %v7184_v12 = vshrl.u32 %v7094_v52, 16  ;;  %v7187_v50 = vshll.u32 %v7094_v52, 16  ;;  %v7013_v20 = vor.u32 %v7012_v60, %v7009_v61 }
 0x375   : > { %v7182_v16 = vsel %vm21393_vm1, %v7172_v57, %v7181_v28  ;;  %v10244_v23 = vcombine.low %v6866_v11, %v6867_v25  ;;  %vm21394_vm7 = vcmp.lt.s32.totalorder %v21389_v6, 8  ;;  %vm6805_vm2 = vcmp.eq.s32.totalorder %v17152_v4, 1  ;;  %v17478_v6 = vpop.permute.xlu1 %7636 }
 0x376   : > { %vm3017_vm14 = vmand %vm2953_vm4, %vm21394_vm7  ;;  %vm21395_vm6 = vcmask 523264   ;;  %vm21397_vm0 = vcmp.ge.s32.totalorder %v21396_v63, 0  ;;  %vm6804_vm10 = vcmp.eq.s32.totalorder %v17164_v48, 1  ;;  %v7186_v57 = vrot.slane %v7184_v12, 3 }
 0x377   : > { %11091 = vmatprep.mubr.msk.bf16.mxu1 %vm21395_vm6, %v7182_v16  ;;  %v3050_v53 = vsel %vm3017_vm14, 1, %v19962_v22  ;;  %vm7553_vm12 = vmand %vm16518_vm5, %vm21397_vm0  ;;  %v7189_v52 = vrot.slane %v7187_v50, 4  ;;  %v3293_v61 = vshrl.u32 %v17445_v42, 16  ;;  %v7016_v60 = vshrl.u32 %v10244_v23, 16 }
 0x378   : > { %v7019_v25 = vshll.u32 %v10244_v23, 16  ;;  %3143 = vperm.xlu1 %11538, %v3050_v53   ;;  %vm21399_vm13 = vcmp.lt.s32.totalorder %v21396_v63, 8  ;;  %vm21400_vm1 = vsmask.f32 3328  ;;  %v3296_v11 = vshll.u32 %v17445_v42, 16  ;;  %vm6837_vm7 = vmpackc.low %vm6805_vm2, %vm6805_vm2  ;;  %v11753_v53 = vld [vmem:[#allocation2 + $0x50] sm:$0xff] }
 0x379   : > { %vm7585_vm4 = vmand %vm7553_vm12, %vm21399_vm13  ;;  %v7014_v4 = vsel %vm21400_vm1, %v7004_v34, %v7013_v20  ;;  %v7190_v16 = vor.u32 %v7189_v52, %v7186_v57  ;;  %v7018_v12 = vrot.slane %v7016_v60, 4  ;;  %v6869_v23 = vsel %vm6837_vm7, 65537, %v19962_v22  ;;  %v21401_v63 = vld [vmem:[#allocation64_spill] sm:$0xff] }
 0x37a   : > { %v7618_v0 = vsel %vm7585_vm4, 1, %v19962_v22  ;;  %vm7078_vm14 = vcmp.ne.s16.totalorder %v7014_v4, 0  ;;  %v7021_v50 = vrot.slane %v7019_v25, 5  ;;  %vm6836_vm6 = vmpackc.low %vm6804_vm10, %vm6804_vm10  ;;  %vm21402_vm0 = vcmp.ge.s32.totalorder %v21401_v63, 0  ;;  %v17490_v25 = vpop.permute.xlu0 %7633 }
 0x37b   : > { %7699 = vperm.xlu0 %11537, %v7618_v0   ;;  %v7095_v34 = vsel %vm7078_vm14, %v11753_v53, 0  ;;  %v6868_v42 = vsel %vm6836_vm6, 65537, %v19962_v22  ;;  %vm21404_vm2 = vnez %v21403_v29  ;;  %vm21405_vm13 = vsmask.f32 4352  ;;  %v21408_v53 = vld [vmem:[#allocation162_spill] sm:$0xff]  ;;  %v21410_v29 = vld [vmem:[#allocation95_spill] sm:$0xff] }
 0x37c   : > { %vm7554_vm12 = vmand %vm21404_vm2, %vm21402_vm0  ;;  %v7191_v57 = vsel %vm21405_vm13, %v7181_v28, %v7190_v16  ;;  %v7193_v52 = vshrl.u32 %v7095_v34, 16  ;;  %v7196_v60 = vshll.u32 %v7095_v34, 16  ;;  %v7022_v4 = vor.u32 %v7021_v50, %v7018_v12 }
 0x37d   : > { %v10245_v0 = vcombine.low %v6868_v42, %v6869_v23  ;;  %vm21406_vm4 = vcmp.lt.s32.totalorder %v21401_v63, 8  ;;  %vm6807_vm1 = vcmp.eq.s32.totalorder %v17185_v7, 1  ;;  %vm21407_vm7 = vcmask 523264  }
 0x37e   : > { %vm7586_vm10 = vmand %vm7554_vm12, %vm21406_vm4  ;;  %11092 = vmatmul.mubr.msk.bf16.gmra.mrb[0].mxu1 %vm21407_vm7, %v7191_v57  ;;  %vm21409_vm14 = vcmp.ge.s32.totalorder %v21408_v53, 0  ;;  %vm21411_vm6 = vnez %v21410_v29  ;;  %vm6806_vm13 = vcmp.eq.s32.totalorder %v17198_v26, 1  ;;  %v7195_v28 = vrot.slane %v7193_v52, 3  ;;  %v17506_v29 = vpop.permute.xlu1 %3083 }
 0x37f   : > { %v7619_v48 = vsel %vm7586_vm10, 1, %v19962_v22  ;;  %vm2954_vm0 = vmand %vm21411_vm6, %vm21409_vm14  ;;  %v7198_v34 = vrot.slane %v7196_v60, 4  ;;  %v3295_v12 = vrot.slane %v3293_v61, 3  ;;  %v7025_v50 = vshrl.u32 %v10245_v0, 16  ;;  %v11754_v60 = vld [vmem:[#allocation2 + $0x58] sm:$0xff] }
 0x380   : > { %v7028_v23 = vshll.u32 %v10245_v0, 16  ;;  %7702 = vperm.xlu1 %11538, %v7619_v48   ;;  %vm21412_vm12 = vcmp.lt.s32.totalorder %v21408_v53, 8  ;;  %vm21413_vm5 = vsmask.f32 3328  ;;  %v3298_v42 = vrot.slane %v3296_v11, 4  ;;  %vm6839_vm10 = vmpackc.low %vm6807_vm1, %vm6807_vm1  ;;  %v21414_v11 = vld [vmem:[#allocation70_spill] sm:$0xff] }
 0x381   : > { %vm3018_vm4 = vmand %vm2954_vm0, %vm21412_vm12  ;;  %v7023_v7 = vsel %vm21413_vm5, %v7013_v20, %v7022_v4  ;;  %v7199_v57 = vor.u32 %v7198_v34, %v7195_v28  ;;  %v7027_v47 = vrot.slane %v7025_v50, 4  ;;  %v6871_v61 = vsel %vm6839_vm10, 65537, %v19962_v22  ;;  %v21416_v48 = vld [vmem:[#allocation152_spill] sm:$0xff]  ;;  %v21423_v53 = vld [vmem:[#allocation119_spill] sm:$0xff] }
 0x382   : > { %v3051_v63 = vsel %vm3018_vm4, 1, %v19962_v22  ;;  %vm7079_vm7 = vcmp.ne.s16.totalorder %v7023_v7, 0  ;;  %v7030_v52 = vrot.slane %v7028_v23, 5  ;;  %vm6838_vm14 = vmpackc.low %vm6806_vm13, %vm6806_vm13  ;;  %vm21415_vm5 = vcmp.ge.s32.totalorder %v21414_v11, 0  ;;  %v17518_v23 = vpop.permute.xlu0 %7639 }
 0x383   : > { %3146 = vperm.xlu0 %11537, %v3051_v63   ;;  %v7096_v0 = vsel %vm7079_vm7, %v11754_v60, 0  ;;  %v6870_v20 = vsel %vm6838_vm14, 65537, %v19962_v22  ;;  %vm21417_vm1 = vnez %v21416_v48  ;;  %vm21418_vm0 = vsmask.f32 4352  ;;  %v21421_v60 = vld [vmem:[#allocation76_spill] sm:$0xff] }
 0x384   : > { %vm7556_vm6 = vmand %vm21417_vm1, %vm21415_vm5  ;;  %v7200_v28 = vsel %vm21418_vm0, %v7190_v16, %v7199_v57  ;;  %v7202_v34 = vshrl.u32 %v7096_v0, 16  ;;  %v7205_v50 = vshll.u32 %v7096_v0, 16  ;;  %v7031_v7 = vor.u32 %v7030_v52, %v7027_v47 }
 0x385   : > { %v10246_v63 = vcombine.low %v6870_v20, %v6871_v61  ;;  %vm21419_vm12 = vcmp.lt.s32.totalorder %v21414_v11, 8  ;;  %vm6809_vm4 = vcmp.eq.s32.totalorder %v17214_v44, 1  ;;  %vm21420_vm10 = vcmask 523264  }
 0x386   : > { %vm7588_vm13 = vmand %vm7556_vm6, %vm21419_vm12  ;;  %11095 = vmatprep.mubr.msk.bf16.mxu1 %vm21420_vm10, %v7200_v28  ;;  %vm21422_vm7 = vcmp.ge.s32.totalorder %v21421_v60, 0  ;;  %vm21424_vm14 = vnez %v21423_v53  ;;  %vm6808_vm0 = vcmp.eq.s32.totalorder %v17225_v45, 1  ;;  %v7204_v16 = vrot.slane %v7202_v34, 3  ;;  %v17536_v28 = vpop.permute.xlu1 %3089 }
 0x387   : > { %v7621_v26 = vsel %vm7588_vm13, 1, %v19962_v22  ;;  %vm7555_vm5 = vmand %vm21424_vm14, %vm21422_vm7  ;;  %v7207_v0 = vrot.slane %v7205_v50, 4  ;;  %v17530_v47 = vor.u32 %v3298_v42, %v3295_v12  ;;  %v7034_v52 = vshrl.u32 %v10246_v63, 16  ;;  %v11755_v42 = vld [vmem:[#allocation2 + $0x60] sm:$0xff] }
 0x388   : > { %v7037_v61 = vshll.u32 %v10246_v63, 16  ;;  %7708 = vperm.xlu1 %11538, %v7621_v26   ;;  %vm21425_vm6 = vcmp.lt.s32.totalorder %v21421_v60, 8  ;;  %vm21426_vm10 = vsmask.f32 3328  ;;  %vm6841_vm13 = vmpackc.low %vm6809_vm4, %vm6809_vm4  ;;  %v21427_v63 = vld [vmem:[#allocation7_spill] sm:$0xff]  ;;  %v21429_v26 = vld [vmem:[#allocation134_spill] sm:$0xff] }
 0x389   : > { %vm7587_vm12 = vmand %vm7555_vm5, %vm21425_vm6  ;;  %v7032_v44 = vsel %vm21426_vm10, %v7022_v4, %v7031_v7  ;;  %v7208_v11 = vor.u32 %v7207_v0, %v7204_v16  ;;  %v7036_v53 = vrot.slane %v7034_v52, 4  ;;  %v6873_v12 = vsel %vm6841_vm13, 65537, %v19962_v22  ;;  %v17548_v52 = vpop.permute.xlu0 %3086 }
 0x38a   : > { %v7620_v20 = vsel %vm7587_vm12, 1, %v19962_v22  ;;  %vm7080_vm1 = vcmp.ne.s16.totalorder %v7032_v44, 0  ;;  %v7039_v34 = vrot.slane %v7037_v61, 5  ;;  %vm6840_vm7 = vmpackc.low %vm6808_vm0, %vm6808_vm0  ;;  %vm21428_vm5 = vcmp.ge.s32.totalorder %v21427_v63, 0 }
 0x38b   : > { %7705 = vperm.xlu0 %11537, %v7620_v20   ;;  %v7097_v50 = vsel %vm7080_vm1, %v11755_v42, 0  ;;  %v6872_v4 = vsel %vm6840_vm7, 65537, %v19962_v22  ;;  %vm21430_vm4 = vnez %v21429_v26  ;;  %vm21431_vm12 = vsmask.f32 4352  ;;  %v21434_v20 = vld [vmem:[#allocation82_spill] sm:$0xff] }
 0x38c   : > { %vm3991_vm6 = vmand %vm21430_vm4, %vm21428_vm5  ;;  %v7209_v60 = vsel %vm21431_vm12, %v7199_v57, %v7208_v11  ;;  %v7211_v16 = vshrl.u32 %v7097_v50, 16  ;;  %v7214_v0 = vshll.u32 %v7097_v50, 16  ;;  %v7040_v45 = vor.u32 %v7039_v34, %v7036_v53  ;;  %v21436_v57 = vld [vmem:[#allocation121_spill] sm:$0xff] }
 0x38d   : > { %v10247_v61 = vcombine.low %v6872_v4, %v6873_v12  ;;  %vm21432_vm0 = vcmp.lt.s32.totalorder %v21427_v63, 8  ;;  %vm6811_vm13 = vcmp.eq.s32.totalorder %v17240_v17, 1  ;;  %vm21433_vm7 = vcmask 523264   ;;  %v11756_v63 = vld [vmem:[#allocation2] sm:$0xf0] }
 0x38e   : > { %vm4023_vm1 = vmand %vm3991_vm6, %vm21432_vm0  ;;  %11096 = vmatmul.mubr.msk.bf16.gmra.mrb[4].mxu1 %vm21433_vm7, %v7209_v60  ;;  %vm21435_vm5 = vcmp.ge.s32.totalorder %v21434_v20, 0  ;;  %vm21437_vm4 = vnez %v21436_v57  ;;  %vm6810_vm14 = vcmp.eq.s32.totalorder %v17252_v24, 1  ;;  %v7213_v42 = vrot.slane %v7211_v16, 3  ;;  %v17569_v60 = vpop.permute.xlu1 %7642  ;;  %v21451_v57 = vld [vmem:[#allocation73_spill] sm:$0xff] }
 0x38f   : > { %v4057_v44 = vsel %vm4023_vm1, 1, %v19962_v22  ;;  %vm7557_vm12 = vmand %vm21437_vm4, %vm21435_vm5  ;;  %v7216_v50 = vrot.slane %v7214_v0, 4  ;;  %v7043_v53 = vshrl.u32 %v10247_v61, 16  ;;  %v7046_v34 = vshll.u32 %v10247_v61, 16 }
 0x390   : > { %4090 = vperm.xlu1 %11538, %v4057_v44   ;;  %vm21438_vm6 = vcmp.lt.s32.totalorder %v21434_v20, 8  ;;  %v7041_v17 = vsel %vm21426_vm10, %v7031_v7, %v7040_v45  ;;  %vm6843_vm1 = vmpackc.low %vm6811_vm13, %vm6811_vm13  ;;  %vm21439_vm5 = vcmp.ne.s16.totalorder %v17530_v47, 0  ;;  %v11757_v7 = vld [vmem:[#allocation2 + $0x68] sm:$0xff] }
 0x391   : > { %vm7589_vm0 = vmand %vm7557_vm12, %vm21438_vm6  ;;  %v7217_v4 = vor.u32 %v7216_v50, %v7213_v42  ;;  %vm7081_vm7 = vcmp.ne.s16.totalorder %v7041_v17, 0  ;;  %v17567_v26 = vsel %vm21439_vm5, %v11756_v63, 0  ;;  %v7045_v16 = vrot.slane %v7043_v53, 4  ;;  %v21440_v42 = vld [vmem:[#allocation107_spill] sm:$0xff]  ;;  %v17581_v17 = vpop.permute.xlu0 %3092 }
 0x392   : > { %v7622_v12 = vsel %vm7589_vm0, 1, %v19962_v22  ;;  %v7048_v0 = vrot.slane %v7046_v34, 5  ;;  %v6875_v61 = vsel %vm6843_vm1, 65537, %v19962_v22  ;;  %vm6842_vm10 = vmpackc.low %vm6810_vm14, %vm6810_vm14  ;;  %v7098_v44 = vsel %vm7081_vm7, %v11757_v7, 0  ;;  %v21445_v7 = vld [vmem:[#allocation10_spill] sm:$0xff] }
 0x393   : > { %7711 = vperm.xlu0 %11537, %v7622_v12   ;;  %v6874_v20 = vsel %vm6842_vm10, 65537, %v19962_v22  ;;  %vm21441_vm13 = vcmp.ge.s32.totalorder %v21440_v42, 0  ;;  %vm21442_vm6 = vsmask.f32 4352  ;;  %v7220_v53 = vshrl.u32 %v7098_v44, 16 }
 0x394   : > { %vm8225_vm12 = vmand %vm15969_vm11, %vm21441_vm13  ;;  %v7218_v50 = vsel %vm21442_vm6, %v7208_v11, %v7217_v4  ;;  %v7223_v34 = vshll.u32 %v7098_v44, 16  ;;  %v7049_v12 = vor.u32 %v7048_v0, %v7045_v16  ;;  %v10248_v63 = vcombine.low %v6874_v20, %v6875_v61 }
 0x395   : > { %vm21443_vm0 = vcmp.lt.s32.totalorder %v21440_v42, 8  ;;  %vm6813_vm1 = vcmp.eq.s32.totalorder %v17268_v14, 1  ;;  %vm21444_vm7 = vcmask 523264   ;;  %vm21446_vm5 = vcmp.ge.s32.totalorder %v21445_v7, 0 }
 0x396   : > { %vm8257_vm14 = vmand %vm8225_vm12, %vm21443_vm0  ;;  %11099 = vmatprep.mubr.msk.bf16.mxu1 %vm21444_vm7, %v7218_v50  ;;  %vm21448_vm11 = vnez %v21447_v15  ;;  %vm6812_vm13 = vcmp.eq.s32.totalorder %v17283_v5, 1  ;;  %v7222_v11 = vrot.slane %v7220_v53, 3  ;;  %v7225_v44 = vrot.slane %v7223_v34, 4  ;;  %v17599_v15 = vpop.permute.xlu1 %7648 }
 0x397   : > { %v8290_v24 = vsel %vm8257_vm14, 1, %v19962_v22  ;;  %vm3992_vm10 = vmand %vm21448_vm11, %vm21446_vm5  ;;  %v7052_v16 = vshrl.u32 %v10248_v63, 16  ;;  %v7055_v0 = vshll.u32 %v10248_v63, 16  ;;  %vm21449_vm12 = vcmp.lt.s32.totalorder %v21445_v7, 8 }
 0x398   : > { %8323 = vperm.xlu1 %11538, %v8290_v24   ;;  %vm4024_vm6 = vmand %vm3992_vm10, %vm21449_vm12  ;;  %vm21450_vm0 = vsmask.f32 3328  ;;  %v3479_v61 = vshrl.u32 %v17567_v26, 16  ;;  %v7226_v42 = vor.u32 %v7225_v44, %v7222_v11  ;;  %v3482_v50 = vshll.u32 %v17567_v26, 16 }
 0x399   : > { %v7050_v14 = vsel %vm21450_vm0, %v7040_v45, %v7049_v12  ;;  %v4058_v20 = vsel %vm4024_vm6, 1, %v19962_v22  ;;  %vm6845_vm14 = vmpackc.low %vm6813_vm1, %vm6813_vm1  ;;  %v7054_v53 = vrot.slane %v7052_v16, 4  ;;  %v7057_v34 = vrot.slane %v7055_v0, 5  ;;  %v11758_v45 = vld [vmem:[#allocation2 + $0x70] sm:$0xff]  ;;  %v17611_v16 = vpop.permute.xlu0 %7645 }
 0x39a   : > { %vm7082_vm7 = vcmp.ne.s16.totalorder %v7050_v14, 0  ;;  %4093 = vperm.xlu0 %11537, %v4058_v20   ;;  %v6877_v63 = vsel %vm6845_vm14, 65537, %v19962_v22  ;;  %vm6844_vm5 = vmpackc.low %vm6812_vm13, %vm6812_vm13  ;;  %vm21452_vm1 = vcmp.ge.s32.totalorder %v21451_v57, 0  ;;  %vm21453_vm10 = vsmask.f32 4352  ;;  %v21456_v20 = vld [vmem:[#allocation106_spill] sm:$0xff] }
 0x39b   : > { %v7099_v24 = vsel %vm7082_vm7, %v11758_v45, 0  ;;  %v6876_v7 = vsel %vm6844_vm5, 65537, %v19962_v22  ;;  %vm8227_vm11 = vmand %vm21132_vm9, %vm21452_vm1  ;;  %v7227_v26 = vsel %vm21453_vm10, %v7217_v4, %v7226_v42  ;;  %v7058_v0 = vor.u32 %v7057_v34, %v7054_v53 }
 0x39c   : > { %v7229_v11 = vshrl.u32 %v7099_v24, 16  ;;  %v7232_v44 = vshll.u32 %v7099_v24, 16  ;;  %v10249_v14 = vcombine.low %v6876_v7, %v6877_v63  ;;  %vm21454_vm12 = vcmp.lt.s32.totalorder %v21451_v57, 8  ;;  %v17631_v24 = vpop.permute.xlu1 %3095 }
 0x39d   : > { %vm8259_vm13 = vmand %vm8227_vm11, %vm21454_vm12  ;;  %vm3151_vm6 = vcmp.eq.s32.totalorder %v17306_v3, 1  ;;  %vm21455_vm0 = vcmask 523264   ;;  %vm21457_vm14 = vcmp.ge.s32.totalorder %v21456_v20, 0  ;;  %vm3150_vm7 = vcmp.eq.s32.totalorder %v17318_v10, 1  ;;  %v6653_v10 = vld [vmem:[#allocation2 + $0x88] sm:$0xf] }
 0x39e   : > { %11100 = vmatmul.mubr.msk.bf16.gmra.mrb[8].mxu1 %vm21455_vm0, %v7227_v26  ;;  %v8292_v5 = vsel %vm8259_vm13, 1, %v19962_v22  ;;  %vm8226_vm9 = vmand %vm15942_vm15, %vm21457_vm14  ;;  %v7231_v43 = vrot.slane %v7229_v11, 3  ;;  %v7234_v4 = vrot.slane %v7232_v44, 4  ;;  %v7061_v53 = vshrl.u32 %v10249_v14, 16 }
 0x39f   : > { %v7064_v34 = vshll.u32 %v10249_v14, 16  ;;  %8329 = vperm.xlu1 %11538, %v8292_v5   ;;  %vm21458_vm5 = vcmp.lt.s32.totalorder %v21456_v20, 8  ;;  %vm21459_vm11 = vsmask.f32 3328  ;;  %v17626_v57 = vrot.slane %v3479_v61, 4  ;;  %vm3183_vm10 = vmpackc.low %vm3151_vm6, %vm3151_vm6  ;;  %v21460_v14 = vld [vmem:[#allocation6_spill] sm:$0xff] }
 0x3a0   : > { %vm8258_vm1 = vmand %vm8226_vm9, %vm21458_vm5  ;;  %v7059_v3 = vsel %vm21459_vm11, %v7049_v12, %v7058_v0  ;;  %v7235_v45 = vor.u32 %v7234_v4, %v7231_v43  ;;  %v17629_v40 = vrot.slane %v3482_v50, 5  ;;  %v7063_v7 = vrot.slane %v7061_v53, 4  ;;  %v11759_v12 = vld [vmem:[#allocation2 + $0x78] sm:$0xff]  ;;  %v21462_v5 = vld [vmem:[#allocation136_spill] sm:$0xff]  ;;  %v17643_v4 = vpop.permute.xlu0 %7651 }
 0x3a1   : > { %v8291_v63 = vsel %vm8258_vm1, 1, %v19962_v22  ;;  %vm7083_vm12 = vcmp.ne.s16.totalorder %v7059_v3, 0  ;;  %v7066_v26 = vrot.slane %v7064_v34, 5  ;;  %v3215_v11 = vsel %vm3183_vm10, 65537, %v19962_v22  ;;  %vm3182_vm15 = vmpackc.low %vm3150_vm7, %vm3150_vm7 }
 0x3a2   : > { %8326 = vperm.xlu0 %11537, %v8291_v63   ;;  %v7100_v61 = vsel %vm7083_vm12, %v11759_v12, 0  ;;  %v3214_v44 = vsel %vm3182_vm15, 65537, %v19962_v22  ;;  %vm21461_vm13 = vcmp.ge.s32.totalorder %v21460_v14, 0  ;;  %vm21463_vm6 = vnez %v21462_v5  ;;  %v21467_v63 = vld [vmem:[#allocation122_spill] sm:$0xff] }
 0x3a3   : > { %vm3993_vm0 = vmand %vm21463_vm6, %vm21461_vm13  ;;  %vm21464_vm14 = vsmask.f32 4352  ;;  %v7238_v20 = vshrl.u32 %v7100_v61, 16  ;;  %v7241_v43 = vshll.u32 %v7100_v61, 16  ;;  %v7067_v53 = vor.u32 %v7066_v26, %v7063_v7 }
 0x3a4   : > { %v7236_v50 = vsel %vm21464_vm14, %v7226_v42, %v7235_v45  ;;  %v10059_v34 = vcombine.low %v3214_v44, %v3215_v11  ;;  %vm21465_vm9 = vcmp.lt.s32.totalorder %v21460_v14, 8  ;;  %vm3153_vm5 = vcmp.eq.s32.totalorder %v17342_v18, 1  ;;  %v17663_v14 = vpop.permute.xlu1 %3101 }
 0x3a5   : > { %vm4025_vm7 = vmand %vm3993_vm0, %vm21465_vm9  ;;  %vm3152_vm1 = vcmp.eq.s32.totalorder %v17361_v36, 1  ;;  %vm21466_vm11 = vcmask 523264   ;;  %vm21468_vm10 = vcmp.ge.s32.totalorder %v21467_v63, 0  ;;  %vm21469_vm12 = vnez %v20879_v51 }
 0x3a6   : > { %11103 = vmatprep.mubr.msk.bf16.mxu1 %vm21466_vm11, %v7236_v50  ;;  %v4059_v3 = vsel %vm4025_vm7, 1, %v19962_v22  ;;  %vm8228_vm15 = vmand %vm21469_vm12, %vm21468_vm10  ;;  %vm3155_vm13 = vcmp.eq.s32.totalorder %v17384_v2, 1  ;;  %v7240_v42 = vrot.slane %v7238_v20, 3  ;;  %v7243_v7 = vrot.slane %v7241_v43, 4 }
 0x3a7   : > { %vm7085_vm6 = vcmp.ne.s16.totalorder %v7067_v53, 0  ;;  %v3301_v26 = vshrl.u32 %v10059_v34, 16  ;;  %v3304_v11 = vshll.u32 %v10059_v34, 16  ;;  %4096 = vperm.xlu1 %11538, %v4059_v3   ;;  %vm21470_vm0 = vcmp.lt.s32.totalorder %v21467_v63, 8  ;;  %vm3185_vm7 = vmpackc.low %vm3153_vm5, %vm3153_vm5  ;;  %v17675_v63 = vpop.permute.xlu0 %3098 }
 0x3a8   : > { %vm8260_vm14 = vmand %vm8228_vm15, %vm21470_vm0  ;;  %vm21471_vm9 = vsmask.f32 3328  ;;  %v7244_v51 = vor.u32 %v7243_v7, %v7240_v42  ;;  %v7102_v44 = vsel %vm7085_vm6, %v6653_v10, 0  ;;  %v3217_v20 = vsel %vm3185_vm7, 65537, %v19962_v22 }
 0x3a9   : > { %v7068_v12 = vsel %vm21471_vm9, %v7058_v0, %v7067_v53  ;;  %v8293_v61 = vsel %vm8260_vm14, 1, %v19962_v22  ;;  %v3303_v5 = vrot.slane %v3301_v26, 3  ;;  %v3306_v50 = vrot.slane %v3304_v11, 4  ;;  %vm3184_vm10 = vmpackc.low %vm3152_vm1, %vm3152_vm1  ;;  %v11760_v0 = vld [vmem:[#allocation2 + $0x80] sm:$0xff]  ;;  %v21472_v53 = vld [vmem:[#allocation81_spill] sm:$0xff] }
 0x3aa   : > { %vm7084_vm11 = vcmp.ne.s16.totalorder %v7068_v12, 0  ;;  %8332 = vperm.xlu0 %11537, %v8293_v61   ;;  %v3216_v18 = vsel %vm3184_vm10, 65537, %v19962_v22  ;;  %vm21473_vm5 = vcmp.ge.s32.totalorder %v21472_v53, 0  ;;  %vm21474_vm12 = vnez %v20906_v49  ;;  %v21478_v12 = vld [vmem:[#allocation9_spill] sm:$0xff]  ;;  %v21480_v49 = vld [vmem:[#allocation135_spill] sm:$0xff] }
 0x3ab   : > { %v7101_v43 = vsel %vm7084_vm11, %v11760_v0, 0  ;;  %vm8229_vm15 = vmand %vm21474_vm12, %vm21473_vm5  ;;  %vm21475_vm6 = vsmask.f32 4352  ;;  %v3307_v42 = vor.u32 %v3306_v50, %v3303_v5  ;;  %v10060_v7 = vcombine.low %v3216_v18, %v3217_v20 }
 0x3ac   : > { %v7245_v34 = vsel %vm21475_vm6, %v7235_v45, %v7244_v51  ;;  %v7247_v10 = vshrl.u32 %v7101_v43, 16  ;;  %v7250_v3 = vshll.u32 %v7101_v43, 16  ;;  %vm21476_vm0 = vcmp.lt.s32.totalorder %v21472_v53, 8  ;;  %v17694_v53 = vpop.permute.xlu1 %7654 }
 0x3ad   : > { %vm8261_vm1 = vmand %vm8229_vm15, %vm21476_vm0  ;;  %vm21477_vm14 = vcmask 523264   ;;  %v7256_v36 = vshrl.u32 %v7102_v44, 16  ;;  %v7259_v26 = vshll.u32 %v7102_v44, 16  ;;  %vm21479_vm9 = vcmp.ge.s32.totalorder %v21478_v12, 0 }
 0x3ae   : > { %11104 = vmatmul.mubr.msk.bf16.gmra.mrb[12].mxu1 %vm21477_vm14, %v7245_v34  ;;  %v8294_v11 = vsel %vm8261_vm1, 1, %v19962_v22  ;;  %vm21481_vm7 = vnez %v21480_v49  ;;  %vm3154_vm10 = vcmp.eq.s32.totalorder %v17396_v31, 1  ;;  %v7249_v45 = vrot.slane %v7247_v10, 3  ;;  %vm21483_vm15 = vmmov %vm21475_vm6 }
 0x3af   : > { %vm3994_vm11 = vmand %vm21481_vm7, %vm21479_vm9  ;;  %v7252_v61 = vrot.slane %v7250_v3, 4  ;;  %v3310_v5 = vshrl.u32 %v10060_v7, 16  ;;  %v3313_v50 = vshll.u32 %v10060_v7, 16  ;;  %8335 = vperm.xlu1 %11538, %v8294_v11   ;;  %vm21482_vm5 = vcmp.lt.s32.totalorder %v21478_v12, 8  ;;  %v21486_v11 = vld [vmem:[#allocation138_spill] sm:$0xff] }
 0x3b0   : > { %vm4026_vm12 = vmand %vm3994_vm11, %vm21482_vm5  ;;  %v3308_v44 = vsel %vm21483_vm15, %v17530_v47, %v3307_v42  ;;  %v7258_v20 = vrot.slane %v7256_v36, 3  ;;  %v7261_v18 = vrot.slane %v7259_v26, 4  ;;  %v11761_v47 = vld [vmem:[#allocation2 + $0x8] sm:$0xff]  ;;  %vm21487_vm14 = vnez %v21486_v11 }
 0x3b1   : > { %v4060_v0 = vsel %vm4026_vm12, 1, %v19962_v22  ;;  %vm3187_vm6 = vmpackc.low %vm3155_vm13, %vm3155_vm13  ;;  %v7253_v43 = vor.u32 %v7252_v61, %v7249_v45  ;;  %vm3436_vm0 = vcmp.ne.s16.totalorder %v3308_v44, 0  ;;  %v3312_v34 = vrot.slane %v3310_v5, 3  ;;  %v21484_v36 = vld [vmem:[#allocation13_spill] sm:$0xff]  ;;  %v17706_v45 = vpop.permute.xlu0 %3104 }
 0x3b2   : > { %v3315_v10 = vrot.slane %v3313_v50, 4  ;;  %4099 = vperm.xlu0 %11537, %v4060_v0   ;;  %v3219_v3 = vsel %vm3187_vm6, 65537, %v19962_v22  ;;  %vm3186_vm1 = vmpackc.low %vm3154_vm10, %vm3154_vm10  ;;  %v3453_v7 = vsel %vm3436_vm0, %v11761_v47, 0  ;;  %vm21485_vm13 = vcmp.ge.s32.totalorder %v21484_v36, 0  ;;  %v21491_v44 = vld [vmem:[#allocation77_spill] sm:$0xff] }
 0x3b3   : > { %v3218_v2 = vsel %vm3186_vm1, 65537, %v19962_v22  ;;  %vm3995_vm9 = vmand %vm21487_vm14, %vm21485_vm13  ;;  %v3487_v12 = vshrl.u32 %v3453_v7, 16  ;;  %v3490_v49 = vshll.u32 %v3453_v7, 16  ;;  %vm21489_vm11 = vcmp.lt.s32.totalorder %v21484_v36, 8  ;;  %v11762_v7 = vld [vmem:[#allocation2 + $0x10] sm:$0xff] }
 0x3b4   : > { %vm21488_vm7 = vmmov %vm21483_vm15  ;;  %v3316_v61 = vor.u32 %v3315_v10, %v3312_v34  ;;  %v10061_v5 = vcombine.low %v3218_v2, %v3219_v3  ;;  %vm3157_vm5 = vcmp.eq.s32.totalorder %v17415_v41, 1  ;;  %vm21490_vm12 = vcmask 523264  }
 0x3b5   : > { %v7254_v26 = vsel %vm21488_vm7, %v7244_v51, %v7253_v43  ;;  %vm4027_vm10 = vmand %vm3995_vm9, %vm21489_vm11  ;;  %v7262_v31 = vor.u32 %v7261_v18, %v7258_v20  ;;  %vm21492_vm15 = vcmp.ge.s32.totalorder %v21491_v44, 0  ;;  %vm21493_vm6 = vnez %v20899_v1 }
 0x3b6   : > { %11107 = vmatprep.mubr.msk.bf16.mxu1 %vm21490_vm12, %v7254_v26  ;;  %v4061_v50 = vsel %vm4027_vm10, 1, %v19962_v22  ;;  %vm8230_vm0 = vmand %vm21493_vm6, %vm21492_vm15  ;;  %vm3156_vm1 = vcmp.eq.s32.totalorder %v17427_v32, 1  ;;  %v3489_v51 = vrot.slane %v3487_v12, 4  ;;  %v3492_v0 = vrot.slane %v3490_v49, 5  ;;  %v21498_v12 = vld [vmem:[#allocation120_spill] sm:$0xff] }
 0x3b7   : > { %vm21494_vm13 = vmmov %vm21488_vm7  ;;  %v3319_v10 = vshrl.u32 %v10061_v5, 16  ;;  %v3322_v3 = vshll.u32 %v10061_v5, 16  ;;  %4102 = vperm.xlu1 %11538, %v4061_v50   ;;  %vm21495_vm14 = vcmp.lt.s32.totalorder %v21491_v44, 8  ;;  %v7263_v20 = vsel %vm21488_vm7, %v7253_v43, %v7262_v31  ;;  %v17741_v5 = vpop.permute.xlu0 %7657  ;;  %v21503_v44 = vld [vmem:[#allocation12_spill] sm:$0xff] }
 0x3b8   : > { %v3317_v34 = vsel %vm21494_vm13, %v3307_v42, %v3316_v61  ;;  %vm8262_vm9 = vmand %vm8230_vm0, %vm21495_vm14  ;;  %v3485_v1 = vor.u32 %v17629_v40, %v17626_v57  ;;  %v3493_v47 = vor.u32 %v3492_v0, %v3489_v51  ;;  %11108 = vmatmul.mubr.msk.bf16.gmra.mrb[16].mxu1 %vm21490_vm12, %v7263_v20  ;;  %v17729_v42 = vpop.permute.xlu1 %7660  ;;  %v21496_v40 = vld [vmem:[#allocation78_spill] sm:$0xff]  ;;  %vm21499_vm6 = vnez %v21498_v12  ;;  %v21505_v51 = vld [vmem:[#allocation137_spill] sm:$0xff] }
 0x3b9   : > { %vm3437_vm11 = vcmp.ne.s16.totalorder %v3317_v34, 0  ;;  %v8295_v18 = vsel %vm8262_vm9, 1, %v19962_v22  ;;  %vm3189_vm10 = vmpackc.low %vm3157_vm5, %vm3157_vm5  ;;  %v3321_v36 = vrot.slane %v3319_v10, 3  ;;  %v3324_v11 = vrot.slane %v3322_v3, 4  ;;  %v17756_v10 = vld [vmem:[%s19147_s4 + $0x100] sm:$0xff]  }
 0x3ba   : > { %v3454_v2 = vsel %vm3437_vm11, %v11762_v7, 0  ;;  %8338 = vperm.xlu0 %11537, %v8295_v18   ;;  %v3221_v43 = vsel %vm3189_vm10, 65537, %v19962_v22  ;;  %vm3188_vm15 = vmpackc.low %vm3156_vm1, %vm3156_vm1  ;;  %vm21497_vm5 = vcmp.ge.s32.totalorder %v21496_v40, 0  ;;  %vm21500_vm13 = vsmask.f32 3328  ;;  %11151 = vmatprep.subr.bf16.mxu1 %v17756_v10 }
 0x3bb   : > { %v3496_v41 = vshrl.u32 %v3454_v2, 16  ;;  %v3499_v26 = vshll.u32 %v3454_v2, 16  ;;  %v3220_v57 = vsel %vm3188_vm15, 65537, %v19962_v22  ;;  %vm7558_vm0 = vmand %vm21499_vm6, %vm21497_vm5  ;;  %v3494_v49 = vsel %vm21500_vm13, %v3485_v1, %v3493_v47 }
 0x3bc   : > { %v3325_v31 = vor.u32 %v3324_v11, %v3321_v36  ;;  %v10062_v50 = vcombine.low %v3220_v57, %v3221_v43  ;;  %vm21501_vm14 = vcmp.lt.s32.totalorder %v21496_v40, 8  ;;  %vm7723_vm1 = vcmp.eq.s32.totalorder %v17448_v38, 1  ;;  %vm21502_vm7 = vmmov %vm21490_vm12  ;;  %v17766_v2 = vpop.permute.xlu1 %3107  ;;  %v21513_v57 = vld [vmem:[#allocation123_spill] sm:$0xff] }
 0x3bd   : > { %vm7590_vm9 = vmand %vm7558_vm0, %vm21501_vm14  ;;  %10919 = vmatprep.mubr.msk.bf16.mxu0 %vm21502_vm7, %v3494_v49  ;;  %vm21504_vm11 = vcmp.ge.s32.totalorder %v21503_v44, 0  ;;  %vm21506_vm10 = vnez %v21505_v51  ;;  %vm7722_vm15 = vcmp.eq.s32.totalorder %v17460_v21, 1  ;;  %v3498_v0 = vrot.slane %v3496_v41, 4 }
 0x3be   : > { %v7623_v32 = vsel %vm7590_vm9, 1, %v19962_v22  ;;  %vm3996_vm12 = vmand %vm21506_vm10, %vm21504_vm11  ;;  %v3501_v34 = vrot.slane %v3499_v26, 5  ;;  %v3328_v3 = vshrl.u32 %v10062_v50, 16  ;;  %v3331_v38 = vshll.u32 %v10062_v50, 16  ;;  %v21511_v26 = vld [vmem:[#allocation86_spill] sm:$0xff] }
 0x3bf   : > { %7714 = vperm.xlu1 %11538, %v7623_v32   ;;  %vm21507_vm5 = vcmp.lt.s32.totalorder %v21503_v44, 8  ;;  %vm21508_vm13 = vsmask.f32 4352  ;;  %vm17762_vm14 = vmpackc.low %vm7723_vm1, %vm7723_vm1  ;;  %vm21512_vm1 = vcmp.ge.s32.totalorder %v21511_v26, 0  ;;  %vm21514_vm11 = vnez %v21513_v57  ;;  %v17778_v32 = vpop.permute.xlu0 %7663 }
 0x3c0   : > { %vm4028_vm0 = vmand %vm3996_vm12, %vm21507_vm5  ;;  %v3326_v20 = vsel %vm21508_vm13, %v3316_v61, %v3325_v31  ;;  %v3502_v7 = vor.u32 %v3501_v34, %v3498_v0  ;;  %v3330_v36 = vrot.slane %v3328_v3, 3  ;;  %v3333_v11 = vrot.slane %v3331_v38, 4  ;;  %v11763_v61 = vld [vmem:[#allocation2 + $0x18] sm:$0xff]  ;;  %v21518_v0 = vld [vmem:[#allocation90_spill] sm:$0xff] }
 0x3c1   : > { %v4062_v18 = vsel %vm4028_vm0, 1, %v19962_v22  ;;  %vm3438_vm9 = vcmp.ne.s16.totalorder %v3326_v20, 0  ;;  %vm7754_vm7 = vmpackc.low %vm7722_vm15, %vm7722_vm15  ;;  %vm21515_vm12 = vsmask.f32 3328  ;;  %vm21516_vm15 = vcmp.lt.s32.totalorder %v21511_v26, 8  ;;  %v21520_v34 = vld [vmem:[#allocation124_spill] sm:$0xff] }
 0x3c2   : > { %4105 = vperm.xlu0 %11537, %v4062_v18   ;;  %v3455_v43 = vsel %vm3438_vm9, %v11763_v61, 0  ;;  %v7786_v41 = vsel %vm7754_vm7, 65537, %v19962_v22  ;;  %vm7560_vm10 = vmand %vm21514_vm11, %vm21512_vm1  ;;  %v3503_v40 = vsel %vm21515_vm12, %v3493_v47, %v3502_v7  ;;  %v17780_v44 = vor.u32 %v3333_v11, %v3330_v36  ;;  %v11764_v38 = vld [vmem:[%s19147_s4 + $0x60] sm:$0xff]   ;;  %v11765_v18 = vld [vmem:[%s19147_s4 + $0x68] sm:$0xff]   ;;  %v17810_v61 = vpop.permute.xlu1 %3113 }
 0x3c3   : > { %v3505_v49 = vshrl.u32 %v3455_v43, 16  ;;  %v3508_v50 = vshll.u32 %v3455_v43, 16  ;;  %v10278_v21 = vcombine.low %v7786_v41, %v7786_v41  ;;  %vm7592_vm5 = vmand %vm7560_vm10, %vm21516_vm15  ;;  %vm7725_vm0 = vcmp.eq.s32.totalorder %v17478_v6, 1  ;;  %v11766_v6 = vld [vmem:[#allocation2 + $0x20] sm:$0xff] }
 0x3c4   : > { %vm21517_vm13 = vcmask 523264   ;;  %v7625_v51 = vsel %vm7592_vm5, 1, %v19962_v22  ;;  %vm21519_vm9 = vcmp.ge.s32.totalorder %v21518_v0, 0  ;;  %vm21521_vm7 = vnez %v21520_v34 }
 0x3c5   : > { %10920 = vmatmul.mubr.msk.bf16.vlgmr.msra.gmra.mrb[32].mxu0 %vm21517_vm13, %v3503_v40  ;;  %vm7559_vm1 = vmand %vm21521_vm7, %vm21519_vm9  ;;  %vm7724_vm12 = vcmp.eq.s32.totalorder %v17490_v25, 1  ;;  %v3507_v47 = vrot.slane %v3505_v49, 4  ;;  %v3510_v3 = vrot.slane %v3508_v50, 5  ;;  %vm21522_vm10 = vsmask.f32 4352  ;;  %7720 = vperm.xlu1 %11538, %v7625_v51  }
 0x3c6   : > { %10952 = vmatpush3.bf16.msra.mxu0 %v11764_v38  ;;  %v3335_v20 = vsel %vm21522_vm10, %v3325_v31, %v17780_v44  ;;  %vm21523_vm15 = vcmp.lt.s32.totalorder %v21518_v0, 8  ;;  %vm17806_vm9 = vmpackc.low %vm7725_vm0, %vm7725_vm0  ;;  %v7787_v43 = vsel %vm17762_vm14, 65537, %v19962_v22  ;;  %vm21528_vm0 = vcmp.ge.s32.totalorder %v14793_v13, 0  ;;  %v7593_v51 = vld [vmem:[#allocation2 + $0x8] sm:$0xf0] }
 0x3c7   : > { %vm7591_vm5 = vmand %vm7559_vm1, %vm21523_vm15  ;;  %10953 = vmatprep.subr.bf16.mxu0 %v11765_v18  ;;  %vm3439_vm13 = vcmp.ne.s16.totalorder %v3335_v20, 0  ;;  %v3511_v31 = vor.u32 %v3510_v3, %v3507_v47  ;;  %vm17815_vm1 = vcmp.ne.s16.totalorder %v10278_v21, 0  ;;  %vm21529_vm15 = vnez %v20917_v19  ;;  %v17828_v21 = vpop.permute.xlu0 %3110  ;;  %v11767_v19 = vld [vmem:[%s19147_s4 + $0x70] sm:$0xff]  }
 0x3c8   : > { %v7624_v36 = vsel %vm7591_vm5, 1, %v19962_v22  ;;  %vm7756_vm10 = vmpackc.low %vm7724_vm12, %vm7724_vm12  ;;  %v3456_v26 = vsel %vm3439_vm13, %v11766_v6, 0  ;;  %vm21530_vm7 = vsmask.f32 3328  ;;  %vm21531_vm14 = vcmp.lt.s32.totalorder %v14793_v13, 8  ;;  %v11768_v3 = vld [vmem:[#allocation2 + $0x10] sm:$0xff] }
 0x3c9   : > { %7717 = vperm.xlu0 %11537, %v7624_v36   ;;  %v7788_v40 = vsel %vm7756_vm10, 65537, %v19962_v22  ;;  %vm8232_vm5 = vmand %vm21529_vm15, %vm21528_vm0  ;;  %v3512_v1 = vsel %vm21530_vm7, %v3502_v7, %v3511_v31  ;;  %v3514_v49 = vshrl.u32 %v3456_v26, 16  ;;  %v3517_v50 = vshll.u32 %v3456_v26, 16  ;;  %v17857_v36 = vpop.permute.xlu1 %7666  ;;  %v21538_v26 = vld [vmem:[#allocation15_spill] sm:$0xff] }
 0x3ca   : > { %10954 = vmatpush3.bf16.msra.mxu0 %v11765_v18  ;;  %v10279_v25 = vcombine.low %v7787_v43, %v7788_v40  ;;  %vm8264_vm12 = vmand %vm8232_vm5, %vm21531_vm14  ;;  %vm3158_vm13 = vcmp.eq.s32.totalorder %v17506_v29, 1  ;;  %vm7726_vm10 = vcmp.eq.s32.totalorder %v17518_v23, 1  ;;  %vm21532_vm11 = vcmask 523264   ;;  %v21540_v40 = vld [vmem:[#allocation139_spill] sm:$0xff] }
 0x3cb   : > { %10923 = vmatprep.mubr.msk.bf16.mxu0 %vm21532_vm11, %v3512_v1  ;;  %10955 = vmatprep.subr.bf16.mxu0 %v11767_v19  ;;  %v7884_v7 = vsel %vm17815_vm1, %v7593_v51, 0  ;;  %v8297_v0 = vsel %vm8264_vm12, 1, %v19962_v22  ;;  %vm21533_vm7 = vcmp.ge.s32.totalorder %v14812_v27, 0  ;;  %vm21534_vm0 = vnez %v20922_v37  ;;  %vm17851_vm1 = vmpackc.low %vm3158_vm13, %vm3158_vm13  ;;  %v17875_v1 = vpop.permute.xlu0 %3116  ;;  %v21546_v51 = vld [vmem:[#allocation17_spill] sm:$0xff] }
 0x3cc   : > { %vm8231_vm15 = vmand %vm21534_vm0, %vm21533_vm7  ;;  %v3516_v13 = vrot.slane %v3514_v49, 4  ;;  %v3519_v47 = vrot.slane %v3517_v50, 5  ;;  %vm7868_vm5 = vcmp.ne.s16.totalorder %v10279_v25, 0  ;;  %8344 = vperm.xlu1 %11538, %v8297_v0   ;;  %vm21535_vm11 = vcmp.lt.s32.totalorder %v14812_v27, 8  ;;  %v11769_v27 = vld [vmem:[%s19147_s4 + $0x78] sm:$0xff]   ;;  %v21548_v25 = vld [vmem:[#allocation140_spill] sm:$0xff] }
 0x3cd   : > { %vm8263_vm14 = vmand %vm8231_vm15, %vm21535_vm11  ;;  %v7885_v38 = vsel %vm7868_vm5, %v11768_v3, 0  ;;  %v7927_v43 = vrot.slane %v7884_v7, 4  ;;  %v7789_v29 = vsel %vm17806_vm9, 65537, %v19962_v22  ;;  %vm21539_vm13 = vcmp.ge.s32.totalorder %v21538_v26, 0  ;;  %v17896_v0 = vpop.permute.xlu1 %7672 }
 0x3ce   : > { %v8296_v20 = vsel %vm8263_vm14, 1, %v19962_v22  ;;  %v17855_v37 = vor.u32 %v3519_v47, %v3516_v13  ;;  %10956 = vmatpush3.bf16.msra.mxu0 %v11767_v19  ;;  %v7928_v41 = vrot.slane %v7885_v38, 4  ;;  %vm7758_vm12 = vmpackc.low %vm7726_vm10, %vm7726_vm10  ;;  %vm21541_vm7 = vnez %v21540_v40  ;;  %v11596_v38 = vld [vmem:[%s19147_s4 + $0x108] sm:$0xff]  }
 0x3cf   : > { %8341 = vperm.xlu0 %11537, %v8296_v20   ;;  %10957 = vmatprep.subr.bf16.mxu0 %v11769_v27  ;;  %v7790_v6 = vsel %vm7758_vm12, 65537, %v19962_v22  ;;  %vm3998_vm0 = vmand %vm21541_vm7, %vm21539_vm13  ;;  %vm21542_vm15 = vsmask.f32 3328  ;;  %vm21543_vm10 = vcmp.lt.s32.totalorder %v21538_v26, 8  ;;  %vm3160_vm11 = vcmp.eq.s32.totalorder %v17536_v28, 1  ;;  %v11770_v28 = vld [vmem:[#allocation2 + $0x18] sm:$0xff]  ;;  %v17908_v3 = vpop.permute.xlu0 %7669 }
 0x3d0   : > { %v3521_v23 = vsel %vm21542_vm15, %v3511_v31, %v17855_v37  ;;  %v10280_v49 = vcombine.low %v7789_v29, %v7790_v6  ;;  %vm4030_vm5 = vmand %vm3998_vm0, %vm21543_vm10  ;;  %vm21544_vm14 = vcmask 1043456   ;;  %vm21545_vm9 = vcmask 523264   ;;  %v21567_v40 = vld [vmem:[#allocation141_spill] sm:$0xff] }
 0x3d1   : > { %v7929_v11 = vsel %vm21544_vm14, %v7927_v43, %v7928_v41  ;;  %10924 = vmatmul.mubr.msk.bf16.gmra.mrb[36].mxu0 %vm21545_vm9, %v3521_v23  ;;  %v4064_v50 = vsel %vm4030_vm5, 1, %v19962_v22  ;;  %vm21547_vm12 = vcmp.ge.s32.totalorder %v21546_v51, 0  ;;  %vm21549_vm13 = vnez %v21548_v25  ;;  %vm21550_vm4 = vmmov %vm21545_vm9  ;;  %v21572_v25 = vld [vmem:[#allocation142_spill] sm:$0xff] }
 0x3d2   : > { %vm3997_vm7 = vmand %vm21549_vm13, %vm21547_vm12  ;;  %vm3159_vm15 = vcmp.eq.s32.totalorder %v17548_v52, 1  ;;  %11119 = vmatprep.mubr.msk.bf16.mxu1 %vm21550_vm4, %v7929_v11  ;;  %10958 = vmatpush3.bf16.msra.mxu0 %v11769_v27  ;;  %vm7869_vm6 = vcmp.ne.s16.totalorder %v10280_v49, 0  ;;  %vm21551_vm0 = vcmp.lt.s32.totalorder %v21546_v51, 8  ;;  %v3222_v52 = vsel %vm17851_vm1, 65537, %v19962_v22  ;;  %v21558_v27 = vld [vmem:[#allocation129_spill] sm:$0xff]  ;;  %v21570_v51 = vld [vmem:[#allocation23_spill] sm:$0xff] }
 0x3d3   : > { %4111 = vperm.xlu1 %11538, %v4064_v50   ;;  %vm4029_vm10 = vmand %vm3997_vm7, %vm21551_vm0  ;;  %v7886_v31 = vsel %vm7869_vm6, %v11770_v28, 0  ;;  %vm21554_vm6 = vcmp.ge.s32.totalorder %v14887_v55, 0  ;;  %vm21555_vm14 = vnez %v20928_v30  ;;  %vm21556_vm9 = vcmp.lt.s32.totalorder %v14887_v55, 8  ;;  %v17943_v23 = vpop.permute.xlu0 %7675 }
 0x3d4   : > { %v4063_v19 = vsel %vm4029_vm10, 1, %v19962_v22  ;;  %vm17892_vm5 = vmpackc.low %vm3160_vm11, %vm3160_vm11  ;;  %v17898_v13 = vrot.slane %v7886_v31, 4  ;;  %vm7727_vm13 = vcmp.eq.s32.totalorder %v17569_v60, 1  ;;  %vm21557_vm1 = vcmask 1043456  }
 0x3d5   : > { %4108 = vperm.xlu0 %11537, %v4063_v19   ;;  %vm3191_vm4 = vmpackc.low %vm3159_vm15, %vm3159_vm15  ;;  %vm21559_vm7 = vcmp.ge.s32.totalorder %v21558_v27, 0  ;;  %vm21560_vm15 = vnez %v20933_v54  ;;  %vm3161_vm10 = vcmp.eq.s32.totalorder %v17581_v17, 1  ;;  %v17933_v54 = vpop.permute.xlu1 %3119  ;;  %v3224_v6 = vsel %vm17892_vm5, 65537, %v19962_v22 }
 0x3d6   : > { %v3223_v47 = vsel %vm3191_vm4, 65537, %v19962_v22  ;;  %vm8234_vm11 = vmand %vm21555_vm14, %vm21554_vm6  ;;  %v7931_v18 = vsel %vm21557_vm1, %v7928_v41, %v17898_v13  ;;  %vm21561_vm4 = vcmask 523264   ;;  %vm21562_vm6 = vcmp.lt.s32.totalorder %v21558_v27, 8 }
 0x3d7   : > { %v10063_v20 = vcombine.low %v3222_v52, %v3223_v47  ;;  %vm8266_vm12 = vmand %vm8234_vm11, %vm21556_vm9  ;;  %11120 = vmatmul.mubr.msk.bf16.vlgmr.msra.gmra.mrb[20].mxu1 %vm21561_vm4, %v7931_v18  ;;  %vm21571_vm5 = vcmp.ge.s32.totalorder %v21570_v51, 0 }
 0x3d8   : > { %v8299_v43 = vsel %vm8266_vm12, 1, %v19962_v22  ;;  %vm8233_vm0 = vmand %vm21560_vm15, %vm21559_vm7  ;;  %11152 = vmatpush3.bf16.msra.mxu1 %v17756_v10  ;;  %v21565_v10 = vld [vmem:[#allocation21_spill] sm:$0xff] }
 0x3d9   : > { %v3337_v30 = vshrl.u32 %v10063_v20, 16  ;;  %v3340_v29 = vshll.u32 %v10063_v20, 16  ;;  %8350 = vperm.xlu1 %11538, %v8299_v43   ;;  %vm8265_vm14 = vmand %vm8233_vm0, %vm21562_vm6  ;;  %11153 = vmatprep.subr.bf16.mxu1 %v11596_v38  ;;  %vm21566_vm12 = vcmp.ge.s32.totalorder %v21565_v10, 0  ;;  %vm21569_vm7 = vcmp.lt.s32.totalorder %v21565_v10, 8  ;;  %v17963_v52 = vpop.permute.xlu1 %3125 }
 0x3da   : > { %v8298_v55 = vsel %vm8265_vm14, 1, %v19962_v22  ;;  %vm17929_vm11 = vmpackc.low %vm7727_vm13, %vm7727_vm13  ;;  %vm21568_vm13 = vnez %v21567_v40  ;;  %vm7729_vm0 = vcmp.eq.s32.totalorder %v17599_v15, 1  ;;  %vm7728_vm6 = vcmp.eq.s32.totalorder %v17611_v16, 1  ;;  %v11597_v16 = vld [vmem:[%s19147_s4 + $0x110] sm:$0xff]  }
 0x3db   : > { %v3339_v17 = vrot.slane %v3337_v30, 3  ;;  %v3342_v41 = vrot.slane %v3340_v29, 4  ;;  %8347 = vperm.xlu0 %11537, %v8298_v55   ;;  %vm3193_vm9 = vmpackc.low %vm3161_vm10, %vm3161_vm10  ;;  %vm21573_vm10 = vnez %v21572_v25  ;;  %vm21574_vm14 = vsmask.f32 4352  ;;  %v17976_v29 = vpop.permute.xlu0 %3122 }
 0x3dc   : > { %v3225_v26 = vsel %vm3193_vm9, 65537, %v19962_v22  ;;  %vm4000_vm1 = vmand %vm21568_vm13, %vm21566_vm12  ;;  %11154 = vmatpush3.bf16.msra.mxu1 %v11596_v38  ;;  %vm21575_vm9 = vcmp.lt.s32.totalorder %v21570_v51, 8  ;;  %v11771_v38 = vld [vmem:[#allocation2 + $0x28] sm:$0xff]  ;;  %v7791_v18 = vsel %vm17929_vm11, 65537, %v19962_v22  ;;  %vm3162_vm11 = vcmp.eq.s32.totalorder %v17631_v24, 1  ;;  %v11773_v51 = vld [vmem:[#allocation2 + $0x30] sm:$0xff] }
 0x3dd   : > { %v3343_v49 = vor.u32 %v3342_v41, %v3339_v17  ;;  %v10064_v11 = vcombine.low %v3224_v6, %v3225_v26  ;;  %vm4032_vm15 = vmand %vm4000_vm1, %vm21569_vm7  ;;  %11155 = vmatprep.subr.bf16.mxu1 %v11597_v16  ;;  %v21581_v41 = vld [vmem:[#allocation133_spill] sm:$0xff] }
 0x3de   : > { %v4066_v50 = vsel %vm4032_vm15, 1, %v19962_v22  ;;  %vm3999_vm4 = vmand %vm21573_vm10, %vm21571_vm5  ;;  %vm21578_vm15 = vcmp.ge.s32.totalorder %v14953_v33, 0  ;;  %vm21580_vm10 = vcmp.lt.s32.totalorder %v14953_v33, 8  ;;  %v11772_v33 = vld [vmem:[#allocation2 + $0x20] sm:$0xff] }
 0x3df   : > { %v3344_v28 = vsel %vm21574_vm14, %v17780_v44, %v3343_v49  ;;  %v3346_v31 = vshrl.u32 %v10064_v11, 16  ;;  %v3349_v19 = vshll.u32 %v10064_v11, 16  ;;  %4117 = vperm.xlu1 %11538, %v4066_v50   ;;  %vm4031_vm12 = vmand %vm3999_vm4, %vm21575_vm9  ;;  %vm21583_vm14 = vnez %v20944_v58  ;;  %v17998_v11 = vpop.permute.xlu1 %7678  ;;  %v18013_v7 = vpop.permute.xlu0 %3128 }
 0x3e0   : > { %vm3440_vm13 = vcmp.ne.s16.totalorder %v3344_v28, 0  ;;  %v4065_v15 = vsel %vm4031_vm12, 1, %v19962_v22  ;;  %vm17959_vm1 = vmpackc.low %vm7729_vm0, %vm7729_vm0  ;;  %vm21579_vm0 = vnez %v20939_v56  ;;  %11156 = vmatpush3.bf16.msra.mxu1 %v11597_v16  ;;  %vm7730_vm12 = vcmp.eq.s32.totalorder %v17643_v4, 1 }
 0x3e1   : > { %v3348_v44 = vrot.slane %v3346_v31, 3  ;;  %v3351_v47 = vrot.slane %v3349_v19, 4  ;;  %4114 = vperm.xlu0 %11537, %v4065_v15   ;;  %vm7760_vm7 = vmpackc.low %vm7728_vm6, %vm7728_vm6  ;;  %v3457_v20 = vsel %vm3440_vm13, %v11771_v38, 0  ;;  %vm21582_vm6 = vcmp.ge.s32.totalorder %v21581_v41, 0 }
 0x3e2   : > { %v7792_v43 = vsel %vm7760_vm7, 65537, %v19962_v22  ;;  %vm8236_vm5 = vmand %vm21579_vm0, %vm21578_vm15  ;;  %v3523_v27 = vshrl.u32 %v3457_v20, 16  ;;  %v3526_v30 = vshll.u32 %v3457_v20, 16  ;;  %vm21584_vm13 = vsmask.f32 4352 }
 0x3e3   : > { %v17978_v55 = vor.u32 %v3351_v47, %v3348_v44  ;;  %v10281_v17 = vcombine.low %v7791_v18, %v7792_v43  ;;  %vm8268_vm4 = vmand %vm8236_vm5, %vm21580_vm10  ;;  %vm21585_vm15 = vcmp.lt.s32.totalorder %v21581_v41, 8  ;;  %v18051_v43 = vpop.permute.xlu0 %7681 }
 0x3e4   : > { %v8301_v60 = vsel %vm8268_vm4, 1, %v19962_v22  ;;  %vm8235_vm9 = vmand %vm21583_vm14, %vm21582_vm6  ;;  %v3525_v56 = vrot.slane %v3523_v27, 4  ;;  %v3528_v6 = vrot.slane %v3526_v30, 5  ;;  %vm21589_vm6 = vnez %v21252_v62  ;;  %v11598_v27 = vld [vmem:[%s19147_s4 + $0x118] sm:$0xff]  }
 0x3e5   : > { %v3353_v26 = vsel %vm21584_vm13, %v3343_v49, %v17978_v55  ;;  %vm7870_vm7 = vcmp.ne.s16.totalorder %v10281_v17, 0  ;;  %8356 = vperm.xlu1 %11538, %v8301_v60   ;;  %vm8267_vm0 = vmand %vm8235_vm9, %vm21585_vm15  ;;  %v7793_v49 = vsel %vm17959_vm1, 65537, %v19962_v22  ;;  %vm21590_vm9 = vsmask.f32 3328  ;;  %v21607_v60 = vld [vmem:[#allocation112_spill] sm:$0xff]  ;;  %11157 = vmatprep.subr.bf16.mxu1 %v11598_v27 }
 0x3e6   : > { %vm3441_vm5 = vcmp.ne.s16.totalorder %v3353_v26, 0  ;;  %v7887_v24 = vsel %vm7870_vm7, %v11772_v33, 0  ;;  %v8300_v10 = vsel %vm8267_vm0, 1, %v19962_v22  ;;  %vm17994_vm10 = vmpackc.low %vm3162_vm11, %vm3162_vm11  ;;  %v3529_v40 = vor.u32 %v3528_v6, %v3525_v56  ;;  %11158 = vmatpush3.bf16.msra.mxu1 %v11598_v27 }
 0x3e7   : > { %v7932_v50 = vrot.slane %v7887_v24, 4  ;;  %8353 = vperm.xlu0 %11537, %v8300_v10   ;;  %vm7762_vm4 = vmpackc.low %vm7730_vm12, %vm7730_vm12  ;;  %v3458_v25 = vsel %vm3441_vm5, %v11773_v51, 0  ;;  %vm21588_vm11 = vcmp.ge.s32.totalorder %v14979_v46, 0  ;;  %vm21591_vm1 = vcmp.lt.s32.totalorder %v14979_v46, 8  ;;  %v21613_v24 = vld [vmem:[#allocation146_spill] sm:$0xff]  ;;  %v21615_v10 = vld [vmem:[#allocation143_spill] sm:$0xff]  ;;  %v18086_v58 = vpop.permute.xlu0 %7687 }
 0x3e8   : > { %v7794_v28 = vsel %vm7762_vm4, 65537, %v19962_v22  ;;  %vm8238_vm14 = vmand %vm21589_vm6, %vm21588_vm11  ;;  %v3530_v31 = vsel %vm21590_vm9, %v17855_v37, %v3529_v40  ;;  %v3532_v19 = vshrl.u32 %v3458_v25, 16  ;;  %v3535_v15 = vshll.u32 %v3458_v25, 16  ;;  %v21618_v51 = vld [vmem:[#allocation147_spill] sm:$0xff]  ;;  %v21620_v25 = vld [vmem:[#allocation113_spill] sm:$0xff] }
 0x3e9   : > { %v10282_v16 = vcombine.low %v7793_v49, %v7794_v28  ;;  %vm8270_vm12 = vmand %vm8238_vm14, %vm21591_vm1  ;;  %vm3164_vm13 = vcmp.eq.s32.totalorder %v17663_v14, 1  ;;  %vm21592_vm7 = vcmask 1043456   ;;  %vm21593_vm15 = vcmask 523264   ;;  %v11774_v14 = vld [vmem:[#allocation2 + $0x28] sm:$0xff] }
 0x3ea   : > { %v7933_v4 = vsel %vm21592_vm7, %v17898_v13, %v7932_v50  ;;  %10927 = vmatprep.mubr.msk.bf16.mxu0 %vm21593_vm15, %v3530_v31  ;;  %v8303_v62 = vsel %vm8270_vm12, 1, %v19962_v22  ;;  %vm21594_vm0 = vcmp.ge.s32.totalorder %v15019_v9, 0  ;;  %vm21595_vm5 = vnez %v20956_v39  ;;  %vm21596_vm6 = vmmov %vm21593_vm15 }
 0x3eb   : > { %vm8237_vm4 = vmand %vm21595_vm5, %vm21594_vm0  ;;  %vm3163_vm11 = vcmp.eq.s32.totalorder %v17675_v63, 1  ;;  %11123 = vmatprep.mubr.msk.bf16.mxu1 %vm21596_vm6, %v7933_v4  ;;  %v3534_v46 = vrot.slane %v3532_v19, 4  ;;  %v3537_v37 = vrot.slane %v3535_v15, 5  ;;  %vm7871_vm14 = vcmp.ne.s16.totalorder %v10282_v16, 0  ;;  %8362 = vperm.xlu1 %11538, %v8303_v62   ;;  %v18037_v63 = vpop.permute.xlu1 %7684  ;;  %v21647_v15 = vld [vmem:[#allocation153_spill] sm:$0xff] }
 0x3ec   : > { %vm21597_vm9 = vcmp.lt.s32.totalorder %v15019_v9, 8  ;;  %v7888_v13 = vsel %vm7871_vm14, %v11774_v14, 0  ;;  %vm18031_vm12 = vmpackc.low %vm3164_vm13, %vm3164_vm13  ;;  %v3226_v9 = vsel %vm17994_vm10, 65537, %v19962_v22  ;;  %vm21600_vm15 = vcmp.ge.s32.totalorder %v15024_v8, 0  ;;  %v21626_v14 = vld [vmem:[#allocation149_spill] sm:$0xff] }
 0x3ed   : > { %vm8269_vm1 = vmand %vm8237_vm4, %vm21597_vm9  ;;  %v18035_v39 = vor.u32 %v3537_v37, %v3534_v46  ;;  %v18039_v38 = vrot.slane %v7888_v13, 4  ;;  %vm21601_vm13 = vnez %v21267_v35  ;;  %vm21602_vm5 = vsmask.f32 3328  ;;  %v21628_v13 = vld [vmem:[#allocation131_spill] sm:$0xff] }
 0x3ee   : > { %v8302_v44 = vsel %vm8269_vm1, 1, %v19962_v22  ;;  %vm3195_vm7 = vmpackc.low %vm3163_vm11, %vm3163_vm11  ;;  %vm21603_vm4 = vcmp.lt.s32.totalorder %v15024_v8, 8  ;;  %vm7731_vm11 = vcmp.eq.s32.totalorder %v17694_v53, 1  ;;  %vm21604_vm6 = vcmask 1043456  }
 0x3ef   : > { %8359 = vperm.xlu0 %11537, %v8302_v44   ;;  %v3227_v20 = vsel %vm3195_vm7, 65537, %v19962_v22  ;;  %vm8240_vm0 = vmand %vm21601_vm13, %vm21600_vm15  ;;  %v3539_v18 = vsel %vm21602_vm5, %v3529_v40, %v18035_v39  ;;  %v7935_v17 = vsel %vm21604_vm6, %v7932_v50, %v18039_v38  ;;  %vm21605_vm14 = vcmask 523264   ;;  %v18076_v6 = vpop.permute.xlu1 %3131 }
 0x3f0   : > { %v10065_v30 = vcombine.low %v3226_v9, %v3227_v20  ;;  %vm8272_vm10 = vmand %vm8240_vm0, %vm21603_vm4  ;;  %10928 = vmatmul.mubr.msk.bf16.gmra.mrb[40].mxu0 %vm21605_vm14, %v3539_v18  ;;  %vm21606_vm9 = vcmp.ge.s32.totalorder %v15039_v59, 0  ;;  %vm21608_vm1 = vnez %v21607_v60  ;;  %vm3165_vm15 = vcmp.eq.s32.totalorder %v17706_v45, 1  ;;  %v18116_v9 = vpop.permute.xlu0 %3134 }
 0x3f1   : > { %v8305_v35 = vsel %vm8272_vm10, 1, %v19962_v22  ;;  %vm8239_vm7 = vmand %vm21608_vm1, %vm21606_vm9  ;;  %vm21610_vm0 = vcmp.lt.s32.totalorder %v15039_v59, 8  ;;  %v3228_v33 = vsel %vm18031_vm12, 65537, %v19962_v22  ;;  %vm21614_vm6 = vcmp.ge.s32.totalorder %v21613_v24, 0 }
 0x3f2   : > { %vm21609_vm13 = vmmov %vm21605_vm14  ;;  %v3355_v8 = vshrl.u32 %v10065_v30, 16  ;;  %v3358_v41 = vshll.u32 %v10065_v30, 16  ;;  %8368 = vperm.xlu1 %11538, %v8305_v35   ;;  %vm21616_vm14 = vnez %v21615_v10  ;;  %vm21617_vm9 = vcmp.lt.s32.totalorder %v21613_v24, 8  ;;  %v21631_v30 = vld [vmem:[#allocation150_spill] sm:$0xff]  ;;  %v11777_v24 = vld [vmem:[#allocation2 + $0x40] sm:$0xff] }
 0x3f3   : > { %11124 = vmatmul.mubr.msk.bf16.gmra.mrb[24].mxu1 %vm21609_vm13, %v7935_v17  ;;  %vm8271_vm5 = vmand %vm8239_vm7, %vm21610_vm0  ;;  %vm7733_vm7 = vcmp.eq.s32.totalorder %v17729_v42, 1  ;;  %vm21619_vm12 = vcmp.ge.s32.totalorder %v21618_v51, 0  ;;  %vm7732_vm0 = vcmp.eq.s32.totalorder %v17741_v5, 1  ;;  %v18106_v16 = vpop.permute.xlu1 %3137  ;;  %v21633_v17 = vld [vmem:[#allocation114_spill] sm:$0xff] }
 0x3f4   : > { %v8304_v53 = vsel %vm8271_vm5, 1, %v19962_v22  ;;  %vm18072_vm4 = vmpackc.low %vm7731_vm11, %vm7731_vm11  ;;  %v3357_v26 = vrot.slane %v3355_v8, 3  ;;  %v3360_v45 = vrot.slane %v3358_v41, 4  ;;  %vm21622_vm5 = vsmask.f32 4352 }
 0x3f5   : > { %8365 = vperm.xlu0 %11537, %v8304_v53   ;;  %vm3197_vm10 = vmpackc.low %vm3165_vm15, %vm3165_vm15  ;;  %vm21621_vm15 = vnez %v21620_v25  ;;  %v7795_v46 = vsel %vm18072_vm4, 65537, %v19962_v22  ;;  %vm21632_vm4 = vcmp.ge.s32.totalorder %v21631_v30, 0 }
 0x3f6   : > { %v3229_v59 = vsel %vm3197_vm10, 65537, %v19962_v22  ;;  %vm8242_vm11 = vmand %vm21616_vm14, %vm21614_vm6  ;;  %v3361_v40 = vor.u32 %v3360_v45, %v3357_v26  ;;  %vm21623_vm10 = vcmp.lt.s32.totalorder %v21618_v51, 8 }
 0x3f7   : > { %v10066_v49 = vcombine.low %v3228_v33, %v3229_v59  ;;  %vm8274_vm1 = vmand %vm8242_vm11, %vm21617_vm9  ;;  %v18138_v45 = vpop.permute.xlu1 %7690 }
 0x3f8   : > { %v8307_v50 = vsel %vm8274_vm1, 1, %v19962_v22  ;;  %vm8241_vm13 = vmand %vm21621_vm15, %vm21619_vm12  ;;  %v3362_v28 = vsel %vm21622_vm5, %v17978_v55, %v3361_v40  ;;  %v11775_v55 = vld [vmem:[#allocation2 + $0x38] sm:$0xff]  ;;  %vm21627_vm1 = vcmp.ge.s32.totalorder %v21626_v14, 0  ;;  %vm21630_vm15 = vcmp.lt.s32.totalorder %v21626_v14, 8 }
 0x3f9   : > { %v3364_v31 = vshrl.u32 %v10066_v49, 16  ;;  %v3367_v19 = vshll.u32 %v10066_v49, 16  ;;  %8374 = vperm.xlu1 %11538, %v8307_v50   ;;  %vm8273_vm6 = vmand %vm8241_vm13, %vm21623_vm10  ;;  %vm3442_vm14 = vcmp.ne.s16.totalorder %v3362_v28, 0  ;;  %vm21634_vm5 = vnez %v21633_v17  ;;  %v21639_v49 = vld [vmem:[#allocation151_spill] sm:$0xff] }
 0x3fa   : > { %v8306_v42 = vsel %vm8273_vm6, 1, %v19962_v22  ;;  %vm18102_vm11 = vmpackc.low %vm7733_vm7, %vm7733_vm7  ;;  %v3459_v62 = vsel %vm3442_vm14, %v11775_v55, 0  ;;  %vm21629_vm7 = vnez %v21628_v13  ;;  %vm7734_vm6 = vcmp.eq.s32.totalorder %v17778_v32, 1  ;;  %v21641_v50 = vld [vmem:[#allocation115_spill] sm:$0xff] }
 0x3fb   : > { %v3366_v4 = vrot.slane %v3364_v31, 3  ;;  %v3369_v5 = vrot.slane %v3367_v19, 4  ;;  %8371 = vperm.xlu0 %11537, %v8306_v42   ;;  %vm7764_vm9 = vmpackc.low %vm7732_vm0, %vm7732_vm0  ;;  %v3541_v44 = vshrl.u32 %v3459_v62, 16  ;;  %v3544_v47 = vshll.u32 %v3459_v62, 16  ;;  %v18153_v31 = vpop.permute.xlu0 %3140 }
 0x3fc   : > { %v7796_v37 = vsel %vm7764_vm9, 65537, %v19962_v22  ;;  %vm8244_vm12 = vmand %vm21629_vm7, %vm21627_vm1  ;;  %vm3166_vm0 = vcmp.eq.s32.totalorder %v17766_v2, 1  ;;  %vm21635_vm14 = vsmask.f32 4352  ;;  %vm21636_vm1 = vcmp.lt.s32.totalorder %v21631_v30, 8  ;;  %v11776_v2 = vld [vmem:[#allocation2 + $0x30] sm:$0xff] }
 0x3fd   : > { %v18118_v20 = vor.u32 %v3369_v5, %v3366_v4  ;;  %v10283_v18 = vcombine.low %v7795_v46, %v7796_v37  ;;  %vm8276_vm13 = vmand %vm8244_vm12, %vm21630_vm15  ;;  %v3543_v35 = vrot.slane %v3541_v44, 4  ;;  %v3546_v60 = vrot.slane %v3544_v47, 5  ;;  %v21655_v44 = vld [vmem:[#allocation154_spill] sm:$0xff] }
 0x3fe   : > { %v8309_v27 = vsel %vm8276_vm13, 1, %v19962_v22  ;;  %vm8243_vm10 = vmand %vm21634_vm5, %vm21632_vm4  ;;  %v7797_v33 = vsel %vm18102_vm11, 65537, %v19962_v22  ;;  %vm21642_vm4 = vnez %v21641_v50  ;;  %vm21644_vm11 = vcmp.lt.s32.totalorder %v21639_v49, 8 }
 0x3ff   : > { %v3371_v8 = vsel %vm21635_vm14, %v3361_v40, %v18118_v20  ;;  %vm7872_vm9 = vcmp.ne.s16.totalorder %v10283_v18, 0  ;;  %8380 = vperm.xlu1 %11538, %v8309_v27   ;;  %vm8275_vm7 = vmand %vm8243_vm10, %vm21636_vm1  ;;  %v3547_v26 = vor.u32 %v3546_v60, %v3543_v35  ;;  %vm21643_vm10 = vsmask.f32 3328  ;;  %v18191_v27 = vpop.permute.xlu0 %7693  ;;  %v21661_v60 = vld [vmem:[#allocation155_spill] sm:$0xff] }
 0x400   : > { %vm3443_vm12 = vcmp.ne.s16.totalorder %v3371_v8, 0  ;;  %v7889_v41 = vsel %vm7872_vm9, %v11776_v2, 0  ;;  %v8308_v53 = vsel %vm8275_vm7, 1, %v19962_v22  ;;  %vm18134_vm15 = vmpackc.low %vm3166_vm0, %vm3166_vm0  ;;  %vm21640_vm0 = vcmp.ge.s32.totalorder %v21639_v49, 0 }
 0x401   : > { %v7936_v59 = vrot.slane %v7889_v41, 4  ;;  %8377 = vperm.xlu0 %11537, %v8308_v53   ;;  %vm7766_vm13 = vmpackc.low %vm7734_vm6, %vm7734_vm6  ;;  %v3460_v10 = vsel %vm3443_vm12, %v11777_v24, 0  ;;  %v3548_v51 = vsel %vm21643_vm10, %v18035_v39, %v3547_v26  ;;  %vm3168_vm14 = vcmp.eq.s32.totalorder %v17810_v61, 1  ;;  %v21649_v39 = vld [vmem:[#allocation116_spill] sm:$0xff]  ;;  %v11778_v61 = vld [vmem:[#allocation2 + $0x38] sm:$0xff] }
 0x402   : > { %v7798_v40 = vsel %vm7766_vm13, 65537, %v19962_v22  ;;  %vm8246_vm5 = vmand %vm21642_vm4, %vm21640_vm0  ;;  %v3550_v25 = vshrl.u32 %v3460_v10, 16  ;;  %v3553_v28 = vshll.u32 %v3460_v10, 16  ;;  %vm21645_vm9 = vcmask 1043456   ;;  %v21668_v24 = vld [vmem:[#allocation156_spill] sm:$0xff] }
 0x403   : > { %v10284_v19 = vcombine.low %v7797_v33, %v7798_v40  ;;  %vm8278_vm6 = vmand %vm8246_vm5, %vm21644_vm11  ;;  %v7937_v32 = vsel %vm21645_vm9, %v18039_v38, %v7936_v59  ;;  %vm21646_vm1 = vcmask 523264   ;;  %vm21648_vm7 = vcmp.ge.s32.totalorder %v21647_v15, 0  ;;  %v18223_v40 = vpop.permute.xlu0 %7699  ;;  %v21691_v10 = vld [vmem:[#allocation160_spill] sm:$0xff] }
 0x404   : > { %10931 = vmatprep.mubr.msk.bf16.mxu0 %vm21646_vm1, %v3548_v51  ;;  %v8311_v42 = vsel %vm8278_vm6, 1, %v19962_v22  ;;  %vm21650_vm12 = vnez %v21649_v39  ;;  %vm3167_vm0 = vcmp.eq.s32.totalorder %v17828_v21, 1  ;;  %vm21651_vm4 = vmmov %vm21646_vm1  ;;  %v3552_v4 = vrot.slane %v3550_v25, 4  ;;  %v18177_v21 = vpop.permute.xlu1 %7696  ;;  %v21672_v25 = vld [vmem:[#allocation157_spill] sm:$0xff] }
 0x405   : > { %vm8245_vm13 = vmand %vm21650_vm12, %vm21648_vm7  ;;  %11127 = vmatprep.mubr.msk.bf16.mxu1 %vm21651_vm4, %v7937_v32  ;;  %v3555_v5 = vrot.slane %v3553_v28, 5  ;;  %vm7873_vm5 = vcmp.ne.s16.totalorder %v10284_v19, 0  ;;  %8386 = vperm.xlu1 %11538, %v8311_v42   ;;  %vm21652_vm10 = vcmp.lt.s32.totalorder %v21647_v15, 8  ;;  %v3230_v14 = vsel %vm18134_vm15, 65537, %v19962_v22  ;;  %v21674_v28 = vld [vmem:[#allocation118_spill] sm:$0xff] }
 0x406   : > { %vm8277_vm11 = vmand %vm8245_vm13, %vm21652_vm10  ;;  %v7890_v38 = vsel %vm7873_vm5, %v11778_v61, 0  ;;  %vm21656_vm1 = vcmp.ge.s32.totalorder %v21655_v44, 0  ;;  %vm21658_vm7 = vsmask.f32 3328  ;;  %vm21659_vm12 = vcmp.lt.s32.totalorder %v21655_v44, 8 }
 0x407   : > { %v8310_v55 = vsel %vm8277_vm11, 1, %v19962_v22  ;;  %vm18171_vm6 = vmpackc.low %vm3168_vm14, %vm3168_vm14  ;;  %v18175_v46 = vor.u32 %v3555_v5, %v3552_v4  ;;  %v18179_v37 = vrot.slane %v7890_v38, 4  ;;  %vm21660_vm15 = vcmask 1043456  }
 0x408   : > { %8383 = vperm.xlu0 %11537, %v8310_v55   ;;  %vm3199_vm9 = vmpackc.low %vm3167_vm0, %vm3167_vm0  ;;  %vm7735_vm0 = vcmp.eq.s32.totalorder %v17857_v36, 1  ;;  %vm3169_vm10 = vcmp.eq.s32.totalorder %v17875_v1, 1  ;;  %v18213_v56 = vpop.permute.xlu1 %3143  ;;  %v3232_v1 = vsel %vm18171_vm6, 65537, %v19962_v22  ;;  %vm21673_vm6 = vcmp.ge.s32.totalorder %v21672_v25, 0  ;;  %v21680_v55 = vld [vmem:[#allocation158_spill] sm:$0xff] }
 0x409   : > { %v3231_v13 = vsel %vm3199_vm9, 65537, %v19962_v22  ;;  %vm8248_vm14 = vmand %vm21379_vm8, %vm21656_vm1  ;;  %v3557_v18 = vsel %vm21658_vm7, %v3547_v26, %v18175_v46  ;;  %v7939_v17 = vsel %vm21660_vm15, %v7936_v59, %v18179_v37  ;;  %vm21662_vm8 = vcmp.ge.s32.totalorder %v21661_v60, 0 }
 0x40a   : > { %v10067_v30 = vcombine.low %v3230_v14, %v3231_v13  ;;  %vm8280_vm13 = vmand %vm8248_vm14, %vm21659_vm12  ;;  %10932 = vmatmul.mubr.msk.bf16.gmra.mrb[44].mxu0 %vm21651_vm4, %v3557_v18  ;;  %vm21665_vm9 = vcmp.lt.s32.totalorder %v21661_v60, 8  ;;  %vm21669_vm7 = vcmp.ge.s32.totalorder %v21668_v24, 0  ;;  %vm7737_vm15 = vcmp.eq.s32.totalorder %v17896_v0, 1  ;;  %v18253_v13 = vpop.permute.xlu0 %3146 }
 0x40b   : > { %v8313_v35 = vsel %vm8280_vm13, 1, %v19962_v22  ;;  %vm8247_vm5 = vmand %vm21386_vm3, %vm21662_vm8  ;;  %vm21671_vm13 = vcmp.lt.s32.totalorder %v21668_v24, 8 }
 0x40c   : > { %vm21664_vm11 = vmmov %vm21651_vm4  ;;  %v3373_v2 = vshrl.u32 %v10067_v30, 16  ;;  %v3376_v41 = vshll.u32 %v10067_v30, 16  ;;  %8392 = vperm.xlu1 %11538, %v8313_v35   ;;  %vm21675_vm4 = vnez %v21674_v28  ;;  %v18243_v39 = vpop.permute.xlu1 %7702  ;;  %v21684_v30 = vld [vmem:[#allocation159_spill] sm:$0xff] }
 0x40d   : > { %11128 = vmatmul.mubr.msk.bf16.gmra.mrb[28].mxu1 %vm21664_vm11, %v7939_v17  ;;  %vm8279_vm1 = vmand %vm8247_vm5, %vm21665_vm9  ;;  %vm7736_vm5 = vcmp.eq.s32.totalorder %v17908_v3, 1  ;;  %v21686_v17 = vld [vmem:[#allocation119_spill] sm:$0xff] }
 0x40e   : > { %v8312_v36 = vsel %vm8279_vm1, 1, %v19962_v22  ;;  %vm18209_vm14 = vmpackc.low %vm7735_vm0, %vm7735_vm0  ;;  %v3375_v26 = vrot.slane %v3373_v2, 3  ;;  %v3378_v33 = vrot.slane %v3376_v41, 4 }
 0x40f   : > { %8389 = vperm.xlu0 %11537, %v8312_v36   ;;  %vm3201_vm3 = vmpackc.low %vm3169_vm10, %vm3169_vm10  ;;  %vm21677_vm10 = vcmp.lt.s32.totalorder %v21672_v25, 8  ;;  %v7799_v61 = vsel %vm18209_vm14, 65537, %v19962_v22  ;;  %vm21685_vm14 = vcmp.ge.s32.totalorder %v21684_v30, 0  ;;  %v18290_v25 = vpop.permute.xlu0 %7705 }
 0x410   : > { %v3233_v59 = vsel %vm3201_vm3, 65537, %v19962_v22  ;;  %vm8250_vm12 = vmand %vm21404_vm2, %vm21669_vm7  ;;  %v3379_v49 = vor.u32 %v3378_v33, %v3375_v26  ;;  %vm21676_vm2 = vsmask.f32 4352  ;;  %vm21681_vm7 = vcmp.ge.s32.totalorder %v21680_v55, 0  ;;  %v18275_v53 = vpop.permute.xlu1 %7708 }
 0x411   : > { %v10068_v50 = vcombine.low %v3232_v1, %v3233_v59  ;;  %vm8282_vm0 = vmand %vm8250_vm12, %vm21671_vm13  ;;  %vm21682_vm12 = vnez %v21416_v48  ;;  %v11781_v1 = vld [vmem:[#allocation2 + $0x50] sm:$0xff] }
 0x412   : > { %v8315_v51 = vsel %vm8282_vm0, 1, %v19962_v22  ;;  %vm8249_vm8 = vmand %vm21675_vm4, %vm21673_vm6  ;;  %v3380_v19 = vsel %vm21676_vm2, %v18118_v20, %v3379_v49  ;;  %v11779_v20 = vld [vmem:[#allocation2 + $0x48] sm:$0xff]  ;;  %vm21683_vm0 = vcmp.lt.s32.totalorder %v21680_v55, 8  ;;  %vm3170_vm6 = vcmp.eq.s32.totalorder %v17933_v54, 1  ;;  %v11780_v54 = vld [vmem:[#allocation2 + $0x40] sm:$0xff] }
 0x413   : > { %v3382_v32 = vshrl.u32 %v10068_v50, 16  ;;  %v3385_v42 = vshll.u32 %v10068_v50, 16  ;;  %8398 = vperm.xlu1 %11538, %v8315_v51   ;;  %vm8281_vm11 = vmand %vm8249_vm8, %vm21677_vm10  ;;  %vm3444_vm9 = vcmp.ne.s16.totalorder %v3380_v19, 0  ;;  %vm21687_vm4 = vnez %v21686_v17  ;;  %v21698_v19 = vld [vmem:[#allocation161_spill] sm:$0xff]  ;;  %v18328_v55 = vpop.permute.xlu0 %7711 }
 0x414   : > { %v8314_v0 = vsel %vm8281_vm11, 1, %v19962_v22  ;;  %vm18239_vm1 = vmpackc.low %vm7737_vm15, %vm7737_vm15  ;;  %v3461_v5 = vsel %vm3444_vm9, %v11779_v20, 0  ;;  %vm21688_vm11 = vcmp.lt.s32.totalorder %v21684_v30, 8 }
 0x415   : > { %v3384_v4 = vrot.slane %v3382_v32, 3  ;;  %v3387_v3 = vrot.slane %v3385_v42, 4  ;;  %8395 = vperm.xlu0 %11537, %v8314_v0   ;;  %vm7768_vm3 = vmpackc.low %vm7736_vm5, %vm7736_vm5  ;;  %v3559_v62 = vshrl.u32 %v3461_v5, 16  ;;  %v3562_v14 = vshll.u32 %v3461_v5, 16 }
 0x416   : > { %v7800_v38 = vsel %vm7768_vm3, 65537, %v19962_v22  ;;  %vm8252_vm13 = vmand %vm21682_vm12, %vm21681_vm7  ;;  %vm7738_vm5 = vcmp.eq.s32.totalorder %v17943_v23, 1  ;;  %v7801_v26 = vsel %vm18239_vm1, 65537, %v19962_v22  ;;  %vm21695_vm1 = vcmp.lt.s32.totalorder %v21691_v10, 8 }
 0x417   : > { %v18255_v44 = vor.u32 %v3387_v3, %v3384_v4  ;;  %v10285_v47 = vcombine.low %v7799_v61, %v7800_v38  ;;  %vm8284_vm15 = vmand %vm8252_vm13, %vm21683_vm0  ;;  %v3561_v48 = vrot.slane %v3559_v62, 4  ;;  %v3564_v35 = vrot.slane %v3562_v14, 5  ;;  %v21706_v61 = vld [vmem:[#allocation162_spill] sm:$0xff] }
 0x418   : > { %v8317_v18 = vsel %vm8284_vm15, 1, %v19962_v22  ;;  %vm8251_vm8 = vmand %vm21687_vm4, %vm21685_vm14  ;;  %vm21692_vm13 = vcmp.ge.s32.totalorder %v21691_v10, 0  ;;  %vm21693_vm0 = vnez %v21498_v12  ;;  %vm3172_vm4 = vcmp.eq.s32.totalorder %v17963_v52, 1  ;;  %v11782_v52 = vld [vmem:[#allocation2 + $0x48] sm:$0xff] }
 0x419   : > { %v3389_v60 = vsel %vm21676_vm2, %v3379_v49, %v18255_v44  ;;  %vm7874_vm10 = vcmp.ne.s16.totalorder %v10285_v47, 0  ;;  %8404 = vperm.xlu1 %11538, %v8317_v18   ;;  %vm8283_vm9 = vmand %vm8251_vm8, %vm21688_vm11  ;;  %v3565_v36 = vor.u32 %v3564_v35, %v3561_v48  ;;  %vm21696_vm8 = vcmask 1043456  }
 0x41a   : > { %vm3445_vm3 = vcmp.ne.s16.totalorder %v3389_v60, 0  ;;  %v7891_v8 = vsel %vm7874_vm10, %v11780_v54, 0  ;;  %v8316_v2 = vsel %vm8283_vm9, 1, %v19962_v22  ;;  %vm18271_vm7 = vmpackc.low %vm3170_vm6, %vm3170_vm6  ;;  %vm21694_vm6 = vsmask.f32 3328  ;;  %v18367_v54 = vpop.permute.xlu0 %4093 }
 0x41b   : > { %v7940_v33 = vrot.slane %v7891_v8, 4  ;;  %8401 = vperm.xlu0 %11537, %v8316_v2   ;;  %vm7770_vm12 = vmpackc.low %vm7738_vm5, %vm7738_vm5  ;;  %v3462_v59 = vsel %vm3445_vm3, %v11781_v1, 0  ;;  %v3566_v49 = vsel %vm21694_vm6, %v18175_v46, %v3565_v36  ;;  %vm21697_vm5 = vcmask 523264   ;;  %v21700_v46 = vld [vmem:[#allocation121_spill] sm:$0xff] }
 0x41c   : > { %v7802_v24 = vsel %vm7770_vm12, 65537, %v19962_v22  ;;  %vm8254_vm15 = vmand %vm21693_vm0, %vm21692_vm13  ;;  %v3568_v50 = vshrl.u32 %v3462_v59, 16  ;;  %v3571_v51 = vshll.u32 %v3462_v59, 16  ;;  %10935 = vmatprep.mubr.msk.bf16.mxu0 %vm21697_vm5, %v3566_v49  ;;  %vm21699_vm2 = vcmp.ge.s32.totalorder %v21698_v19, 0 }
 0x41d   : > { %v10286_v28 = vcombine.low %v7801_v26, %v7802_v24  ;;  %vm8286_vm14 = vmand %vm8254_vm15, %vm21695_vm1  ;;  %v7941_v23 = vsel %vm21696_vm8, %v18179_v37, %v7940_v33  ;;  %vm21701_vm10 = vnez %v21700_v46  ;;  %vm3171_vm9 = vcmp.eq.s32.totalorder %v17976_v29, 1  ;;  %v18314_v29 = vpop.permute.xlu1 %4090 }
 0x41e   : > { %v8319_v12 = vsel %vm8286_vm14, 1, %v19962_v22  ;;  %vm8253_vm11 = vmand %vm21701_vm10, %vm21699_vm2  ;;  %v3570_v32 = vrot.slane %v3568_v50, 4  ;;  %v3573_v42 = vrot.slane %v3571_v51, 5  ;;  %vm21703_vm13 = vcmp.lt.s32.totalorder %v21698_v19, 8 }
 0x41f   : > { %vm21702_vm3 = vmmov %vm21697_vm5  ;;  %vm7875_vm12 = vcmp.ne.s16.totalorder %v10286_v28, 0  ;;  %8410 = vperm.xlu1 %11538, %v8319_v12   ;;  %v3234_v20 = vsel %vm18271_vm7, 65537, %v19962_v22  ;;  %vm21707_vm1 = vcmp.ge.s32.totalorder %v21706_v61, 0  ;;  %vm21708_vm14 = vnez %v21513_v57  ;;  %v21713_v57 = vld [vmem:[#allocation109_spill] sm:$0xff]  ;;  %v11784_v12 = vld [vmem:[#allocation2 + $0x58] sm:$0xff] }
 0x420   : > { %11131 = vmatprep.mubr.msk.bf16.mxu1 %vm21702_vm3, %v7941_v23  ;;  %vm8285_vm0 = vmand %vm8253_vm11, %vm21703_vm13  ;;  %v7892_v37 = vsel %vm7875_vm12, %v11782_v52, 0  ;;  %v18312_v4 = vor.u32 %v3573_v42, %v3570_v32  ;;  %vm21709_vm8 = vsmask.f32 3328  ;;  %vm21710_vm5 = vcmp.lt.s32.totalorder %v21706_v61, 8  ;;  %v11785_v52 = vld [vmem:[#allocation2 + $0x58] sm:$0xff] }
 0x421   : > { %v8318_v0 = vsel %vm8285_vm0, 1, %v19962_v22  ;;  %vm18308_vm15 = vmpackc.low %vm3172_vm4, %vm3172_vm4  ;;  %v18316_v3 = vrot.slane %v7892_v37, 4  ;;  %vm7739_vm10 = vcmp.eq.s32.totalorder %v17998_v11, 1  ;;  %vm21711_vm7 = vcmask 1043456   ;;  %v18417_v46 = vpop.permute.xlu0 %8326 }
 0x422   : > { %8407 = vperm.xlu0 %11537, %v8318_v0   ;;  %vm3203_vm6 = vmpackc.low %vm3171_vm9, %vm3171_vm9  ;;  %v3575_v38 = vsel %vm21709_vm8, %v3565_v36, %v18312_v4  ;;  %vm21714_vm9 = vcmp.ge.s32.totalorder %v21713_v57, 0  ;;  %vm3173_vm13 = vcmp.eq.s32.totalorder %v18013_v7, 1  ;;  %vm7740_vm8 = vcmp.eq.s32.totalorder %v18051_v43, 1 }
 0x423   : > { %v3235_v5 = vsel %vm3203_vm6, 65537, %v19962_v22  ;;  %vm8256_vm4 = vmand %vm21708_vm14, %vm21707_vm1  ;;  %v7943_v14 = vsel %vm21711_vm7, %v7940_v33, %v18316_v3  ;;  %vm21717_vm6 = vcmp.lt.s32.totalorder %v21713_v57, 8  ;;  %vm7741_vm14 = vcmp.eq.s32.totalorder %v18037_v63, 1 }
 0x424   : > { %v10069_v62 = vcombine.low %v3234_v20, %v3235_v5  ;;  %vm8288_vm2 = vmand %vm8256_vm4, %vm21710_vm5  ;;  %vm3174_vm5 = vcmp.eq.s32.totalorder %v18076_v6, 1  ;;  %vm7742_vm7 = vcmp.eq.s32.totalorder %v18086_v58, 1  ;;  %v3236_v63 = vsel %vm18308_vm15, 65537, %v19962_v22 }
 0x425   : > { %vm21712_vm11 = vmmov %vm21702_vm3  ;;  %v8321_v47 = vsel %vm8288_vm2, 1, %v19962_v22  ;;  %vm21715_vm3 = vnez %v21520_v34  ;;  %v18353_v34 = vpop.permute.xlu1 %8323  ;;  %vm3177_vm15 = vcmp.eq.s32.totalorder %v18153_v31, 1 }
 0x426   : > { %10936 = vmatmul.mubr.msk.bf16.gmra.mrb[48].mxu0 %vm21712_vm11, %v3575_v38  ;;  %vm8255_vm12 = vmand %vm21715_vm3, %vm21714_vm9  ;;  %v3391_v18 = vshrl.u32 %v10069_v62, 16  ;;  %v3394_v30 = vshll.u32 %v10069_v62, 16  ;;  %8416 = vperm.xlu1 %11538, %v8321_v47   ;;  %vm3175_vm9 = vcmp.eq.s32.totalorder %v18116_v9, 1  ;;  %vm7743_vm3 = vcmp.eq.s32.totalorder %v18138_v45, 1 }
 0x427   : > { %vm21716_vm0 = vmmov %vm21712_vm11  ;;  %vm3176_vm11 = vcmp.eq.s32.totalorder %v18106_v16, 1  ;;  %v11783_v16 = vld [vmem:[#allocation2 + $0x50] sm:$0xff] }
 0x428   : > { %11132 = vmatmul.mubr.msk.bf16.gmra.mrb[0].mxu1 %vm21716_vm0, %v7943_v14  ;;  %vm8287_vm1 = vmand %vm8255_vm12, %vm21717_vm6  ;;  %v3393_v7 = vrot.slane %v3391_v18, 3  ;;  %v3396_v48 = vrot.slane %v3394_v30, 4  ;;  %vm7744_vm6 = vcmp.eq.s32.totalorder %v18191_v27, 1 }
 0x429   : > { %v8320_v11 = vsel %vm8287_vm1, 1, %v19962_v22  ;;  %vm18347_vm4 = vmpackc.low %vm7739_vm10, %vm7739_vm10  ;;  %vm3178_vm1 = vcmp.eq.s32.totalorder %v18213_v56, 1  ;;  %v18405_v58 = vpop.permute.xlu1 %8329  ;;  %v18466_v60 = vpop.permute.xlu0 %8332 }
 0x42a   : > { %8413 = vperm.xlu0 %11537, %v8320_v11   ;;  %vm3205_vm2 = vmpackc.low %vm3173_vm13, %vm3173_vm13  ;;  %v3397_v8 = vor.u32 %v3396_v48, %v3393_v7  ;;  %vm7745_vm13 = vcmp.eq.s32.totalorder %v18177_v21, 1  ;;  %v7803_v41 = vsel %vm18347_vm4, 65537, %v19962_v22  ;;  %v11791_v21 = vld [vmem:[#allocation2 + $0x70] sm:$0xff] }
 0x42b   : > { %v3237_v35 = vsel %vm3205_vm2, 65537, %v19962_v22  ;;  %vm18361_vm10 = vmpackc.low %vm7741_vm14, %vm7741_vm14  ;;  %vm21724_vm14 = vsmask.f32 4352 }
 0x42c   : > { %v10070_v2 = vcombine.low %v3236_v63, %v3237_v35  ;;  %vm7772_vm12 = vmpackc.low %vm7740_vm8, %vm7740_vm8  ;;  %v3398_v43 = vsel %vm21724_vm14, %v18255_v44, %v3397_v8  ;;  %vm7746_vm8 = vcmp.eq.s32.totalorder %v18223_v40, 1  ;;  %v7805_v6 = vsel %vm18361_vm10, 65537, %v19962_v22 }
 0x42d   : > { %v7804_v36 = vsel %vm7772_vm12, 65537, %v19962_v22  ;;  %vm18381_vm0 = vmpackc.low %vm3174_vm5, %vm3174_vm5  ;;  %vm3446_vm5 = vcmp.ne.s16.totalorder %v3398_v43, 0  ;;  %vm3179_vm12 = vcmp.eq.s32.totalorder %v18253_v13, 1  ;;  %vm7747_vm14 = vcmp.eq.s32.totalorder %v18243_v39, 1  ;;  %v18447_v18 = vpop.permute.xlu1 %4096 }
 0x42e   : > { %v3400_v33 = vshrl.u32 %v10070_v2, 16  ;;  %v3403_v1 = vshll.u32 %v10070_v2, 16  ;;  %v10287_v59 = vcombine.low %v7803_v41, %v7804_v36  ;;  %vm7774_vm4 = vmpackc.low %vm7742_vm7, %vm7742_vm7  ;;  %v3238_v28 = vsel %vm18381_vm0, 65537, %v19962_v22  ;;  %v11786_v36 = vld [vmem:[#allocation2 + $0x60] sm:$0xff] }
 0x42f   : > { %v7806_v24 = vsel %vm7774_vm4, 65537, %v19962_v22  ;;  %vm18400_vm2 = vmpackc.low %vm3176_vm11, %vm3176_vm11  ;;  %v3463_v19 = vsel %vm3446_vm5, %v11784_v12, 0  ;;  %vm7748_vm11 = vcmp.eq.s32.totalorder %v18290_v25, 1  ;;  %vm7749_vm5 = vcmp.eq.s32.totalorder %v18275_v53, 1 }
 0x430   : > { %v3402_v10 = vrot.slane %v3400_v33, 3  ;;  %v3405_v49 = vrot.slane %v3403_v1, 4  ;;  %vm7876_vm7 = vcmp.ne.s16.totalorder %v10287_v59, 0  ;;  %v10288_v50 = vcombine.low %v7805_v6, %v7806_v24  ;;  %vm3207_vm10 = vmpackc.low %vm3175_vm9, %vm3175_vm9 }
 0x431   : > { %v7893_v51 = vsel %vm7876_vm7, %v11783_v16, 0  ;;  %v3239_v23 = vsel %vm3207_vm10, 65537, %v19962_v22  ;;  %vm3209_vm4 = vmpackc.low %vm3177_vm15, %vm3177_vm15  ;;  %v3240_v0 = vsel %vm18400_vm2, 65537, %v19962_v22  ;;  %v3577_v5 = vshrl.u32 %v3463_v19, 16  ;;  %v18504_v13 = vpop.permute.xlu1 %8335  ;;  %v18528_v25 = vpop.permute.xlu0 %4099 }
 0x432   : > { %v3406_v9 = vor.u32 %v3405_v49, %v3402_v10  ;;  %v7944_v32 = vrot.slane %v7893_v51, 4  ;;  %vm7877_vm9 = vcmp.ne.s16.totalorder %v10288_v50, 0  ;;  %v10071_v42 = vcombine.low %v3238_v28, %v3239_v23  ;;  %vm18428_vm0 = vmpackc.low %vm7743_vm3, %vm7743_vm3  ;;  %v18498_v49 = vld [vmem:[#allocation2 + $0x60] sm:$0xff] }
 0x433   : > { %v7894_v37 = vsel %vm7877_vm9, %v11785_v52, 0  ;;  %v3241_v20 = vsel %vm3209_vm4, 65537, %v19962_v22  ;;  %vm21729_vm7 = vsmask.f32 4352  ;;  %vm18440_vm15 = vmpackc.low %vm7744_vm6, %vm7744_vm6  ;;  %vm7750_vm3 = vcmp.eq.s32.totalorder %v18328_v55, 1 }
 0x434   : > { %v3407_v31 = vsel %vm21729_vm7, %v3397_v8, %v3406_v9  ;;  %v18435_v61 = vrot.slane %v7894_v37, 4  ;;  %v3409_v38 = vshrl.u32 %v10071_v42, 16  ;;  %v3412_v62 = vshll.u32 %v10071_v42, 16  ;;  %vm18459_vm7 = vmpackc.low %vm7745_vm13, %vm7745_vm13 }
 0x435   : > { %vm3447_vm2 = vcmp.ne.s16.totalorder %v3407_v31, 0  ;;  %vm21732_vm10 = vcmask 1043456   ;;  %v10072_v47 = vcombine.low %v3240_v0, %v3241_v20  ;;  %v3579_v57 = vrot.slane %v3577_v5, 4  ;;  %v11788_v5 = vld [vmem:[#allocation2 + $0x68] sm:$0xff] }
 0x436   : > { %v7945_v14 = vsel %vm21732_vm10, %v18316_v3, %v7944_v32  ;;  %v3411_v30 = vrot.slane %v3409_v38, 3  ;;  %v3414_v11 = vrot.slane %v3412_v62, 4  ;;  %vm21733_vm9 = vcmask 523264   ;;  %vm21734_vm6 = vmmov %vm21732_vm10 }
 0x437   : > { %11135 = vmatprep.mubr.msk.bf16.mxu1 %vm21733_vm9, %v7945_v14  ;;  %v3580_v27 = vshll.u32 %v3463_v19, 16  ;;  %v7947_v17 = vsel %vm21734_vm6, %v7944_v32, %v18435_v61  ;;  %v7807_v7 = vsel %vm18428_vm0, 65537, %v19962_v22  ;;  %v3418_v48 = vshrl.u32 %v10072_v47, 16  ;;  %vm21735_vm4 = vmmov %vm21733_vm9 }
 0x438   : > { %v3421_v63 = vshll.u32 %v10072_v47, 16  ;;  %11136 = vmatmul.mubr.msk.bf16.gmra.mrb[4].mxu1 %vm21735_vm4, %v7947_v17  ;;  %v7808_v35 = vsel %vm18440_vm15, 65537, %v19962_v22  ;;  %v3415_v8 = vor.u32 %v3414_v11, %v3411_v30  ;;  %v3464_v26 = vsel %vm3447_vm2, %v11786_v36, 0  ;;  %vm18472_vm0 = vmpackc.low %vm3178_vm1, %vm3178_vm1  ;;  %v18553_v11 = vpop.permute.xlu1 %4102 }
 0x439   : > { %v3582_v2 = vrot.slane %v3580_v27, 5  ;;  %v10289_v41 = vcombine.low %v7807_v7, %v7808_v35  ;;  %vm4185_vm13 = vcmp.eq.s32.totalorder %v18314_v29, 1  ;;  %v3420_v43 = vrot.slane %v3418_v48, 3  ;;  %vm18480_vm15 = vmpackc.low %vm7746_vm8, %vm7746_vm8 }
 0x43a   : > { %v3423_v33 = vrot.slane %v3421_v63, 4  ;;  %v3586_v1 = vshrl.u32 %v3464_v26, 16  ;;  %v3589_v59 = vshll.u32 %v3464_v26, 16  ;;  %vm21742_vm2 = vsmask.f32 4352  ;;  %vm18491_vm10 = vmpackc.low %vm3179_vm12, %vm3179_vm12 }
 0x43b   : > { %v3416_v56 = vsel %vm21742_vm2, %v3406_v9, %v3415_v8  ;;  %v3583_v24 = vor.u32 %v3582_v2, %v3579_v57  ;;  %v7809_v44 = vsel %vm18459_vm7, 65537, %v19962_v22  ;;  %vm7878_vm1 = vcmp.ne.s16.totalorder %v10289_v41, 0  ;;  %vm7779_vm6 = vmpackc.low %vm7747_vm14, %vm7747_vm14  ;;  %v18569_v41 = vld [vmem:[#allocation2 + $0x70] sm:$0xff] }
 0x43c   : > { %vm4186_vm8 = vcmp.eq.s32.totalorder %v18367_v54, 1  ;;  %vm3448_vm9 = vcmp.ne.s16.totalorder %v3416_v56, 0  ;;  %v18496_v40 = vor.u32 %v3423_v33, %v3420_v43  ;;  %v7895_v50 = vsel %vm7878_vm1, %v18498_v49, 0  ;;  %vm18514_vm4 = vmpackc.low %vm7748_vm11, %vm7748_vm11  ;;  %v3019_v56 = vld [vmem:[#allocation2 + $0x80] sm:$0x1f]  ;;  %v18587_v54 = vld [vmem:[#allocation2 + $0x78] sm:$0xff] }
 0x43d   : > { %v3588_v16 = vrot.slane %v3586_v1, 4  ;;  %vm21745_vm12 = vsmask.f32 3328  ;;  %v7948_v28 = vrot.slane %v7895_v50, 4  ;;  %v3591_v23 = vrot.slane %v3589_v59, 5  ;;  %vm21748_vm14 = vmmov %vm21742_vm2 }
 0x43e   : > { %v3584_v51 = vsel %vm21745_vm12, %v18312_v4, %v3583_v24  ;;  %v7810_v12 = vsel %vm18480_vm15, 65537, %v19962_v22  ;;  %v3425_v39 = vsel %vm21748_vm14, %v3415_v8, %v18496_v40  ;;  %vm21749_vm7 = vcmask 523264   ;;  %v18567_v8 = vpop.permute.xlu0 %8338 }
 0x43f   : > { %10939 = vmatprep.mubr.msk.bf16.mxu0 %vm21749_vm7, %v3584_v51  ;;  %v3242_v4 = vsel %vm18472_vm0, 65537, %v19962_v22  ;;  %v10290_v9 = vcombine.low %v7809_v44, %v7810_v12  ;;  %v3243_v32 = vsel %vm18491_vm10, 65537, %v19962_v22  ;;  %vm8418_vm15 = vcmp.eq.s32.totalorder %v18353_v34, 1  ;;  %vm18536_vm0 = vmpackc.low %vm7749_vm5, %vm7749_vm5  ;;  %v18590_v51 = vpop.permute.xlu1 %7714 }
 0x440   : > { %v3592_v42 = vor.u32 %v3591_v23, %v3588_v16  ;;  %v7811_v52 = vsel %vm7779_vm6, 65537, %v19962_v22  ;;  %v10073_v37 = vcombine.low %v3242_v4, %v3243_v32  ;;  %vm21750_vm11 = vcmask 1043456   ;;  %vm21753_vm10 = vmmov %vm21749_vm7 }
 0x441   : > { %v7949_v0 = vsel %vm21750_vm11, %v18435_v61, %v7948_v28  ;;  %vm3449_vm2 = vcmp.ne.s16.totalorder %v3425_v39, 0  ;;  %vm7879_vm1 = vcmp.ne.s16.totalorder %v10290_v9, 0  ;;  %v7812_v20 = vsel %vm18514_vm4, 65537, %v19962_v22  ;;  %vm7782_vm6 = vmpackc.low %vm7750_vm3, %vm7750_vm3  ;;  %v18549_v61 = vld [vmem:[#allocation2 + $0x68] sm:$0xff] }
 0x442   : > { %11139 = vmatprep.mubr.msk.bf16.mxu1 %vm21753_vm10, %v7949_v0  ;;  %v3465_v31 = vsel %vm3448_vm9, %v11788_v5, 0  ;;  %v3593_v53 = vsel %vm21745_vm12, %v3583_v24, %v3592_v42  ;;  %v7896_v38 = vsel %vm7879_vm1, %v18549_v61, 0  ;;  %v3427_v62 = vshrl.u32 %v10073_v37, 16  ;;  %vm21754_vm5 = vmmov %vm21749_vm7  ;;  %v18604_v4 = vpop.permute.xlu0 %4105 }
 0x443   : > { %v3430_v45 = vshll.u32 %v10073_v37, 16  ;;  %10940 = vmatmul.mubr.msk.bf16.gmra.mrb[52].mxu0 %vm21754_vm5, %v3593_v53  ;;  %v7950_v14 = vrot.slane %v7896_v38, 4  ;;  %v10291_v47 = vcombine.low %v7811_v52, %v7812_v20  ;;  %v3595_v57 = vshrl.u32 %v3465_v31, 16  ;;  %vm21755_vm9 = vmmov %vm21750_vm11  ;;  %v11793_v52 = vld [vmem:[#allocation2 + $0x78] sm:$0xff] }
 0x444   : > { %v3598_v30 = vshll.u32 %v3465_v31, 16  ;;  %v3429_v27 = vrot.slane %v3427_v62, 3  ;;  %v7813_v17 = vsel %vm18536_vm0, 65537, %v19962_v22  ;;  %v7814_v7 = vsel %vm7782_vm6, 65537, %v19962_v22  ;;  %vm18563_vm4 = vmpackc.low %vm4185_vm13, %vm4185_vm13 }
 0x445   : > { %v3432_v55 = vrot.slane %v3430_v45, 4  ;;  %vm7880_vm3 = vcmp.ne.s16.totalorder %v10291_v47, 0  ;;  %v3597_v48 = vrot.slane %v3595_v57, 4  ;;  %v7951_v3 = vsel %vm21755_vm9, %v7948_v28, %v7950_v14  ;;  %vm21758_vm14 = vmmov %vm21754_vm5  ;;  %v7721_v45 = vpop.permute.xlu1 %7720 }
 0x446   : > { %v3600_v63 = vrot.slane %v3598_v30, 5  ;;  %v7897_v36 = vsel %vm7880_vm3, %v18569_v41, 0  ;;  %11140 = vmatmul.mubr.msk.bf16.gmra.mrb[8].mxu1 %vm21758_vm14, %v7951_v3  ;;  %v10292_v26 = vcombine.low %v7813_v17, %v7814_v7  ;;  %v3466_v43 = vsel %vm3449_vm2, %v11791_v21, 0  ;;  %vm18577_vm13 = vmpackc.low %vm4186_vm8, %vm4186_vm8 }
 0x447   : > { %v3433_v2 = vor.u32 %v3432_v55, %v3429_v27  ;;  %v7952_v33 = vrot.slane %v7897_v36, 4  ;;  %v3604_v1 = vshrl.u32 %v3466_v43, 16  ;;  %v3607_v59 = vshll.u32 %v3466_v43, 16  ;;  %vm21762_vm1 = vmmov %vm21745_vm12 }
 0x448   : > { %v3601_v29 = vor.u32 %v3600_v63, %v3597_v48  ;;  %vm21761_vm7 = vsmask.f32 4352  ;;  %v4249_v44 = vsel %vm18563_vm4, 65537, %v19962_v22  ;;  %vm7881_vm0 = vcmp.ne.s16.totalorder %v10292_v26, 0  ;;  %vm21763_vm8 = vmmov %vm21754_vm5  ;;  %v7718_v48 = vpop.permute.xlu0 %7717  ;;  %v4055_v63 = vld [vmem:[#allocation2] sm:$0x80] }
 0x449   : > { %v3434_v24 = vsel %vm21761_vm7, %v18496_v40, %v3433_v2  ;;  %vm3451_vm11 = vcmp.ne.s16.totalorder %v3433_v2, 0  ;;  %v7898_v16 = vsel %vm7881_vm0, %v18587_v54, 0  ;;  %v3606_v40 = vrot.slane %v3604_v1, 4  ;;  %vm8450_vm10 = vmpackc.low %vm8418_vm15, %vm8418_vm15 }
 0x44a   : > { %vm3450_vm2 = vcmp.ne.s16.totalorder %v3434_v24, 0  ;;  %v3468_v10 = vsel %vm3451_vm11, %v3019_v56, 0  ;;  %v3602_v50 = vsel %vm21762_vm1, %v3592_v42, %v3601_v29  ;;  %v18593_v28 = vrot.slane %v7898_v16, 4  ;;  %vm21764_vm6 = vmmov %vm21755_vm9 }
 0x44b   : > { %10943 = vmatprep.mubr.msk.bf16.mxu0 %vm21763_vm8, %v3602_v50  ;;  %v3609_v23 = vrot.slane %v3607_v59, 5  ;;  %v4250_v12 = vsel %vm18577_vm13, 65537, %v19962_v22  ;;  %v7953_v39 = vsel %vm21764_vm6, %v7950_v14, %v7952_v33  ;;  %vm8420_vm12 = vcmp.eq.s32.totalorder %v18405_v58, 1  ;;  %vm21765_vm3 = vmmov %vm21763_vm8 }
 0x44c   : > { %v10102_v19 = vcombine.low %v4249_v44, %v4250_v12  ;;  %vm8419_vm5 = vcmp.eq.s32.totalorder %v18417_v46, 1  ;;  %11143 = vmatprep.mubr.msk.bf16.mxu1 %vm21765_vm3, %v7953_v39  ;;  %vm18607_vm9 = vmpackc.low %vm8420_vm12, %vm8420_vm12  ;;  %vm4187_vm4 = vcmp.eq.s32.totalorder %v18447_v18, 1  ;;  %vm8421_vm14 = vcmp.eq.s32.totalorder %v18466_v60, 1 }
 0x44d   : > { %v3610_v9 = vor.u32 %v3609_v23, %v3606_v40  ;;  %vm21768_vm15 = vmmov %vm21764_vm6  ;;  %v8482_v58 = vsel %vm8450_vm10, 65537, %v19962_v22  ;;  %v3467_v37 = vsel %vm3450_vm2, %v11793_v52, 0  ;;  %v8484_v53 = vsel %vm18607_vm9, 65537, %v19962_v22 }
 0x44e   : > { %v7955_v32 = vsel %vm21768_vm15, %v7952_v33, %v18593_v28  ;;  %v4331_v42 = vshll.u32 %v10102_v19, 16  ;;  %v4334_v46 = vshrl.u32 %v10102_v19, 16  ;;  %vm8451_vm13 = vmpackc.low %vm8419_vm5, %vm8419_vm5  ;;  %v3613_v18 = vshrl.u32 %v3467_v37, 16  ;;  %v8342_v16 = vpop.permute.xlu0 %8341 }
 0x44f   : > { %vm21769_vm7 = vmmov %vm21762_vm1  ;;  %v8483_v15 = vsel %vm8451_vm13, 65537, %v19962_v22  ;;  %v3616_v5 = vshll.u32 %v3467_v37, 16  ;;  %v3622_v62 = vshrl.u32 %v3468_v10, 16  ;;  %v3625_v30 = vshll.u32 %v3468_v10, 16 }
 0x450   : > { %v3611_v0 = vsel %vm21769_vm7, %v3601_v29, %v3610_v9  ;;  %vm21770_vm11 = vmmov %vm21765_vm3  ;;  %v4333_v31 = vrot.slane %v4331_v42, 1  ;;  %v10323_v38 = vcombine.low %v8482_v58, %v8483_v15  ;;  %v3615_v47 = vrot.slane %v3613_v18, 4 }
 0x451   : > { %11144 = vmatmul.mubr.msk.bf16.gmra.mrb[12].mxu1 %vm21770_vm11, %v7955_v32  ;;  %vm18620_vm0 = vmpackc.low %vm4187_vm4, %vm4187_vm4  ;;  %v3618_v57 = vrot.slane %v3616_v5, 5  ;;  %v3624_v35 = vrot.slane %v3622_v62, 4  ;;  %v3627_v26 = vrot.slane %v3625_v30, 5  ;;  %vm8422_vm10 = vcmp.eq.s32.totalorder %v18504_v13, 1  ;;  %v8345_v13 = vpop.permute.xlu1 %8344 }
 0x452   : > { %vm21773_vm1 = vmmov %vm21765_vm3  ;;  %v18632_v27 = vor.u32 %v4334_v46, %v4333_v31  ;;  %v8563_v55 = vshrl.u32 %v10323_v38, 16  ;;  %v8566_v17 = vshll.u32 %v10323_v38, 16  ;;  %v4251_v7 = vsel %vm18620_vm0, 65537, %v19962_v22 }
 0x453   : > { %10944 = vmatmul.mubr.msk.bf16.gmra.mrb[56].mxu0 %vm21773_vm1, %v3611_v0  ;;  %vm8453_vm2 = vmpackc.low %vm8421_vm14, %vm8421_vm14  ;;  %vm4457_vm8 = vcmp.ne.s16.totalorder %v4333_v31, 0  ;;  %v3619_v3 = vor.u32 %v3618_v57, %v3615_v47  ;;  %vm4188_vm5 = vcmp.eq.s32.totalorder %v18528_v25, 1  ;;  %v3628_v6 = vor.u32 %v3627_v26, %v3624_v35  ;;  %v11797_v35 = vld [vmem:[#allocation2 + $0x18] sm:$0xff] }
 0x454   : > { %v8485_v14 = vsel %vm8453_vm2, 65537, %v19962_v22  ;;  %v8565_v2 = vrot.slane %v8563_v55, 3  ;;  %v8568_v36 = vrot.slane %v8566_v17, 4  ;;  %vm21774_vm6 = vmmov %vm21769_vm7  ;;  %v18644_v1 = vsel %vm4457_vm8, %v4055_v63, 0  ;;  %v4109_v18 = vpop.permute.xlu0 %4108  ;;  %v11795_v55 = vld [vmem:[#allocation2 + $0x88] sm:$0xf] }
 0x455   : > { %v10324_v60 = vcombine.low %v8484_v53, %v8485_v14  ;;  %v3620_v33 = vsel %vm21774_vm6, %v3610_v9, %v3619_v3  ;;  %vm18639_vm12 = vmpackc.low %vm8422_vm10, %vm8422_vm10  ;;  %vm4189_vm15 = vcmp.eq.s32.totalorder %v18553_v11, 1  ;;  %vm8423_vm14 = vcmp.eq.s32.totalorder %v18567_v8, 1  ;;  %v11794_v8 = vld [vmem:[#allocation2 + $0x8] sm:$0xf0]  ;;  %v4112_v46 = vpop.permute.xlu1 %4111 }
 0x456   : > { %v8569_v59 = vor.u32 %v8568_v36, %v8565_v2  ;;  %vm21777_vm3 = vmmov %vm21773_vm1  ;;  %v8486_v10 = vsel %vm18639_vm12, 65537, %v19962_v22  ;;  %vm4190_vm8 = vcmp.eq.s32.totalorder %v18604_v4, 1  ;;  %vm21780_vm10 = vsmask.f32 4352 }
 0x457   : > { %v8571_v21 = vshrl.u32 %v10324_v60, 16  ;;  %v8574_v43 = vshll.u32 %v10324_v60, 16  ;;  %10947 = vmatprep.mubr.msk.bf16.mxu0 %vm21777_vm3, %v3620_v33  ;;  %vm4220_vm9 = vmpackc.low %vm4188_vm5, %vm4188_vm5  ;;  %vm7753_vm12 = vcmp.eq.s32.totalorder %v7721_v45, 1  ;;  %vm7752_vm5 = vcmp.eq.s32.totalorder %v7718_v48, 1  ;;  %v18674_v60 = vld [vmem:[#allocation2 + $0x80] sm:$0xff] }
 0x458   : > { %v4252_v44 = vsel %vm4220_vm9, 65537, %v19962_v22  ;;  %vm4221_vm4 = vmpackc.low %vm4189_vm15, %vm4189_vm15  ;;  %vm8705_vm13 = vcmp.ne.s16.totalorder %v8569_v59, 0  ;;  %vm8425_vm15 = vcmp.eq.s32.totalorder %v8345_v13, 1 }
 0x459   : > { %v8573_v56 = vrot.slane %v8571_v21, 3  ;;  %v8576_v24 = vrot.slane %v8574_v43, 4  ;;  %vm21778_vm7 = vmmov %vm21774_vm6  ;;  %v10103_v50 = vcombine.low %v4251_v7, %v4252_v44  ;;  %v4253_v11 = vsel %vm4221_vm4, 65537, %v19962_v22  ;;  %v8351_v7 = vpop.permute.xlu1 %8350 }
 0x45a   : > { %v3629_v25 = vsel %vm21778_vm7, %v3619_v3, %v3628_v6  ;;  %vm8455_vm11 = vmpackc.low %vm8423_vm14, %vm8423_vm14  ;;  %v18658_v12 = vsel %vm8705_vm13, %v11794_v8, 0  ;;  %vm8424_vm4 = vcmp.eq.s32.totalorder %v8342_v16, 1  ;;  %vm21781_vm14 = vsmask.f32 7424  ;;  %v8348_v43 = vpop.permute.xlu0 %8347 }
 0x45b   : > { %v8577_v40 = vor.u32 %v8576_v24, %v8573_v56  ;;  %vm21779_vm0 = vmmov %vm21773_vm1  ;;  %v8487_v23 = vsel %vm8455_vm11, 65537, %v19962_v22  ;;  %vm7751_vm1 = vcmp.eq.s32.totalorder %v18590_v51, 1  ;;  %v4338_v19 = vshll.u32 %v10103_v50, 16 }
 0x45c   : > { %10948 = vmatmul.mubr.msk.bf16.gmra.mrb[60].mxu0 %vm21779_vm0, %v3629_v25  ;;  %v10325_v39 = vcombine.low %v8486_v10, %v8487_v23  ;;  %vm7783_vm2 = vmpackc.low %vm7751_vm1, %vm7751_vm1  ;;  %v4342_v34 = vshrl.u32 %v10103_v50, 16  ;;  %v11798_v10 = vld [vmem:[#allocation2 + $0x10] sm:$0xff]  ;;  %v11799_v23 = vld [vmem:[#allocation2 + $0x8] sm:$0xff] }
 0x45d   : > { %v18662_v9 = vsel %vm21780_vm10, %v8569_v59, %v8577_v40  ;;  %vm4222_vm6 = vmpackc.low %vm4190_vm8, %vm4190_vm8  ;;  %v4340_v32 = vrot.slane %v4338_v19, 1  ;;  %v7815_v51 = vsel %vm7783_vm2, 65537, %v19962_v22 }
 0x45e   : > { %v8580_v58 = vshrl.u32 %v10325_v39, 16  ;;  %v8583_v42 = vshll.u32 %v10325_v39, 16  ;;  %vm7785_vm3 = vmpackc.low %vm7753_vm12, %vm7753_vm12  ;;  %v4254_v52 = vsel %vm4222_vm6, 65537, %v19962_v22  ;;  %vm8706_vm1 = vcmp.ne.s16.totalorder %v18662_v9, 0  ;;  %v4118_v19 = vpop.permute.xlu1 %4117 }
 0x45f   : > { %v7817_v37 = vsel %vm7785_vm3, 65537, %v19962_v22  ;;  %vm7784_vm9 = vmpackc.low %vm7752_vm5, %vm7752_vm5  ;;  %v4341_v4 = vsel %vm21781_vm14, %v18632_v27, %v4340_v32  ;;  %v4344_v0 = vor.u32 %v4342_v34, %v4340_v32  ;;  %v10104_v5 = vcombine.low %v4253_v11, %v4254_v52 }
 0x460   : > { %v8582_v15 = vrot.slane %v8580_v58, 3  ;;  %v8585_v20 = vrot.slane %v8583_v42, 4  ;;  %vm8457_vm13 = vmpackc.low %vm8425_vm15, %vm8425_vm15  ;;  %vm4458_vm7 = vcmp.ne.s16.totalorder %v4341_v4, 0  ;;  %v10294_v31 = vcombine.low %v7817_v37, %v7817_v37  ;;  %v4115_v37 = vpop.permute.xlu0 %4114 }
 0x461   : > { %v7816_v53 = vsel %vm7784_vm9, 65537, %v19962_v22  ;;  %vm8456_vm11 = vmpackc.low %vm8424_vm4, %vm8424_vm4  ;;  %v8489_v45 = vsel %vm8457_vm13, 65537, %v19962_v22  ;;  %v4346_v47 = vshll.u32 %v10104_v5, 16  ;;  %v4350_v57 = vshrl.u32 %v10104_v5, 16 }
 0x462   : > { %v8586_v38 = vor.u32 %v8585_v20, %v8582_v15  ;;  %v10293_v62 = vcombine.low %v7815_v51, %v7816_v53  ;;  %v8488_v14 = vsel %vm8456_vm11, 65537, %v19962_v22  ;;  %vm7883_vm0 = vcmp.ne.s16.totalorder %v10294_v31, 0  ;;  %vm21782_vm2 = vmmov %vm21780_vm10 }
 0x463   : > { %v10326_v30 = vcombine.low %v8488_v14, %v8489_v45  ;;  %v7900_v17 = vsel %vm7883_vm0, %v11795_v55, 0  ;;  %vm4192_vm10 = vcmp.eq.s32.totalorder %v4112_v46, 1  ;;  %v4348_v48 = vrot.slane %v4346_v47, 1  ;;  %vm21783_vm5 = vmmov %vm21781_vm14 }
 0x464   : > { %v8587_v27 = vsel %vm21782_vm2, %v8577_v40, %v8586_v38  ;;  %vm7882_vm8 = vcmp.ne.s16.totalorder %v10293_v62, 0  ;;  %v7958_v63 = vrot.slane %v7900_v17, 4  ;;  %vm4224_vm12 = vmpackc.low %vm4192_vm10, %vm4192_vm10  ;;  %vm4191_vm9 = vcmp.eq.s32.totalorder %v4109_v18, 1  ;;  %v8357_v47 = vpop.permute.xlu1 %8356 }
 0x465   : > { %vm8707_vm6 = vcmp.ne.s16.totalorder %v8587_v27, 0  ;;  %v7899_v3 = vsel %vm7882_vm8, %v18674_v60, 0  ;;  %v8589_v26 = vshrl.u32 %v10326_v30, 16  ;;  %v8592_v21 = vshll.u32 %v10326_v30, 16  ;;  %vm4223_vm15 = vmpackc.low %vm4191_vm9, %vm4191_vm9 }
 0x466   : > { %v8724_v2 = vsel %vm8707_vm6, %v11797_v35, 0  ;;  %v7956_v36 = vrot.slane %v7899_v3, 4  ;;  %v4349_v59 = vsel %vm21783_vm5, %v4344_v0, %v4348_v48  ;;  %v4352_v6 = vor.u32 %v4350_v57, %v4348_v48  ;;  %vm21784_vm4 = vmmov %vm21782_vm2 }
 0x467   : > { %v8766_v33 = vshrl.u32 %v8724_v2, 16  ;;  %v8769_v29 = vshll.u32 %v8724_v2, 16  ;;  %vm4459_vm3 = vcmp.ne.s16.totalorder %v4349_v59, 0  ;;  %v8591_v13 = vrot.slane %v8589_v26, 3 }
 0x468   : > { %v8594_v56 = vrot.slane %v8592_v21, 4  ;;  %v4256_v24 = vsel %vm4224_vm12, 65537, %v19962_v22  ;;  %v4476_v50 = vsel %vm4459_vm3, %v11798_v10, 0  ;;  %v4475_v8 = vsel %vm4458_vm7, %v11799_v23, 0 }
 0x469   : > { %v18679_v44 = vrot.slane %v8766_v33, 4  ;;  %v18681_v25 = vrot.slane %v8769_v29, 5  ;;  %v4514_v16 = vshrl.u32 %v4476_v50, 16  ;;  %v4517_v40 = vshll.u32 %v4476_v50, 16 }
 0x46a   : > { %v18683_v11 = vor.u32 %v8594_v56, %v8591_v13  ;;  %v4255_v39 = vsel %vm4223_vm15, 65537, %v19962_v22  ;;  %v4502_v34 = vshrl.u32 %v18644_v1, 16  ;;  %v4506_v32 = vshrl.u32 %v4475_v8, 16 }
 0x46b   : > { %v4509_v58 = vshll.u32 %v4475_v8, 16  ;;  %v18688_v42 = vrot.slane %v4514_v16, 7  ;;  %v10105_v46 = vcombine.low %v4255_v39, %v4256_v24  ;;  %vm21785_vm14 = vcmask 1043456  }
 0x46c   : > { %v18692_v51 = vsel %vm21784_vm4, %v8586_v38, %v18683_v11  ;;  %v7957_v52 = vsel %vm21785_vm14, %v18593_v28, %v7956_v36  ;;  %v4504_v4 = vrot.slane %v4502_v34, 7  ;;  %v4508_v0 = vrot.slane %v4506_v32, 7  ;;  %vm21787_vm8 = vmmov %vm21785_vm14  ;;  %v11800_v28 = vld [vmem:[#allocation2 + $0x10] sm:$0xff] }
 0x46d   : > { %vm8708_vm13 = vcmp.ne.s16.totalorder %v18692_v51, 0  ;;  %vm21786_vm7 = vcmask 523264   ;;  %vm8427_vm11 = vcmp.eq.s32.totalorder %v8351_v7, 1  ;;  %v4354_v1 = vshll.u32 %v10105_v46, 16 }
 0x46e   : > { %11147 = vmatprep.mubr.msk.bf16.mxu1 %vm21786_vm7, %v7957_v52  ;;  %v4358_v15 = vshrl.u32 %v10105_v46, 16  ;;  %vm8459_vm0 = vmpackc.low %vm8427_vm11, %vm8427_vm11  ;;  %vm8426_vm2 = vcmp.eq.s32.totalorder %v8348_v43, 1  ;;  %v7959_v20 = vsel %vm21787_vm8, %v7956_v36, %v7958_v63  ;;  %v4511_v18 = vor.u32 %v4509_v58, %v4508_v0  ;;  %v8354_v63 = vpop.permute.xlu0 %8353 }
 0x46f   : > { %v8491_v5 = vsel %vm8459_vm0, 65537, %v19962_v22  ;;  %vm8458_vm10 = vmpackc.low %vm8426_vm2, %vm8426_vm2  ;;  %v8723_v31 = vsel %vm8706_vm1, %v11800_v28, 0  ;;  %v8749_v53 = vshrl.u32 %v18658_v12, 16  ;;  %v4356_v38 = vrot.slane %v4354_v1, 1 }
 0x470   : > { %vm21788_vm6 = vmmov %vm21786_vm7  ;;  %v8490_v62 = vsel %vm8458_vm10, 65537, %v19962_v22  ;;  %v8752_v45 = vshll.u32 %v18658_v12, 16  ;;  %v8757_v14 = vshrl.u32 %v8723_v31, 16  ;;  %vm21789_vm12 = vsmask.f32 256 }
 0x471   : > { %11148 = vmatmul.mubr.msk.bf16.gmra.mrb[16].mxu1 %vm21788_vm6, %v7959_v20  ;;  %v4512_v57 = vsel %vm21789_vm12, %v4504_v4, %v4511_v18  ;;  %v10327_v30 = vcombine.low %v8490_v62, %v8491_v5  ;;  %v8751_v27 = vrot.slane %v8749_v53, 4  ;;  %v8760_v55 = vshll.u32 %v8723_v31, 16  ;;  %vm21790_vm1 = vmmov %vm21788_vm6  ;;  %v11802_v20 = vld [vmem:[#allocation2 + $0x18] sm:$0xff]  ;;  %v11803_v5 = vld [vmem:[#allocation2 + $0x28] sm:$0xff] }
 0x472   : > { %v18708_v17 = vsel %vm21783_vm5, %v4352_v6, %v4356_v38  ;;  %v18710_v7 = vor.u32 %v4358_v15, %v4356_v38  ;;  %10959 = vmatprep.mubr.msk.bf16.mxu0 %vm21790_vm1, %v4512_v57  ;;  %v8754_v9 = vrot.slane %v8752_v45, 5  ;;  %v8759_v48 = vrot.slane %v8757_v14, 4  ;;  %vm21791_vm11 = vmmov %vm21789_vm12  ;;  %v8363_v6 = vpop.permute.xlu1 %8362 }
 0x473   : > { %vm4460_vm3 = vcmp.ne.s16.totalorder %v18708_v17, 0  ;;  %v8598_v12 = vshrl.u32 %v10327_v30, 16  ;;  %v8601_v3 = vshll.u32 %v10327_v30, 16  ;;  %v8762_v35 = vrot.slane %v8760_v55, 5  ;;  %vm21793_vm8 = vmmov %vm21790_vm1  ;;  %v21799_v30 = vld [vmem:[#allocation125_spill] sm:$0xff] }
 0x474   : > { %v8755_v2 = vor.u32 %v8754_v9, %v8751_v27  ;;  %vm4194_vm9 = vcmp.eq.s32.totalorder %v4118_v19, 1  ;;  %vm4193_vm15 = vcmp.eq.s32.totalorder %v4115_v37, 1  ;;  %v4519_v36 = vor.u32 %v4517_v40, %v18688_v42  ;;  %vm21794_vm12 = vmmov %vm21790_vm1  ;;  %v8360_v40 = vpop.permute.xlu0 %8359 }
 0x475   : > { %v8600_v26 = vrot.slane %v8598_v12, 3  ;;  %v8603_v21 = vrot.slane %v8601_v3, 4  ;;  %v8763_v43 = vor.u32 %v8762_v35, %v8759_v48  ;;  %vm4226_vm4 = vmpackc.low %vm4194_vm9, %vm4194_vm9  ;;  %vm8429_vm14 = vcmp.eq.s32.totalorder %v8357_v47, 1 }
 0x476   : > { %v4258_v33 = vsel %vm4226_vm4, 65537, %v19962_v22  ;;  %vm4225_vm7 = vmpackc.low %vm4193_vm15, %vm4193_vm15  ;;  %v4520_v29 = vsel %vm21791_vm11, %v4508_v0, %v4519_v36  ;;  %vm8428_vm0 = vcmp.eq.s32.totalorder %v8354_v63, 1  ;;  %v8772_v59 = vor.u32 %v18681_v25, %v18679_v44  ;;  %v11801_v44 = vld [vmem:[#allocation2 + $0x20] sm:$0xff]  ;;  %v8369_v1 = vpop.permute.xlu1 %8368 }
 0x477   : > { %v8604_v13 = vor.u32 %v8603_v21, %v8600_v26  ;;  %vm21792_vm2 = vsmask.f32 3328  ;;  %v4257_v24 = vsel %vm4225_vm7, 65537, %v19962_v22  ;;  %10960 = vmatmul.mubr.msk.bf16.vlgmr.msra.gmra.mrb[32].mxu0 %vm21793_vm8, %v4520_v29  ;;  %vm8461_vm10 = vmpackc.low %vm8429_vm14, %vm8429_vm14  ;;  %vm8431_vm6 = vcmp.eq.s32.totalorder %v8363_v6, 1 }
 0x478   : > { %v8764_v56 = vsel %vm21792_vm2, %v8755_v2, %v8763_v43  ;;  %v10106_v10 = vcombine.low %v4257_v24, %v4258_v33  ;;  %v8493_v50 = vsel %vm8461_vm10, 65537, %v19962_v22  ;;  %vm8460_vm5 = vmpackc.low %vm8428_vm0, %vm8428_vm0  ;;  %v8725_v25 = vsel %vm8708_vm13, %v11801_v44, 0  ;;  %v8366_v45 = vpop.permute.xlu0 %8365 }
 0x479   : > { %11159 = vmatprep.mubr.msk.bf16.mxu1 %vm21794_vm12, %v8764_v56  ;;  %vm21795_vm1 = vmmov %vm21792_vm2  ;;  %vm21796_vm9 = vsmask.f32 4352  ;;  %v8492_v8 = vsel %vm8460_vm5, 65537, %v19962_v22  ;;  %vm8430_vm14 = vcmp.eq.s32.totalorder %v8360_v40, 1  ;;  %v8775_v19 = vshrl.u32 %v8725_v25, 16 }
 0x47a   : > { %v8773_v16 = vsel %vm21795_vm1, %v8763_v43, %v8772_v59  ;;  %v8605_v23 = vsel %vm21796_vm9, %v18683_v11, %v8604_v13  ;;  %vm21797_vm15 = vmmov %vm21793_vm8  ;;  %v4362_v39 = vshll.u32 %v10106_v10, 16  ;;  %v4366_v34 = vshrl.u32 %v10106_v10, 16  ;;  %v8375_v2 = vpop.permute.xlu1 %8374 }
 0x47b   : > { %11160 = vmatmul.mubr.msk.bf16.vlgmr.msra.gmra.mrb[20].mxu1 %vm21797_vm15, %v8773_v16  ;;  %vm8463_vm4 = vmpackc.low %vm8431_vm6, %vm8431_vm6  ;;  %vm8709_vm7 = vcmp.ne.s16.totalorder %v8605_v23, 0  ;;  %v10328_v32 = vcombine.low %v8492_v8, %v8493_v50  ;;  %v8777_v46 = vrot.slane %v8775_v19, 4  ;;  %v8778_v52 = vshll.u32 %v8725_v25, 16 }
 0x47c   : > { %vm8462_vm11 = vmpackc.low %vm8430_vm14, %vm8430_vm14  ;;  %v8495_v58 = vsel %vm8463_vm4, 65537, %v19962_v22  ;;  %v4364_v37 = vrot.slane %v4362_v39, 1  ;;  %vm8433_vm13 = vcmp.eq.s32.totalorder %v8369_v1, 1  ;;  %v4477_v18 = vsel %vm4460_vm3, %v11802_v20, 0  ;;  %v8372_v43 = vpop.permute.xlu0 %8371  ;;  %v11806_v1 = vld [vmem:[#allocation2 + $0x30] sm:$0xff] }
 0x47d   : > { %v8494_v51 = vsel %vm8462_vm11, 65537, %v19962_v22  ;;  %v8607_v11 = vshrl.u32 %v10328_v32, 16  ;;  %v8610_v4 = vshll.u32 %v10328_v32, 16  ;;  %v8780_v15 = vrot.slane %v8778_v52, 5  ;;  %vm8465_vm2 = vmpackc.low %vm8433_vm13, %vm8433_vm13  ;;  %v11805_v32 = vld [vmem:[#allocation2 + $0x28] sm:$0xff] }
 0x47e   : > { %v10329_v0 = vcombine.low %v8494_v51, %v8495_v58  ;;  %v8726_v28 = vsel %vm8709_vm7, %v11803_v5, 0  ;;  %vm21798_vm0 = vsmask.f32 7424  ;;  %v4368_v53 = vor.u32 %v4366_v34, %v4364_v37  ;;  %vm21801_vm12 = vmmov %vm21795_vm1  ;;  %v8381_v39 = vpop.permute.xlu1 %8380 }
 0x47f   : > { %v4365_v31 = vsel %vm21798_vm0, %v18710_v7, %v4364_v37  ;;  %v8609_v38 = vrot.slane %v8607_v11, 3  ;;  %v8612_v62 = vrot.slane %v8610_v4, 4  ;;  %v8781_v57 = vor.u32 %v8780_v15, %v8777_v46  ;;  %vm21800_vm10 = vmmov %vm21798_vm0 }
 0x480   : > { %vm4461_vm8 = vcmp.ne.s16.totalorder %v4365_v31, 0  ;;  %v8616_v14 = vshrl.u32 %v10329_v0, 16  ;;  %v8619_v47 = vshll.u32 %v10329_v0, 16  ;;  %v4373_v27 = vsel %vm21800_vm10, %v4368_v53, %v21799_v30  ;;  %vm21802_vm1 = vmmov %vm21796_vm9  ;;  %v8378_v37 = vpop.permute.xlu0 %8377 }
 0x481   : > { %v8613_v55 = vor.u32 %v8612_v62, %v8609_v38  ;;  %v8497_v17 = vsel %vm8465_vm2, 65537, %v19962_v22  ;;  %vm8432_vm3 = vcmp.eq.s32.totalorder %v8366_v45, 1  ;;  %vm4462_vm6 = vcmp.ne.s16.totalorder %v4373_v27, 0  ;;  %vm21803_vm9 = vmmov %vm21797_vm15 }
 0x482   : > { %v8618_v9 = vrot.slane %v8616_v14, 3  ;;  %v8621_v48 = vrot.slane %v8619_v47, 4  ;;  %v8782_v7 = vsel %vm21801_vm12, %v8772_v59, %v8781_v57  ;;  %vm8464_vm5 = vmpackc.low %vm8432_vm3, %vm8432_vm3  ;;  %v4522_v3 = vshrl.u32 %v4477_v18, 16  ;;  %v11804_v59 = vld [vmem:[#allocation2 + $0x20] sm:$0xff] }
 0x483   : > { %v8614_v63 = vsel %vm21802_vm1, %v8604_v13, %v8613_v55  ;;  %11163 = vmatprep.mubr.msk.bf16.mxu1 %vm21803_vm9, %v8782_v7  ;;  %v8496_v12 = vsel %vm8464_vm5, 65537, %v19962_v22  ;;  %v4525_v35 = vshll.u32 %v4477_v18, 16  ;;  %vm8435_vm4 = vcmp.eq.s32.totalorder %v8375_v2, 1  ;;  %vm21804_vm7 = vmmov %vm21802_vm1 }
 0x484   : > { %vm8710_vm15 = vcmp.ne.s16.totalorder %v8614_v63, 0  ;;  %v8622_v36 = vor.u32 %v8621_v48, %v8618_v9  ;;  %v10330_v26 = vcombine.low %v8496_v12, %v8497_v17  ;;  %v4524_v21 = vrot.slane %v4522_v3, 7  ;;  %vm8467_vm14 = vmpackc.low %vm8435_vm4, %vm8435_vm4  ;;  %v8387_v30 = vpop.permute.xlu1 %8386  ;;  %v21812_v3 = vld [vmem:[#allocation108_spill] sm:$0xff] }
 0x485   : > { %v8784_v33 = vshrl.u32 %v8726_v28, 16  ;;  %v8787_v29 = vshll.u32 %v8726_v28, 16  ;;  %v4478_v6 = vsel %vm4461_vm8, %v11804_v59, 0  ;;  %v8499_v10 = vsel %vm8467_vm14, 65537, %v19962_v22  ;;  %vm21806_vm8 = vmmov %vm21803_vm9 }
 0x486   : > { %v8623_v13 = vsel %vm21804_vm7, %v8613_v55, %v8622_v36  ;;  %v8625_v56 = vshrl.u32 %v10330_v26, 16  ;;  %v8628_v24 = vshll.u32 %v10330_v26, 16  ;;  %v4527_v50 = vor.u32 %v4525_v35, %v4524_v21  ;;  %vm21807_vm12 = vmmov %vm21802_vm1  ;;  %v11807_v55 = vld [vmem:[#allocation2 + $0x38] sm:$0xff] }
 0x487   : > { %vm8711_vm11 = vcmp.ne.s16.totalorder %v8623_v13, 0  ;;  %vm8434_vm13 = vcmp.eq.s32.totalorder %v8372_v43, 1  ;;  %v8786_v16 = vrot.slane %v8784_v33, 4  ;;  %v8789_v25 = vrot.slane %v8787_v29, 5  ;;  %vm21809_vm1 = vmmov %vm21806_vm8  ;;  %v8384_v7 = vpop.permute.xlu0 %8383 }
 0x488   : > { %v8627_v40 = vrot.slane %v8625_v56, 3  ;;  %v8630_v44 = vrot.slane %v8628_v24, 4  ;;  %vm8466_vm0 = vmpackc.low %vm8434_vm13, %vm8434_vm13  ;;  %v4530_v23 = vshrl.u32 %v4478_v6, 16  ;;  %vm21805_vm2 = vsmask.f32 256 }
 0x489   : > { %v4528_v8 = vsel %vm21805_vm2, %v18688_v42, %v4527_v50  ;;  %v8498_v19 = vsel %vm8466_vm0, 65537, %v19962_v22  ;;  %v4533_v34 = vshll.u32 %v4478_v6, 16  ;;  %v4479_v58 = vsel %vm4462_vm6, %v11805_v32, 0  ;;  %vm21811_vm14 = vmmov %vm21809_vm1 }
 0x48a   : > { %v8631_v51 = vor.u32 %v8630_v44, %v8627_v40  ;;  %10963 = vmatprep.mubr.msk.bf16.mxu0 %vm21806_vm8, %v4528_v8  ;;  %v10331_v46 = vcombine.low %v8498_v19, %v8499_v10  ;;  %v8790_v52 = vor.u32 %v8789_v25, %v8786_v16  ;;  %vm8437_vm10 = vcmp.eq.s32.totalorder %v8381_v39, 1  ;;  %vm21813_vm0 = vmmov %vm21805_vm2  ;;  %v11808_v16 = vld [vmem:[#allocation2 + $0x40] sm:$0xff]  ;;  %v11809_v44 = vld [vmem:[#allocation2 + $0x48] sm:$0xff] }
 0x48b   : > { %vm8469_vm3 = vmpackc.low %vm8437_vm10, %vm8437_vm10  ;;  %v4532_v11 = vrot.slane %v4530_v23, 7  ;;  %v4538_v4 = vshrl.u32 %v4479_v58, 16  ;;  %v4541_v0 = vshll.u32 %v4479_v58, 16  ;;  %v8727_v42 = vsel %vm8710_vm15, %v11806_v1, 0  ;;  %v8393_v50 = vpop.permute.xlu1 %8392 }
 0x48c   : > { %v8632_v15 = vsel %vm21807_vm12, %v8622_v36, %v8631_v51  ;;  %v8634_v20 = vshrl.u32 %v10331_v46, 16  ;;  %v8637_v18 = vshll.u32 %v10331_v46, 16  ;;  %vm21808_vm5 = vsmask.f32 3328  ;;  %vm21810_vm15 = vmmov %vm21805_vm2 }
 0x48d   : > { %v8791_v5 = vsel %vm21808_vm5, %v8781_v57, %v8790_v52  ;;  %vm8712_vm6 = vcmp.ne.s16.totalorder %v8632_v15, 0  ;;  %v8501_v28 = vsel %vm8469_vm3, 65537, %v19962_v22  ;;  %vm8436_vm9 = vcmp.eq.s32.totalorder %v8378_v37, 1  ;;  %vm21814_vm2 = vmmov %vm21807_vm12 }
 0x48e   : > { %11164 = vmatmul.mubr.msk.bf16.gmra.mrb[24].mxu1 %vm21809_vm1, %v8791_v5  ;;  %v4535_v31 = vor.u32 %v4533_v34, %v4532_v11  ;;  %v8636_v53 = vrot.slane %v8634_v20, 3  ;;  %v8639_v38 = vrot.slane %v8637_v18, 4  ;;  %vm8468_vm4 = vmpackc.low %vm8436_vm9, %vm8436_vm9  ;;  %v4540_v62 = vrot.slane %v4538_v4, 7  ;;  %v8390_v39 = vpop.permute.xlu0 %8389 }
 0x48f   : > { %v8793_v45 = vshrl.u32 %v8727_v42, 16  ;;  %v8500_v14 = vsel %vm8468_vm4, 65537, %v19962_v22  ;;  %v8796_v27 = vshll.u32 %v8727_v42, 16  ;;  %v8728_v57 = vsel %vm8711_vm11, %v11807_v55, 0  ;;  %vm21815_vm8 = vmmov %vm21813_vm0 }
 0x490   : > { %v4536_v47 = vsel %vm21810_vm15, %v4524_v21, %v4535_v31  ;;  %v8640_v17 = vor.u32 %v8639_v38, %v8636_v53  ;;  %v10332_v9 = vcombine.low %v8500_v14, %v8501_v28  ;;  %v4543_v48 = vor.u32 %v4541_v0, %v4540_v62  ;;  %vm21816_vm10 = vmmov %vm21809_vm1  ;;  %v11810_v53 = vld [vmem:[#allocation2 + $0x50] sm:$0xff] }
 0x491   : > { %10964 = vmatmul.mubr.msk.bf16.gmra.mrb[36].mxu0 %vm21811_vm14, %v4536_v47  ;;  %vm8439_vm7 = vcmp.eq.s32.totalorder %v8387_v30, 1  ;;  %v8795_v63 = vrot.slane %v8793_v45, 4  ;;  %v8798_v12 = vrot.slane %v8796_v27, 5  ;;  %v4552_v35 = vsel %vm21813_vm0, %v4540_v62, %v21812_v3  ;;  %vm21817_vm15 = vmmov %vm21814_vm2 }
 0x492   : > { %vm8471_vm13 = vmpackc.low %vm8439_vm7, %vm8439_vm7  ;;  %v8802_v2 = vshrl.u32 %v8728_v57, 16  ;;  %v8641_v36 = vsel %vm21814_vm2, %v8631_v51, %v8640_v17  ;;  %v8643_v26 = vshrl.u32 %v10332_v9, 16  ;;  %v8646_v21 = vshll.u32 %v10332_v9, 16  ;;  %v8399_v28 = vpop.permute.xlu1 %8398 }
 0x493   : > { %v4544_v43 = vsel %vm21815_vm8, %v4532_v11, %v4543_v48  ;;  %vm8713_vm11 = vcmp.ne.s16.totalorder %v8641_v36, 0  ;;  %v8503_v33 = vsel %vm8471_vm13, 65537, %v19962_v22  ;;  %vm8438_vm3 = vcmp.eq.s32.totalorder %v8384_v7, 1  ;;  %vm21819_vm0 = vmmov %vm21808_vm5 }
 0x494   : > { %10967 = vmatprep.mubr.msk.bf16.mxu0 %vm21816_vm10, %v4544_v43  ;;  %v8799_v29 = vor.u32 %v8798_v12, %v8795_v63  ;;  %v8645_v59 = vrot.slane %v8643_v26, 3  ;;  %v8648_v6 = vrot.slane %v8646_v21, 4  ;;  %vm8470_vm12 = vmpackc.low %vm8438_vm3, %vm8438_vm3  ;;  %v8804_v13 = vrot.slane %v8802_v2, 4  ;;  %v8396_v47 = vpop.permute.xlu0 %8395  ;;  %v11811_v21 = vld [vmem:[#allocation2 + $0x58] sm:$0xff] }
 0x495   : > { %v8805_v56 = vshll.u32 %v8728_v57, 16  ;;  %v8502_v24 = vsel %vm8470_vm12, 65537, %v19962_v22  ;;  %v8729_v40 = vsel %vm8712_vm6, %v11808_v16, 0  ;;  %v8730_v25 = vsel %vm8713_vm11, %v11809_v44, 0  ;;  %vm21818_vm6 = vmmov %vm21809_vm1 }
 0x496   : > { %v8800_v10 = vsel %vm21808_vm5, %v8790_v52, %v8799_v29  ;;  %v8649_v23 = vor.u32 %v8648_v6, %v8645_v59  ;;  %v10333_v8 = vcombine.low %v8502_v24, %v8503_v33  ;;  %vm8441_vm9 = vcmp.eq.s32.totalorder %v8393_v50, 1  ;;  %vm21820_vm2 = vmmov %vm21809_vm1 }
 0x497   : > { %11167 = vmatprep.mubr.msk.bf16.mxu1 %vm21809_vm1, %v8800_v10  ;;  %v8807_v19 = vrot.slane %v8805_v56, 5  ;;  %vm8473_vm4 = vmpackc.low %vm8441_vm9, %vm8441_vm9  ;;  %v8811_v34 = vshrl.u32 %v8729_v40, 16  ;;  %v8814_v32 = vshll.u32 %v8729_v40, 16  ;;  %v8820_v58 = vshrl.u32 %v8730_v25, 16 }
 0x498   : > { %v8823_v51 = vshll.u32 %v8730_v25, 16  ;;  %v8650_v46 = vsel %vm21817_vm15, %v8640_v17, %v8649_v23  ;;  %v8652_v52 = vshrl.u32 %v10333_v8, 16  ;;  %v8655_v37 = vshll.u32 %v10333_v8, 16  ;;  %vm21821_vm10 = vmmov %vm21817_vm15  ;;  %v8405_v36 = vpop.permute.xlu1 %8404 }
 0x499   : > { %v8505_v11 = vsel %vm8473_vm4, 65537, %v19962_v22  ;;  %10968 = vmatmul.mubr.msk.bf16.gmra.mrb[40].mxu0 %vm21818_vm6, %v4552_v35  ;;  %vm8714_vm14 = vcmp.ne.s16.totalorder %v8650_v46, 0  ;;  %vm8440_vm7 = vcmp.eq.s32.totalorder %v8390_v39, 1  ;;  %v8808_v4 = vor.u32 %v8807_v19, %v8804_v13  ;;  %vm21822_vm5 = vmmov %vm21819_vm0 }
 0x49a   : > { %v8813_v0 = vrot.slane %v8811_v34, 4  ;;  %v8654_v1 = vrot.slane %v8652_v52, 3  ;;  %v8657_v42 = vrot.slane %v8655_v37, 4  ;;  %vm8472_vm13 = vmpackc.low %vm8440_vm7, %vm8440_vm7  ;;  %v8816_v15 = vrot.slane %v8814_v32, 5  ;;  %v8402_v6 = vpop.permute.xlu0 %8401 }
 0x49b   : > { %v8822_v20 = vrot.slane %v8820_v58, 4  ;;  %v8504_v18 = vsel %vm8472_vm13, 65537, %v19962_v22  ;;  %v8809_v5 = vsel %vm21819_vm0, %v8799_v29, %v8808_v4  ;;  %v8825_v31 = vrot.slane %v8823_v51, 5  ;;  %vm21823_vm9 = vmmov %vm21820_vm2 }
 0x49c   : > { %v8731_v38 = vsel %vm8714_vm14, %v11810_v53, 0  ;;  %v8658_v62 = vor.u32 %v8657_v42, %v8654_v1  ;;  %v10334_v45 = vcombine.low %v8504_v18, %v8505_v11  ;;  %11168 = vmatmul.mubr.msk.bf16.gmra.mrb[28].mxu1 %vm21820_vm2, %v8809_v5  ;;  %vm8443_vm8 = vcmp.eq.s32.totalorder %v8399_v28, 1  ;;  %vm21824_vm4 = vmmov %vm21819_vm0 }
 0x49d   : > { %v8817_v14 = vor.u32 %v8816_v15, %v8813_v0  ;;  %vm8475_vm11 = vmpackc.low %vm8443_vm8, %vm8443_vm8  ;;  %v8826_v30 = vor.u32 %v8825_v31, %v8822_v20  ;;  %v8829_v27 = vshrl.u32 %v8731_v38, 16  ;;  %v8832_v55 = vshll.u32 %v8731_v38, 16 }
 0x49e   : > { %v8659_v57 = vsel %vm21821_vm10, %v8649_v23, %v8658_v62  ;;  %v8661_v17 = vshrl.u32 %v10334_v45, 16  ;;  %v8664_v9 = vshll.u32 %v10334_v45, 16  ;;  %v8507_v48 = vsel %vm8475_vm11, 65537, %v19962_v22  ;;  %vm21825_vm14 = vmmov %vm21821_vm10  ;;  %v8411_v34 = vpop.permute.xlu1 %8410 }
 0x49f   : > { %vm8715_vm3 = vcmp.ne.s16.totalorder %v8659_v57, 0  ;;  %vm8442_vm12 = vcmp.eq.s32.totalorder %v8396_v47, 1  ;;  %v8818_v7 = vsel %vm21822_vm5, %v8808_v4, %v8817_v14  ;;  %v8831_v3 = vrot.slane %v8829_v27, 4  ;;  %vm21826_vm7 = vmmov %vm21820_vm2 }
 0x4a0   : > { %v8663_v63 = vrot.slane %v8661_v17, 3  ;;  %v8666_v12 = vrot.slane %v8664_v9, 4  ;;  %vm8474_vm1 = vmpackc.low %vm8442_vm12, %vm8442_vm12  ;;  %11171 = vmatprep.mubr.msk.bf16.mxu1 %vm21823_vm9, %v8818_v7  ;;  %v8834_v35 = vrot.slane %v8832_v55, 5  ;;  %v8827_v26 = vsel %vm21824_vm4, %v8817_v14, %v8826_v30 }
 0x4a1   : > { %v8506_v2 = vsel %vm8474_vm1, 65537, %v19962_v22  ;;  %v8732_v43 = vsel %vm8715_vm3, %v11811_v21, 0  ;;  %vm8445_vm15 = vcmp.eq.s32.totalorder %v8405_v36, 1  ;;  %vm8444_vm0 = vcmp.eq.s32.totalorder %v8402_v6, 1  ;;  %vm21827_vm2 = vmmov %vm21824_vm4  ;;  %v8408_v37 = vpop.permute.xlu0 %8407 }
 0x4a2   : > { %v8667_v33 = vor.u32 %v8666_v12, %v8663_v63  ;;  %v10335_v29 = vcombine.low %v8506_v2, %v8507_v48  ;;  %v8835_v59 = vor.u32 %v8834_v35, %v8831_v3  ;;  %vm8477_vm6 = vmpackc.low %vm8445_vm15, %vm8445_vm15  ;;  %v8838_v13 = vshrl.u32 %v8732_v43, 16 }
 0x4a3   : > { %v8841_v56 = vshll.u32 %v8732_v43, 16  ;;  %v8509_v16 = vsel %vm8477_vm6, 65537, %v19962_v22  ;;  %vm8476_vm8 = vmpackc.low %vm8444_vm0, %vm8444_vm0  ;;  %vm8447_vm10 = vcmp.eq.s32.totalorder %v8411_v34, 1  ;;  %vm8446_vm1 = vcmp.eq.s32.totalorder %v8408_v37, 1 }
 0x4a4   : > { %v8668_v24 = vsel %vm21825_vm14, %v8658_v62, %v8667_v33  ;;  %v8670_v10 = vshrl.u32 %v10335_v29, 16  ;;  %v8673_v50 = vshll.u32 %v10335_v29, 16  ;;  %11172 = vmatmul.mubr.msk.bf16.gmra.mrb[0].mxu1 %vm21826_vm7, %v8827_v26  ;;  %v8836_v40 = vsel %vm21827_vm2, %v8826_v30, %v8835_v59  ;;  %vm21828_vm11 = vmmov %vm21826_vm7 }
 0x4a5   : > { %vm8716_vm13 = vcmp.ne.s16.totalorder %v8668_v24, 0  ;;  %v8840_v44 = vrot.slane %v8838_v13, 4  ;;  %11175 = vmatprep.mubr.msk.bf16.mxu1 %vm21828_vm11, %v8836_v40  ;;  %v8843_v8 = vrot.slane %v8841_v56, 5  ;;  %v8508_v39 = vsel %vm8476_vm8, 65537, %v19962_v22  ;;  %vm8479_vm3 = vmpackc.low %vm8447_vm10, %vm8447_vm10  ;;  %v8417_v53 = vpop.permute.xlu1 %8416 }
 0x4a6   : > { %v8672_v25 = vrot.slane %v8670_v10, 3  ;;  %v8675_v23 = vrot.slane %v8673_v50, 4  ;;  %v8733_v19 = vsel %vm8716_vm13, %v18498_v49, 0  ;;  %v10336_v46 = vcombine.low %v8508_v39, %v8509_v16  ;;  %vm21829_vm12 = vmmov %vm21825_vm14  ;;  %v8289_v16 = vld [vmem:[#allocation2 + $0x88] sm:$0x1f] }
 0x4a7   : > { %v8847_v32 = vshrl.u32 %v8733_v19, 16  ;;  %v8850_v58 = vshll.u32 %v8733_v19, 16  ;;  %v8844_v52 = vor.u32 %v8843_v8, %v8840_v44  ;;  %v8511_v15 = vsel %vm8479_vm3, 65537, %v19962_v22  ;;  %vm21830_vm9 = vmmov %vm21827_vm2 }
 0x4a8   : > { %v8676_v51 = vor.u32 %v8675_v23, %v8672_v25  ;;  %v8679_v1 = vshrl.u32 %v10336_v46, 16  ;;  %v8682_v42 = vshll.u32 %v10336_v46, 16  ;;  %vm8478_vm4 = vmpackc.low %vm8446_vm1, %vm8446_vm1  ;;  %vm8449_vm14 = vcmp.eq.s32.totalorder %v8417_v53, 1 }
 0x4a9   : > { %v8849_v11 = vrot.slane %v8847_v32, 4  ;;  %v8852_v4 = vrot.slane %v8850_v58, 5  ;;  %v8845_v49 = vsel %vm21830_vm9, %v8835_v59, %v8844_v52  ;;  %vm21831_vm15 = vmmov %vm21826_vm7  ;;  %v8510_v31 = vsel %vm8478_vm4, 65537, %v19962_v22  ;;  %v8414_v30 = vpop.permute.xlu0 %8413 }
 0x4aa   : > { %v8677_v0 = vsel %vm21829_vm12, %v8667_v33, %v8676_v51  ;;  %v8681_v18 = vrot.slane %v8679_v1, 3  ;;  %v8684_v5 = vrot.slane %v8682_v42, 4  ;;  %vm21832_vm6 = vmmov %vm21827_vm2  ;;  %v10337_v47 = vcombine.low %v8510_v31, %v8511_v15  ;;  %v11599_v42 = vld [vmem:[%s19150_s7] sm:$0xff]   ;;  %v11600_v15 = vld [vmem:[%s19150_s7 + $0x8] sm:$0xff]  }
 0x4ab   : > { %vm8717_vm5 = vcmp.ne.s16.totalorder %v8677_v0, 0  ;;  %v8853_v20 = vor.u32 %v8852_v4, %v8849_v11  ;;  %vm8481_vm13 = vmpackc.low %vm8449_vm14, %vm8449_vm14  ;;  %vm8448_vm8 = vcmp.eq.s32.totalorder %v8414_v30, 1  ;;  %11191 = vmatprep.subr.bf16.mxu0 %v11599_v42 }
 0x4ac   : > { %11176 = vmatmul.mubr.msk.bf16.gmra.mrb[4].mxu1 %vm21831_vm15, %v8845_v49  ;;  %v8734_v28 = vsel %vm8717_vm5, %v18549_v61, 0  ;;  %v8685_v14 = vor.u32 %v8684_v5, %v8681_v18  ;;  %vm21833_vm0 = vmmov %vm21829_vm12  ;;  %v8688_v17 = vshrl.u32 %v10337_v47, 16  ;;  %v8691_v61 = vshll.u32 %v10337_v47, 16  ;;  %11192 = vmatpush3.bf16.msra.mxu0 %v11599_v42  ;;  %v11601_v49 = vld [vmem:[%s19150_s7 + $0x10] sm:$0xff]  }
 0x4ad   : > { %v8854_v38 = vsel %vm21832_vm6, %v8844_v52, %v8853_v20  ;;  %v8856_v62 = vshrl.u32 %v8734_v28, 16  ;;  %v8859_v45 = vshll.u32 %v8734_v28, 16  ;;  %v8513_v9 = vsel %vm8481_vm13, 65537, %v19962_v22  ;;  %vm8480_vm11 = vmpackc.low %vm8448_vm8, %vm8448_vm8  ;;  %11193 = vmatprep.subr.bf16.mxu0 %v11600_v15 }
 0x4ae   : > { %11179 = vmatprep.mubr.msk.bf16.mxu1 %vm21826_vm7, %v8854_v38  ;;  %v8686_v57 = vsel %vm21833_vm0, %v8676_v51, %v8685_v14  ;;  %v8690_v7 = vrot.slane %v8688_v17, 3  ;;  %v8693_v63 = vrot.slane %v8691_v61, 4  ;;  %v8512_v3 = vsel %vm8480_vm11, 65537, %v19962_v22  ;;  %vm21834_vm10 = vmmov %vm21832_vm6 }
 0x4af   : > { %v8858_v27 = vrot.slane %v8856_v62, 4  ;;  %v8861_v55 = vrot.slane %v8859_v45, 5  ;;  %vm8718_vm2 = vcmp.ne.s16.totalorder %v8686_v57, 0  ;;  %v10338_v21 = vcombine.low %v8512_v3, %v8513_v9  ;;  %vm21835_vm3 = vmmov %vm21826_vm7 }
 0x4b0   : > { %v8735_v12 = vsel %vm8718_vm2, %v18569_v41, 0  ;;  %v8694_v26 = vor.u32 %v8693_v63, %v8690_v7  ;;  %vm21836_vm12 = vmmov %vm21833_vm0  ;;  %11194 = vmatpush3.bf16.msra.mxu0 %v11600_v15 }
 0x4b1   : > { %v8862_v48 = vor.u32 %v8861_v55, %v8858_v27  ;;  %v8865_v2 = vshrl.u32 %v8735_v12, 16  ;;  %v8868_v36 = vshll.u32 %v8735_v12, 16  ;;  %v8697_v59 = vshrl.u32 %v10338_v21, 16  ;;  %vm21837_vm1 = vmmov %vm21832_vm6  ;;  %11195 = vmatprep.subr.bf16.mxu0 %v11601_v49 }
 0x4b2   : > { %v8695_v29 = vsel %vm21836_vm12, %v8685_v14, %v8694_v26  ;;  %v8700_v6 = vshll.u32 %v10338_v21, 16  ;;  %vm21838_vm9 = vmmov %vm21835_vm3 }
 0x4b3   : > { %v8863_v35 = vsel %vm21834_vm10, %v8853_v20, %v8862_v48  ;;  %v8867_v43 = vrot.slane %v8865_v2, 4  ;;  %v8870_v33 = vrot.slane %v8868_v36, 5  ;;  %vm8719_vm5 = vcmp.ne.s16.totalorder %v8695_v29, 0  ;;  %vm21839_vm4 = vmmov %vm21833_vm0  ;;  %v11602_v20 = vld [vmem:[%s19150_s7 + $0x18] sm:$0xff]   ;;  %v18873_v36 = vld [vmem:[%s19148_s5] ss:$0 sm:$0xff] }
 0x4b4   : > { %11180 = vmatmul.mubr.msk.bf16.gmra.mrb[8].mxu1 %vm21835_vm3, %v8863_v35  ;;  %v8699_v56 = vrot.slane %v8697_v59, 3  ;;  %v8702_v41 = vrot.slane %v8700_v6, 4  ;;  %v8736_v22 = vsel %vm8719_vm5, %v18587_v54, 0  ;;  %vm21840_vm14 = vmmov %vm21837_vm1  ;;  %11196 = vmatpush3.bf16.msra.mxu0 %v11601_v49 }
 0x4b5   : > { %v8871_v13 = vor.u32 %v8870_v33, %v8867_v43  ;;  %v8874_v10 = vshrl.u32 %v8736_v22, 16  ;;  %v8877_v50 = vshll.u32 %v8736_v22, 16  ;;  %vm21841_vm7 = vmmov %vm21835_vm3  ;;  %11197 = vmatprep.subr.bf16.mxu0 %v11602_v20  ;;  %v18878_v33 = vld [vmem:[%s19149_s6] ss:$0 sm:$0xff] }
 0x4b6   : > { %v8703_v40 = vor.u32 %v8702_v41, %v8699_v56  ;;  %vm21842_vm13 = vmmov %vm21837_vm1 }
 0x4b7   : > { %v8872_v24 = vsel %vm21837_vm1, %v8862_v48, %v8871_v13  ;;  %v8876_v44 = vrot.slane %v8874_v10, 4  ;;  %v8879_v25 = vrot.slane %v8877_v50, 5  ;;  %vm21843_vm0 = vmmov %vm21835_vm3 }
 0x4b8   : > { %11183 = vmatprep.mubr.msk.bf16.mxu1 %vm21838_vm9, %v8872_v24  ;;  %v8704_v23 = vsel %vm21839_vm4, %v8694_v26, %v8703_v40  ;;  %vm8721_vm15 = vcmp.ne.s16.totalorder %v8703_v40, 0  ;;  %vm21844_vm2 = vmmov %vm21837_vm1  ;;  %11198 = vmatpush3.bf16.msra.mxu0 %v11602_v20 }
 0x4b9   : > { %vm8720_vm6 = vcmp.ne.s16.totalorder %v8704_v23, 0  ;;  %v8738_v8 = vsel %vm8721_vm15, %v8289_v16, 0  ;;  %v8880_v19 = vor.u32 %v8879_v25, %v8876_v44  ;;  %vm21845_vm8 = vmmov %vm21843_vm0 }
 0x4ba   : > { %v8737_v39 = vsel %vm8720_vm6, %v18674_v60, 0  ;;  %v8892_v34 = vshrl.u32 %v8738_v8, 16  ;;  %v8895_v54 = vshll.u32 %v8738_v8, 16  ;;  %vm21846_vm11 = vmmov %vm21843_vm0 }
 0x4bb   : > { %v8881_v32 = vsel %vm21840_vm14, %v8871_v13, %v8880_v19  ;;  %v8883_v58 = vshrl.u32 %v8737_v39, 16  ;;  %v8886_v51 = vshll.u32 %v8737_v39, 16  ;;  %vm21847_vm10 = vmmov %vm21843_vm0 }
 0x4bc   : > { %11184 = vmatmul.mubr.msk.bf16.gmra.mrb[12].mxu1 %vm21841_vm7, %v8881_v32  ;;  %v8894_v46 = vrot.slane %v8892_v34, 4  ;;  %v8897_v52 = vrot.slane %v8895_v54, 5  ;;  %vm21848_vm3 = vmmov %vm21843_vm0 }
 0x4bd   : > { %v8885_v37 = vrot.slane %v8883_v58, 4  ;;  %v8888_v11 = vrot.slane %v8886_v51, 5  ;;  %vm21849_vm12 = vmmov %vm21843_vm0 }
 0x4be   : > { %v8898_v0 = vor.u32 %v8897_v52, %v8894_v46  ;;  %vm21850_vm5 = vmmov %vm21843_vm0 }
 0x4bf   : > { %v8889_v4 = vor.u32 %v8888_v11, %v8885_v37  ;;  %vm21851_vm1 = vmmov %vm21843_vm0 }
 0x4c0   : > { %vm21852_vm9 = vmmov %vm21843_vm0 }
 0x4c1   : > { %v8890_v1 = vsel %vm21842_vm13, %v8880_v19, %v8889_v4  ;;  %v8899_v60 = vsel %vm21844_vm2, %v8889_v4, %v8898_v0  ;;  %vm21853_vm4 = vmmov %vm21843_vm0 }
 0x4c2   : > { %11187 = vmatprep.mubr.msk.bf16.mxu1 %vm21843_vm0, %v8890_v1  ;;  %vm21854_vm15 = vmmov %vm21843_vm0 }
 0x4c3   : > { %vm21855_vm6 = vmmov %vm21843_vm0 }
 0x4c4   : > { %11188 = vmatmul.mubr.msk.bf16.gmra.mrb[16].mxu1 %vm21845_vm8, %v8899_v60  ;;  %vm21856_vm14 = vmmov %vm21843_vm0 }
 0x4c5   : > { %vm21857_vm7 = vmmov %vm21843_vm0 }
 0x4c6   : > { %vm21858_vm13 = vmmov %vm21843_vm0 }
 0x4c7   : > { %vm21859_vm2 = vmmov %vm21843_vm0 }
 0x4c8   : > { %vm21860_vm8 = vmmov %vm21843_vm0 }
 0x4dd   : > { %v18830_v18 = vpop.f32.mrb[44].mxu0 }
 0x4de   : > { %v18832_v5 = vpop.f32.mrb[45].mxu0 }
 0x4df   : > { %v18834_v28 = vpop.f32.mrb[46].mxu0 }
 0x4e0   : > { %v18836_v31 = vpop.f32.mrb[47].mxu0 }
 0x4f9   : > { %v18838_v53 = vpop.f32.mrb[48].mxu0 }
 0x4fa   : > { %v18840_v38 = vpop.f32.mrb[49].mxu0 }
 0x4fb   : > { %v18842_v62 = vpop.f32.mrb[50].mxu0 }
 0x4fc   : > { %v18844_v45 = vpop.f32.mrb[51].mxu0 }
 0x516   : > { %v18846_v14 = vpop.f32.mrb[52].mxu0 }
 0x517   : > { %v18848_v47 = vpop.f32.mrb[53].mxu0 }
 0x518   : > { %v18850_v30 = vpop.f32.mrb[54].mxu0 }
 0x519   : > { %v18852_v27 = vpop.f32.mrb[55].mxu0 }
 0x526   : > { %v18854_v55 = vpop.f32.mrb[56].mxu0 }
 0x527   : > { %v18856_v57 = vpop.f32.mrb[57].mxu0 }
 0x528   : > { %v18858_v17 = vpop.f32.mrb[58].mxu0 }
 0x529   : > { %v18860_v61 = vpop.f32.mrb[59].mxu0 }
 0x52f   : > { %v18862_v9 = vpop.f32.mrb[60].mxu0 }
 0x530   : > { %v18864_v48 = vpop.f32.mrb[61].mxu0 }
 0x531   : > { %v18866_v7 = vpop.f32.mrb[62].mxu0 }
 0x532   : > { %v18868_v63 = vpop.f32.mrb[63].mxu0 }
 0x54a   : > { %v10961_v12 = vpop.f32.mrb[32].mxu0 }
 0x54b   : > { %v4739_v3 = vpop.f32.mrb[33].mxu0 }
 0x54c   : > { %v10962_v35 = vpop.f32.mrb[34].mxu0 }
 0x54d   : > { %v4742_v26 = vpop.f32.mrb[35].mxu0 }
 0x54e   : > { %v11161_v2 = vpop.f32.mrb[20].mxu1 }
 0x54f   : > { %v11239_v21 = vadd.f32 %v11161_v2, %v10961_v12  ;;  %v9006_v43 = vpop.f32.mrb[21].mxu1 }
 0x550   : > { %v11240_v29 = vadd.f32 %v9006_v43, %v4739_v3  ;;  %v11162_v59 = vpop.f32.mrb[22].mxu1 }
 0x551   : > { %v9174_v6 = vmul.f32 %v11239_v21, %v18873_v36  ;;  %v11241_v13 = vadd.f32 %v11162_v59, %v10962_v35  ;;  %v9009_v56 = vpop.f32.mrb[23].mxu1 }
 0x552   : > { %v9172_v41 = vmul.f32 %v11240_v29, %v18873_v36  ;;  %v11242_v22 = vadd.f32 %v9009_v56, %v4742_v26 }
 0x553   : > { %v9213_v24 = vadd.f32 %v18878_v33, %v9174_v6  ;;  %v9175_v10 = vmul.f32 %v11241_v13, %v18873_v36 }
 0x554   : > { %v9211_v50 = vadd.f32 %v18878_v33, %v9172_v41  ;;  %v9173_v16 = vmul.f32 %v11242_v22, %v18873_v36 }
 0x555   : > { %v9214_v40 = vadd.f32 %v18878_v33, %v9175_v10  ;;  %v9245_v25 = vmax.f32 %v9213_v24, 0.0 }
 0x556   : > { %v9212_v44 = vadd.f32 %v18878_v33, %v9173_v16  ;;  %v9243_v8 = vmax.f32 %v9211_v50, 0.0 }
 0x557   : > { %v9246_v23 = vmax.f32 %v9214_v40, 0.0 }
 0x558   : > { %v9244_v19 = vmax.f32 %v9212_v44, 0.0 }
 0x559   : > { %v9276_v39 = vpack.c.bf16 %v9246_v23, %v9245_v25 }
 0x55a   : > { %v9275_v34 = vpack.c.bf16 %v9244_v19, %v9243_v8 }
 0x55c   : > { %11199 = vmatprep.mubr.msk.bf16.mxu0 %vm21846_vm11, %v9275_v34 }
 0x55d   : > { %11200 = vmatmul.mubr.msk.bf16.vlgmr.msra.gmra.mrb[64].mxu0 %vm21847_vm10, %v9276_v39 }
 0x561   : > { %v11165_v54 = vpop.f32.mrb[24].mxu1 }
 0x562   : > { %v9022_v32 = vpop.f32.mrb[25].mxu1 }
 0x563   : > { %v11166_v58 = vpop.f32.mrb[26].mxu1 }
 0x564   : > { %v10965_v51 = vpop.f32.mrb[36].mxu0  ;;  %v9025_v46 = vpop.f32.mrb[27].mxu1 }
 0x565   : > { %v11243_v52 = vadd.f32 %v11165_v54, %v10965_v51  ;;  %v4755_v37 = vpop.f32.mrb[37].mxu0 }
 0x566   : > { %v11244_v11 = vadd.f32 %v9022_v32, %v4755_v37  ;;  %v10966_v4 = vpop.f32.mrb[38].mxu0 }
 0x567   : > { %v9178_v0 = vmul.f32 %v11243_v52, %v18873_v36  ;;  %v11245_v1 = vadd.f32 %v11166_v58, %v10966_v4  ;;  %v4758_v60 = vpop.f32.mrb[39].mxu0 }
 0x568   : > { %v9176_v42 = vmul.f32 %v11244_v11, %v18873_v36  ;;  %v11246_v15 = vadd.f32 %v9025_v46, %v4758_v60 }
 0x569   : > { %v9217_v49 = vadd.f32 %v18878_v33, %v9178_v0  ;;  %v9179_v20 = vmul.f32 %v11245_v1, %v18873_v36 }
 0x56a   : > { %v9215_v12 = vadd.f32 %v18878_v33, %v9176_v42  ;;  %v9177_v3 = vmul.f32 %v11246_v15, %v18873_v36 }
 0x56b   : > { %v9218_v35 = vadd.f32 %v18878_v33, %v9179_v20  ;;  %v9249_v21 = vmax.f32 %v9217_v49, 0.0 }
 0x56c   : > { %v9216_v2 = vadd.f32 %v18878_v33, %v9177_v3  ;;  %v10969_v26 = vpop.f32.mrb[40].mxu0  ;;  %v9247_v59 = vmax.f32 %v9215_v12, 0.0 }
 0x56d   : > { %v9250_v43 = vmax.f32 %v9218_v35, 0.0  ;;  %v4771_v29 = vpop.f32.mrb[41].mxu0 }
 0x56e   : > { %v9248_v6 = vmax.f32 %v9216_v2, 0.0  ;;  %v10970_v13 = vpop.f32.mrb[42].mxu0 }
 0x56f   : > { %v9278_v56 = vpack.c.bf16 %v9250_v43, %v9249_v21  ;;  %v4774_v41 = vpop.f32.mrb[43].mxu0  ;;  %v11169_v24 = vpop.f32.mrb[28].mxu1 }
 0x570   : > { %v9277_v22 = vpack.c.bf16 %v9248_v6, %v9247_v59  ;;  %v11247_v10 = vadd.f32 %v11169_v24, %v10969_v26  ;;  %v9038_v50 = vpop.f32.mrb[29].mxu1 }
 0x571   : > { %v11248_v16 = vadd.f32 %v9038_v50, %v4771_v29  ;;  %v11170_v40 = vpop.f32.mrb[30].mxu1 }
 0x572   : > { %11203 = vmatprep.mubr.msk.bf16.mxu0 %vm21848_vm3, %v9277_v22  ;;  %v9182_v44 = vmul.f32 %v11247_v10, %v18873_v36  ;;  %v11249_v25 = vadd.f32 %v11170_v40, %v10970_v13  ;;  %v9041_v23 = vpop.f32.mrb[31].mxu1 }
 0x573   : > { %11204 = vmatmul.mubr.msk.bf16.gmra.mrb[68].mxu0 %vm21849_vm12, %v9278_v56  ;;  %v9180_v8 = vmul.f32 %v11248_v16, %v18873_v36  ;;  %v11250_v19 = vadd.f32 %v9041_v23, %v4774_v41 }
 0x574   : > { %v9221_v39 = vadd.f32 %v18878_v33, %v9182_v44  ;;  %v9183_v34 = vmul.f32 %v11249_v25, %v18873_v36 }
 0x575   : > { %v9219_v54 = vadd.f32 %v18878_v33, %v9180_v8  ;;  %v9181_v32 = vmul.f32 %v11250_v19, %v18873_v36 }
 0x576   : > { %v9222_v58 = vadd.f32 %v18878_v33, %v9183_v34  ;;  %v9253_v52 = vmax.f32 %v9221_v39, 0.0 }
 0x577   : > { %v9220_v51 = vadd.f32 %v18878_v33, %v9181_v32  ;;  %v11173_v46 = vpop.f32.mrb[0].mxu1  ;;  %v9251_v0 = vmax.f32 %v9219_v54, 0.0 }
 0x578   : > { %v9254_v37 = vmax.f32 %v9222_v58, 0.0  ;;  %v11251_v11 = vadd.f32 %v11173_v46, %v18830_v18  ;;  %v9054_v4 = vpop.f32.mrb[1].mxu1 }
 0x579   : > { %v9252_v1 = vmax.f32 %v9220_v51, 0.0  ;;  %v11252_v60 = vadd.f32 %v9054_v4, %v18832_v5  ;;  %v11174_v42 = vpop.f32.mrb[2].mxu1 }
 0x57a   : > { %v9280_v15 = vpack.c.bf16 %v9254_v37, %v9253_v52  ;;  %v9186_v49 = vmul.f32 %v11251_v11, %v18873_v36  ;;  %v11253_v20 = vadd.f32 %v11174_v42, %v18834_v28  ;;  %v9057_v12 = vpop.f32.mrb[3].mxu1 }
 0x57b   : > { %v9279_v3 = vpack.c.bf16 %v9252_v1, %v9251_v0  ;;  %v9184_v35 = vmul.f32 %v11252_v60, %v18873_v36  ;;  %v11254_v2 = vadd.f32 %v9057_v12, %v18836_v31 }
 0x57c   : > { %v9225_v26 = vadd.f32 %v18878_v33, %v9186_v49  ;;  %v9187_v18 = vmul.f32 %v11253_v20, %v18873_v36 }
 0x57d   : > { %v9223_v21 = vadd.f32 %v18878_v33, %v9184_v35  ;;  %v9185_v5 = vmul.f32 %v11254_v2, %v18873_v36  ;;  %11207 = vmatprep.mubr.msk.bf16.mxu0 %vm21850_vm5, %v9279_v3 }
 0x57e   : > { %v9226_v43 = vadd.f32 %v18878_v33, %v9187_v18  ;;  %11208 = vmatmul.mubr.msk.bf16.gmra.mrb[72].mxu0 %vm21851_vm1, %v9280_v15  ;;  %v9257_v59 = vmax.f32 %v9225_v26, 0.0 }
 0x57f   : > { %v9224_v28 = vadd.f32 %v18878_v33, %v9185_v5  ;;  %v11177_v29 = vpop.f32.mrb[4].mxu1  ;;  %v9255_v56 = vmax.f32 %v9223_v21, 0.0 }
 0x580   : > { %v9258_v6 = vmax.f32 %v9226_v43, 0.0  ;;  %v11255_v31 = vadd.f32 %v11177_v29, %v18838_v53  ;;  %v9070_v13 = vpop.f32.mrb[5].mxu1 }
 0x581   : > { %v9256_v41 = vmax.f32 %v9224_v28, 0.0  ;;  %v11256_v22 = vadd.f32 %v9070_v13, %v18840_v38  ;;  %v11178_v24 = vpop.f32.mrb[6].mxu1 }
 0x582   : > { %v9282_v10 = vpack.c.bf16 %v9258_v6, %v9257_v59  ;;  %v9190_v50 = vmul.f32 %v11255_v31, %v18873_v36  ;;  %v11257_v16 = vadd.f32 %v11178_v24, %v18842_v62  ;;  %v9073_v40 = vpop.f32.mrb[7].mxu1 }
 0x583   : > { %v9281_v44 = vpack.c.bf16 %v9256_v41, %v9255_v56  ;;  %v9188_v25 = vmul.f32 %v11256_v22, %v18873_v36  ;;  %v11258_v23 = vadd.f32 %v9073_v40, %v18844_v45 }
 0x584   : > { %v9229_v8 = vadd.f32 %v18878_v33, %v9190_v50  ;;  %v9191_v53 = vmul.f32 %v11257_v16, %v18873_v36 }
 0x585   : > { %v9227_v19 = vadd.f32 %v18878_v33, %v9188_v25  ;;  %v9189_v38 = vmul.f32 %v11258_v23, %v18873_v36  ;;  %11211 = vmatprep.mubr.msk.bf16.mxu0 %vm21852_vm9, %v9281_v44 }
 0x586   : > { %v9230_v39 = vadd.f32 %v18878_v33, %v9191_v53  ;;  %11212 = vmatmul.mubr.msk.bf16.gmra.mrb[76].mxu0 %vm21853_vm4, %v9282_v10  ;;  %v9261_v54 = vmax.f32 %v9229_v8, 0.0 }
 0x587   : > { %v9228_v62 = vadd.f32 %v18878_v33, %v9189_v38  ;;  %v11181_v34 = vpop.f32.mrb[8].mxu1  ;;  %v9259_v51 = vmax.f32 %v9227_v19, 0.0 }
 0x588   : > { %v9262_v32 = vmax.f32 %v9230_v39, 0.0  ;;  %v11259_v45 = vadd.f32 %v11181_v34, %v18846_v14  ;;  %v9086_v58 = vpop.f32.mrb[9].mxu1 }
 0x589   : > { %v9260_v46 = vmax.f32 %v9228_v62, 0.0  ;;  %v11260_v52 = vadd.f32 %v9086_v58, %v18848_v47  ;;  %v11182_v37 = vpop.f32.mrb[10].mxu1 }
 0x58a   : > { %v9284_v11 = vpack.c.bf16 %v9262_v32, %v9261_v54  ;;  %v9194_v4 = vmul.f32 %v11259_v45, %v18873_v36  ;;  %v11261_v0 = vadd.f32 %v11182_v37, %v18850_v30  ;;  %v9089_v1 = vpop.f32.mrb[11].mxu1 }
 0x58b   : > { %v9283_v60 = vpack.c.bf16 %v9260_v46, %v9259_v51  ;;  %v9192_v42 = vmul.f32 %v11260_v52, %v18873_v36  ;;  %v11262_v15 = vadd.f32 %v9089_v1, %v18852_v27 }
 0x58c   : > { %v9233_v49 = vadd.f32 %v18878_v33, %v9194_v4  ;;  %v9195_v14 = vmul.f32 %v11261_v0, %v18873_v36  ;;  %v11812_v0 = vld [vmem:[%s12215_s16 + $0x8] sm:$0xff]  }
 0x58d   : > { %v9231_v20 = vadd.f32 %v18878_v33, %v9192_v42  ;;  %v9193_v47 = vmul.f32 %v11262_v15, %v18873_v36  ;;  %11215 = vmatprep.mubr.msk.bf16.mxu0 %vm21854_vm15, %v9283_v60  ;;  %v9612_v1 = vunpack.c.l.bf16 %v11812_v0  ;;  %v11813_v15 = vld [vmem:[%s12215_s16] sm:$0xff]  }
 0x58e   : > { %v9234_v12 = vadd.f32 %v18878_v33, %v9195_v14  ;;  %11216 = vmatmul.mubr.msk.bf16.gmra.mrb[80].mxu0 %vm21855_vm6, %v9284_v11  ;;  %v9265_v3 = vmax.f32 %v9233_v49, 0.0  ;;  %v9610_v49 = vunpack.c.l.bf16 %v11813_v15 }
 0x58f   : > { %v9232_v30 = vadd.f32 %v18878_v33, %v9193_v47  ;;  %v9263_v2 = vmax.f32 %v9231_v20, 0.0  ;;  %v11185_v21 = vpop.f32.mrb[12].mxu1  ;;  %v9613_v47 = vunpack.c.h.bf16 %v11812_v0 }
 0x590   : > { %v9266_v35 = vmax.f32 %v9234_v12, 0.0  ;;  %v11263_v5 = vadd.f32 %v11185_v21, %v18854_v55  ;;  %v9102_v43 = vpop.f32.mrb[13].mxu1 }
 0x591   : > { %v9264_v27 = vmax.f32 %v9232_v30, 0.0  ;;  %v11264_v28 = vadd.f32 %v9102_v43, %v18856_v57  ;;  %v11186_v29 = vpop.f32.mrb[14].mxu1 }
 0x592   : > { %v9286_v26 = vpack.c.bf16 %v9266_v35, %v9265_v3  ;;  %v9198_v59 = vmul.f32 %v11263_v5, %v18873_v36  ;;  %v11265_v6 = vadd.f32 %v11186_v29, %v18858_v17  ;;  %v9105_v31 = vpop.f32.mrb[15].mxu1  ;;  %v9611_v35 = vunpack.c.h.bf16 %v11813_v15 }
 0x593   : > { %v9285_v18 = vpack.c.bf16 %v9264_v27, %v9263_v2  ;;  %v9196_v13 = vmul.f32 %v11264_v28, %v18873_v36  ;;  %v11266_v56 = vadd.f32 %v9105_v31, %v18860_v61 }
 0x594   : > { %v9237_v41 = vadd.f32 %v18878_v33, %v9198_v59  ;;  %v9199_v55 = vmul.f32 %v11265_v6, %v18873_v36 }
 0x595   : > { %11219 = vmatprep.mubr.msk.bf16.mxu0 %vm21856_vm14, %v9285_v18  ;;  %v9235_v57 = vadd.f32 %v18878_v33, %v9196_v13  ;;  %v9197_v22 = vmul.f32 %v11266_v56, %v18873_v36 }
 0x596   : > { %11220 = vmatmul.mubr.msk.bf16.gmra.mrb[84].mxu0 %vm21857_vm7, %v9286_v26  ;;  %v9238_v24 = vadd.f32 %v18878_v33, %v9199_v55  ;;  %v9269_v50 = vmax.f32 %v9237_v41, 0.0  ;;  %v11814_v55 = vld [vmem:[%s12215_s16 + $0x18] sm:$0xff]  }
 0x597   : > { %v9236_v10 = vadd.f32 %v18878_v33, %v9197_v22  ;;  %v11189_v17 = vpop.f32.mrb[16].mxu1  ;;  %v9267_v25 = vmax.f32 %v9235_v57, 0.0  ;;  %v9616_v57 = vunpack.c.l.bf16 %v11814_v55 }
 0x598   : > { %v9270_v16 = vmax.f32 %v9238_v24, 0.0  ;;  %v11267_v40 = vadd.f32 %v11189_v17, %v18862_v9  ;;  %v9118_v44 = vpop.f32.mrb[17].mxu1 }
 0x599   : > { %v9268_v61 = vmax.f32 %v9236_v10, 0.0  ;;  %v11268_v23 = vadd.f32 %v9118_v44, %v18864_v48  ;;  %v11190_v8 = vpop.f32.mrb[18].mxu1  ;;  %v11815_v10 = vld [vmem:[%s12215_s16 + $0x10] sm:$0xff]  }
 0x59a   : > { %v9288_v53 = vpack.c.bf16 %v9270_v16, %v9269_v50  ;;  %v9202_v19 = vmul.f32 %v11267_v40, %v18873_v36  ;;  %v11269_v38 = vadd.f32 %v11190_v8, %v18866_v7  ;;  %v9121_v39 = vpop.f32.mrb[19].mxu1  ;;  %v9614_v17 = vunpack.c.l.bf16 %v11815_v10 }
 0x59b   : > { %v9287_v62 = vpack.c.bf16 %v9268_v61, %v9267_v25  ;;  %v9200_v34 = vmul.f32 %v11268_v23, %v18873_v36  ;;  %v11270_v54 = vadd.f32 %v9121_v39, %v18868_v63  ;;  %v9617_v40 = vunpack.c.h.bf16 %v11814_v55 }
 0x59c   : > { %v9241_v32 = vadd.f32 %v18878_v33, %v9202_v19  ;;  %v9203_v9 = vmul.f32 %v11269_v38, %v18873_v36  ;;  %v9615_v23 = vunpack.c.h.bf16 %v11815_v10 }
 0x59d   : > { %v9239_v45 = vadd.f32 %v18878_v33, %v9200_v34  ;;  %v9201_v48 = vmul.f32 %v11270_v54, %v18873_v36  ;;  %11223 = vmatprep.mubr.msk.bf16.mxu0 %vm21858_vm13, %v9287_v62  ;;  %v18983_v36 = vld [vmem:[%s19151_s8] ss:$0 sm:$0xff] }
 0x59e   : > { %v9242_v58 = vadd.f32 %v18878_v33, %v9203_v9  ;;  %11224 = vmatmul.mubr.msk.bf16.gmra.mrb[88].mxu0 %vm21843_vm0, %v9288_v53  ;;  %v9273_v51 = vmax.f32 %v9241_v32, 0.0 }
 0x59f   : > { %v9240_v7 = vadd.f32 %v18878_v33, %v9201_v48  ;;  %v9271_v46 = vmax.f32 %v9239_v45, 0.0  ;;  %v18988_v33 = vld [vmem:[%s19152_s9] ss:$0 sm:$0xff] }
 0x5a0   : > { %v9274_v63 = vmax.f32 %v9242_v58, 0.0 }
 0x5a1   : > { %v9272_v52 = vmax.f32 %v9240_v7, 0.0 }
 0x5a2   : > { %v9290_v37 = vpack.c.bf16 %v9274_v63, %v9273_v51  ;;  %v11816_v63 = vld [vmem:[%s12215_s16 + $0x28] sm:$0xff]  }
 0x5a3   : > { %v9289_v11 = vpack.c.bf16 %v9272_v52, %v9271_v46  ;;  %v9620_v46 = vunpack.c.l.bf16 %v11816_v63 }
 0x5a5   : > { %11227 = vmatprep.mubr.msk.bf16.mxu0 %vm21859_vm2, %v9289_v11  ;;  %v11817_v11 = vld [vmem:[%s12215_s16 + $0x20] sm:$0xff]  }
 0x5a6   : > { %11228 = vmatmul.mubr.msk.bf16.gmra.mrb[92].mxu0 %vm21860_vm8, %v9290_v37 }
 0x630   : > { %v11201_v4 = vpop.f32.mrb[64].mxu0 }
 0x631   : > { %v9541_v60 = vmul.f32 %v11201_v4, %v18983_v36  ;;  %v9405_v42 = vpop.f32.mrb[65].mxu0  ;;  %v9618_v4 = vunpack.c.l.bf16 %v11817_v11 }
 0x632   : > { %v9539_v14 = vmul.f32 %v18983_v36, %v9405_v42  ;;  %v11202_v20 = vpop.f32.mrb[66].mxu0 }
 0x633   : > { %v9580_v12 = vadd.f32 %v18988_v33, %v9541_v60  ;;  %v9542_v30 = vmul.f32 %v11202_v20, %v18983_v36  ;;  %v9408_v3 = vpop.f32.mrb[67].mxu0  ;;  %v9621_v60 = vunpack.c.h.bf16 %v11816_v63 }
 0x634   : > { %v9578_v2 = vadd.f32 %v18988_v33, %v9539_v14  ;;  %v9540_v27 = vmul.f32 %v18983_v36, %v9408_v3  ;;  %v9619_v14 = vunpack.c.h.bf16 %v11817_v11 }
 0x635   : > { %v9644_v26 = vadd.f32 %v9612_v1, %v9580_v12  ;;  %v9581_v18 = vadd.f32 %v18988_v33, %v9542_v30 }
 0x636   : > { %v9642_v21 = vadd.f32 %v9610_v49, %v9578_v2  ;;  %v9579_v5 = vadd.f32 %v18988_v33, %v9540_v27 }
 0x637   : > { %v9645_v43 = vadd.f32 %v9613_v47, %v9581_v18  ;;  %v9676_v29 = vmax.f32 %v9644_v26, 0.0  ;;  %v11818_v18 = vld [vmem:[%s12215_s16 + $0x38] sm:$0xff]  }
 0x638   : > { %v9643_v28 = vadd.f32 %v9611_v35, %v9579_v5  ;;  %v9674_v6 = vmax.f32 %v9642_v21, 0.0  ;;  %v9624_v21 = vunpack.c.l.bf16 %v11818_v18  ;;  %v9625_v55 = vunpack.c.h.bf16 %v11818_v18  ;;  %v11823_v18 = vld [vmem:[%s12215_s16 + $0x50] sm:$0xff]  }
 0x639   : > { %v9677_v59 = vmax.f32 %v9645_v43, 0.0 }
 0x63a   : > { %v9675_v31 = vmax.f32 %v9643_v28, 0.0 }
 0x63b   : > { %v10472_v13 = vpack.c.bf16 %v9677_v59, %v9676_v29  ;;  %v11819_v59 = vld [vmem:[%s12215_s16 + $0x30] sm:$0xff]  }
 0x63c   : > { %v10467_v56 = vpack.c.bf16 %v9675_v31, %v9674_v6  ;;  %v9622_v6 = vunpack.c.l.bf16 %v11819_v59 }
 0x63d   : > { %10544 = vst [vmem:[%s19003_s18 + $0x8] sm:$0xff] %v10472_v13  }
 0x63e   : > { %10468 = vst [vmem:[%s19003_s18] sm:$0xff] %v10467_v56  }
 0x646   : > { %v11205_v41 = vpop.f32.mrb[68].mxu0 }
 0x647   : > { %v9545_v22 = vmul.f32 %v11205_v41, %v18983_v36  ;;  %v9421_v24 = vpop.f32.mrb[69].mxu0 }
 0x648   : > { %v9543_v50 = vmul.f32 %v18983_v36, %v9421_v24  ;;  %v11206_v16 = vpop.f32.mrb[70].mxu0 }
 0x649   : > { %v9584_v44 = vadd.f32 %v18988_v33, %v9545_v22  ;;  %v9546_v25 = vmul.f32 %v11206_v16, %v18983_v36  ;;  %v9424_v61 = vpop.f32.mrb[71].mxu0 }
 0x64a   : > { %v9582_v8 = vadd.f32 %v18988_v33, %v9543_v50  ;;  %v9544_v53 = vmul.f32 %v18983_v36, %v9424_v61 }
 0x64b   : > { %v9648_v19 = vadd.f32 %v9616_v57, %v9584_v44  ;;  %v9585_v38 = vadd.f32 %v18988_v33, %v9546_v25 }
 0x64c   : > { %v9646_v39 = vadd.f32 %v9614_v17, %v9582_v8  ;;  %v9583_v62 = vadd.f32 %v18988_v33, %v9544_v53  ;;  %v9623_v17 = vunpack.c.h.bf16 %v11819_v59 }
 0x64d   : > { %v9649_v34 = vadd.f32 %v9617_v40, %v9585_v38  ;;  %v9680_v32 = vmax.f32 %v9648_v19, 0.0  ;;  %v11820_v38 = vld [vmem:[%s12215_s16 + $0x48] sm:$0xff]  }
 0x64e   : > { %v9647_v54 = vadd.f32 %v9615_v23, %v9583_v62  ;;  %v9678_v45 = vmax.f32 %v9646_v39, 0.0  ;;  %v9628_v39 = vunpack.c.l.bf16 %v11820_v38  ;;  %v9629_v63 = vunpack.c.h.bf16 %v11820_v38  ;;  %v11824_v38 = vld [vmem:[%s12215_s16 + $0x68] sm:$0xff]  }
 0x64f   : > { %v9681_v9 = vmax.f32 %v9649_v34, 0.0 }
 0x650   : > { %v9679_v48 = vmax.f32 %v9647_v54, 0.0 }
 0x651   : > { %v10482_v58 = vpack.c.bf16 %v9681_v9, %v9680_v32  ;;  %v11209_v51 = vpop.f32.mrb[72].mxu0  ;;  %v11821_v9 = vld [vmem:[%s12215_s16 + $0x40] sm:$0xff]  }
 0x652   : > { %v10477_v7 = vpack.c.bf16 %v9679_v48, %v9678_v45  ;;  %v9549_v52 = vmul.f32 %v11209_v51, %v18983_v36  ;;  %v9437_v37 = vpop.f32.mrb[73].mxu0  ;;  %v9626_v45 = vunpack.c.l.bf16 %v11821_v9 }
 0x653   : > { %10546 = vst [vmem:[%s19003_s18 + $0x18] sm:$0xff] %v10482_v58   ;;  %v9547_v0 = vmul.f32 %v18983_v36, %v9437_v37  ;;  %v11210_v1 = vpop.f32.mrb[74].mxu0 }
 0x654   : > { %10545 = vst [vmem:[%s19003_s18 + $0x10] sm:$0xff] %v10477_v7   ;;  %v9588_v42 = vadd.f32 %v18988_v33, %v9549_v52  ;;  %v9550_v15 = vmul.f32 %v11210_v1, %v18983_v36  ;;  %v9440_v49 = vpop.f32.mrb[75].mxu0 }
 0x655   : > { %v9586_v20 = vadd.f32 %v18988_v33, %v9547_v0  ;;  %v9548_v47 = vmul.f32 %v18983_v36, %v9440_v49 }
 0x656   : > { %v9652_v12 = vadd.f32 %v9620_v46, %v9588_v42  ;;  %v9589_v30 = vadd.f32 %v18988_v33, %v9550_v15 }
 0x657   : > { %v9650_v3 = vadd.f32 %v9618_v4, %v9586_v20  ;;  %v9587_v35 = vadd.f32 %v18988_v33, %v9548_v47  ;;  %v9627_v4 = vunpack.c.h.bf16 %v11821_v9 }
 0x658   : > { %v9653_v2 = vadd.f32 %v9621_v60, %v9589_v30  ;;  %v9684_v5 = vmax.f32 %v9652_v12, 0.0  ;;  %v11822_v30 = vld [vmem:[%s12215_s16 + $0x58] sm:$0xff]  }
 0x659   : > { %v9651_v27 = vadd.f32 %v9619_v14, %v9587_v35  ;;  %v11213_v26 = vpop.f32.mrb[76].mxu0  ;;  %v9682_v31 = vmax.f32 %v9650_v3, 0.0  ;;  %v9632_v3 = vunpack.c.l.bf16 %v11822_v30  ;;  %v9633_v59 = vunpack.c.h.bf16 %v11822_v30  ;;  %v11827_v30 = vld [vmem:[%s12215_s16 + $0x70] sm:$0xff]  }
 0x65a   : > { %v9685_v43 = vmax.f32 %v9653_v2, 0.0  ;;  %v9553_v28 = vmul.f32 %v11213_v26, %v18983_v36  ;;  %v9453_v29 = vpop.f32.mrb[77].mxu0 }
 0x65b   : > { %v9683_v13 = vmax.f32 %v9651_v27, 0.0  ;;  %v9551_v56 = vmul.f32 %v18983_v36, %v9453_v29  ;;  %v11214_v41 = vpop.f32.mrb[78].mxu0 }
 0x65c   : > { %v10492_v57 = vpack.c.bf16 %v9685_v43, %v9684_v5  ;;  %v9592_v22 = vadd.f32 %v18988_v33, %v9553_v28  ;;  %v9554_v24 = vmul.f32 %v11214_v41, %v18983_v36  ;;  %v9456_v10 = vpop.f32.mrb[79].mxu0  ;;  %v9631_v41 = vunpack.c.h.bf16 %v11823_v18 }
 0x65d   : > { %v10487_v50 = vpack.c.bf16 %v9683_v13, %v9682_v31  ;;  %v9590_v16 = vadd.f32 %v18988_v33, %v9551_v56  ;;  %v9552_v40 = vmul.f32 %v18983_v36, %v9456_v10 }
 0x65e   : > { %10548 = vst [vmem:[%s19003_s18 + $0x28] sm:$0xff] %v10492_v57   ;;  %v9656_v44 = vadd.f32 %v9624_v21, %v9592_v22  ;;  %v9593_v25 = vadd.f32 %v18988_v33, %v9554_v24  ;;  %v9630_v21 = vunpack.c.l.bf16 %v11823_v18 }
 0x65f   : > { %10547 = vst [vmem:[%s19003_s18 + $0x20] sm:$0xff] %v10487_v50   ;;  %v9654_v61 = vadd.f32 %v9622_v6, %v9590_v16  ;;  %v9591_v23 = vadd.f32 %v18988_v33, %v9552_v40 }
 0x660   : > { %v9657_v8 = vadd.f32 %v9625_v55, %v9593_v25  ;;  %v9688_v62 = vmax.f32 %v9656_v44, 0.0 }
 0x661   : > { %v9655_v53 = vadd.f32 %v9623_v17, %v9591_v23  ;;  %v11217_v19 = vpop.f32.mrb[80].mxu0  ;;  %v9686_v48 = vmax.f32 %v9654_v61, 0.0 }
 0x662   : > { %v9689_v34 = vmax.f32 %v9657_v8, 0.0  ;;  %v9557_v54 = vmul.f32 %v11217_v19, %v18983_v36  ;;  %v9469_v32 = vpop.f32.mrb[81].mxu0 }
 0x663   : > { %v9687_v58 = vmax.f32 %v9655_v53, 0.0  ;;  %v9555_v7 = vmul.f32 %v18983_v36, %v9469_v32  ;;  %v11218_v51 = vpop.f32.mrb[82].mxu0 }
 0x664   : > { %v10502_v46 = vpack.c.bf16 %v9689_v34, %v9688_v62  ;;  %v9596_v52 = vadd.f32 %v18988_v33, %v9557_v54  ;;  %v9558_v37 = vmul.f32 %v11218_v51, %v18983_v36  ;;  %v9472_v11 = vpop.f32.mrb[83].mxu0  ;;  %v11825_v54 = vld [vmem:[%s12215_s16 + $0x60] sm:$0xff]  }
 0x665   : > { %v10497_v0 = vpack.c.bf16 %v9687_v58, %v9686_v48  ;;  %v9594_v1 = vadd.f32 %v18988_v33, %v9555_v7  ;;  %v9556_v60 = vmul.f32 %v18983_v36, %v9472_v11  ;;  %v9634_v32 = vunpack.c.l.bf16 %v11825_v54 }
 0x666   : > { %10550 = vst [vmem:[%s19003_s18 + $0x38] sm:$0xff] %v10502_v46   ;;  %v9660_v42 = vadd.f32 %v9628_v39, %v9596_v52  ;;  %v9597_v15 = vadd.f32 %v18988_v33, %v9558_v37  ;;  %v9636_v39 = vunpack.c.l.bf16 %v11824_v38  ;;  %v9637_v48 = vunpack.c.h.bf16 %v11824_v38 }
 0x667   : > { %10549 = vst [vmem:[%s19003_s18 + $0x30] sm:$0xff] %v10497_v0   ;;  %v9658_v49 = vadd.f32 %v9626_v45, %v9594_v1  ;;  %v9595_v14 = vadd.f32 %v18988_v33, %v9556_v60 }
 0x668   : > { %v9661_v20 = vadd.f32 %v9629_v63, %v9597_v15  ;;  %v9692_v35 = vmax.f32 %v9660_v42, 0.0  ;;  %v9635_v63 = vunpack.c.h.bf16 %v11825_v54  ;;  %v11826_v15 = vld [vmem:[%s12215_s16 + $0x78] sm:$0xff]   ;;  %s10463_s16 = sshll.u32 %s11982_s25, 11  ;;  %s19102_s25 = scalar_lea.sflag [#allocation4], %s407_s15 }
 0x669   : > { %v9659_v47 = vadd.f32 %v9627_v4, %v9595_v14  ;;  %v11221_v12 = vpop.f32.mrb[84].mxu0  ;;  %v9690_v5 = vmax.f32 %v9658_v49, 0.0  ;;  %v9640_v49 = vunpack.c.l.bf16 %v11826_v15  ;;  %v9641_v18 = vunpack.c.h.bf16 %v11826_v15  ;;  %s19094_s20 = scalar_lea.hbm %s19155_s12, %s10463_s16  ;;  %s11834_s16 = scalar_lea.vmem %s11833_s28, 4096 }
 0x66a   : > { %v9693_v2 = vmax.f32 %v9661_v20, 0.0  ;;  %v9561_v27 = vmul.f32 %v11221_v12, %v18983_v36  ;;  %v9485_v26 = vpop.f32.mrb[85].mxu0  ;;  %p11836_p1 = scmp.lt.s32.totalorder %s11834_s16, %s11828_s19 }
 0x66b   : > { %v9691_v43 = vmax.f32 %v9659_v47, 0.0  ;;  %v9559_v28 = vmul.f32 %v18983_v36, %v9485_v26  ;;  %v11222_v29 = vpop.f32.mrb[86].mxu0 }
 0x66c   : > { %v10512_v6 = vpack.c.bf16 %v9693_v2, %v9692_v35  ;;  %v9600_v31 = vadd.f32 %v18988_v33, %v9561_v27  ;;  %v9562_v13 = vmul.f32 %v11222_v29, %v18983_v36  ;;  %v9488_v56 = vpop.f32.mrb[87].mxu0  ;;  %v9639_v29 = vunpack.c.h.bf16 %v11827_v30  ;;  %p11837_p2 = por %p11836_p1, %p11835_p0 }
 0x66d   : > { %v10507_v55 = vpack.c.bf16 %v9691_v43, %v9690_v5  ;;  %v9598_v57 = vadd.f32 %v18988_v33, %v9559_v28  ;;  %v9560_v22 = vmul.f32 %v18983_v36, %v9488_v56 }
 0x66e   : > { %10552 = vst [vmem:[%s19003_s18 + $0x48] sm:$0xff] %v10512_v6   ;;  %v9664_v24 = vadd.f32 %v9632_v3, %v9600_v31  ;;  %v9601_v10 = vadd.f32 %v18988_v33, %v9562_v13  ;;  %v9638_v3 = vunpack.c.l.bf16 %v11827_v30  ;;  %p11838_p3 = pnand %p11837_p2, %p11831_p13 }
 0x66f   : > { %10551 = vst [vmem:[%s19003_s18 + $0x40] sm:$0xff] %v10507_v55   ;;  %v9662_v17 = vadd.f32 %v9630_v21, %v9598_v57  ;;  %v9599_v50 = vadd.f32 %v18988_v33, %v9560_v22 }
 0x670   : > { %v9665_v16 = vadd.f32 %v9633_v59, %v9601_v10  ;;  %v9696_v44 = vmax.f32 %v9664_v24, 0.0 }
 0x671   : > { %v9663_v40 = vadd.f32 %v9631_v41, %v9599_v50  ;;  %v9694_v61 = vmax.f32 %v9662_v17, 0.0  ;;  %v11225_v19 = vpop.f32.mrb[88].mxu0 }
 0x672   : > { %v9697_v25 = vmax.f32 %v9665_v16, 0.0  ;;  %v9565_v62 = vmul.f32 %v11225_v19, %v18983_v36  ;;  %v9501_v34 = vpop.f32.mrb[89].mxu0 }
 0x673   : > { %v9695_v23 = vmax.f32 %v9663_v40, 0.0  ;;  %v9563_v9 = vmul.f32 %v18983_v36, %v9501_v34  ;;  %v11226_v45 = vpop.f32.mrb[90].mxu0 }
 0x674   : > { %v10522_v8 = vpack.c.bf16 %v9697_v25, %v9696_v44  ;;  %v9604_v58 = vadd.f32 %v18988_v33, %v9565_v62  ;;  %v9566_v7 = vmul.f32 %v11226_v45, %v18983_v36  ;;  %v9504_v51 = vpop.f32.mrb[91].mxu0 }
 0x675   : > { %v10517_v53 = vpack.c.bf16 %v9695_v23, %v9694_v61  ;;  %v9602_v46 = vadd.f32 %v18988_v33, %v9563_v9  ;;  %v9564_v52 = vmul.f32 %v18983_v36, %v9504_v51 }
 0x676   : > { %10554 = vst [vmem:[%s19003_s18 + $0x58] sm:$0xff] %v10522_v8   ;;  %v9668_v37 = vadd.f32 %v9636_v39, %v9604_v58  ;;  %v9605_v11 = vadd.f32 %v18988_v33, %v9566_v7 }
 0x677   : > { %10553 = vst [vmem:[%s19003_s18 + $0x50] sm:$0xff] %v10517_v53   ;;  %v9666_v4 = vadd.f32 %v9634_v32, %v9602_v46  ;;  %v9603_v0 = vadd.f32 %v18988_v33, %v9564_v52 }
 0x678   : > { %v9669_v1 = vadd.f32 %v9637_v48, %v9605_v11  ;;  %v9700_v14 = vmax.f32 %v9668_v37, 0.0 }
 0x679   : > { %v9667_v60 = vadd.f32 %v9635_v63, %v9603_v0  ;;  %v11229_v42 = vpop.f32.mrb[92].mxu0  ;;  %v9698_v35 = vmax.f32 %v9666_v4, 0.0 }
 0x67a   : > { %v9701_v20 = vmax.f32 %v9669_v1, 0.0  ;;  %v9569_v47 = vmul.f32 %v11229_v42, %v18983_v36  ;;  %v9517_v12 = vpop.f32.mrb[93].mxu0 }
 0x67b   : > { %v9699_v2 = vmax.f32 %v9667_v60, 0.0  ;;  %v9567_v27 = vmul.f32 %v18983_v36, %v9517_v12  ;;  %v11230_v26 = vpop.f32.mrb[94].mxu0 }
 0x67c   : > { %v10532_v21 = vpack.c.bf16 %v9701_v20, %v9700_v14  ;;  %v9608_v5 = vadd.f32 %v18988_v33, %v9569_v47  ;;  %v9570_v43 = vmul.f32 %v11230_v26, %v18983_v36  ;;  %v9520_v28 = vpop.f32.mrb[95].mxu0 }
 0x67d   : > { %v10527_v59 = vpack.c.bf16 %v9699_v2, %v9698_v35  ;;  %v9606_v6 = vadd.f32 %v18988_v33, %v9567_v27  ;;  %v9568_v31 = vmul.f32 %v18983_v36, %v9520_v28 }
 0x67e   : > { %10556 = vst [vmem:[%s19003_s18 + $0x68] sm:$0xff] %v10532_v21   ;;  %v9672_v13 = vadd.f32 %v9640_v49, %v9608_v5  ;;  %v9609_v56 = vadd.f32 %v18988_v33, %v9570_v43 }
 0x67f   : > { %10555 = vst [vmem:[%s19003_s18 + $0x60] sm:$0xff] %v10527_v59   ;;  %v9670_v41 = vadd.f32 %v9638_v3, %v9606_v6  ;;  %v9607_v55 = vadd.f32 %v18988_v33, %v9568_v31 }
 0x680   : > { %v9673_v57 = vadd.f32 %v9641_v18, %v9609_v56  ;;  %v9704_v24 = vmax.f32 %v9672_v13, 0.0 }
 0x681   : > { %v9671_v22 = vadd.f32 %v9639_v29, %v9607_v55  ;;  %v9702_v17 = vmax.f32 %v9670_v41, 0.0 }
 0x682   : > { %v9705_v10 = vmax.f32 %v9673_v57, 0.0 }
 0x683   : > { %v9703_v36 = vmax.f32 %v9671_v22, 0.0 }
 0x684   : > { %v10542_v50 = vpack.c.bf16 %v9705_v10, %v9704_v24 }
 0x685   : > { %v10537_v33 = vpack.c.bf16 %v9703_v36, %v9702_v17 }
 0x686   : > { %10558 = vst [vmem:[%s19003_s18 + $0x78] sm:$0xff] %v10542_v50  }
 0x687   : > { %10557 = vst [vmem:[%s19003_s18 + $0x70] sm:$0xff] %v10537_v33  }
 0x688   : > { %11841 = shalt.err (!%p11838_p3)
}
 0x689   : > { %s11842_s15 = scalar_lea.hbm %s19094_s20, 2048  ;;  %s11846_s17 = scalar_lea.hbm %s19155_s12, 4096 }
 0x68a   : > { %p11843_p4 = scmp.ne.s32.totalorder %s19094_s20, %s11842_s15  ;;  %p11847_p9 = scmp.lt.u32.totalorder %s19094_s20, %s19155_s12 }
 0x68b   : > { %p11848_p10 = scmp.lt.u32.totalorder %s11846_s17, %s11842_s15  ;;  %p11850_p12 = scmp.lt.u32.totalorder %s11842_s15, %s19094_s20 }
 0x68c   : > { %p11844_p7 = pnand %p11843_p4, %p11999_p5 }
 0x68d   : > { %p11849_p11 = por %p11848_p10, %p11847_p9 }
 0x68e   : > { %p11845_p8 = pneg %p11844_p7 }
 0x68f   : > { %p11851_p13 = por %p11850_p12, %p11849_p11 }
 0x691   : > { %p11852_p0 = pnand %p11851_p13, %p11845_p8 }
 0x693   : > { %11855 = shalt.err (!%p11852_p0)
}
 0x694   : > { %s11894_s19 = smov 64   ;;  %s11895_s16 = smov 4  }
 0x695   : > { %11495 = dma.vmem_to_hbm [thread:$0]  (%p11999_p5), %s19096_s26, 2048, %s19094_s20, %s19102_s25, %s11894_s19, %s11894_s19, %s11895_s16  }
 0x696 PF: > { %p11501_p1 = scmp.ge.s32.totalorder %s11890_s24, 2  ;;  %s9896_s0 = sand.u32 1, %s11878_s21  }
 0x697   : > { %s9897_s15 = scalar_lea.sflag [#allocation4], %s9896_s0 }
 0x698   : > { %p11498_p2 = pnand %p11501_p1, %p12003_p6 }
 0x69a   : > { %11873 = dma.done.wait (!%p11498_p2), %s9897_s15, 2048  }
 0x69b   : > { %11875 = vsyncadd (!%p11498_p2), %s9897_s15, 4294965248  ;;  %p22_p3 = scmp.ge.s32.totalorder %s11986_s27, 4   ;;  %s21861_s21 = smov %s11882_s22 }
 0x69c   : > { %s21862_s22 = smov %s11886_s23  ;;  %s21863_s23 = smov %s11997_s30 }
 0x69d   : > { %s21864_s24 = smov %s11986_s27  ;;  %24 = sbr.rel (!%p22_p3) target bundleno = 5 (0x5), region = 111 }
 0x6a4   :  { %9902 = vsyncpa [#allocation4], 1 }
 0x6a5   :  { %9904 = vsyncpa [#allocation4 + $0x1], 1 }

</bundles_post_ra>
